<compile_context>
chip_gen: v7x
topology: tpu7x:2x2x1
jax: 0.10.0
libtpu: 0.0.40
codegen_flags: <defaults>
</compile_context>

<pallas_src>
import functools
from collections import namedtuple

import numpy as np
import jax
import jax.numpy as jnp
from jax.experimental import pallas as pl
from jax.experimental.pallas import tpu as pltpu

BN_EPS = 1e-5


# ----------------------------- in-kernel helpers -----------------------------

def _bn_cols(x2d, gamma_row, beta_row):
    """BatchNorm with batch statistics (track_running_stats=False), per column."""
    mean = jnp.mean(x2d, axis=0, keepdims=True)
    var = jnp.mean((x2d - mean) ** 2, axis=0, keepdims=True)
    return (x2d - mean) * jax.lax.rsqrt(var + BN_EPS) * gamma_row + beta_row


def _phase_split_value(v, s, p):
    # TODO(synk): general in-kernel spatial phase split (strided value slices) for
    # a stride>1 layer that is NOT the first executed layer; not exercised here.
    parts = []
    for rh in range(s):
        qh = (rh - p) % s
        for rw in range(s):
            qw = (rw - p) % s
            parts.append(v[:, qh::s, qw::s, :])
    return jnp.concatenate(parts, axis=0)


def _layer_body(x4, w, cfg, pad_ref):
    """One supernet layer = sum over its selected Bottleneck ops.

    x4:      (s*s*n, Hq, Wq, cin) phase-major if stride>1, else (n, H, W, cin).
    pad_ref: (s*s*n, hs, ws, c_tot) VMEM scratch holding the spatially padded,
             phase-split depthwise input.
    Returns (n, hout, wout, cout) f32.
    """
    s, kmax = cfg["stride"], cfg["kmax"]
    cin, cout = cfg["cin"], cfg["cout"]
    h_exp, n_id = cfg["h_exp"], cfg["n_id"]
    c_tot, n_ops = cfg["c_tot"], cfg["n_ops"]
    p = kmax // 2
    nph = s * s
    nph_n, hq, wq, _ = x4.shape
    n = nph_n // nph
    hout, wout = hq, wq                      # holds for s | H, odd k, pad = k//2
    m_in = nph_n * hq * wq
    m_out = n * hout * wout

    x2d = x4.reshape(m_in, cin)

    # --- 1x1 expand conv for all expansion!=1 ops (one concatenated matmul) ---
    if h_exp > 0:
        h = jnp.dot(x2d, w["w_exp"], preferred_element_type=jnp.float32)
        h = jnp.clip(_bn_cols(h, w["g1"], w["b1"]), 0.0, 6.0)
        h4 = h.reshape(nph_n, hq, wq, h_exp)

    # --- place hidden into the zero-padded, phase-split depthwise scratch ------
    # TODO(synk): zero only the halo instead of the full scratch.
    pad_ref[...] = jnp.zeros_like(pad_ref)
    for rh in range(s):
        qh = (rh - p) % s
        oh = (p - rh + qh) // s
        for rw in range(s):
            qw = (rw - p) % s
            ow = (p - rw + qw) // s
            ph = rh * s + rw
            if h_exp > 0:
                pad_ref[ph * n:(ph + 1) * n, oh:oh + hq, ow:ow + wq, 0:h_exp] = \
                    h4[ph * n:(ph + 1) * n]
            for j in range(n_id):            # expansion==1 ops consume x directly
                c0 = h_exp + j * cin
                pad_ref[ph * n:(ph + 1) * n, oh:oh + hq, ow:ow + wq, c0:c0 + cin] = \
                    x4[ph * n:(ph + 1) * n]

    # --- depthwise conv at output resolution (all taps are contiguous reads) ---
    wdw = w["w_dw"]
    acc = jnp.zeros((n, hout, wout, c_tot), jnp.float32)
    for kh in range(kmax):
        a, rh = kh // s, kh % s
        for kw in range(kmax):
            b, rw = kw // s, kw % s
            ph = rh * s + rw
            tap = pad_ref[ph * n:(ph + 1) * n, a:a + hout, b:b + wout, :]
            acc = acc + tap * wdw[kh, kw, :]
    h2 = jnp.clip(_bn_cols(acc.reshape(m_out, c_tot), w["g2"], w["b2"]), 0.0, 6.0)

    # --- 1x1 projections of all ops as one block-diagonal matmul + per-op BN3 ---
    proj = jnp.dot(h2, w["w_proj"], preferred_element_type=jnp.float32)
    proj = _bn_cols(proj, w["g3"], w["b3"])
    if n_ops > 1:
        # sum over ops via a stacked-identity matmul (no lane-offset slice adds)
        y = jnp.dot(proj, w["sum_mat"], preferred_element_type=jnp.float32)
    else:
        y = proj
    if cfg["residual"]:                      # each selected op adds the identity once
        y = y + (x2d if n_ops == 1 else x2d * float(n_ops))
    return y.reshape(n, hout, wout, cout)


def _supernet_kernel(*refs, plan):
    """Whole network: all layers + ReLU6 + global avg-pool + FC, one call."""
    num_w = sum(e["n_refs"] for e in plan)
    num_in = 1 + num_w + 2
    it = iter(refs[:num_in])
    out_ref = refs[num_in]
    scratch_refs = refs[num_in + 1:]

    x4 = next(it)[...]                       # network input (phase-major if strided)
    for li, e in enumerate(plan):
        w = {}
        if e["h_exp"] > 0:
            w["w_exp"], w["g1"], w["b1"] = next(it)[...], next(it)[...], next(it)[...]
        w["w_dw"], w["g2"], w["b2"] = next(it)[...], next(it)[...], next(it)[...]
        w["w_proj"], w["g3"], w["b3"] = next(it)[...], next(it)[...], next(it)[...]
        if e["n_ops"] > 1:
            w["sum_mat"] = next(it)[...]
        if li > 0 and e["stride"] > 1:
            x4 = _phase_split_value(x4, e["stride"], e["kmax"] // 2)
        x4 = _layer_body(x4, w, e, scratch_refs[li])

    # head: ReLU6 -> global avg pool -> Dropout (identity) -> FC (lane-padded out)
    w_fc, b_fc = next(it)[...], next(it)[...]
    v = jnp.clip(x4, 0.0, 6.0)
    n, hh, ww, c = v.shape
    pooled = jnp.mean(v.reshape(n, hh * ww, c), axis=1)
    # TODO(synk): Dropout(p=0.2) is inference-mode identity; no mask emitted.
    out_ref[...] = jnp.dot(pooled, w_fc, preferred_element_type=jnp.float32) + b_fc


# ---------------------------- host-side preparation ----------------------------

def _full_spec(arr):
    nd = arr.ndim
    return pl.BlockSpec(arr.shape, lambda i, _nd=nd: (0,) * _nd)


def select_layer_ops(params, shared_masks, task_masks, task, architecture,
                     search_space, in_channels):
    """Replicates ComplexModel.forward's mask / must_select selection logic."""
    search_size = len(search_space)
    num_layers = len(architecture)
    shared_m = np.asarray(shared_masks).reshape(num_layers, search_size).astype(bool).copy()
    task_m = np.asarray(task_masks).reshape(num_layers, search_size).astype(bool)
    shared_p, task_p = params["ops"][-1], params["ops"][task]
    selection = []
    ic = in_channels
    for li, cfg in enumerate(architecture):
        must = (ic != cfg.out_channels or cfg.stride > 1)
        sm, tm = shared_m[li], task_m[li]
        if not must and not sm.any() and not tm.any():
            ic = cfg.out_channels
            continue
        if must and not sm.any() and not tm.any():
            sm[0] = True
        selected = ([(shared_p[li][oi], op) for oi, op in enumerate(search_space) if sm[oi]]
                    + [(task_p[li][oi], op) for oi, op in enumerate(search_space) if tm[oi]])
        selection.append((cfg, ic, selected))
        ic = cfg.out_channels
    return selection


def build_fused_network(selection, w_fc, b_fc):
    """One-time host-side (numpy) weight fusion; hoisted out of the forward path."""
    plan, weights = [], []
    for cfg, cin, selected in selection:
        cout, stride = cfg.out_channels, cfg.stride
        exp_ops = [(pp, op) for pp, op in selected if op.expansion != 1]
        id_ops = [(pp, op) for pp, op in selected if op.expansion == 1]
        ordered = exp_ops + id_ops
        n_ops = len(ordered)
        kmax = max(op.kernel_size for _, op in ordered)
        assert kmax % 2 == 1, "odd depthwise kernels assumed"
        hidden = [cin * op.expansion for _, op in ordered]
        h_exp = sum(cin * op.expansion for _, op in exp_ops)
        c_tot = h_exp + cin * len(id_ops)

        wl = []
        if h_exp > 0:
            wl.append(np.concatenate([np.asarray(pp["w_exp"]) for pp, _ in exp_ops],
                                     axis=1).astype(np.float32))
            wl.append(np.concatenate([np.asarray(pp["g1"]) for pp, _ in exp_ops]
                                     ).reshape(1, h_exp).astype(np.float32))
            wl.append(np.concatenate([np.asarray(pp["b1"]) for pp, _ in exp_ops]
                                     ).reshape(1, h_exp).astype(np.float32))
        wdw_parts = []
        for pp, op in ordered:
            wk = np.asarray(pp["w_dw"]).astype(np.float32)
            d = (kmax - op.kernel_size) // 2
            if d:                             # zero-pad smaller odd kernel: exact
                wk = np.pad(wk, ((d, d), (d, d), (0, 0)))
            wdw_parts.append(wk)
        wl.append(np.concatenate(wdw_parts, axis=-1))
        wl.append(np.concatenate([np.asarray(pp["g2"]) for pp, _ in ordered]
                                 ).reshape(1, c_tot).astype(np.float32))
        wl.append(np.concatenate([np.asarray(pp["b2"]) for pp, _ in ordered]
                                 ).reshape(1, c_tot).astype(np.float32))
        w_proj = np.zeros((c_tot, n_ops * cout), np.float32)
        off = 0
        for oi, (pp, op) in enumerate(ordered):
            w_proj[off:off + hidden[oi], oi * cout:(oi + 1) * cout] = np.asarray(pp["w_proj"])
            off += hidden[oi]
        wl.append(w_proj)
        wl.append(np.concatenate([np.asarray(pp["g3"]) for pp, _ in ordered]
                                 ).reshape(1, n_ops * cout).astype(np.float32))
        wl.append(np.concatenate([np.asarray(pp["b3"]) for pp, _ in ordered]
                                 ).reshape(1, n_ops * cout).astype(np.float32))
        if n_ops > 1:
            wl.append(np.tile(np.eye(cout, dtype=np.float32), (n_ops, 1)))

        plan.append(dict(cin=cin, cout=cout, stride=stride, kmax=kmax, h_exp=h_exp,
                         n_id=len(id_ops), c_tot=c_tot, n_ops=n_ops,
                         residual=(stride == 1 and cin == cout),
                         n_refs=(3 if h_exp > 0 else 0) + 6 + (1 if n_ops > 1 else 0)))
        weights += [jnp.asarray(a) for a in wl]

    # classifier head, padded to a lane-dense (multiple-of-128) column count
    wf = np.asarray(w_fc, np.float32)
    bf = np.asarray(b_fc, np.float32)
    ncls = wf.shape[1]
    ncls_pad = ((ncls + 127) // 128) * 128
    wfp = np.zeros((wf.shape[0], ncls_pad), np.float32)
    wfp[:, :ncls] = wf
    bfp = np.zeros((1, ncls_pad), np.float32)
    bfp[:, :ncls] = bf
    weights += [jnp.asarray(wfp), jnp.asarray(bfp)]
    return plan, weights, ncls, ncls_pad


def supernet_forward(x_nchw, plan, weights, ncls, ncls_pad):
    n, _, H0, W0 = x_nchw.shape
    x = jnp.transpose(x_nchw, (0, 2, 3, 1)).astype(jnp.float32)     # NCHW -> NHWC

    # Phase-split the network input when the first executed layer is strided, so
    # every in-kernel depthwise tap is a contiguous read of the padded scratch.
    if plan and plan[0]["stride"] > 1:
        s, p = plan[0]["stride"], plan[0]["kmax"] // 2
        assert H0 % s == 0 and W0 % s == 0, "fused path assumes stride divides H, W"
        parts = []
        for rh in range(s):
            qh = (rh - p) % s
            for rw in range(s):
                qw = (rw - p) % s
                parts.append(x[:, qh::s, qw::s, :])
        x = jnp.concatenate(parts, axis=0)

    # per-layer depthwise scratch shapes (phase-split, spatially padded)
    scratch = []
    Hc, Wc = H0, W0
    for e in plan:
        s, kmax = e["stride"], e["kmax"]
        assert Hc % s == 0 and Wc % s == 0
        hq, wq = Hc // s, Wc // s
        hs = hq + (kmax - 1) // s
        ws = wq + (kmax - 1) // s
        scratch.append(pltpu.VMEM((s * s * n, hs, ws, e["c_tot"]), jnp.float32))
        Hc, Wc = hq, wq

    inputs = [x] + list(weights)
    kern = functools.partial(_supernet_kernel, plan=plan)
    out = pl.pallas_call(
        kern,
        out_shape=jax.ShapeDtypeStruct((n, ncls_pad), jnp.float32),
        grid=(1,),
        in_specs=[_full_spec(a) for a in inputs],
        out_specs=pl.BlockSpec((n, ncls_pad), lambda i: (0, 0)),
        scratch_shapes=scratch,
        compiler_params=pltpu.CompilerParams(
            # TODO(synk): for v7x, split the batch on a 'parallel' axis with
            # per-core BN partial sums + a cross-core combine (second TensorCore).
            dimension_semantics=("arbitrary",),
            vmem_limit_bytes=32 * 1024 * 1024),
    )(*inputs)
    return out[:, :ncls]


# ------------------------------ params / reference ------------------------------

def init_bottleneck(key, in_c, out_c, k, e):
    hidden = in_c * e
    k0, k1, k2 = jax.random.split(key, 3)
    p = {}
    if e != 1:
        p["w_exp"] = 0.1 * jax.random.normal(k0, (in_c, hidden), jnp.float32)
        p["g1"] = jnp.ones((hidden,), jnp.float32)
        p["b1"] = jnp.zeros((hidden,), jnp.float32)
    p["w_dw"] = 0.1 * jax.random.normal(k1, (k, k, hidden), jnp.float32)
    p["g2"] = jnp.ones((hidden,), jnp.float32)
    p["b2"] = jnp.zeros((hidden,), jnp.float32)
    p["w_proj"] = 0.1 * jax.random.normal(k2, (hidden, out_c), jnp.float32)
    p["g3"] = jnp.ones((out_c,), jnp.float32)
    p["b3"] = jnp.zeros((out_c,), jnp.float32)
    return p


def init_model_params(key, architecture, search_space, in_channels, num_classes):
    num_tasks = len(num_classes)
    ops = []
    for _ in range(num_tasks + 1):            # tasks 0..T-1, last = shared
        key, sub = jax.random.split(key)
        task_ops = []
        ic = in_channels
        for cfg in architecture:
            layer_ops = []
            for op in search_space:
                sub, k_op = jax.random.split(sub)
                layer_ops.append(init_bottleneck(k_op, ic, cfg.out_channels,
                                                 op.kernel_size, op.expansion))
            task_ops.append(layer_ops)
            ic = cfg.out_channels
        ops.append(task_ops)
    fc_w, fc_b = [], []
    c_last = architecture[-1].out_channels
    for ncls in num_classes:
        key, kw = jax.random.split(key)
        fc_w.append(0.1 * jax.random.normal(kw, (c_last, ncls), jnp.float32))
        fc_b.append(jnp.zeros((ncls,), jnp.float32))
    return {"ops": ops, "fc_w": fc_w, "fc_b": fc_b}


def _ref_bn(x, g, b):
    mean = jnp.mean(x, axis=(0, 1, 2), keepdims=True)
    var = jnp.mean((x - mean) ** 2, axis=(0, 1, 2), keepdims=True)
    return (x - mean) * jax.lax.rsqrt(var + BN_EPS) * g + b


def _ref_bottleneck(x, pp, op, stride, prec):
    e, k = op.expansion, op.kernel_size
    h = x
    if e != 1:
        h = jnp.einsum("nhwc,cd->nhwd", x, pp["w_exp"], precision=prec)
        h = jnp.clip(_ref_bn(h, pp["g1"], pp["b1"]), 0.0, 6.0)
    p = k // 2
    n, H, W, C = h.shape
    hp = jnp.pad(h, ((0, 0), (p, p), (p, p), (0, 0)))
    hout = (H + 2 * p - k) // stride + 1
    wout = (W + 2 * p - k) // stride + 1
    acc = jnp.zeros((n, hout, wout, C), jnp.float32)
    for kh in range(k):
        for kw in range(k):
            acc = acc + hp[:, kh:kh + stride * hout:stride,
                           kw:kw + stride * wout:stride, :] * pp["w_dw"][kh, kw, :]
    acc = jnp.clip(_ref_bn(acc, pp["g2"], pp["b2"]), 0.0, 6.0)
    y = jnp.einsum("nhwc,cd->nhwd", acc, pp["w_proj"], precision=prec)
    y = _ref_bn(y, pp["g3"], pp["b3"])
    if stride == 1 and x.shape[-1] == y.shape[-1]:
        y = y + x
    return y


def reference_forward(x_nchw, selection, w_fc, b_fc):
    prec = jax.lax.Precision.HIGHEST
    x = jnp.transpose(x_nchw, (0, 2, 3, 1)).astype(jnp.float32)
    for cfg, cin, selected in selection:
        x = sum(_ref_bottleneck(x, pp, op, cfg.stride, prec) for pp, op in selected)
    x = jnp.clip(x, 0.0, 6.0)
    pooled = jnp.mean(x, axis=(1, 2))
    return jnp.dot(pooled, w_fc, precision=prec) + b_fc.reshape(1, -1)


# --------------------------------- main ---------------------------------

if __name__ == "__main__":
    LayerCfg = namedtuple("LayerCfg", ["out_channels", "stride"])
    OpCfg = namedtuple("OpCfg", ["kernel_size", "expansion"])

    architecture = [LayerCfg(out_channels=16, stride=2),
                    LayerCfg(out_channels=16, stride=1)]
    search_space = [OpCfg(kernel_size=3, expansion=2),
                    OpCfg(kernel_size=5, expansion=2)]
    in_channels = 8
    num_classes = [10, 5]
    task = 0

    key = jax.random.PRNGKey(0)
    key, kp, kx = jax.random.split(key, 3)
    params = init_model_params(kp, architecture, search_space, in_channels,
                               num_classes)
    x = jax.random.normal(kx, (2, in_channels, 16, 16), jnp.float32)   # NCHW

    # mask_size = num_layers * search_size = 4
    shared_masks = np.array([1, 0, 0, 0], dtype=np.int32)
    task_masks = np.array([0, 1, 1, 0], dtype=np.int32)

    # one-time host-side prep (mask selection + weight fusion), reused per forward
    selection = select_layer_ops(params, shared_masks, task_masks, task,
                                 architecture, search_space, in_channels)
    plan, weights, ncls, ncls_pad = build_fused_network(
        selection, params["fc_w"][task], params["fc_b"][task])

    logits = supernet_forward(x, plan, weights, ncls, ncls_pad)
    jax.block_until_ready(logits)
    assert logits.shape == (2, num_classes[task])

    # pure-JAX reference check (validates the strided phase-split depthwise path)
    ref = reference_forward(x, selection, params["fc_w"][task], params["fc_b"][task])
    err = float(jnp.max(jnp.abs(logits - ref)))
    assert err < 5e-2, f"kernel vs reference mismatch: {err}"
    print("KERNEL_OK")
</pallas_src>

<mosaic_0001>
module attributes {stable_mosaic.version = 11 : i64} {
  func.func @_supernet_kernel(%arg0: i32, %arg1: memref<8x8x8x8xf32, #tpu.memory_space<vmem>>, %arg2: memref<8x32xf32, #tpu.memory_space<vmem>>, %arg3: memref<1x32xf32, #tpu.memory_space<vmem>>, %arg4: memref<1x32xf32, #tpu.memory_space<vmem>>, %arg5: memref<5x5x32xf32, #tpu.memory_space<vmem>>, %arg6: memref<1x32xf32, #tpu.memory_space<vmem>>, %arg7: memref<1x32xf32, #tpu.memory_space<vmem>>, %arg8: memref<32x32xf32, #tpu.memory_space<vmem>>, %arg9: memref<1x32xf32, #tpu.memory_space<vmem>>, %arg10: memref<1x32xf32, #tpu.memory_space<vmem>>, %arg11: memref<32x16xf32, #tpu.memory_space<vmem>>, %arg12: memref<16x32xf32, #tpu.memory_space<vmem>>, %arg13: memref<1x32xf32, #tpu.memory_space<vmem>>, %arg14: memref<1x32xf32, #tpu.memory_space<vmem>>, %arg15: memref<3x3x32xf32, #tpu.memory_space<vmem>>, %arg16: memref<1x32xf32, #tpu.memory_space<vmem>>, %arg17: memref<1x32xf32, #tpu.memory_space<vmem>>, %arg18: memref<32x16xf32, #tpu.memory_space<vmem>>, %arg19: memref<1x16xf32, #tpu.memory_space<vmem>>, %arg20: memref<1x16xf32, #tpu.memory_space<vmem>>, %arg21: memref<16x128xf32, #tpu.memory_space<vmem>>, %arg22: memref<1x128xf32, #tpu.memory_space<vmem>>, %arg23: memref<2x128xf32, #tpu.memory_space<vmem>>, %arg24: memref<8x10x10x32xf32, #tpu.memory_space<vmem>>, %arg25: memref<2x10x10x32xf32, #tpu.memory_space<vmem>>) attributes {dimension_semantics = [#tpu.dimension_semantics<arbitrary>], iteration_bounds = array<i64: 1>, scalar_prefetch = 0 : i64, scratch_operands = 2 : i64, tpu.core_type = #tpu.core_type<tc>, window_params = [{pipeline_mode = #tpu.pipeline_mode<synchronous>, transform_indices = @transform_0, window_bounds = array<i64: 8, 8, 8, 8>}, {pipeline_mode = #tpu.pipeline_mode<synchronous>, transform_indices = @transform_1, window_bounds = array<i64: 8, 32>}, {pipeline_mode = #tpu.pipeline_mode<synchronous>, transform_indices = @transform_2, window_bounds = array<i64: 1, 32>}, {pipeline_mode = #tpu.pipeline_mode<synchronous>, transform_indices = @transform_3, window_bounds = array<i64: 1, 32>}, {pipeline_mode = #tpu.pipeline_mode<synchronous>, transform_indices = @transform_4, window_bounds = array<i64: 5, 5, 32>}, {pipeline_mode = #tpu.pipeline_mode<synchronous>, transform_indices = @transform_5, window_bounds = array<i64: 1, 32>}, {pipeline_mode = #tpu.pipeline_mode<synchronous>, transform_indices = @transform_6, window_bounds = array<i64: 1, 32>}, {pipeline_mode = #tpu.pipeline_mode<synchronous>, transform_indices = @transform_7, window_bounds = array<i64: 32, 32>}, {pipeline_mode = #tpu.pipeline_mode<synchronous>, transform_indices = @transform_8, window_bounds = array<i64: 1, 32>}, {pipeline_mode = #tpu.pipeline_mode<synchronous>, transform_indices = @transform_9, window_bounds = array<i64: 1, 32>}, {pipeline_mode = #tpu.pipeline_mode<synchronous>, transform_indices = @transform_10, window_bounds = array<i64: 32, 16>}, {pipeline_mode = #tpu.pipeline_mode<synchronous>, transform_indices = @transform_11, window_bounds = array<i64: 16, 32>}, {pipeline_mode = #tpu.pipeline_mode<synchronous>, transform_indices = @transform_12, window_bounds = array<i64: 1, 32>}, {pipeline_mode = #tpu.pipeline_mode<synchronous>, transform_indices = @transform_13, window_bounds = array<i64: 1, 32>}, {pipeline_mode = #tpu.pipeline_mode<synchronous>, transform_indices = @transform_14, window_bounds = array<i64: 3, 3, 32>}, {pipeline_mode = #tpu.pipeline_mode<synchronous>, transform_indices = @transform_15, window_bounds = array<i64: 1, 32>}, {pipeline_mode = #tpu.pipeline_mode<synchronous>, transform_indices = @transform_16, window_bounds = array<i64: 1, 32>}, {pipeline_mode = #tpu.pipeline_mode<synchronous>, transform_indices = @transform_17, window_bounds = array<i64: 32, 16>}, {pipeline_mode = #tpu.pipeline_mode<synchronous>, transform_indices = @transform_18, window_bounds = array<i64: 1, 16>}, {pipeline_mode = #tpu.pipeline_mode<synchronous>, transform_indices = @transform_19, window_bounds = array<i64: 1, 16>}, {pipeline_mode = #tpu.pipeline_mode<synchronous>, transform_indices = @transform_20, window_bounds = array<i64: 16, 128>}, {pipeline_mode = #tpu.pipeline_mode<synchronous>, transform_indices = @transform_21, window_bounds = array<i64: 1, 128>}, {pipeline_mode = #tpu.pipeline_mode<synchronous>, transform_indices = @transform_22, window_bounds = array<i64: 2, 128>}]} {
    %c0 = arith.constant 0 : index
    %c0_0 = arith.constant 0 : index
    %c0_1 = arith.constant 0 : index
    %c0_2 = arith.constant 0 : index
    %0 = vector.load %arg1[%c0, %c0_0, %c0_1, %c0_2] : memref<8x8x8x8xf32, #tpu.memory_space<vmem>>, vector<8x8x8x8xf32>
    %c0_3 = arith.constant 0 : index
    %c0_4 = arith.constant 0 : index
    %1 = vector.load %arg2[%c0_3, %c0_4] : memref<8x32xf32, #tpu.memory_space<vmem>>, vector<8x32xf32>
    %c0_5 = arith.constant 0 : index
    %c0_6 = arith.constant 0 : index
    %2 = vector.load %arg3[%c0_5, %c0_6] : memref<1x32xf32, #tpu.memory_space<vmem>>, vector<1x32xf32>
    %c0_7 = arith.constant 0 : index
    %c0_8 = arith.constant 0 : index
    %3 = vector.load %arg4[%c0_7, %c0_8] : memref<1x32xf32, #tpu.memory_space<vmem>>, vector<1x32xf32>
    %c0_9 = arith.constant 0 : index
    %c0_10 = arith.constant 0 : index
    %c0_11 = arith.constant 0 : index
    %4 = vector.load %arg5[%c0_9, %c0_10, %c0_11] : memref<5x5x32xf32, #tpu.memory_space<vmem>>, vector<5x5x32xf32>
    %c0_12 = arith.constant 0 : index
    %c0_13 = arith.constant 0 : index
    %5 = vector.load %arg6[%c0_12, %c0_13] : memref<1x32xf32, #tpu.memory_space<vmem>>, vector<1x32xf32>
    %c0_14 = arith.constant 0 : index
    %c0_15 = arith.constant 0 : index
    %6 = vector.load %arg7[%c0_14, %c0_15] : memref<1x32xf32, #tpu.memory_space<vmem>>, vector<1x32xf32>
    %c0_16 = arith.constant 0 : index
    %c0_17 = arith.constant 0 : index
    %7 = vector.load %arg8[%c0_16, %c0_17] : memref<32x32xf32, #tpu.memory_space<vmem>>, vector<32x32xf32>
    %c0_18 = arith.constant 0 : index
    %c0_19 = arith.constant 0 : index
    %8 = vector.load %arg9[%c0_18, %c0_19] : memref<1x32xf32, #tpu.memory_space<vmem>>, vector<1x32xf32>
    %c0_20 = arith.constant 0 : index
    %c0_21 = arith.constant 0 : index
    %9 = vector.load %arg10[%c0_20, %c0_21] : memref<1x32xf32, #tpu.memory_space<vmem>>, vector<1x32xf32>
    %c0_22 = arith.constant 0 : index
    %c0_23 = arith.constant 0 : index
    %10 = vector.load %arg11[%c0_22, %c0_23] : memref<32x16xf32, #tpu.memory_space<vmem>>, vector<32x16xf32>
    %11 = vector.shape_cast %0 : vector<8x8x8x8xf32> to vector<512x8xf32>
    %cst = arith.constant dense<0.000000e+00> : vector<512x32xf32>
    %12 = tpu.matmul %11, %1, %cst {dimension_numbers = #tpu.dot_dimension_numbers<[1], [0], [0], [1], [0, 0, 1, 1], [], []>} : vector<512x8xf32>, vector<8x32xf32>, vector<512x32xf32> -> vector<512x32xf32>
    %cst_24 = arith.constant dense<0.000000e+00> : vector<32xf32>
    %13 = vector.multi_reduction <add>, %12, %cst_24 [0] : vector<512x32xf32> to vector<32xf32>
    %14 = vector.shape_cast %13 : vector<32xf32> to vector<1x32xf32>
    %cst_25 = arith.constant 5.120000e+02 : f32
    %15 = vector.broadcast %cst_25 : f32 to vector<1x32xf32>
    %16 = arith.divf %14, %15 : vector<1x32xf32>
    %17 = vector.broadcast %16 : vector<1x32xf32> to vector<512x32xf32>
    %18 = arith.subf %12, %17 : vector<512x32xf32>
    %19 = arith.mulf %18, %18 : vector<512x32xf32>
    %cst_26 = arith.constant dense<0.000000e+00> : vector<32xf32>
    %20 = vector.multi_reduction <add>, %19, %cst_26 [0] : vector<512x32xf32> to vector<32xf32>
    %21 = vector.shape_cast %20 : vector<32xf32> to vector<1x32xf32>
    %cst_27 = arith.constant 5.120000e+02 : f32
    %22 = vector.broadcast %cst_27 : f32 to vector<1x32xf32>
    %23 = arith.divf %21, %22 : vector<1x32xf32>
    %24 = vector.broadcast %16 : vector<1x32xf32> to vector<512x32xf32>
    %25 = arith.subf %12, %24 : vector<512x32xf32>
    %cst_28 = arith.constant 9.99999974E-6 : f32
    %26 = vector.broadcast %cst_28 : f32 to vector<1x32xf32>
    %27 = arith.addf %23, %26 : vector<1x32xf32>
    %28 = math.rsqrt %27 : vector<1x32xf32>
    %29 = vector.broadcast %28 : vector<1x32xf32> to vector<512x32xf32>
    %30 = arith.mulf %25, %29 : vector<512x32xf32>
    %31 = vector.broadcast %2 : vector<1x32xf32> to vector<512x32xf32>
    %32 = arith.mulf %30, %31 : vector<512x32xf32>
    %33 = vector.broadcast %3 : vector<1x32xf32> to vector<512x32xf32>
    %34 = arith.addf %32, %33 : vector<512x32xf32>
    %cst_29 = arith.constant 0.000000e+00 : f32
    %cst_30 = arith.constant 6.000000e+00 : f32
    %35 = vector.broadcast %cst_29 : f32 to vector<512x32xf32>
    %36 = arith.maximumf %35, %34 : vector<512x32xf32>
    %37 = vector.broadcast %cst_30 : f32 to vector<512x32xf32>
    %38 = arith.minimumf %37, %36 : vector<512x32xf32>
    %39 = vector.shape_cast %38 : vector<512x32xf32> to vector<8x8x8x32xf32>
    %cst_31 = arith.constant 0.000000e+00 : f32
    %40 = vector.broadcast %cst_31 : f32 to vector<8x10x10x32xf32>
    %c0_32 = arith.constant 0 : index
    %c0_33 = arith.constant 0 : index
    %c0_34 = arith.constant 0 : index
    %c0_35 = arith.constant 0 : index
    %41 = vector.load %arg24[%c0_32, %c0_33, %c0_34, %c0_35] : memref<8x10x10x32xf32, #tpu.memory_space<vmem>>, vector<8x10x10x32xf32>
    tpu.vector_store %arg24[%c0_32, %c0_33, %c0_34, %c0_35], %40 {strides = array<i32>} : memref<8x10x10x32xf32, #tpu.memory_space<vmem>>, vector<8x10x10x32xf32>,
    %42 = vector.extract_strided_slice %39 {offsets = [0, 0, 0, 0], sizes = [2, 8, 8, 32], strides = [1, 1, 1, 1]} : vector<8x8x8x32xf32> to vector<2x8x8x32xf32>
    %c0_36 = arith.constant 0 : index
    %c1 = arith.constant 1 : index
    %c1_37 = arith.constant 1 : index
    %c0_38 = arith.constant 0 : index
    %43 = vector.load %arg24[%c0_36, %c1, %c1_37, %c0_38] : memref<8x10x10x32xf32, #tpu.memory_space<vmem>>, vector<2x8x8x32xf32>
    tpu.vector_store %arg24[%c0_36, %c1, %c1_37, %c0_38], %42 {strides = array<i32>} : memref<8x10x10x32xf32, #tpu.memory_space<vmem>>, vector<2x8x8x32xf32>,
    %44 = vector.extract_strided_slice %39 {offsets = [2, 0, 0, 0], sizes = [2, 8, 8, 32], strides = [1, 1, 1, 1]} : vector<8x8x8x32xf32> to vector<2x8x8x32xf32>
    %c2 = arith.constant 2 : index
    %c1_39 = arith.constant 1 : index
    %c1_40 = arith.constant 1 : index
    %c0_41 = arith.constant 0 : index
    %45 = vector.load %arg24[%c2, %c1_39, %c1_40, %c0_41] : memref<8x10x10x32xf32, #tpu.memory_space<vmem>>, vector<2x8x8x32xf32>
    tpu.vector_store %arg24[%c2, %c1_39, %c1_40, %c0_41], %44 {strides = array<i32>} : memref<8x10x10x32xf32, #tpu.memory_space<vmem>>, vector<2x8x8x32xf32>,
    %46 = vector.extract_strided_slice %39 {offsets = [4, 0, 0, 0], sizes = [2, 8, 8, 32], strides = [1, 1, 1, 1]} : vector<8x8x8x32xf32> to vector<2x8x8x32xf32>
    %c4 = arith.constant 4 : index
    %c1_42 = arith.constant 1 : index
    %c1_43 = arith.constant 1 : index
    %c0_44 = arith.constant 0 : index
    %47 = vector.load %arg24[%c4, %c1_42, %c1_43, %c0_44] : memref<8x10x10x32xf32, #tpu.memory_space<vmem>>, vector<2x8x8x32xf32>
    tpu.vector_store %arg24[%c4, %c1_42, %c1_43, %c0_44], %46 {strides = array<i32>} : memref<8x10x10x32xf32, #tpu.memory_space<vmem>>, vector<2x8x8x32xf32>,
    %48 = vector.extract_strided_slice %39 {offsets = [6, 0, 0, 0], sizes = [2, 8, 8, 32], strides = [1, 1, 1, 1]} : vector<8x8x8x32xf32> to vector<2x8x8x32xf32>
    %c6 = arith.constant 6 : index
    %c1_45 = arith.constant 1 : index
    %c1_46 = arith.constant 1 : index
    %c0_47 = arith.constant 0 : index
    %49 = vector.load %arg24[%c6, %c1_45, %c1_46, %c0_47] : memref<8x10x10x32xf32, #tpu.memory_space<vmem>>, vector<2x8x8x32xf32>
    tpu.vector_store %arg24[%c6, %c1_45, %c1_46, %c0_47], %48 {strides = array<i32>} : memref<8x10x10x32xf32, #tpu.memory_space<vmem>>, vector<2x8x8x32xf32>,
    %cst_48 = arith.constant 0.000000e+00 : f32
    %50 = vector.broadcast %cst_48 : f32 to vector<2x8x8x32xf32>
    %c0_49 = arith.constant 0 : index
    %c0_50 = arith.constant 0 : index
    %c0_51 = arith.constant 0 : index
    %c0_52 = arith.constant 0 : index
    %51 = vector.load %arg24[%c0_49, %c0_50, %c0_51, %c0_52] : memref<8x10x10x32xf32, #tpu.memory_space<vmem>>, vector<2x8x8x32xf32>
    %52 = vector.extract_strided_slice %4 {offsets = [0, 0, 0], sizes = [1, 1, 32], strides = [1, 1, 1]} : vector<5x5x32xf32> to vector<1x1x32xf32>
    %53 = vector.shape_cast %52 : vector<1x1x32xf32> to vector<32xf32>
    %54 = vector.shape_cast %53 : vector<32xf32> to vector<1x1x1x32xf32>
    %55 = vector.broadcast %54 : vector<1x1x1x32xf32> to vector<2x8x8x32xf32>
    %56 = arith.mulf %51, %55 : vector<2x8x8x32xf32>
    %57 = arith.addf %50, %56 : vector<2x8x8x32xf32>
    %c2_53 = arith.constant 2 : index
    %c0_54 = arith.constant 0 : index
    %c0_55 = arith.constant 0 : index
    %c0_56 = arith.constant 0 : index
    %58 = vector.load %arg24[%c2_53, %c0_54, %c0_55, %c0_56] : memref<8x10x10x32xf32, #tpu.memory_space<vmem>>, vector<2x8x8x32xf32>
    %59 = vector.extract_strided_slice %4 {offsets = [0, 1, 0], sizes = [1, 1, 32], strides = [1, 1, 1]} : vector<5x5x32xf32> to vector<1x1x32xf32>
    %60 = vector.shape_cast %59 : vector<1x1x32xf32> to vector<32xf32>
    %61 = vector.shape_cast %60 : vector<32xf32> to vector<1x1x1x32xf32>
    %62 = vector.broadcast %61 : vector<1x1x1x32xf32> to vector<2x8x8x32xf32>
    %63 = arith.mulf %58, %62 : vector<2x8x8x32xf32>
    %64 = arith.addf %57, %63 : vector<2x8x8x32xf32>
    %c0_57 = arith.constant 0 : index
    %c0_58 = arith.constant 0 : index
    %c1_59 = arith.constant 1 : index
    %c0_60 = arith.constant 0 : index
    %65 = vector.load %arg24[%c0_57, %c0_58, %c1_59, %c0_60] : memref<8x10x10x32xf32, #tpu.memory_space<vmem>>, vector<2x8x8x32xf32>
    %66 = vector.extract_strided_slice %4 {offsets = [0, 2, 0], sizes = [1, 1, 32], strides = [1, 1, 1]} : vector<5x5x32xf32> to vector<1x1x32xf32>
    %67 = vector.shape_cast %66 : vector<1x1x32xf32> to vector<32xf32>
    %68 = vector.shape_cast %67 : vector<32xf32> to vector<1x1x1x32xf32>
    %69 = vector.broadcast %68 : vector<1x1x1x32xf32> to vector<2x8x8x32xf32>
    %70 = arith.mulf %65, %69 : vector<2x8x8x32xf32>
    %71 = arith.addf %64, %70 : vector<2x8x8x32xf32>
    %c2_61 = arith.constant 2 : index
    %c0_62 = arith.constant 0 : index
    %c1_63 = arith.constant 1 : index
    %c0_64 = arith.constant 0 : index
    %72 = vector.load %arg24[%c2_61, %c0_62, %c1_63, %c0_64] : memref<8x10x10x32xf32, #tpu.memory_space<vmem>>, vector<2x8x8x32xf32>
    %73 = vector.extract_strided_slice %4 {offsets = [0, 3, 0], sizes = [1, 1, 32], strides = [1, 1, 1]} : vector<5x5x32xf32> to vector<1x1x32xf32>
    %74 = vector.shape_cast %73 : vector<1x1x32xf32> to vector<32xf32>
    %75 = vector.shape_cast %74 : vector<32xf32> to vector<1x1x1x32xf32>
    %76 = vector.broadcast %75 : vector<1x1x1x32xf32> to vector<2x8x8x32xf32>
    %77 = arith.mulf %72, %76 : vector<2x8x8x32xf32>
    %78 = arith.addf %71, %77 : vector<2x8x8x32xf32>
    %c0_65 = arith.constant 0 : index
    %c0_66 = arith.constant 0 : index
    %c2_67 = arith.constant 2 : index
    %c0_68 = arith.constant 0 : index
    %79 = vector.load %arg24[%c0_65, %c0_66, %c2_67, %c0_68] : memref<8x10x10x32xf32, #tpu.memory_space<vmem>>, vector<2x8x8x32xf32>
    %80 = vector.extract_strided_slice %4 {offsets = [0, 4, 0], sizes = [1, 1, 32], strides = [1, 1, 1]} : vector<5x5x32xf32> to vector<1x1x32xf32>
    %81 = vector.shape_cast %80 : vector<1x1x32xf32> to vector<32xf32>
    %82 = vector.shape_cast %81 : vector<32xf32> to vector<1x1x1x32xf32>
    %83 = vector.broadcast %82 : vector<1x1x1x32xf32> to vector<2x8x8x32xf32>
    %84 = arith.mulf %79, %83 : vector<2x8x8x32xf32>
    %85 = arith.addf %78, %84 : vector<2x8x8x32xf32>
    %c4_69 = arith.constant 4 : index
    %c0_70 = arith.constant 0 : index
    %c0_71 = arith.constant 0 : index
    %c0_72 = arith.constant 0 : index
    %86 = vector.load %arg24[%c4_69, %c0_70, %c0_71, %c0_72] : memref<8x10x10x32xf32, #tpu.memory_space<vmem>>, vector<2x8x8x32xf32>
    %87 = vector.extract_strided_slice %4 {offsets = [1, 0, 0], sizes = [1, 1, 32], strides = [1, 1, 1]} : vector<5x5x32xf32> to vector<1x1x32xf32>
    %88 = vector.shape_cast %87 : vector<1x1x32xf32> to vector<32xf32>
    %89 = vector.shape_cast %88 : vector<32xf32> to vector<1x1x1x32xf32>
    %90 = vector.broadcast %89 : vector<1x1x1x32xf32> to vector<2x8x8x32xf32>
    %91 = arith.mulf %86, %90 : vector<2x8x8x32xf32>
    %92 = arith.addf %85, %91 : vector<2x8x8x32xf32>
    %c6_73 = arith.constant 6 : index
    %c0_74 = arith.constant 0 : index
    %c0_75 = arith.constant 0 : index
    %c0_76 = arith.constant 0 : index
    %93 = vector.load %arg24[%c6_73, %c0_74, %c0_75, %c0_76] : memref<8x10x10x32xf32, #tpu.memory_space<vmem>>, vector<2x8x8x32xf32>
    %94 = vector.extract_strided_slice %4 {offsets = [1, 1, 0], sizes = [1, 1, 32], strides = [1, 1, 1]} : vector<5x5x32xf32> to vector<1x1x32xf32>
    %95 = vector.shape_cast %94 : vector<1x1x32xf32> to vector<32xf32>
    %96 = vector.shape_cast %95 : vector<32xf32> to vector<1x1x1x32xf32>
    %97 = vector.broadcast %96 : vector<1x1x1x32xf32> to vector<2x8x8x32xf32>
    %98 = arith.mulf %93, %97 : vector<2x8x8x32xf32>
    %99 = arith.addf %92, %98 : vector<2x8x8x32xf32>
    %c4_77 = arith.constant 4 : index
    %c0_78 = arith.constant 0 : index
    %c1_79 = arith.constant 1 : index
    %c0_80 = arith.constant 0 : index
    %100 = vector.load %arg24[%c4_77, %c0_78, %c1_79, %c0_80] : memref<8x10x10x32xf32, #tpu.memory_space<vmem>>, vector<2x8x8x32xf32>
    %101 = vector.extract_strided_slice %4 {offsets = [1, 2, 0], sizes = [1, 1, 32], strides = [1, 1, 1]} : vector<5x5x32xf32> to vector<1x1x32xf32>
    %102 = vector.shape_cast %101 : vector<1x1x32xf32> to vector<32xf32>
    %103 = vector.shape_cast %102 : vector<32xf32> to vector<1x1x1x32xf32>
    %104 = vector.broadcast %103 : vector<1x1x1x32xf32> to vector<2x8x8x32xf32>
    %105 = arith.mulf %100, %104 : vector<2x8x8x32xf32>
    %106 = arith.addf %99, %105 : vector<2x8x8x32xf32>
    %c6_81 = arith.constant 6 : index
    %c0_82 = arith.constant 0 : index
    %c1_83 = arith.constant 1 : index
    %c0_84 = arith.constant 0 : index
    %107 = vector.load %arg24[%c6_81, %c0_82, %c1_83, %c0_84] : memref<8x10x10x32xf32, #tpu.memory_space<vmem>>, vector<2x8x8x32xf32>
    %108 = vector.extract_strided_slice %4 {offsets = [1, 3, 0], sizes = [1, 1, 32], strides = [1, 1, 1]} : vector<5x5x32xf32> to vector<1x1x32xf32>
    %109 = vector.shape_cast %108 : vector<1x1x32xf32> to vector<32xf32>
    %110 = vector.shape_cast %109 : vector<32xf32> to vector<1x1x1x32xf32>
    %111 = vector.broadcast %110 : vector<1x1x1x32xf32> to vector<2x8x8x32xf32>
    %112 = arith.mulf %107, %111 : vector<2x8x8x32xf32>
    %113 = arith.addf %106, %112 : vector<2x8x8x32xf32>
    %c4_85 = arith.constant 4 : index
    %c0_86 = arith.constant 0 : index
    %c2_87 = arith.constant 2 : index
    %c0_88 = arith.constant 0 : index
    %114 = vector.load %arg24[%c4_85, %c0_86, %c2_87, %c0_88] : memref<8x10x10x32xf32, #tpu.memory_space<vmem>>, vector<2x8x8x32xf32>
    %115 = vector.extract_strided_slice %4 {offsets = [1, 4, 0], sizes = [1, 1, 32], strides = [1, 1, 1]} : vector<5x5x32xf32> to vector<1x1x32xf32>
    %116 = vector.shape_cast %115 : vector<1x1x32xf32> to vector<32xf32>
    %117 = vector.shape_cast %116 : vector<32xf32> to vector<1x1x1x32xf32>
    %118 = vector.broadcast %117 : vector<1x1x1x32xf32> to vector<2x8x8x32xf32>
    %119 = arith.mulf %114, %118 : vector<2x8x8x32xf32>
    %120 = arith.addf %113, %119 : vector<2x8x8x32xf32>
    %c0_89 = arith.constant 0 : index
    %c1_90 = arith.constant 1 : index
    %c0_91 = arith.constant 0 : index
    %c0_92 = arith.constant 0 : index
    %121 = vector.load %arg24[%c0_89, %c1_90, %c0_91, %c0_92] : memref<8x10x10x32xf32, #tpu.memory_space<vmem>>, vector<2x8x8x32xf32>
    %122 = vector.extract_strided_slice %4 {offsets = [2, 0, 0], sizes = [1, 1, 32], strides = [1, 1, 1]} : vector<5x5x32xf32> to vector<1x1x32xf32>
    %123 = vector.shape_cast %122 : vector<1x1x32xf32> to vector<32xf32>
    %124 = vector.shape_cast %123 : vector<32xf32> to vector<1x1x1x32xf32>
    %125 = vector.broadcast %124 : vector<1x1x1x32xf32> to vector<2x8x8x32xf32>
    %126 = arith.mulf %121, %125 : vector<2x8x8x32xf32>
    %127 = arith.addf %120, %126 : vector<2x8x8x32xf32>
    %c2_93 = arith.constant 2 : index
    %c1_94 = arith.constant 1 : index
    %c0_95 = arith.constant 0 : index
    %c0_96 = arith.constant 0 : index
    %128 = vector.load %arg24[%c2_93, %c1_94, %c0_95, %c0_96] : memref<8x10x10x32xf32, #tpu.memory_space<vmem>>, vector<2x8x8x32xf32>
    %129 = vector.extract_strided_slice %4 {offsets = [2, 1, 0], sizes = [1, 1, 32], strides = [1, 1, 1]} : vector<5x5x32xf32> to vector<1x1x32xf32>
    %130 = vector.shape_cast %129 : vector<1x1x32xf32> to vector<32xf32>
    %131 = vector.shape_cast %130 : vector<32xf32> to vector<1x1x1x32xf32>
    %132 = vector.broadcast %131 : vector<1x1x1x32xf32> to vector<2x8x8x32xf32>
    %133 = arith.mulf %128, %132 : vector<2x8x8x32xf32>
    %134 = arith.addf %127, %133 : vector<2x8x8x32xf32>
    %c0_97 = arith.constant 0 : index
    %c1_98 = arith.constant 1 : index
    %c1_99 = arith.constant 1 : index
    %c0_100 = arith.constant 0 : index
    %135 = vector.load %arg24[%c0_97, %c1_98, %c1_99, %c0_100] : memref<8x10x10x32xf32, #tpu.memory_space<vmem>>, vector<2x8x8x32xf32>
    %136 = vector.extract_strided_slice %4 {offsets = [2, 2, 0], sizes = [1, 1, 32], strides = [1, 1, 1]} : vector<5x5x32xf32> to vector<1x1x32xf32>
    %137 = vector.shape_cast %136 : vector<1x1x32xf32> to vector<32xf32>
    %138 = vector.shape_cast %137 : vector<32xf32> to vector<1x1x1x32xf32>
    %139 = vector.broadcast %138 : vector<1x1x1x32xf32> to vector<2x8x8x32xf32>
    %140 = arith.mulf %135, %139 : vector<2x8x8x32xf32>
    %141 = arith.addf %134, %140 : vector<2x8x8x32xf32>
    %c2_101 = arith.constant 2 : index
    %c1_102 = arith.constant 1 : index
    %c1_103 = arith.constant 1 : index
    %c0_104 = arith.constant 0 : index
    %142 = vector.load %arg24[%c2_101, %c1_102, %c1_103, %c0_104] : memref<8x10x10x32xf32, #tpu.memory_space<vmem>>, vector<2x8x8x32xf32>
    %143 = vector.extract_strided_slice %4 {offsets = [2, 3, 0], sizes = [1, 1, 32], strides = [1, 1, 1]} : vector<5x5x32xf32> to vector<1x1x32xf32>
    %144 = vector.shape_cast %143 : vector<1x1x32xf32> to vector<32xf32>
    %145 = vector.shape_cast %144 : vector<32xf32> to vector<1x1x1x32xf32>
    %146 = vector.broadcast %145 : vector<1x1x1x32xf32> to vector<2x8x8x32xf32>
    %147 = arith.mulf %142, %146 : vector<2x8x8x32xf32>
    %148 = arith.addf %141, %147 : vector<2x8x8x32xf32>
    %c0_105 = arith.constant 0 : index
    %c1_106 = arith.constant 1 : index
    %c2_107 = arith.constant 2 : index
    %c0_108 = arith.constant 0 : index
    %149 = vector.load %arg24[%c0_105, %c1_106, %c2_107, %c0_108] : memref<8x10x10x32xf32, #tpu.memory_space<vmem>>, vector<2x8x8x32xf32>
    %150 = vector.extract_strided_slice %4 {offsets = [2, 4, 0], sizes = [1, 1, 32], strides = [1, 1, 1]} : vector<5x5x32xf32> to vector<1x1x32xf32>
    %151 = vector.shape_cast %150 : vector<1x1x32xf32> to vector<32xf32>
    %152 = vector.shape_cast %151 : vector<32xf32> to vector<1x1x1x32xf32>
    %153 = vector.broadcast %152 : vector<1x1x1x32xf32> to vector<2x8x8x32xf32>
    %154 = arith.mulf %149, %153 : vector<2x8x8x32xf32>
    %155 = arith.addf %148, %154 : vector<2x8x8x32xf32>
    %c4_109 = arith.constant 4 : index
    %c1_110 = arith.constant 1 : index
    %c0_111 = arith.constant 0 : index
    %c0_112 = arith.constant 0 : index
    %156 = vector.load %arg24[%c4_109, %c1_110, %c0_111, %c0_112] : memref<8x10x10x32xf32, #tpu.memory_space<vmem>>, vector<2x8x8x32xf32>
    %157 = vector.extract_strided_slice %4 {offsets = [3, 0, 0], sizes = [1, 1, 32], strides = [1, 1, 1]} : vector<5x5x32xf32> to vector<1x1x32xf32>
    %158 = vector.shape_cast %157 : vector<1x1x32xf32> to vector<32xf32>
    %159 = vector.shape_cast %158 : vector<32xf32> to vector<1x1x1x32xf32>
    %160 = vector.broadcast %159 : vector<1x1x1x32xf32> to vector<2x8x8x32xf32>
    %161 = arith.mulf %156, %160 : vector<2x8x8x32xf32>
    %162 = arith.addf %155, %161 : vector<2x8x8x32xf32>
    %c6_113 = arith.constant 6 : index
    %c1_114 = arith.constant 1 : index
    %c0_115 = arith.constant 0 : index
    %c0_116 = arith.constant 0 : index
    %163 = vector.load %arg24[%c6_113, %c1_114, %c0_115, %c0_116] : memref<8x10x10x32xf32, #tpu.memory_space<vmem>>, vector<2x8x8x32xf32>
    %164 = vector.extract_strided_slice %4 {offsets = [3, 1, 0], sizes = [1, 1, 32], strides = [1, 1, 1]} : vector<5x5x32xf32> to vector<1x1x32xf32>
    %165 = vector.shape_cast %164 : vector<1x1x32xf32> to vector<32xf32>
    %166 = vector.shape_cast %165 : vector<32xf32> to vector<1x1x1x32xf32>
    %167 = vector.broadcast %166 : vector<1x1x1x32xf32> to vector<2x8x8x32xf32>
    %168 = arith.mulf %163, %167 : vector<2x8x8x32xf32>
    %169 = arith.addf %162, %168 : vector<2x8x8x32xf32>
    %c4_117 = arith.constant 4 : index
    %c1_118 = arith.constant 1 : index
    %c1_119 = arith.constant 1 : index
    %c0_120 = arith.constant 0 : index
    %170 = vector.load %arg24[%c4_117, %c1_118, %c1_119, %c0_120] : memref<8x10x10x32xf32, #tpu.memory_space<vmem>>, vector<2x8x8x32xf32>
    %171 = vector.extract_strided_slice %4 {offsets = [3, 2, 0], sizes = [1, 1, 32], strides = [1, 1, 1]} : vector<5x5x32xf32> to vector<1x1x32xf32>
    %172 = vector.shape_cast %171 : vector<1x1x32xf32> to vector<32xf32>
    %173 = vector.shape_cast %172 : vector<32xf32> to vector<1x1x1x32xf32>
    %174 = vector.broadcast %173 : vector<1x1x1x32xf32> to vector<2x8x8x32xf32>
    %175 = arith.mulf %170, %174 : vector<2x8x8x32xf32>
    %176 = arith.addf %169, %175 : vector<2x8x8x32xf32>
    %c6_121 = arith.constant 6 : index
    %c1_122 = arith.constant 1 : index
    %c1_123 = arith.constant 1 : index
    %c0_124 = arith.constant 0 : index
    %177 = vector.load %arg24[%c6_121, %c1_122, %c1_123, %c0_124] : memref<8x10x10x32xf32, #tpu.memory_space<vmem>>, vector<2x8x8x32xf32>
    %178 = vector.extract_strided_slice %4 {offsets = [3, 3, 0], sizes = [1, 1, 32], strides = [1, 1, 1]} : vector<5x5x32xf32> to vector<1x1x32xf32>
    %179 = vector.shape_cast %178 : vector<1x1x32xf32> to vector<32xf32>
    %180 = vector.shape_cast %179 : vector<32xf32> to vector<1x1x1x32xf32>
    %181 = vector.broadcast %180 : vector<1x1x1x32xf32> to vector<2x8x8x32xf32>
    %182 = arith.mulf %177, %181 : vector<2x8x8x32xf32>
    %183 = arith.addf %176, %182 : vector<2x8x8x32xf32>
    %c4_125 = arith.constant 4 : index
    %c1_126 = arith.constant 1 : index
    %c2_127 = arith.constant 2 : index
    %c0_128 = arith.constant 0 : index
    %184 = vector.load %arg24[%c4_125, %c1_126, %c2_127, %c0_128] : memref<8x10x10x32xf32, #tpu.memory_space<vmem>>, vector<2x8x8x32xf32>
    %185 = vector.extract_strided_slice %4 {offsets = [3, 4, 0], sizes = [1, 1, 32], strides = [1, 1, 1]} : vector<5x5x32xf32> to vector<1x1x32xf32>
    %186 = vector.shape_cast %185 : vector<1x1x32xf32> to vector<32xf32>
    %187 = vector.shape_cast %186 : vector<32xf32> to vector<1x1x1x32xf32>
    %188 = vector.broadcast %187 : vector<1x1x1x32xf32> to vector<2x8x8x32xf32>
    %189 = arith.mulf %184, %188 : vector<2x8x8x32xf32>
    %190 = arith.addf %183, %189 : vector<2x8x8x32xf32>
    %c0_129 = arith.constant 0 : index
    %c2_130 = arith.constant 2 : index
    %c0_131 = arith.constant 0 : index
    %c0_132 = arith.constant 0 : index
    %191 = vector.load %arg24[%c0_129, %c2_130, %c0_131, %c0_132] : memref<8x10x10x32xf32, #tpu.memory_space<vmem>>, vector<2x8x8x32xf32>
    %192 = vector.extract_strided_slice %4 {offsets = [4, 0, 0], sizes = [1, 1, 32], strides = [1, 1, 1]} : vector<5x5x32xf32> to vector<1x1x32xf32>
    %193 = vector.shape_cast %192 : vector<1x1x32xf32> to vector<32xf32>
    %194 = vector.shape_cast %193 : vector<32xf32> to vector<1x1x1x32xf32>
    %195 = vector.broadcast %194 : vector<1x1x1x32xf32> to vector<2x8x8x32xf32>
    %196 = arith.mulf %191, %195 : vector<2x8x8x32xf32>
    %197 = arith.addf %190, %196 : vector<2x8x8x32xf32>
    %c2_133 = arith.constant 2 : index
    %c2_134 = arith.constant 2 : index
    %c0_135 = arith.constant 0 : index
    %c0_136 = arith.constant 0 : index
    %198 = vector.load %arg24[%c2_133, %c2_134, %c0_135, %c0_136] : memref<8x10x10x32xf32, #tpu.memory_space<vmem>>, vector<2x8x8x32xf32>
    %199 = vector.extract_strided_slice %4 {offsets = [4, 1, 0], sizes = [1, 1, 32], strides = [1, 1, 1]} : vector<5x5x32xf32> to vector<1x1x32xf32>
    %200 = vector.shape_cast %199 : vector<1x1x32xf32> to vector<32xf32>
    %201 = vector.shape_cast %200 : vector<32xf32> to vector<1x1x1x32xf32>
    %202 = vector.broadcast %201 : vector<1x1x1x32xf32> to vector<2x8x8x32xf32>
    %203 = arith.mulf %198, %202 : vector<2x8x8x32xf32>
    %204 = arith.addf %197, %203 : vector<2x8x8x32xf32>
    %c0_137 = arith.constant 0 : index
    %c2_138 = arith.constant 2 : index
    %c1_139 = arith.constant 1 : index
    %c0_140 = arith.constant 0 : index
    %205 = vector.load %arg24[%c0_137, %c2_138, %c1_139, %c0_140] : memref<8x10x10x32xf32, #tpu.memory_space<vmem>>, vector<2x8x8x32xf32>
    %206 = vector.extract_strided_slice %4 {offsets = [4, 2, 0], sizes = [1, 1, 32], strides = [1, 1, 1]} : vector<5x5x32xf32> to vector<1x1x32xf32>
    %207 = vector.shape_cast %206 : vector<1x1x32xf32> to vector<32xf32>
    %208 = vector.shape_cast %207 : vector<32xf32> to vector<1x1x1x32xf32>
    %209 = vector.broadcast %208 : vector<1x1x1x32xf32> to vector<2x8x8x32xf32>
    %210 = arith.mulf %205, %209 : vector<2x8x8x32xf32>
    %211 = arith.addf %204, %210 : vector<2x8x8x32xf32>
    %c2_141 = arith.constant 2 : index
    %c2_142 = arith.constant 2 : index
    %c1_143 = arith.constant 1 : index
    %c0_144 = arith.constant 0 : index
    %212 = vector.load %arg24[%c2_141, %c2_142, %c1_143, %c0_144] : memref<8x10x10x32xf32, #tpu.memory_space<vmem>>, vector<2x8x8x32xf32>
    %213 = vector.extract_strided_slice %4 {offsets = [4, 3, 0], sizes = [1, 1, 32], strides = [1, 1, 1]} : vector<5x5x32xf32> to vector<1x1x32xf32>
    %214 = vector.shape_cast %213 : vector<1x1x32xf32> to vector<32xf32>
    %215 = vector.shape_cast %214 : vector<32xf32> to vector<1x1x1x32xf32>
    %216 = vector.broadcast %215 : vector<1x1x1x32xf32> to vector<2x8x8x32xf32>
    %217 = arith.mulf %212, %216 : vector<2x8x8x32xf32>
    %218 = arith.addf %211, %217 : vector<2x8x8x32xf32>
    %c0_145 = arith.constant 0 : index
    %c2_146 = arith.constant 2 : index
    %c2_147 = arith.constant 2 : index
    %c0_148 = arith.constant 0 : index
    %219 = vector.load %arg24[%c0_145, %c2_146, %c2_147, %c0_148] : memref<8x10x10x32xf32, #tpu.memory_space<vmem>>, vector<2x8x8x32xf32>
    %220 = vector.extract_strided_slice %4 {offsets = [4, 4, 0], sizes = [1, 1, 32], strides = [1, 1, 1]} : vector<5x5x32xf32> to vector<1x1x32xf32>
    %221 = vector.shape_cast %220 : vector<1x1x32xf32> to vector<32xf32>
    %222 = vector.shape_cast %221 : vector<32xf32> to vector<1x1x1x32xf32>
    %223 = vector.broadcast %222 : vector<1x1x1x32xf32> to vector<2x8x8x32xf32>
    %224 = arith.mulf %219, %223 : vector<2x8x8x32xf32>
    %225 = arith.addf %218, %224 : vector<2x8x8x32xf32>
    %226 = vector.shape_cast %225 : vector<2x8x8x32xf32> to vector<128x32xf32>
    %cst_149 = arith.constant dense<0.000000e+00> : vector<32xf32>
    %227 = vector.multi_reduction <add>, %226, %cst_149 [0] : vector<128x32xf32> to vector<32xf32>
    %228 = vector.shape_cast %227 : vector<32xf32> to vector<1x32xf32>
    %cst_150 = arith.constant 1.280000e+02 : f32
    %229 = vector.broadcast %cst_150 : f32 to vector<1x32xf32>
    %230 = arith.divf %228, %229 : vector<1x32xf32>
    %231 = vector.broadcast %230 : vector<1x32xf32> to vector<128x32xf32>
    %232 = arith.subf %226, %231 : vector<128x32xf32>
    %233 = arith.mulf %232, %232 : vector<128x32xf32>
    %cst_151 = arith.constant dense<0.000000e+00> : vector<32xf32>
    %234 = vector.multi_reduction <add>, %233, %cst_151 [0] : vector<128x32xf32> to vector<32xf32>
    %235 = vector.shape_cast %234 : vector<32xf32> to vector<1x32xf32>
    %cst_152 = arith.constant 1.280000e+02 : f32
    %236 = vector.broadcast %cst_152 : f32 to vector<1x32xf32>
    %237 = arith.divf %235, %236 : vector<1x32xf32>
    %238 = vector.broadcast %230 : vector<1x32xf32> to vector<128x32xf32>
    %239 = arith.subf %226, %238 : vector<128x32xf32>
    %cst_153 = arith.constant 9.99999974E-6 : f32
    %240 = vector.broadcast %cst_153 : f32 to vector<1x32xf32>
    %241 = arith.addf %237, %240 : vector<1x32xf32>
    %242 = math.rsqrt %241 : vector<1x32xf32>
    %243 = vector.broadcast %242 : vector<1x32xf32> to vector<128x32xf32>
    %244 = arith.mulf %239, %243 : vector<128x32xf32>
    %245 = vector.broadcast %5 : vector<1x32xf32> to vector<128x32xf32>
    %246 = arith.mulf %244, %245 : vector<128x32xf32>
    %247 = vector.broadcast %6 : vector<1x32xf32> to vector<128x32xf32>
    %248 = arith.addf %246, %247 : vector<128x32xf32>
    %cst_154 = arith.constant 0.000000e+00 : f32
    %cst_155 = arith.constant 6.000000e+00 : f32
    %249 = vector.broadcast %cst_154 : f32 to vector<128x32xf32>
    %250 = arith.maximumf %249, %248 : vector<128x32xf32>
    %251 = vector.broadcast %cst_155 : f32 to vector<128x32xf32>
    %252 = arith.minimumf %251, %250 : vector<128x32xf32>
    %cst_156 = arith.constant dense<0.000000e+00> : vector<128x32xf32>
    %253 = tpu.matmul %252, %7, %cst_156 {dimension_numbers = #tpu.dot_dimension_numbers<[1], [0], [0], [1], [0, 0, 1, 1], [], []>} : vector<128x32xf32>, vector<32x32xf32>, vector<128x32xf32> -> vector<128x32xf32>
    %cst_157 = arith.constant dense<0.000000e+00> : vector<32xf32>
    %254 = vector.multi_reduction <add>, %253, %cst_157 [0] : vector<128x32xf32> to vector<32xf32>
    %255 = vector.shape_cast %254 : vector<32xf32> to vector<1x32xf32>
    %cst_158 = arith.constant 1.280000e+02 : f32
    %256 = vector.broadcast %cst_158 : f32 to vector<1x32xf32>
    %257 = arith.divf %255, %256 : vector<1x32xf32>
    %258 = vector.broadcast %257 : vector<1x32xf32> to vector<128x32xf32>
    %259 = arith.subf %253, %258 : vector<128x32xf32>
    %260 = arith.mulf %259, %259 : vector<128x32xf32>
    %cst_159 = arith.constant dense<0.000000e+00> : vector<32xf32>
    %261 = vector.multi_reduction <add>, %260, %cst_159 [0] : vector<128x32xf32> to vector<32xf32>
    %262 = vector.shape_cast %261 : vector<32xf32> to vector<1x32xf32>
    %cst_160 = arith.constant 1.280000e+02 : f32
    %263 = vector.broadcast %cst_160 : f32 to vector<1x32xf32>
    %264 = arith.divf %262, %263 : vector<1x32xf32>
    %265 = vector.broadcast %257 : vector<1x32xf32> to vector<128x32xf32>
    %266 = arith.subf %253, %265 : vector<128x32xf32>
    %cst_161 = arith.constant 9.99999974E-6 : f32
    %267 = vector.broadcast %cst_161 : f32 to vector<1x32xf32>
    %268 = arith.addf %264, %267 : vector<1x32xf32>
    %269 = math.rsqrt %268 : vector<1x32xf32>
    %270 = vector.broadcast %269 : vector<1x32xf32> to vector<128x32xf32>
    %271 = arith.mulf %266, %270 : vector<128x32xf32>
    %272 = vector.broadcast %8 : vector<1x32xf32> to vector<128x32xf32>
    %273 = arith.mulf %271, %272 : vector<128x32xf32>
    %274 = vector.broadcast %9 : vector<1x32xf32> to vector<128x32xf32>
    %275 = arith.addf %273, %274 : vector<128x32xf32>
    %cst_162 = arith.constant dense<0.000000e+00> : vector<128x16xf32>
    %276 = tpu.matmul %275, %10, %cst_162 {dimension_numbers = #tpu.dot_dimension_numbers<[1], [0], [0], [1], [0, 0, 1, 1], [], []>} : vector<128x32xf32>, vector<32x16xf32>, vector<128x16xf32> -> vector<128x16xf32>
    %277 = vector.shape_cast %276 : vector<128x16xf32> to vector<2x8x8x16xf32>
    %c0_163 = arith.constant 0 : index
    %c0_164 = arith.constant 0 : index
    %278 = vector.load %arg12[%c0_163, %c0_164] : memref<16x32xf32, #tpu.memory_space<vmem>>, vector<16x32xf32>
    %c0_165 = arith.constant 0 : index
    %c0_166 = arith.constant 0 : index
    %279 = vector.load %arg13[%c0_165, %c0_166] : memref<1x32xf32, #tpu.memory_space<vmem>>, vector<1x32xf32>
    %c0_167 = arith.constant 0 : index
    %c0_168 = arith.constant 0 : index
    %280 = vector.load %arg14[%c0_167, %c0_168] : memref<1x32xf32, #tpu.memory_space<vmem>>, vector<1x32xf32>
    %c0_169 = arith.constant 0 : index
    %c0_170 = arith.constant 0 : index
    %c0_171 = arith.constant 0 : index
    %281 = vector.load %arg15[%c0_169, %c0_170, %c0_171] : memref<3x3x32xf32, #tpu.memory_space<vmem>>, vector<3x3x32xf32>
    %c0_172 = arith.constant 0 : index
    %c0_173 = arith.constant 0 : index
    %282 = vector.load %arg16[%c0_172, %c0_173] : memref<1x32xf32, #tpu.memory_space<vmem>>, vector<1x32xf32>
    %c0_174 = arith.constant 0 : index
    %c0_175 = arith.constant 0 : index
    %283 = vector.load %arg17[%c0_174, %c0_175] : memref<1x32xf32, #tpu.memory_space<vmem>>, vector<1x32xf32>
    %c0_176 = arith.constant 0 : index
    %c0_177 = arith.constant 0 : index
    %284 = vector.load %arg18[%c0_176, %c0_177] : memref<32x16xf32, #tpu.memory_space<vmem>>, vector<32x16xf32>
    %c0_178 = arith.constant 0 : index
    %c0_179 = arith.constant 0 : index
    %285 = vector.load %arg19[%c0_178, %c0_179] : memref<1x16xf32, #tpu.memory_space<vmem>>, vector<1x16xf32>
    %c0_180 = arith.constant 0 : index
    %c0_181 = arith.constant 0 : index
    %286 = vector.load %arg20[%c0_180, %c0_181] : memref<1x16xf32, #tpu.memory_space<vmem>>, vector<1x16xf32>
    %287 = vector.shape_cast %277 : vector<2x8x8x16xf32> to vector<128x16xf32>
    %cst_182 = arith.constant dense<0.000000e+00> : vector<128x32xf32>
    %288 = tpu.matmul %287, %278, %cst_182 {dimension_numbers = #tpu.dot_dimension_numbers<[1], [0], [0], [1], [0, 0, 1, 1], [], []>} : vector<128x16xf32>, vector<16x32xf32>, vector<128x32xf32> -> vector<128x32xf32>
    %cst_183 = arith.constant dense<0.000000e+00> : vector<32xf32>
    %289 = vector.multi_reduction <add>, %288, %cst_183 [0] : vector<128x32xf32> to vector<32xf32>
    %290 = vector.shape_cast %289 : vector<32xf32> to vector<1x32xf32>
    %cst_184 = arith.constant 1.280000e+02 : f32
    %291 = vector.broadcast %cst_184 : f32 to vector<1x32xf32>
    %292 = arith.divf %290, %291 : vector<1x32xf32>
    %293 = vector.broadcast %292 : vector<1x32xf32> to vector<128x32xf32>
    %294 = arith.subf %288, %293 : vector<128x32xf32>
    %295 = arith.mulf %294, %294 : vector<128x32xf32>
    %cst_185 = arith.constant dense<0.000000e+00> : vector<32xf32>
    %296 = vector.multi_reduction <add>, %295, %cst_185 [0] : vector<128x32xf32> to vector<32xf32>
    %297 = vector.shape_cast %296 : vector<32xf32> to vector<1x32xf32>
    %cst_186 = arith.constant 1.280000e+02 : f32
    %298 = vector.broadcast %cst_186 : f32 to vector<1x32xf32>
    %299 = arith.divf %297, %298 : vector<1x32xf32>
    %300 = vector.broadcast %292 : vector<1x32xf32> to vector<128x32xf32>
    %301 = arith.subf %288, %300 : vector<128x32xf32>
    %cst_187 = arith.constant 9.99999974E-6 : f32
    %302 = vector.broadcast %cst_187 : f32 to vector<1x32xf32>
    %303 = arith.addf %299, %302 : vector<1x32xf32>
    %304 = math.rsqrt %303 : vector<1x32xf32>
    %305 = vector.broadcast %304 : vector<1x32xf32> to vector<128x32xf32>
    %306 = arith.mulf %301, %305 : vector<128x32xf32>
    %307 = vector.broadcast %279 : vector<1x32xf32> to vector<128x32xf32>
    %308 = arith.mulf %306, %307 : vector<128x32xf32>
    %309 = vector.broadcast %280 : vector<1x32xf32> to vector<128x32xf32>
    %310 = arith.addf %308, %309 : vector<128x32xf32>
    %cst_188 = arith.constant 0.000000e+00 : f32
    %cst_189 = arith.constant 6.000000e+00 : f32
    %311 = vector.broadcast %cst_188 : f32 to vector<128x32xf32>
    %312 = arith.maximumf %311, %310 : vector<128x32xf32>
    %313 = vector.broadcast %cst_189 : f32 to vector<128x32xf32>
    %314 = arith.minimumf %313, %312 : vector<128x32xf32>
    %315 = vector.shape_cast %314 : vector<128x32xf32> to vector<2x8x8x32xf32>
    %cst_190 = arith.constant 0.000000e+00 : f32
    %316 = vector.broadcast %cst_190 : f32 to vector<2x10x10x32xf32>
    %c0_191 = arith.constant 0 : index
    %c0_192 = arith.constant 0 : index
    %c0_193 = arith.constant 0 : index
    %c0_194 = arith.constant 0 : index
    %317 = vector.load %arg25[%c0_191, %c0_192, %c0_193, %c0_194] : memref<2x10x10x32xf32, #tpu.memory_space<vmem>>, vector<2x10x10x32xf32>
    tpu.vector_store %arg25[%c0_191, %c0_192, %c0_193, %c0_194], %316 {strides = array<i32>} : memref<2x10x10x32xf32, #tpu.memory_space<vmem>>, vector<2x10x10x32xf32>,
    %c0_195 = arith.constant 0 : index
    %c1_196 = arith.constant 1 : index
    %c1_197 = arith.constant 1 : index
    %c0_198 = arith.constant 0 : index
    %318 = vector.load %arg25[%c0_195, %c1_196, %c1_197, %c0_198] : memref<2x10x10x32xf32, #tpu.memory_space<vmem>>, vector<2x8x8x32xf32>
    tpu.vector_store %arg25[%c0_195, %c1_196, %c1_197, %c0_198], %315 {strides = array<i32>} : memref<2x10x10x32xf32, #tpu.memory_space<vmem>>, vector<2x8x8x32xf32>,
    %cst_199 = arith.constant 0.000000e+00 : f32
    %319 = vector.broadcast %cst_199 : f32 to vector<2x8x8x32xf32>
    %c0_200 = arith.constant 0 : index
    %c0_201 = arith.constant 0 : index
    %c0_202 = arith.constant 0 : index
    %c0_203 = arith.constant 0 : index
    %320 = vector.load %arg25[%c0_200, %c0_201, %c0_202, %c0_203] : memref<2x10x10x32xf32, #tpu.memory_space<vmem>>, vector<2x8x8x32xf32>
    %321 = vector.extract_strided_slice %281 {offsets = [0, 0, 0], sizes = [1, 1, 32], strides = [1, 1, 1]} : vector<3x3x32xf32> to vector<1x1x32xf32>
    %322 = vector.shape_cast %321 : vector<1x1x32xf32> to vector<32xf32>
    %323 = vector.shape_cast %322 : vector<32xf32> to vector<1x1x1x32xf32>
    %324 = vector.broadcast %323 : vector<1x1x1x32xf32> to vector<2x8x8x32xf32>
    %325 = arith.mulf %320, %324 : vector<2x8x8x32xf32>
    %326 = arith.addf %319, %325 : vector<2x8x8x32xf32>
    %c0_204 = arith.constant 0 : index
    %c0_205 = arith.constant 0 : index
    %c1_206 = arith.constant 1 : index
    %c0_207 = arith.constant 0 : index
    %327 = vector.load %arg25[%c0_204, %c0_205, %c1_206, %c0_207] : memref<2x10x10x32xf32, #tpu.memory_space<vmem>>, vector<2x8x8x32xf32>
    %328 = vector.extract_strided_slice %281 {offsets = [0, 1, 0], sizes = [1, 1, 32], strides = [1, 1, 1]} : vector<3x3x32xf32> to vector<1x1x32xf32>
    %329 = vector.shape_cast %328 : vector<1x1x32xf32> to vector<32xf32>
    %330 = vector.shape_cast %329 : vector<32xf32> to vector<1x1x1x32xf32>
    %331 = vector.broadcast %330 : vector<1x1x1x32xf32> to vector<2x8x8x32xf32>
    %332 = arith.mulf %327, %331 : vector<2x8x8x32xf32>
    %333 = arith.addf %326, %332 : vector<2x8x8x32xf32>
    %c0_208 = arith.constant 0 : index
    %c0_209 = arith.constant 0 : index
    %c2_210 = arith.constant 2 : index
    %c0_211 = arith.constant 0 : index
    %334 = vector.load %arg25[%c0_208, %c0_209, %c2_210, %c0_211] : memref<2x10x10x32xf32, #tpu.memory_space<vmem>>, vector<2x8x8x32xf32>
    %335 = vector.extract_strided_slice %281 {offsets = [0, 2, 0], sizes = [1, 1, 32], strides = [1, 1, 1]} : vector<3x3x32xf32> to vector<1x1x32xf32>
    %336 = vector.shape_cast %335 : vector<1x1x32xf32> to vector<32xf32>
    %337 = vector.shape_cast %336 : vector<32xf32> to vector<1x1x1x32xf32>
    %338 = vector.broadcast %337 : vector<1x1x1x32xf32> to vector<2x8x8x32xf32>
    %339 = arith.mulf %334, %338 : vector<2x8x8x32xf32>
    %340 = arith.addf %333, %339 : vector<2x8x8x32xf32>
    %c0_212 = arith.constant 0 : index
    %c1_213 = arith.constant 1 : index
    %c0_214 = arith.constant 0 : index
    %c0_215 = arith.constant 0 : index
    %341 = vector.load %arg25[%c0_212, %c1_213, %c0_214, %c0_215] : memref<2x10x10x32xf32, #tpu.memory_space<vmem>>, vector<2x8x8x32xf32>
    %342 = vector.extract_strided_slice %281 {offsets = [1, 0, 0], sizes = [1, 1, 32], strides = [1, 1, 1]} : vector<3x3x32xf32> to vector<1x1x32xf32>
    %343 = vector.shape_cast %342 : vector<1x1x32xf32> to vector<32xf32>
    %344 = vector.shape_cast %343 : vector<32xf32> to vector<1x1x1x32xf32>
    %345 = vector.broadcast %344 : vector<1x1x1x32xf32> to vector<2x8x8x32xf32>
    %346 = arith.mulf %341, %345 : vector<2x8x8x32xf32>
    %347 = arith.addf %340, %346 : vector<2x8x8x32xf32>
    %c0_216 = arith.constant 0 : index
    %c1_217 = arith.constant 1 : index
    %c1_218 = arith.constant 1 : index
    %c0_219 = arith.constant 0 : index
    %348 = vector.load %arg25[%c0_216, %c1_217, %c1_218, %c0_219] : memref<2x10x10x32xf32, #tpu.memory_space<vmem>>, vector<2x8x8x32xf32>
    %349 = vector.extract_strided_slice %281 {offsets = [1, 1, 0], sizes = [1, 1, 32], strides = [1, 1, 1]} : vector<3x3x32xf32> to vector<1x1x32xf32>
    %350 = vector.shape_cast %349 : vector<1x1x32xf32> to vector<32xf32>
    %351 = vector.shape_cast %350 : vector<32xf32> to vector<1x1x1x32xf32>
    %352 = vector.broadcast %351 : vector<1x1x1x32xf32> to vector<2x8x8x32xf32>
    %353 = arith.mulf %348, %352 : vector<2x8x8x32xf32>
    %354 = arith.addf %347, %353 : vector<2x8x8x32xf32>
    %c0_220 = arith.constant 0 : index
    %c1_221 = arith.constant 1 : index
    %c2_222 = arith.constant 2 : index
    %c0_223 = arith.constant 0 : index
    %355 = vector.load %arg25[%c0_220, %c1_221, %c2_222, %c0_223] : memref<2x10x10x32xf32, #tpu.memory_space<vmem>>, vector<2x8x8x32xf32>
    %356 = vector.extract_strided_slice %281 {offsets = [1, 2, 0], sizes = [1, 1, 32], strides = [1, 1, 1]} : vector<3x3x32xf32> to vector<1x1x32xf32>
    %357 = vector.shape_cast %356 : vector<1x1x32xf32> to vector<32xf32>
    %358 = vector.shape_cast %357 : vector<32xf32> to vector<1x1x1x32xf32>
    %359 = vector.broadcast %358 : vector<1x1x1x32xf32> to vector<2x8x8x32xf32>
    %360 = arith.mulf %355, %359 : vector<2x8x8x32xf32>
    %361 = arith.addf %354, %360 : vector<2x8x8x32xf32>
    %c0_224 = arith.constant 0 : index
    %c2_225 = arith.constant 2 : index
    %c0_226 = arith.constant 0 : index
    %c0_227 = arith.constant 0 : index
    %362 = vector.load %arg25[%c0_224, %c2_225, %c0_226, %c0_227] : memref<2x10x10x32xf32, #tpu.memory_space<vmem>>, vector<2x8x8x32xf32>
    %363 = vector.extract_strided_slice %281 {offsets = [2, 0, 0], sizes = [1, 1, 32], strides = [1, 1, 1]} : vector<3x3x32xf32> to vector<1x1x32xf32>
    %364 = vector.shape_cast %363 : vector<1x1x32xf32> to vector<32xf32>
    %365 = vector.shape_cast %364 : vector<32xf32> to vector<1x1x1x32xf32>
    %366 = vector.broadcast %365 : vector<1x1x1x32xf32> to vector<2x8x8x32xf32>
    %367 = arith.mulf %362, %366 : vector<2x8x8x32xf32>
    %368 = arith.addf %361, %367 : vector<2x8x8x32xf32>
    %c0_228 = arith.constant 0 : index
    %c2_229 = arith.constant 2 : index
    %c1_230 = arith.constant 1 : index
    %c0_231 = arith.constant 0 : index
    %369 = vector.load %arg25[%c0_228, %c2_229, %c1_230, %c0_231] : memref<2x10x10x32xf32, #tpu.memory_space<vmem>>, vector<2x8x8x32xf32>
    %370 = vector.extract_strided_slice %281 {offsets = [2, 1, 0], sizes = [1, 1, 32], strides = [1, 1, 1]} : vector<3x3x32xf32> to vector<1x1x32xf32>
    %371 = vector.shape_cast %370 : vector<1x1x32xf32> to vector<32xf32>
    %372 = vector.shape_cast %371 : vector<32xf32> to vector<1x1x1x32xf32>
    %373 = vector.broadcast %372 : vector<1x1x1x32xf32> to vector<2x8x8x32xf32>
    %374 = arith.mulf %369, %373 : vector<2x8x8x32xf32>
    %375 = arith.addf %368, %374 : vector<2x8x8x32xf32>
    %c0_232 = arith.constant 0 : index
    %c2_233 = arith.constant 2 : index
    %c2_234 = arith.constant 2 : index
    %c0_235 = arith.constant 0 : index
    %376 = vector.load %arg25[%c0_232, %c2_233, %c2_234, %c0_235] : memref<2x10x10x32xf32, #tpu.memory_space<vmem>>, vector<2x8x8x32xf32>
    %377 = vector.extract_strided_slice %281 {offsets = [2, 2, 0], sizes = [1, 1, 32], strides = [1, 1, 1]} : vector<3x3x32xf32> to vector<1x1x32xf32>
    %378 = vector.shape_cast %377 : vector<1x1x32xf32> to vector<32xf32>
    %379 = vector.shape_cast %378 : vector<32xf32> to vector<1x1x1x32xf32>
    %380 = vector.broadcast %379 : vector<1x1x1x32xf32> to vector<2x8x8x32xf32>
    %381 = arith.mulf %376, %380 : vector<2x8x8x32xf32>
    %382 = arith.addf %375, %381 : vector<2x8x8x32xf32>
    %383 = vector.shape_cast %382 : vector<2x8x8x32xf32> to vector<128x32xf32>
    %cst_236 = arith.constant dense<0.000000e+00> : vector<32xf32>
    %384 = vector.multi_reduction <add>, %383, %cst_236 [0] : vector<128x32xf32> to vector<32xf32>
    %385 = vector.shape_cast %384 : vector<32xf32> to vector<1x32xf32>
    %cst_237 = arith.constant 1.280000e+02 : f32
    %386 = vector.broadcast %cst_237 : f32 to vector<1x32xf32>
    %387 = arith.divf %385, %386 : vector<1x32xf32>
    %388 = vector.broadcast %387 : vector<1x32xf32> to vector<128x32xf32>
    %389 = arith.subf %383, %388 : vector<128x32xf32>
    %390 = arith.mulf %389, %389 : vector<128x32xf32>
    %cst_238 = arith.constant dense<0.000000e+00> : vector<32xf32>
    %391 = vector.multi_reduction <add>, %390, %cst_238 [0] : vector<128x32xf32> to vector<32xf32>
    %392 = vector.shape_cast %391 : vector<32xf32> to vector<1x32xf32>
    %cst_239 = arith.constant 1.280000e+02 : f32
    %393 = vector.broadcast %cst_239 : f32 to vector<1x32xf32>
    %394 = arith.divf %392, %393 : vector<1x32xf32>
    %395 = vector.broadcast %387 : vector<1x32xf32> to vector<128x32xf32>
    %396 = arith.subf %383, %395 : vector<128x32xf32>
    %cst_240 = arith.constant 9.99999974E-6 : f32
    %397 = vector.broadcast %cst_240 : f32 to vector<1x32xf32>
    %398 = arith.addf %394, %397 : vector<1x32xf32>
    %399 = math.rsqrt %398 : vector<1x32xf32>
    %400 = vector.broadcast %399 : vector<1x32xf32> to vector<128x32xf32>
    %401 = arith.mulf %396, %400 : vector<128x32xf32>
    %402 = vector.broadcast %282 : vector<1x32xf32> to vector<128x32xf32>
    %403 = arith.mulf %401, %402 : vector<128x32xf32>
    %404 = vector.broadcast %283 : vector<1x32xf32> to vector<128x32xf32>
    %405 = arith.addf %403, %404 : vector<128x32xf32>
    %cst_241 = arith.constant 0.000000e+00 : f32
    %cst_242 = arith.constant 6.000000e+00 : f32
    %406 = vector.broadcast %cst_241 : f32 to vector<128x32xf32>
    %407 = arith.maximumf %406, %405 : vector<128x32xf32>
    %408 = vector.broadcast %cst_242 : f32 to vector<128x32xf32>
    %409 = arith.minimumf %408, %407 : vector<128x32xf32>
    %cst_243 = arith.constant dense<0.000000e+00> : vector<128x16xf32>
    %410 = tpu.matmul %409, %284, %cst_243 {dimension_numbers = #tpu.dot_dimension_numbers<[1], [0], [0], [1], [0, 0, 1, 1], [], []>} : vector<128x32xf32>, vector<32x16xf32>, vector<128x16xf32> -> vector<128x16xf32>
    %cst_244 = arith.constant dense<0.000000e+00> : vector<16xf32>
    %411 = vector.multi_reduction <add>, %410, %cst_244 [0] : vector<128x16xf32> to vector<16xf32>
    %412 = vector.shape_cast %411 : vector<16xf32> to vector<1x16xf32>
    %cst_245 = arith.constant 1.280000e+02 : f32
    %413 = vector.broadcast %cst_245 : f32 to vector<1x16xf32>
    %414 = arith.divf %412, %413 : vector<1x16xf32>
    %415 = vector.broadcast %414 : vector<1x16xf32> to vector<128x16xf32>
    %416 = arith.subf %410, %415 : vector<128x16xf32>
    %417 = arith.mulf %416, %416 : vector<128x16xf32>
    %cst_246 = arith.constant dense<0.000000e+00> : vector<16xf32>
    %418 = vector.multi_reduction <add>, %417, %cst_246 [0] : vector<128x16xf32> to vector<16xf32>
    %419 = vector.shape_cast %418 : vector<16xf32> to vector<1x16xf32>
    %cst_247 = arith.constant 1.280000e+02 : f32
    %420 = vector.broadcast %cst_247 : f32 to vector<1x16xf32>
    %421 = arith.divf %419, %420 : vector<1x16xf32>
    %422 = vector.broadcast %414 : vector<1x16xf32> to vector<128x16xf32>
    %423 = arith.subf %410, %422 : vector<128x16xf32>
    %cst_248 = arith.constant 9.99999974E-6 : f32
    %424 = vector.broadcast %cst_248 : f32 to vector<1x16xf32>
    %425 = arith.addf %421, %424 : vector<1x16xf32>
    %426 = math.rsqrt %425 : vector<1x16xf32>
    %427 = vector.broadcast %426 : vector<1x16xf32> to vector<128x16xf32>
    %428 = arith.mulf %423, %427 : vector<128x16xf32>
    %429 = vector.broadcast %285 : vector<1x16xf32> to vector<128x16xf32>
    %430 = arith.mulf %428, %429 : vector<128x16xf32>
    %431 = vector.broadcast %286 : vector<1x16xf32> to vector<128x16xf32>
    %432 = arith.addf %430, %431 : vector<128x16xf32>
    %433 = arith.addf %432, %287 : vector<128x16xf32>
    %434 = vector.shape_cast %433 : vector<128x16xf32> to vector<2x8x8x16xf32>
    %c0_249 = arith.constant 0 : index
    %c0_250 = arith.constant 0 : index
    %435 = vector.load %arg21[%c0_249, %c0_250] : memref<16x128xf32, #tpu.memory_space<vmem>>, vector<16x128xf32>
    %c0_251 = arith.constant 0 : index
    %c0_252 = arith.constant 0 : index
    %436 = vector.load %arg22[%c0_251, %c0_252] : memref<1x128xf32, #tpu.memory_space<vmem>>, vector<1x128xf32>
    %cst_253 = arith.constant 0.000000e+00 : f32
    %cst_254 = arith.constant 6.000000e+00 : f32
    %437 = vector.broadcast %cst_253 : f32 to vector<2x8x8x16xf32>
    %438 = arith.maximumf %437, %434 : vector<2x8x8x16xf32>
    %439 = vector.broadcast %cst_254 : f32 to vector<2x8x8x16xf32>
    %440 = arith.minimumf %439, %438 : vector<2x8x8x16xf32>
    %441 = vector.shape_cast %440 : vector<2x8x8x16xf32> to vector<2x64x16xf32>
    %cst_255 = arith.constant dense<0.000000e+00> : vector<2x16xf32>
    %442 = vector.multi_reduction <add>, %441, %cst_255 [1] : vector<2x64x16xf32> to vector<2x16xf32>
    %cst_256 = arith.constant 6.400000e+01 : f32
    %443 = vector.broadcast %cst_256 : f32 to vector<2x16xf32>
    %444 = arith.divf %442, %443 : vector<2x16xf32>
    %cst_257 = arith.constant dense<0.000000e+00> : vector<2x128xf32>
    %445 = tpu.matmul %444, %435, %cst_257 {dimension_numbers = #tpu.dot_dimension_numbers<[1], [0], [0], [1], [0, 0, 1, 1], [], []>} : vector<2x16xf32>, vector<16x128xf32>, vector<2x128xf32> -> vector<2x128xf32>
    %446 = vector.broadcast %436 : vector<1x128xf32> to vector<2x128xf32>
    %447 = arith.addf %445, %446 : vector<2x128xf32>
    %c0_258 = arith.constant 0 : index
    %c0_259 = arith.constant 0 : index
    %448 = vector.load %arg23[%c0_258, %c0_259] : memref<2x128xf32, #tpu.memory_space<vmem>>, vector<2x128xf32>
    tpu.vector_store %arg23[%c0_258, %c0_259], %447 {strides = array<i32>} : memref<2x128xf32, #tpu.memory_space<vmem>>, vector<2x128xf32>,
    return
  }
  func.func @transform_0(%arg0: i32) -> (i32, i32, i32, i32) {
    %c0_i32 = arith.constant 0 : i32
    %c0_i32_0 = arith.constant 0 : i32
    %c0_i32_1 = arith.constant 0 : i32
    %c0_i32_2 = arith.constant 0 : i32
    %c0_i32_3 = arith.constant 0 : i32
    return %c0_i32, %c0_i32_0, %c0_i32_1, %c0_i32_2 : i32, i32, i32, i32
  }
  func.func @transform_1(%arg0: i32) -> (i32, i32) {
    %c0_i32 = arith.constant 0 : i32
    %c0_i32_0 = arith.constant 0 : i32
    %c0_i32_1 = arith.constant 0 : i32
    return %c0_i32, %c0_i32_0 : i32, i32
  }
  func.func @transform_2(%arg0: i32) -> (i32, i32) {
    %c0_i32 = arith.constant 0 : i32
    %c0_i32_0 = arith.constant 0 : i32
    %c0_i32_1 = arith.constant 0 : i32
    return %c0_i32, %c0_i32_0 : i32, i32
  }
  func.func @transform_3(%arg0: i32) -> (i32, i32) {
    %c0_i32 = arith.constant 0 : i32
    %c0_i32_0 = arith.constant 0 : i32
    %c0_i32_1 = arith.constant 0 : i32
    return %c0_i32, %c0_i32_0 : i32, i32
  }
  func.func @transform_4(%arg0: i32) -> (i32, i32, i32) {
    %c0_i32 = arith.constant 0 : i32
    %c0_i32_0 = arith.constant 0 : i32
    %c0_i32_1 = arith.constant 0 : i32
    %c0_i32_2 = arith.constant 0 : i32
    return %c0_i32, %c0_i32_0, %c0_i32_1 : i32, i32, i32
  }
  func.func @transform_5(%arg0: i32) -> (i32, i32) {
    %c0_i32 = arith.constant 0 : i32
    %c0_i32_0 = arith.constant 0 : i32
    %c0_i32_1 = arith.constant 0 : i32
    return %c0_i32, %c0_i32_0 : i32, i32
  }
  func.func @transform_6(%arg0: i32) -> (i32, i32) {
    %c0_i32 = arith.constant 0 : i32
    %c0_i32_0 = arith.constant 0 : i32
    %c0_i32_1 = arith.constant 0 : i32
    return %c0_i32, %c0_i32_0 : i32, i32
  }
  func.func @transform_7(%arg0: i32) -> (i32, i32) {
    %c0_i32 = arith.constant 0 : i32
    %c0_i32_0 = arith.constant 0 : i32
    %c0_i32_1 = arith.constant 0 : i32
    return %c0_i32, %c0_i32_0 : i32, i32
  }
  func.func @transform_8(%arg0: i32) -> (i32, i32) {
    %c0_i32 = arith.constant 0 : i32
    %c0_i32_0 = arith.constant 0 : i32
    %c0_i32_1 = arith.constant 0 : i32
    return %c0_i32, %c0_i32_0 : i32, i32
  }
  func.func @transform_9(%arg0: i32) -> (i32, i32) {
    %c0_i32 = arith.constant 0 : i32
    %c0_i32_0 = arith.constant 0 : i32
    %c0_i32_1 = arith.constant 0 : i32
    return %c0_i32, %c0_i32_0 : i32, i32
  }
  func.func @transform_10(%arg0: i32) -> (i32, i32) {
    %c0_i32 = arith.constant 0 : i32
    %c0_i32_0 = arith.constant 0 : i32
    %c0_i32_1 = arith.constant 0 : i32
    return %c0_i32, %c0_i32_0 : i32, i32
  }
  func.func @transform_11(%arg0: i32) -> (i32, i32) {
    %c0_i32 = arith.constant 0 : i32
    %c0_i32_0 = arith.constant 0 : i32
    %c0_i32_1 = arith.constant 0 : i32
    return %c0_i32, %c0_i32_0 : i32, i32
  }
  func.func @transform_12(%arg0: i32) -> (i32, i32) {
    %c0_i32 = arith.constant 0 : i32
    %c0_i32_0 = arith.constant 0 : i32
    %c0_i32_1 = arith.constant 0 : i32
    return %c0_i32, %c0_i32_0 : i32, i32
  }
  func.func @transform_13(%arg0: i32) -> (i32, i32) {
    %c0_i32 = arith.constant 0 : i32
    %c0_i32_0 = arith.constant 0 : i32
    %c0_i32_1 = arith.constant 0 : i32
    return %c0_i32, %c0_i32_0 : i32, i32
  }
  func.func @transform_14(%arg0: i32) -> (i32, i32, i32) {
    %c0_i32 = arith.constant 0 : i32
    %c0_i32_0 = arith.constant 0 : i32
    %c0_i32_1 = arith.constant 0 : i32
    %c0_i32_2 = arith.constant 0 : i32
    return %c0_i32, %c0_i32_0, %c0_i32_1 : i32, i32, i32
  }
  func.func @transform_15(%arg0: i32) -> (i32, i32) {
    %c0_i32 = arith.constant 0 : i32
    %c0_i32_0 = arith.constant 0 : i32
    %c0_i32_1 = arith.constant 0 : i32
    return %c0_i32, %c0_i32_0 : i32, i32
  }
  func.func @transform_16(%arg0: i32) -> (i32, i32) {
    %c0_i32 = arith.constant 0 : i32
    %c0_i32_0 = arith.constant 0 : i32
    %c0_i32_1 = arith.constant 0 : i32
    return %c0_i32, %c0_i32_0 : i32, i32
  }
  func.func @transform_17(%arg0: i32) -> (i32, i32) {
    %c0_i32 = arith.constant 0 : i32
    %c0_i32_0 = arith.constant 0 : i32
    %c0_i32_1 = arith.constant 0 : i32
    return %c0_i32, %c0_i32_0 : i32, i32
  }
  func.func @transform_18(%arg0: i32) -> (i32, i32) {
    %c0_i32 = arith.constant 0 : i32
    %c0_i32_0 = arith.constant 0 : i32
    %c0_i32_1 = arith.constant 0 : i32
    return %c0_i32, %c0_i32_0 : i32, i32
  }
  func.func @transform_19(%arg0: i32) -> (i32, i32) {
    %c0_i32 = arith.constant 0 : i32
    %c0_i32_0 = arith.constant 0 : i32
    %c0_i32_1 = arith.constant 0 : i32
    return %c0_i32, %c0_i32_0 : i32, i32
  }
  func.func @transform_20(%arg0: i32) -> (i32, i32) {
    %c0_i32 = arith.constant 0 : i32
    %c0_i32_0 = arith.constant 0 : i32
    %c0_i32_1 = arith.constant 0 : i32
    return %c0_i32, %c0_i32_0 : i32, i32
  }
  func.func @transform_21(%arg0: i32) -> (i32, i32) {
    %c0_i32 = arith.constant 0 : i32
    %c0_i32_0 = arith.constant 0 : i32
    %c0_i32_1 = arith.constant 0 : i32
    return %c0_i32, %c0_i32_0 : i32, i32
  }
  func.func @transform_22(%arg0: i32) -> (i32, i32) {
    %c0_i32 = arith.constant 0 : i32
    %c0_i32_0 = arith.constant 0 : i32
    %c0_i32_1 = arith.constant 0 : i32
    return %c0_i32, %c0_i32_0 : i32, i32
  }
}

</mosaic_0001>

<bundles_post_ra>
// kernel: tpu_custom_call.1
= control target key start
LH: loop header
LB: loop body
LE: loop exit
PB: predicated region body
PF: predicated region fallthrough
CT: control target
= control target key end

     0   :  { %s11269_s0 = inlined_call_operand.hbm [shape: f32[8,8,8,8], index: 0, kind: input, shape index: {}]   ;;  %s11270_s1 = inlined_call_operand.hbm [shape: f32[8,32], index: 1, kind: input, shape index: {}]   ;;  %s11271_s2 = inlined_call_operand.vmem [shape: f32[1,32], index: 2, kind: input, shape index: {}]   ;;  %s11272_s3 = inlined_call_operand.hbm [shape: f32[1,32], index: 3, kind: input, shape index: {}]   ;;  %s11273_s4 = inlined_call_operand.vmem [shape: f32[5,5,32], index: 4, kind: input, shape index: {}]   ;;  %s11274_s5 = inlined_call_operand.hbm [shape: f32[1,32], index: 5, kind: input, shape index: {}]   ;;  %s11275_s6 = inlined_call_operand.hbm [shape: f32[1,32], index: 6, kind: input, shape index: {}]   ;;  %s11276_s7 = inlined_call_operand.vmem [shape: f32[32,32], index: 7, kind: input, shape index: {}]   ;;  %s11277_s8 = inlined_call_operand.hbm [shape: f32[1,32], index: 8, kind: input, shape index: {}]   ;;  %s11278_s9 = inlined_call_operand.hbm [shape: f32[1,32], index: 9, kind: input, shape index: {}]   ;;  %s11279_s10 = inlined_call_operand.vmem [shape: f32[32,16], index: 10, kind: input, shape index: {}]   ;;  %s11280_s11 = inlined_call_operand.vmem [shape: f32[16,32], index: 11, kind: input, shape index: {}]   ;;  %s11281_s12 = inlined_call_operand.hbm [shape: f32[1,32], index: 12, kind: input, shape index: {}]   ;;  %s11282_s13 = inlined_call_operand.hbm [shape: f32[1,32], index: 13, kind: input, shape index: {}]   ;;  %s11283_s14 = inlined_call_operand.vmem [shape: f32[3,3,32], index: 14, kind: input, shape index: {}]   ;;  %s11284_s15 = inlined_call_operand.vmem [shape: f32[1,32], index: 15, kind: input, shape index: {}]   ;;  %s11285_s16 = inlined_call_operand.vmem [shape: f32[1,32], index: 16, kind: input, shape index: {}]   ;;  %s11286_s17 = inlined_call_operand.vmem [shape: f32[32,16], index: 17, kind: input, shape index: {}]   ;;  %s11287_s18 = inlined_call_operand.vmem [shape: f32[1,16], index: 18, kind: input, shape index: {}]   ;;  %s11288_s19 = inlined_call_operand.vmem [shape: f32[1,16], index: 19, kind: input, shape index: {}]   ;;  %s11289_s20 = inlined_call_operand.vmem [shape: f32[16,128], index: 20, kind: input, shape index: {}]   ;;  %s11290_s21 = inlined_call_operand.vmem [shape: f32[1,128], index: 21, kind: input, shape index: {}]   ;;  %s11291_s22 = inlined_call_operand.hbm [shape: f32[2,128], index: 22, kind: output, shape index: {}]  }
   0x1   :  { %11599 = sst [smem:[#allocation152_spill]] %s11269_s0 }
   0x2   :  { %11600 = sst [smem:[#allocation153_spill]] %s11270_s1 }
   0x3   :  { %11601 = sst [smem:[#allocation154_spill]] %s11271_s2 }
   0x4   :  { %11602 = sst [smem:[#allocation155_spill]] %s11272_s3 }
   0x5   :  { %11603 = sst [smem:[#allocation156_spill]] %s11273_s4 }
   0x6   :  { %11604 = sst [smem:[#allocation157_spill]] %s11274_s5 }
   0x7   :  { %11605 = sst [smem:[#allocation158_spill]] %s11275_s6 }
   0x8   :  { %11606 = sst [smem:[#allocation159_spill]] %s11291_s22 }
   0x9   :  { %27 = vsyncpa [#allocation5], 0 }
   0xa   :  { %28 = vsyncpa [#allocation8], 0 }
   0xb   :  { %29 = vsyncpa [#allocation11], 0 }
   0xc   :  { %30 = vsyncpa [#allocation14], 0 }
   0xd   :  { %31 = vsyncpa [#allocation17], 0 }
   0xe   :  { %32 = vsyncpa [#allocation6], 0  ;;  %s6385_s3 = smov [#allocation7]   ;;  %s6386_s29 = smov [#allocation10]  }
   0xf   :  { %s51_s28 = sshll.u32 %s6385_s3, 4  ;;  %s75_s30 = sshll.u32 %s6386_s29, 4  ;;  %s52_s28 = int_to_ptr.vmem [resolvable:$true] %s51_s28  ;;  %s76_s30 = int_to_ptr.vmem [resolvable:$true] %s75_s30 }
  0x10   :  { %s11607_s23 = sld [smem:[#allocation153_spill]] }
  0x16   :  { %s6153_s1 = scalar_lea.hbm %s11607_s23, 128 }
  0x17   :  { %p6154_p0 = scmp.ne.s32.totalorder %s11607_s23, %s6153_s1  ;;  %p6157_p1 = scmp.lt.u32.totalorder %s6153_s1, %s11607_s23 }
  0x19   :  { %p6159_p2 = pnand %p6157_p1, %p6154_p0 }
  0x1b   :  { %6162 = shalt.err (!%p6159_p2)
}
  0x1c   :  { %s6163_s26 = scalar_lea.vmem %s52_s28, 128  ;;  %p6168_p4 = scmp.lt.s32.totalorder %s52_s28, %s52_s28 }
  0x1d   :  { %p6164_p3 = scmp.ne.s32.totalorder %s52_s28, %s6163_s26  ;;  %p6169_p5 = scmp.lt.s32.totalorder %s6163_s26, %s6163_s26 }
  0x1f   :  { %p6170_p6 = por %p6169_p5, %p6168_p4 }
  0x21   :  { %p6171_p7 = pnand %p6170_p6, %p6164_p3 }
  0x23   :  { %6174 = shalt.err (!%p6171_p7)
}
  0x24   :  { %54 = dma.hbm_to_vmem [thread:$0]  %s11607_s23, 128, %s52_s28, [#allocation8]  }
  0x25   :  { %s11608_s4 = sld [smem:[#allocation157_spill]] }
  0x2b   :  { %s6175_s0 = scalar_lea.hbm %s11608_s4, 16 }
  0x2c   :  { %p6176_p8 = scmp.ne.s32.totalorder %s11608_s4, %s6175_s0  ;;  %p6179_p9 = scmp.lt.u32.totalorder %s6175_s0, %s11608_s4 }
  0x2e   :  { %p6181_p10 = pnand %p6179_p9, %p6176_p8 }
  0x30   :  { %6184 = shalt.err (!%p6181_p10)
}
  0x31   :  { %s6185_s25 = scalar_lea.vmem %s76_s30, 16  ;;  %s6189_s26 = scalar_lea.vmem %s76_s30, 32 }
  0x32   :  { %p6186_p11 = scmp.ne.s32.totalorder %s76_s30, %s6185_s25  ;;  %p6190_p12 = scmp.lt.s32.totalorder %s76_s30, %s76_s30 }
  0x33   :  { %p6191_p13 = scmp.lt.s32.totalorder %s6189_s26, %s6185_s25 }
  0x35   :  { %p6192_p0 = por %p6191_p13, %p6190_p12 }
  0x37   :  { %p6193_p1 = pnand %p6192_p0, %p6186_p11 }
  0x39   :  { %6196 = shalt.err (!%p6193_p1)
}
  0x3a   :  { %78 = dma.hbm_to_vmem [thread:$0]  %s11608_s4, 16, %s76_s30, [#allocation11]  }
  0x3b   :  { %s6387_s2 = smov [#allocation13]   ;;  %s6388_s3 = smov [#allocation16]  }
  0x3c   :  { %s97_s27 = sshll.u32 %s6387_s2, 4  ;;  %s121_s29 = sshll.u32 %s6388_s3, 4  ;;  %s98_s27 = int_to_ptr.vmem [resolvable:$true] %s97_s27  ;;  %s122_s29 = int_to_ptr.vmem [resolvable:$true] %s121_s29 }
  0x3d   :  { %s6197_s24 = scalar_lea.hbm %s11277_s8, 16 }
  0x3e   :  { %p6198_p2 = scmp.ne.s32.totalorder %s11277_s8, %s6197_s24  ;;  %p6201_p3 = scmp.lt.u32.totalorder %s6197_s24, %s11277_s8 }
  0x40   :  { %p6203_p4 = pnand %p6201_p3, %p6198_p2 }
  0x42   :  { %6206 = shalt.err (!%p6203_p4)
}
  0x43   :  { %s6207_s30 = scalar_lea.vmem %s98_s27, 16  ;;  %s6211_s4 = scalar_lea.vmem %s98_s27, 32 }
  0x44   :  { %p6208_p5 = scmp.ne.s32.totalorder %s98_s27, %s6207_s30  ;;  %p6212_p6 = scmp.lt.s32.totalorder %s98_s27, %s98_s27 }
  0x45   :  { %p6213_p7 = scmp.lt.s32.totalorder %s6211_s4, %s6207_s30 }
  0x47   :  { %p6214_p8 = por %p6213_p7, %p6212_p6 }
  0x49   :  { %p6215_p9 = pnand %p6214_p8, %p6208_p5 }
  0x4b   :  { %6218 = shalt.err (!%p6215_p9)
}
  0x4c   :  { %100 = dma.hbm_to_vmem [thread:$0]  %s11277_s8, 16, %s98_s27, [#allocation14]  }
  0x4d   :  { %s6219_s0 = scalar_lea.hbm %s11281_s12, 16 }
  0x4e   :  { %p6220_p10 = scmp.ne.s32.totalorder %s11281_s12, %s6219_s0  ;;  %p6223_p11 = scmp.lt.u32.totalorder %s6219_s0, %s11281_s12 }
  0x50   :  { %p6225_p12 = pnand %p6223_p11, %p6220_p10 }
  0x52   :  { %6228 = shalt.err (!%p6225_p12)
}
  0x53   :  { %s6229_s25 = scalar_lea.vmem %s122_s29, 16  ;;  %s6233_s26 = scalar_lea.vmem %s122_s29, 32 }
  0x54   :  { %p6230_p13 = scmp.ne.s32.totalorder %s122_s29, %s6229_s25  ;;  %p6234_p0 = scmp.lt.s32.totalorder %s122_s29, %s122_s29 }
  0x55   :  { %p6235_p1 = scmp.lt.s32.totalorder %s6233_s26, %s6229_s25 }
  0x57   :  { %p6236_p2 = por %p6235_p1, %p6234_p0 }
  0x59   :  { %p6237_p3 = pnand %p6236_p2, %p6230_p13 }
  0x5b   :  { %6240 = shalt.err (!%p6237_p3)
}
  0x5c   :  { %124 = dma.hbm_to_vmem [thread:$0]  %s11281_s12, 16, %s122_s29, [#allocation17]  }
  0x5d   :  { %s6389_s30 = smov [#allocation4]   ;;  %s11609_s2 = sld [smem:[#allocation152_spill]] }
  0x5e   :  { %s38_s4 = sshll.u32 %s6389_s30, 4  ;;  %s39_s4 = int_to_ptr.vmem [resolvable:$true] %s38_s4 }
  0x63   :  { %s6241_s3 = scalar_lea.hbm %s11609_s2, 8192 }
  0x64   :  { %p6242_p4 = scmp.ne.s32.totalorder %s11609_s2, %s6241_s3  ;;  %p6245_p5 = scmp.lt.u32.totalorder %s6241_s3, %s11609_s2 }
  0x66   :  { %p6247_p6 = pnand %p6245_p5, %p6242_p4 }
  0x68   :  { %6250 = shalt.err (!%p6247_p6)
}
  0x69   :  { %s6251_s6 = scalar_lea.vmem %s39_s4, 8192  ;;  %p6256_p8 = scmp.lt.s32.totalorder %s39_s4, %s39_s4 }
  0x6a   :  { %p6252_p7 = scmp.ne.s32.totalorder %s39_s4, %s6251_s6  ;;  %p6257_p9 = scmp.lt.s32.totalorder %s6251_s6, %s6251_s6 }
  0x6c   :  { %p6258_p10 = por %p6257_p9, %p6256_p8 }
  0x6e   :  { %p6259_p11 = pnand %p6258_p10, %p6252_p7 }
  0x70   :  { %6262 = shalt.err (!%p6259_p11)
}
  0x71   :  { %s6390_s12 = smov 128   ;;  %s6391_s29 = smov 8  }
  0x72   :  { %44 = dma.hbm_to_vmem [thread:$0]  %s11609_s2, 8192, %s39_s4, [#allocation5], %s6390_s12, %s6390_s12, %s6391_s29  }
  0x73   :  { %s6392_s8 = smov [#allocation9]   ;;  %s6393_s30 = smov [#allocation12]  }
  0x74   :  { %s63_s27 = sshll.u32 %s6392_s8, 4  ;;  %s85_s28 = sshll.u32 %s6393_s30, 4  ;;  %s64_s27 = int_to_ptr.vmem [resolvable:$true] %s63_s27  ;;  %s86_s28 = int_to_ptr.vmem [resolvable:$true] %s85_s28 }
  0x75   :  { %s11610_s0 = sld [smem:[#allocation155_spill]] }
  0x7b   :  { %s6263_s5 = scalar_lea.hbm %s11610_s0, 16 }
  0x7c   :  { %p6264_p12 = scmp.ne.s32.totalorder %s11610_s0, %s6263_s5  ;;  %p6267_p13 = scmp.lt.u32.totalorder %s6263_s5, %s11610_s0 }
  0x7e   :  { %p6269_p0 = pnand %p6267_p13, %p6264_p12 }
  0x80   :  { %6272 = shalt.err (!%p6269_p0)
}
  0x81   :  { %s6273_s4 = scalar_lea.vmem %s64_s27, 16  ;;  %s6277_s2 = scalar_lea.vmem %s64_s27, 32 }
  0x82   :  { %p6274_p1 = scmp.ne.s32.totalorder %s64_s27, %s6273_s4  ;;  %p6278_p2 = scmp.lt.s32.totalorder %s64_s27, %s64_s27 }
  0x83   :  { %p6279_p3 = scmp.lt.s32.totalorder %s6277_s2, %s6273_s4 }
  0x85   :  { %p6280_p4 = por %p6279_p3, %p6278_p2 }
  0x87   :  { %p6281_p5 = pnand %p6280_p4, %p6274_p1 }
  0x89   :  { %6284 = shalt.err (!%p6281_p5)
}
  0x8a   :  { %66 = dma.hbm_to_vmem [thread:$0]  %s11610_s0, 16, %s64_s27, [#allocation8]  }
  0x8b   :  { %s11611_s8 = sld [smem:[#allocation158_spill]] }
  0x91   :  { %s6285_s22 = scalar_lea.hbm %s11611_s8, 16 }
  0x92   :  { %p6286_p6 = scmp.ne.s32.totalorder %s11611_s8, %s6285_s22  ;;  %p6289_p7 = scmp.lt.u32.totalorder %s6285_s22, %s11611_s8 }
  0x94   :  { %p6291_p8 = pnand %p6289_p7, %p6286_p6 }
  0x96   :  { %6294 = shalt.err (!%p6291_p8)
}
  0x97   :  { %s6295_s24 = scalar_lea.vmem %s86_s28, 16  ;;  %s6299_s1 = scalar_lea.vmem %s86_s28, 32 }
  0x98   :  { %p6296_p9 = scmp.ne.s32.totalorder %s86_s28, %s6295_s24  ;;  %p6300_p10 = scmp.lt.s32.totalorder %s86_s28, %s86_s28 }
  0x99   :  { %p6301_p11 = scmp.lt.s32.totalorder %s6299_s1, %s6295_s24 }
  0x9b   :  { %p6302_p12 = por %p6301_p11, %p6300_p10 }
  0x9d   :  { %p6303_p13 = pnand %p6302_p12, %p6296_p9 }
  0x9f   :  { %6306 = shalt.err (!%p6303_p13)
}
  0xa0   :  { %88 = dma.hbm_to_vmem [thread:$0]  %s11611_s8, 16, %s86_s28, [#allocation11]  }
  0xa1   :  { %s6394_s6 = smov [#allocation15]   ;;  %s6395_s2 = smov [#allocation18]  }
  0xa2   :  { %s107_s4 = sshll.u32 %s6394_s6, 4  ;;  %s131_s12 = sshll.u32 %s6395_s2, 4  ;;  %s108_s4 = int_to_ptr.vmem [resolvable:$true] %s107_s4  ;;  %s132_s12 = int_to_ptr.vmem [resolvable:$true] %s131_s12 }
  0xa3   :  { %s6307_s26 = scalar_lea.hbm %s11278_s9, 16 }
  0xa4   :  { %p6308_p0 = scmp.ne.s32.totalorder %s11278_s9, %s6307_s26  ;;  %p6311_p1 = scmp.lt.u32.totalorder %s6307_s26, %s11278_s9 }
  0xa6   :  { %p6313_p2 = pnand %p6311_p1, %p6308_p0 }
  0xa8   :  { %6316 = shalt.err (!%p6313_p2)
}
  0xa9   :  { %s6317_s28 = scalar_lea.vmem %s108_s4, 16  ;;  %s6321_s8 = scalar_lea.vmem %s108_s4, 32 }
  0xaa   :  { %p6318_p3 = scmp.ne.s32.totalorder %s108_s4, %s6317_s28  ;;  %p6322_p4 = scmp.lt.s32.totalorder %s108_s4, %s108_s4 }
  0xab   :  { %p6323_p5 = scmp.lt.s32.totalorder %s6321_s8, %s6317_s28 }
  0xad   :  { %p6324_p6 = por %p6323_p5, %p6322_p4 }
  0xaf   :  { %p6325_p7 = pnand %p6324_p6, %p6318_p3 }
  0xb1   :  { %6328 = shalt.err (!%p6325_p7)
}
  0xb2   :  { %110 = dma.hbm_to_vmem [thread:$0]  %s11278_s9, 16, %s108_s4, [#allocation14]  }
  0xb3   :  { %s6329_s0 = scalar_lea.hbm %s11282_s13, 16 }
  0xb4   :  { %p6330_p8 = scmp.ne.s32.totalorder %s11282_s13, %s6329_s0  ;;  %p6333_p9 = scmp.lt.u32.totalorder %s6329_s0, %s11282_s13 }
  0xb6   :  { %p6335_p10 = pnand %p6333_p9, %p6330_p8 }
  0xb8   :  { %6338 = shalt.err (!%p6335_p10)
}
  0xb9   :  { %s6339_s26 = scalar_lea.vmem %s132_s12, 16  ;;  %s6343_s22 = scalar_lea.vmem %s132_s12, 32 }
  0xba   :  { %p6340_p11 = scmp.ne.s32.totalorder %s132_s12, %s6339_s26  ;;  %p6344_p12 = scmp.lt.s32.totalorder %s132_s12, %s132_s12 }
  0xbb   :  { %p6345_p13 = scmp.lt.s32.totalorder %s6343_s22, %s6339_s26 }
  0xbd   :  { %p6346_p0 = por %p6345_p13, %p6344_p12 }
  0xbf   :  { %p6347_p1 = pnand %p6346_p0, %p6340_p11 }
  0xc1   :  { %6350 = shalt.err (!%p6347_p1)
}
  0xc2   :  { %134 = dma.hbm_to_vmem [thread:$0]  %s11282_s13, 16, %s132_s12, [#allocation17]  }
  0xc3   :  { %6373 = dma.done.wait [#allocation5], 8192  }
  0xc4   :  { %6374 = vsyncadd [#allocation5], 4294959104 }
  0xc5   :  { %6375 = dma.done.wait [#allocation8], 144  }
  0xc6   :  { %6376 = vsyncadd [#allocation8], 4294967152 }
  0xc7   :  { %6377 = dma.done.wait [#allocation11], 32  }
  0xc8   :  { %6378 = vsyncadd [#allocation11], 4294967264 }
  0xc9   :  { %6379 = dma.done.wait [#allocation14], 32  }
  0xca   :  { %6380 = vsyncadd [#allocation14], 4294967264 }
  0xcb   :  { %6381 = dma.done.wait [#allocation17], 32  }
  0xcc   :  { %6382 = vsyncadd [#allocation17], 4294967264  ;;  %vm840_vm0 = vcmask 261120   ;;  %vm1573_vm1 = vcmask 254976   ;;  %v11299_v0 = vmov 0.0   ;;  %vm262_vm2 = vcmask 64512  }
  0xcd   :  { %1572 = vst.msk [vmem:[#allocation2] sm:$0xff] %vm840_vm0, %v11299_v0  ;;  %1575 = vst.msk [vmem:[#allocation2 + $0x10] sm:$0xff] %vm840_vm0, %v11299_v0  ;;  %v242_v1 = vld [vmem:[#allocation7] sm:$0xff]  ;;  %v179_v3 = vld [vmem:[#allocation4 + $0x8] sm:$0xff]  ;;  %s11692_s30 = sld [smem:[#allocation156_spill]]  ;;  %s11702_s5 = sld [smem:[#allocation154_spill]] }
  0xce   :  { %1574 = vst.msk [vmem:[#allocation2 + $0x8] sm:$0x3] %vm1573_vm1, %v11299_v0  ;;  %1576 = vst.msk [vmem:[#allocation2 + $0x18] sm:$0x3] %vm1573_vm1, %v11299_v0  ;;  %v178_v2 = vld [vmem:[#allocation4] sm:$0xff]  ;;  %5853 = vmatprep.subr.mxu0 %v242_v1  ;;  %v180_v4 = vld [vmem:[#allocation4 + $0x10] sm:$0xff] }
  0xcf   :  { %1577 = vst.msk [vmem:[#allocation2 + $0x20] sm:$0xff] %vm840_vm0, %v11299_v0  ;;  %1579 = vst.msk [vmem:[#allocation2 + $0x30] sm:$0xff] %vm840_vm0, %v11299_v0  ;;  %5855 = vmatprep.mubr.msk.f32.mxu0 %vm262_vm2, %v178_v2  ;;  %5854 = vmatpush3.msra.mxu0 %v242_v1  ;;  %v181_v5 = vld [vmem:[#allocation4 + $0x18] sm:$0xff]  ;;  %v182_v6 = vld [vmem:[#allocation4 + $0x20] sm:$0xff]  ;;  %vm3880_vm3 = vcmask 130048   ;;  %vm6398_vm4 = vmmov 0  }
  0xd0   :  { %1578 = vst.msk [vmem:[#allocation2 + $0x28] sm:$0x3] %vm1573_vm1, %v11299_v0  ;;  %1580 = vst.msk [vmem:[#allocation2 + $0x38] sm:$0x3] %vm1573_vm1, %v11299_v0  ;;  %5856 = vmatmul.mubr.msk.f32.vlgmr.msra.gmra.mrb[0].mxu0 %vm262_vm2, %v179_v3  ;;  %v183_v7 = vld [vmem:[#allocation4 + $0x28] sm:$0xff]  ;;  %v184_v8 = vld [vmem:[#allocation4 + $0x30] sm:$0xff] }
  0xd1   :  { %1581 = vst.msk [vmem:[#allocation2 + $0x40] sm:$0xff] %vm840_vm0, %v11299_v0  ;;  %1583 = vst.msk [vmem:[#allocation2 + $0x50] sm:$0xff] %vm840_vm0, %v11299_v0  ;;  %5858 = vmatprep.mubr.msk.f32.mxu0 %vm262_vm2, %v180_v4  ;;  %v185_v9 = vld [vmem:[#allocation4 + $0x38] sm:$0xff]  ;;  %v186_v10 = vld [vmem:[#allocation4 + $0x40] sm:$0xff]  ;;  %vm5471_vm5 = vcmask 1041409   ;;  %s6399_s27 = smov [#allocation19]  }
  0xd2   :  { %1582 = vst.msk [vmem:[#allocation2 + $0x48] sm:$0x3] %vm1573_vm1, %v11299_v0  ;;  %1584 = vst.msk [vmem:[#allocation2 + $0x58] sm:$0x3] %vm1573_vm1, %v11299_v0  ;;  %v187_v11 = vld [vmem:[#allocation4 + $0x48] sm:$0xff]  ;;  %v188_v12 = vld [vmem:[#allocation4 + $0x50] sm:$0xff] }
  0xd3   :  { %1585 = vst.msk [vmem:[#allocation2 + $0x60] sm:$0xff] %vm840_vm0, %v11299_v0  ;;  %1587 = vst.msk [vmem:[#allocation2 + $0x70] sm:$0xff] %vm840_vm0, %v11299_v0  ;;  %v189_v13 = vld [vmem:[#allocation4 + $0x58] sm:$0xff]  ;;  %v190_v14 = vld [vmem:[#allocation4 + $0x60] sm:$0xff]  ;;  %s5552_s0 = sshll.u32 %s6399_s27, 4  ;;  %s5553_s0 = int_to_ptr.vmem [resolvable:$true] %s5552_s0 }
  0xd4   :  { %1586 = vst.msk [vmem:[#allocation2 + $0x68] sm:$0x3] %vm1573_vm1, %v11299_v0  ;;  %1588 = vst.msk [vmem:[#allocation2 + $0x78] sm:$0x3] %vm1573_vm1, %v11299_v0  ;;  %5859 = vmatmul.mubr.msk.f32.gmra.mrb[2].mxu0 %vm262_vm2, %v181_v5  ;;  %v191_v15 = vld [vmem:[#allocation4 + $0x68] sm:$0xff]  ;;  %v192_v16 = vld [vmem:[#allocation4 + $0x70] sm:$0xff]  ;;  %p6356_p3 = scmp.lt.s32.totalorder %s5553_s0, %s5553_s0 }
  0xd5   :  { %1589 = vst.msk [vmem:[#allocation2 + $0x80] sm:$0xff] %vm840_vm0, %v11299_v0  ;;  %1591 = vst.msk [vmem:[#allocation2 + $0x90] sm:$0xff] %vm840_vm0, %v11299_v0  ;;  %5861 = vmatprep.mubr.msk.f32.mxu0 %vm262_vm2, %v182_v6  ;;  %v193_v17 = vld [vmem:[#allocation4 + $0x78] sm:$0xff]  ;;  %v194_v18 = vld [vmem:[#allocation4 + $0x80] sm:$0xff] }
  0xd6   :  { %1590 = vst.msk [vmem:[#allocation2 + $0x88] sm:$0x3] %vm1573_vm1, %v11299_v0  ;;  %1592 = vst.msk [vmem:[#allocation2 + $0x98] sm:$0x3] %vm1573_vm1, %v11299_v0  ;;  %v195_v19 = vld [vmem:[#allocation4 + $0x88] sm:$0xff]  ;;  %v196_v20 = vld [vmem:[#allocation4 + $0x90] sm:$0xff] }
  0xd7   :  { %1593 = vst.msk [vmem:[#allocation2 + $0xa0] sm:$0xff] %vm840_vm0, %v11299_v0  ;;  %1595 = vst.msk [vmem:[#allocation2 + $0xb0] sm:$0xff] %vm840_vm0, %v11299_v0  ;;  %v197_v21 = vld [vmem:[#allocation4 + $0x98] sm:$0xff]  ;;  %v198_v22 = vld [vmem:[#allocation4 + $0xa0] sm:$0xff] }
  0xd8   :  { %1594 = vst.msk [vmem:[#allocation2 + $0xa8] sm:$0x3] %vm1573_vm1, %v11299_v0  ;;  %1596 = vst.msk [vmem:[#allocation2 + $0xb8] sm:$0x3] %vm1573_vm1, %v11299_v0  ;;  %5862 = vmatmul.mubr.msk.f32.gmra.mrb[4].mxu0 %vm262_vm2, %v183_v7  ;;  %v199_v23 = vld [vmem:[#allocation4 + $0xa8] sm:$0xff]  ;;  %v200_v24 = vld [vmem:[#allocation4 + $0xb0] sm:$0xff] }
  0xd9   :  { %1597 = vst.msk [vmem:[#allocation2 + $0xc0] sm:$0xff] %vm840_vm0, %v11299_v0  ;;  %1599 = vst.msk [vmem:[#allocation2 + $0xd0] sm:$0xff] %vm840_vm0, %v11299_v0  ;;  %5864 = vmatprep.mubr.msk.f32.mxu0 %vm262_vm2, %v184_v8  ;;  %v201_v25 = vld [vmem:[#allocation4 + $0xb8] sm:$0xff]  ;;  %v202_v26 = vld [vmem:[#allocation4 + $0xc0] sm:$0xff] }
  0xda   :  { %1598 = vst.msk [vmem:[#allocation2 + $0xc8] sm:$0x3] %vm1573_vm1, %v11299_v0  ;;  %1600 = vst.msk [vmem:[#allocation2 + $0xd8] sm:$0x3] %vm1573_vm1, %v11299_v0  ;;  %v203_v27 = vld [vmem:[#allocation4 + $0xc8] sm:$0xff]  ;;  %v204_v28 = vld [vmem:[#allocation4 + $0xd0] sm:$0xff] }
  0xdb   :  { %1601 = vst.msk [vmem:[#allocation2 + $0xe0] sm:$0xff] %vm840_vm0, %v11299_v0  ;;  %1603 = vst.msk [vmem:[#allocation2 + $0xf0] sm:$0xff] %vm840_vm0, %v11299_v0  ;;  %v205_v29 = vld [vmem:[#allocation4 + $0xd8] sm:$0xff]  ;;  %v206_v30 = vld [vmem:[#allocation4 + $0xe0] sm:$0xff] }
  0xdc   :  { %1602 = vst.msk [vmem:[#allocation2 + $0xe8] sm:$0x3] %vm1573_vm1, %v11299_v0  ;;  %1604 = vst.msk [vmem:[#allocation2 + $0xf8] sm:$0x3] %vm1573_vm1, %v11299_v0  ;;  %5865 = vmatmul.mubr.msk.f32.gmra.mrb[6].mxu0 %vm262_vm2, %v185_v9  ;;  %v207_v31 = vld [vmem:[#allocation4 + $0xe8] sm:$0xff]  ;;  %v208_v32 = vld [vmem:[#allocation4 + $0xf0] sm:$0xff] }
  0xdd   :  { %1605 = vst.msk [vmem:[#allocation2 + $0x100] sm:$0xff] %vm840_vm0, %v11299_v0  ;;  %1607 = vst.msk [vmem:[#allocation2 + $0x110] sm:$0xff] %vm840_vm0, %v11299_v0  ;;  %5867 = vmatprep.mubr.msk.f32.mxu0 %vm262_vm2, %v186_v10  ;;  %v209_v33 = vld [vmem:[#allocation4 + $0xf8] sm:$0xff]  ;;  %v210_v34 = vld [vmem:[#allocation4 + $0x100] sm:$0xff] }
  0xde   :  { %1606 = vst.msk [vmem:[#allocation2 + $0x108] sm:$0x3] %vm1573_vm1, %v11299_v0  ;;  %1608 = vst.msk [vmem:[#allocation2 + $0x118] sm:$0x3] %vm1573_vm1, %v11299_v0  ;;  %v211_v35 = vld [vmem:[#allocation4 + $0x108] sm:$0xff]  ;;  %v212_v36 = vld [vmem:[#allocation4 + $0x110] sm:$0xff] }
  0xdf   :  { %1609 = vst.msk [vmem:[#allocation2 + $0x120] sm:$0xff] %vm840_vm0, %v11299_v0  ;;  %1611 = vst.msk [vmem:[#allocation2 + $0x130] sm:$0xff] %vm840_vm0, %v11299_v0  ;;  %v213_v37 = vld [vmem:[#allocation4 + $0x118] sm:$0xff]  ;;  %v214_v38 = vld [vmem:[#allocation4 + $0x120] sm:$0xff] }
  0xe0   :  { %1610 = vst.msk [vmem:[#allocation2 + $0x128] sm:$0x3] %vm1573_vm1, %v11299_v0  ;;  %1612 = vst.msk [vmem:[#allocation2 + $0x138] sm:$0x3] %vm1573_vm1, %v11299_v0  ;;  %5868 = vmatmul.mubr.msk.f32.gmra.mrb[8].mxu0 %vm262_vm2, %v187_v11  ;;  %v215_v39 = vld [vmem:[#allocation4 + $0x128] sm:$0xff]  ;;  %v216_v40 = vld [vmem:[#allocation4 + $0x130] sm:$0xff] }
  0xe1   :  { %1613 = vst.msk [vmem:[#allocation2 + $0x140] sm:$0xff] %vm840_vm0, %v11299_v0  ;;  %1615 = vst.msk [vmem:[#allocation2 + $0x150] sm:$0xff] %vm840_vm0, %v11299_v0  ;;  %5870 = vmatprep.mubr.msk.f32.mxu0 %vm262_vm2, %v188_v12  ;;  %v217_v41 = vld [vmem:[#allocation4 + $0x138] sm:$0xff]  ;;  %v218_v42 = vld [vmem:[#allocation4 + $0x140] sm:$0xff] }
  0xe2   :  { %1614 = vst.msk [vmem:[#allocation2 + $0x148] sm:$0x3] %vm1573_vm1, %v11299_v0  ;;  %1616 = vst.msk [vmem:[#allocation2 + $0x158] sm:$0x3] %vm1573_vm1, %v11299_v0  ;;  %v219_v43 = vld [vmem:[#allocation4 + $0x148] sm:$0xff]  ;;  %v220_v44 = vld [vmem:[#allocation4 + $0x150] sm:$0xff] }
  0xe3   :  { %1617 = vst.msk [vmem:[#allocation2 + $0x160] sm:$0xff] %vm840_vm0, %v11299_v0  ;;  %1619 = vst.msk [vmem:[#allocation2 + $0x170] sm:$0xff] %vm840_vm0, %v11299_v0  ;;  %v221_v45 = vld [vmem:[#allocation4 + $0x158] sm:$0xff]  ;;  %v222_v46 = vld [vmem:[#allocation4 + $0x160] sm:$0xff] }
  0xe4   :  { %1618 = vst.msk [vmem:[#allocation2 + $0x168] sm:$0x3] %vm1573_vm1, %v11299_v0  ;;  %1620 = vst.msk [vmem:[#allocation2 + $0x178] sm:$0x3] %vm1573_vm1, %v11299_v0  ;;  %5871 = vmatmul.mubr.msk.f32.gmra.mrb[10].mxu0 %vm262_vm2, %v189_v13  ;;  %v223_v47 = vld [vmem:[#allocation4 + $0x168] sm:$0xff]  ;;  %v224_v48 = vld [vmem:[#allocation4 + $0x170] sm:$0xff] }
  0xe5   :  { %1621 = vst.msk [vmem:[#allocation2 + $0x180] sm:$0xff] %vm840_vm0, %v11299_v0  ;;  %1623 = vst.msk [vmem:[#allocation2 + $0x190] sm:$0xff] %vm840_vm0, %v11299_v0  ;;  %5873 = vmatprep.mubr.msk.f32.mxu0 %vm262_vm2, %v190_v14  ;;  %v225_v49 = vld [vmem:[#allocation4 + $0x178] sm:$0xff]  ;;  %v226_v50 = vld [vmem:[#allocation4 + $0x180] sm:$0xff] }
  0xe6   :  { %1622 = vst.msk [vmem:[#allocation2 + $0x188] sm:$0x3] %vm1573_vm1, %v11299_v0  ;;  %1624 = vst.msk [vmem:[#allocation2 + $0x198] sm:$0x3] %vm1573_vm1, %v11299_v0  ;;  %v227_v51 = vld [vmem:[#allocation4 + $0x188] sm:$0xff]  ;;  %v228_v52 = vld [vmem:[#allocation4 + $0x190] sm:$0xff] }
  0xe7   :  { %1625 = vst.msk [vmem:[#allocation2 + $0x1a0] sm:$0xff] %vm840_vm0, %v11299_v0  ;;  %1627 = vst.msk [vmem:[#allocation2 + $0x1b0] sm:$0xff] %vm840_vm0, %v11299_v0  ;;  %v229_v53 = vld [vmem:[#allocation4 + $0x198] sm:$0xff]  ;;  %v230_v54 = vld [vmem:[#allocation4 + $0x1a0] sm:$0xff] }
  0xe8   :  { %1626 = vst.msk [vmem:[#allocation2 + $0x1a8] sm:$0x3] %vm1573_vm1, %v11299_v0  ;;  %1628 = vst.msk [vmem:[#allocation2 + $0x1b8] sm:$0x3] %vm1573_vm1, %v11299_v0  ;;  %5874 = vmatmul.mubr.msk.f32.gmra.mrb[12].mxu0 %vm262_vm2, %v191_v15  ;;  %v231_v55 = vld [vmem:[#allocation4 + $0x1a8] sm:$0xff]  ;;  %v232_v56 = vld [vmem:[#allocation4 + $0x1b0] sm:$0xff] }
  0xe9   :  { %1629 = vst.msk [vmem:[#allocation2 + $0x1c0] sm:$0xff] %vm840_vm0, %v11299_v0  ;;  %1631 = vst.msk [vmem:[#allocation2 + $0x1d0] sm:$0xff] %vm840_vm0, %v11299_v0  ;;  %5876 = vmatprep.mubr.msk.f32.mxu0 %vm262_vm2, %v192_v16  ;;  %v233_v57 = vld [vmem:[#allocation4 + $0x1b8] sm:$0xff]  ;;  %v234_v58 = vld [vmem:[#allocation4 + $0x1c0] sm:$0xff] }
  0xea   :  { %1630 = vst.msk [vmem:[#allocation2 + $0x1c8] sm:$0x3] %vm1573_vm1, %v11299_v0  ;;  %1632 = vst.msk [vmem:[#allocation2 + $0x1d8] sm:$0x3] %vm1573_vm1, %v11299_v0  ;;  %v235_v59 = vld [vmem:[#allocation4 + $0x1c8] sm:$0xff]  ;;  %v236_v60 = vld [vmem:[#allocation4 + $0x1d0] sm:$0xff] }
  0xeb   :  { %1633 = vst.msk [vmem:[#allocation2 + $0x1e0] sm:$0xff] %vm840_vm0, %v11299_v0  ;;  %1635 = vst.msk [vmem:[#allocation2 + $0x1f0] sm:$0xff] %vm840_vm0, %v11299_v0  ;;  %v237_v61 = vld [vmem:[#allocation4 + $0x1d8] sm:$0xff]  ;;  %v238_v62 = vld [vmem:[#allocation4 + $0x1e0] sm:$0xff] }
  0xec   :  { %1634 = vst.msk [vmem:[#allocation2 + $0x1e8] sm:$0x3] %vm1573_vm1, %v11299_v0  ;;  %1636 = vst.msk [vmem:[#allocation2 + $0x1f8] sm:$0x3] %vm1573_vm1, %v11299_v0  ;;  %5877 = vmatmul.mubr.msk.f32.gmra.mrb[14].mxu0 %vm262_vm2, %v193_v17  ;;  %v239_v63 = vld [vmem:[#allocation4 + $0x1e8] sm:$0xff]  ;;  %v240_v1 = vld [vmem:[#allocation4 + $0x1f0] sm:$0xff] }
  0xed   :  { %1637 = vst.msk [vmem:[#allocation2 + $0x200] sm:$0xff] %vm840_vm0, %v11299_v0  ;;  %1639 = vst.msk [vmem:[#allocation2 + $0x210] sm:$0xff] %vm840_vm0, %v11299_v0  ;;  %5879 = vmatprep.mubr.msk.f32.mxu0 %vm262_vm2, %v194_v18  ;;  %v241_v2 = vld [vmem:[#allocation4 + $0x1f8] sm:$0xff] }
  0xee   :  { %1638 = vst.msk [vmem:[#allocation2 + $0x208] sm:$0x3] %vm1573_vm1, %v11299_v0  ;;  %1640 = vst.msk [vmem:[#allocation2 + $0x218] sm:$0x3] %vm1573_vm1, %v11299_v0 }
  0xef   :  { %1641 = vst.msk [vmem:[#allocation2 + $0x220] sm:$0xff] %vm840_vm0, %v11299_v0  ;;  %1643 = vst.msk [vmem:[#allocation2 + $0x230] sm:$0xff] %vm840_vm0, %v11299_v0 }
  0xf0   :  { %1642 = vst.msk [vmem:[#allocation2 + $0x228] sm:$0x3] %vm1573_vm1, %v11299_v0  ;;  %1644 = vst.msk [vmem:[#allocation2 + $0x238] sm:$0x3] %vm1573_vm1, %v11299_v0  ;;  %5880 = vmatmul.mubr.msk.f32.gmra.mrb[16].mxu0 %vm262_vm2, %v195_v19 }
  0xf1   :  { %1645 = vst.msk [vmem:[#allocation2 + $0x240] sm:$0xff] %vm840_vm0, %v11299_v0  ;;  %1647 = vst.msk [vmem:[#allocation2 + $0x250] sm:$0xff] %vm840_vm0, %v11299_v0  ;;  %5882 = vmatprep.mubr.msk.f32.mxu0 %vm262_vm2, %v196_v20 }
  0xf2   :  { %1646 = vst.msk [vmem:[#allocation2 + $0x248] sm:$0x3] %vm1573_vm1, %v11299_v0  ;;  %1648 = vst.msk [vmem:[#allocation2 + $0x258] sm:$0x3] %vm1573_vm1, %v11299_v0 }
  0xf3   :  { %1649 = vst.msk [vmem:[#allocation2 + $0x260] sm:$0xff] %vm840_vm0, %v11299_v0  ;;  %1651 = vst.msk [vmem:[#allocation2 + $0x270] sm:$0xff] %vm840_vm0, %v11299_v0 }
  0xf4   :  { %1650 = vst.msk [vmem:[#allocation2 + $0x268] sm:$0x3] %vm1573_vm1, %v11299_v0  ;;  %1652 = vst.msk [vmem:[#allocation2 + $0x278] sm:$0x3] %vm1573_vm1, %v11299_v0  ;;  %5883 = vmatmul.mubr.msk.f32.gmra.mrb[18].mxu0 %vm262_vm2, %v197_v21 }
  0xf5   :  { %1653 = vst.msk [vmem:[#allocation2 + $0x280] sm:$0xff] %vm840_vm0, %v11299_v0  ;;  %1655 = vst.msk [vmem:[#allocation2 + $0x290] sm:$0xff] %vm840_vm0, %v11299_v0  ;;  %5885 = vmatprep.mubr.msk.f32.mxu0 %vm262_vm2, %v198_v22 }
  0xf6   :  { %1654 = vst.msk [vmem:[#allocation2 + $0x288] sm:$0x3] %vm1573_vm1, %v11299_v0  ;;  %1656 = vst.msk [vmem:[#allocation2 + $0x298] sm:$0x3] %vm1573_vm1, %v11299_v0 }
  0xf7   :  { %1657 = vst.msk [vmem:[#allocation2 + $0x2a0] sm:$0xff] %vm840_vm0, %v11299_v0  ;;  %1659 = vst.msk [vmem:[#allocation2 + $0x2b0] sm:$0xff] %vm840_vm0, %v11299_v0 }
  0xf8   :  { %1658 = vst.msk [vmem:[#allocation2 + $0x2a8] sm:$0x3] %vm1573_vm1, %v11299_v0  ;;  %1660 = vst.msk [vmem:[#allocation2 + $0x2b8] sm:$0x3] %vm1573_vm1, %v11299_v0  ;;  %5886 = vmatmul.mubr.msk.f32.gmra.mrb[20].mxu0 %vm262_vm2, %v199_v23 }
  0xf9   :  { %1661 = vst.msk [vmem:[#allocation2 + $0x2c0] sm:$0xff] %vm840_vm0, %v11299_v0  ;;  %1663 = vst.msk [vmem:[#allocation2 + $0x2d0] sm:$0xff] %vm840_vm0, %v11299_v0  ;;  %5888 = vmatprep.mubr.msk.f32.mxu0 %vm262_vm2, %v200_v24 }
  0xfa   :  { %1662 = vst.msk [vmem:[#allocation2 + $0x2c8] sm:$0x3] %vm1573_vm1, %v11299_v0  ;;  %1664 = vst.msk [vmem:[#allocation2 + $0x2d8] sm:$0x3] %vm1573_vm1, %v11299_v0 }
  0xfb   :  { %1665 = vst.msk [vmem:[#allocation2 + $0x2e0] sm:$0xff] %vm840_vm0, %v11299_v0  ;;  %1667 = vst.msk [vmem:[#allocation2 + $0x2f0] sm:$0xff] %vm840_vm0, %v11299_v0 }
  0xfc   :  { %1666 = vst.msk [vmem:[#allocation2 + $0x2e8] sm:$0x3] %vm1573_vm1, %v11299_v0  ;;  %1668 = vst.msk [vmem:[#allocation2 + $0x2f8] sm:$0x3] %vm1573_vm1, %v11299_v0  ;;  %5889 = vmatmul.mubr.msk.f32.gmra.mrb[22].mxu0 %vm262_vm2, %v201_v25 }
  0xfd   :  { %1669 = vst.msk [vmem:[#allocation2 + $0x300] sm:$0xff] %vm840_vm0, %v11299_v0  ;;  %1673 = vst.msk [vmem:[#allocation2 + $0x320] sm:$0xff] %vm840_vm0, %v11299_v0  ;;  %5891 = vmatprep.mubr.msk.f32.mxu0 %vm262_vm2, %v202_v26 }
  0xfe   :  { %1670 = vst.msk [vmem:[#allocation2 + $0x308] sm:$0x3] %vm1573_vm1, %v11299_v0  ;;  %1674 = vst.msk [vmem:[#allocation2 + $0x328] sm:$0x3] %vm1573_vm1, %v11299_v0 }
  0xff   :  { %1675 = vst.msk [vmem:[#allocation2 + $0x330] sm:$0xff] %vm840_vm0, %v11299_v0  ;;  %1677 = vst.msk [vmem:[#allocation2 + $0x340] sm:$0xff] %vm840_vm0, %v11299_v0 }
 0x100   :  { %1676 = vst.msk [vmem:[#allocation2 + $0x338] sm:$0x3] %vm1573_vm1, %v11299_v0  ;;  %1678 = vst.msk [vmem:[#allocation2 + $0x348] sm:$0x3] %vm1573_vm1, %v11299_v0  ;;  %5892 = vmatmul.mubr.msk.f32.gmra.mrb[24].mxu0 %vm262_vm2, %v203_v27 }
 0x101   :  { %1679 = vst.msk [vmem:[#allocation2 + $0x350] sm:$0xff] %vm840_vm0, %v11299_v0  ;;  %1681 = vst.msk [vmem:[#allocation2 + $0x360] sm:$0xff] %vm840_vm0, %v11299_v0  ;;  %5894 = vmatprep.mubr.msk.f32.mxu0 %vm262_vm2, %v204_v28 }
 0x102   :  { %1680 = vst.msk [vmem:[#allocation2 + $0x358] sm:$0x3] %vm1573_vm1, %v11299_v0  ;;  %1682 = vst.msk [vmem:[#allocation2 + $0x368] sm:$0x3] %vm1573_vm1, %v11299_v0 }
 0x103   :  { %1683 = vst.msk [vmem:[#allocation2 + $0x370] sm:$0xff] %vm840_vm0, %v11299_v0  ;;  %1685 = vst.msk [vmem:[#allocation2 + $0x380] sm:$0xff] %vm840_vm0, %v11299_v0 }
 0x104   :  { %1684 = vst.msk [vmem:[#allocation2 + $0x378] sm:$0x3] %vm1573_vm1, %v11299_v0  ;;  %1686 = vst.msk [vmem:[#allocation2 + $0x388] sm:$0x3] %vm1573_vm1, %v11299_v0  ;;  %5895 = vmatmul.mubr.msk.f32.gmra.mrb[26].mxu0 %vm262_vm2, %v205_v29 }
 0x105   :  { %1687 = vst.msk [vmem:[#allocation2 + $0x390] sm:$0xff] %vm840_vm0, %v11299_v0  ;;  %1689 = vst.msk [vmem:[#allocation2 + $0x3a0] sm:$0xff] %vm840_vm0, %v11299_v0  ;;  %5897 = vmatprep.mubr.msk.f32.mxu0 %vm262_vm2, %v206_v30 }
 0x106   :  { %1688 = vst.msk [vmem:[#allocation2 + $0x398] sm:$0x3] %vm1573_vm1, %v11299_v0  ;;  %1690 = vst.msk [vmem:[#allocation2 + $0x3a8] sm:$0x3] %vm1573_vm1, %v11299_v0 }
 0x107   :  { %1693 = vst.msk [vmem:[#allocation2 + $0x3c0] sm:$0xff] %vm840_vm0, %v11299_v0  ;;  %1695 = vst.msk [vmem:[#allocation2 + $0x3d0] sm:$0xff] %vm840_vm0, %v11299_v0 }
 0x108   :  { %1694 = vst.msk [vmem:[#allocation2 + $0x3c8] sm:$0x3] %vm1573_vm1, %v11299_v0  ;;  %1696 = vst.msk [vmem:[#allocation2 + $0x3d8] sm:$0x3] %vm1573_vm1, %v11299_v0  ;;  %5898 = vmatmul.mubr.msk.f32.gmra.mrb[28].mxu0 %vm262_vm2, %v207_v31 }
 0x109   :  { %1697 = vst.msk [vmem:[#allocation2 + $0x3e0] sm:$0xff] %vm840_vm0, %v11299_v0  ;;  %1699 = vst.msk [vmem:[#allocation2 + $0x3f0] sm:$0xff] %vm840_vm0, %v11299_v0  ;;  %5900 = vmatprep.mubr.msk.f32.mxu0 %vm262_vm2, %v208_v32 }
 0x10a   :  { %1698 = vst.msk [vmem:[#allocation2 + $0x3e8] sm:$0x3] %vm1573_vm1, %v11299_v0  ;;  %1700 = vst.msk [vmem:[#allocation2 + $0x3f8] sm:$0x3] %vm1573_vm1, %v11299_v0 }
 0x10b   :  { %1701 = vst.msk [vmem:[#allocation2 + $0x400] sm:$0xff] %vm840_vm0, %v11299_v0  ;;  %1703 = vst.msk [vmem:[#allocation2 + $0x410] sm:$0xff] %vm840_vm0, %v11299_v0 }
 0x10c   :  { %1702 = vst.msk [vmem:[#allocation2 + $0x408] sm:$0x3] %vm1573_vm1, %v11299_v0  ;;  %1704 = vst.msk [vmem:[#allocation2 + $0x418] sm:$0x3] %vm1573_vm1, %v11299_v0  ;;  %5901 = vmatmul.mubr.msk.f32.gmra.mrb[30].mxu0 %vm262_vm2, %v209_v33 }
 0x10d   :  { %1705 = vst.msk [vmem:[#allocation2 + $0x420] sm:$0xff] %vm840_vm0, %v11299_v0  ;;  %1707 = vst.msk [vmem:[#allocation2 + $0x430] sm:$0xff] %vm840_vm0, %v11299_v0  ;;  %5903 = vmatprep.mubr.msk.f32.mxu0 %vm262_vm2, %v210_v34 }
 0x10e   :  { %1706 = vst.msk [vmem:[#allocation2 + $0x428] sm:$0x3] %vm1573_vm1, %v11299_v0  ;;  %1708 = vst.msk [vmem:[#allocation2 + $0x438] sm:$0x3] %vm1573_vm1, %v11299_v0 }
 0x10f   :  { %1709 = vst.msk [vmem:[#allocation2 + $0x440] sm:$0xff] %vm840_vm0, %v11299_v0  ;;  %1713 = vst.msk [vmem:[#allocation2 + $0x460] sm:$0xff] %vm840_vm0, %v11299_v0 }
 0x110   :  { %1710 = vst.msk [vmem:[#allocation2 + $0x448] sm:$0x3] %vm1573_vm1, %v11299_v0  ;;  %1714 = vst.msk [vmem:[#allocation2 + $0x468] sm:$0x3] %vm1573_vm1, %v11299_v0  ;;  %5904 = vmatmul.mubr.msk.f32.gmra.mrb[32].mxu0 %vm262_vm2, %v211_v35 }
 0x111   :  { %1715 = vst.msk [vmem:[#allocation2 + $0x470] sm:$0xff] %vm840_vm0, %v11299_v0  ;;  %1717 = vst.msk [vmem:[#allocation2 + $0x480] sm:$0xff] %vm840_vm0, %v11299_v0  ;;  %5906 = vmatprep.mubr.msk.f32.mxu0 %vm262_vm2, %v212_v36 }
 0x112   :  { %1716 = vst.msk [vmem:[#allocation2 + $0x478] sm:$0x3] %vm1573_vm1, %v11299_v0  ;;  %1718 = vst.msk [vmem:[#allocation2 + $0x488] sm:$0x3] %vm1573_vm1, %v11299_v0 }
 0x113   :  { %1719 = vst.msk [vmem:[#allocation2 + $0x490] sm:$0xff] %vm840_vm0, %v11299_v0  ;;  %1721 = vst.msk [vmem:[#allocation2 + $0x4a0] sm:$0xff] %vm840_vm0, %v11299_v0 }
 0x114   :  { %1720 = vst.msk [vmem:[#allocation2 + $0x498] sm:$0x3] %vm1573_vm1, %v11299_v0  ;;  %1722 = vst.msk [vmem:[#allocation2 + $0x4a8] sm:$0x3] %vm1573_vm1, %v11299_v0  ;;  %5907 = vmatmul.mubr.msk.f32.gmra.mrb[34].mxu0 %vm262_vm2, %v213_v37 }
 0x115   :  { %1723 = vst.msk [vmem:[#allocation2 + $0x4b0] sm:$0xff] %vm840_vm0, %v11299_v0  ;;  %1725 = vst.msk [vmem:[#allocation2 + $0x4c0] sm:$0xff] %vm840_vm0, %v11299_v0  ;;  %5909 = vmatprep.mubr.msk.f32.mxu0 %vm262_vm2, %v214_v38 }
 0x116   :  { %1724 = vst.msk [vmem:[#allocation2 + $0x4b8] sm:$0x3] %vm1573_vm1, %v11299_v0  ;;  %1726 = vst.msk [vmem:[#allocation2 + $0x4c8] sm:$0x3] %vm1573_vm1, %v11299_v0 }
 0x117   :  { %1727 = vst.msk [vmem:[#allocation2 + $0x4d0] sm:$0xff] %vm840_vm0, %v11299_v0  ;;  %1729 = vst.msk [vmem:[#allocation2 + $0x4e0] sm:$0xff] %vm840_vm0, %v11299_v0 }
 0x118   :  { %1728 = vst.msk [vmem:[#allocation2 + $0x4d8] sm:$0x3] %vm1573_vm1, %v11299_v0  ;;  %1730 = vst.msk [vmem:[#allocation2 + $0x4e8] sm:$0x3] %vm1573_vm1, %v11299_v0  ;;  %5910 = vmatmul.mubr.msk.f32.gmra.mrb[36].mxu0 %vm262_vm2, %v215_v39 }
 0x119   :  { %4276 = vst.msk [vmem:[#allocation3] sm:$0xff] %vm840_vm0, %v11299_v0  ;;  %4278 = vst.msk [vmem:[#allocation3 + $0x10] sm:$0xff] %vm840_vm0, %v11299_v0  ;;  %5912 = vmatprep.mubr.msk.f32.mxu0 %vm262_vm2, %v216_v40 }
 0x11a   :  { %4277 = vst.msk [vmem:[#allocation3 + $0x8] sm:$0x3] %vm1573_vm1, %v11299_v0  ;;  %4279 = vst.msk [vmem:[#allocation3 + $0x18] sm:$0x3] %vm1573_vm1, %v11299_v0 }
 0x11b   :  { %4280 = vst.msk [vmem:[#allocation3 + $0x20] sm:$0xff] %vm840_vm0, %v11299_v0  ;;  %4282 = vst.msk [vmem:[#allocation3 + $0x30] sm:$0xff] %vm840_vm0, %v11299_v0 }
 0x11c   :  { %4281 = vst.msk [vmem:[#allocation3 + $0x28] sm:$0x3] %vm1573_vm1, %v11299_v0  ;;  %4283 = vst.msk [vmem:[#allocation3 + $0x38] sm:$0x3] %vm1573_vm1, %v11299_v0  ;;  %5913 = vmatmul.mubr.msk.f32.gmra.mrb[38].mxu0 %vm262_vm2, %v217_v41 }
 0x11d   :  { %4284 = vst.msk [vmem:[#allocation3 + $0x40] sm:$0xff] %vm840_vm0, %v11299_v0  ;;  %4286 = vst.msk [vmem:[#allocation3 + $0x50] sm:$0xff] %vm840_vm0, %v11299_v0  ;;  %5915 = vmatprep.mubr.msk.f32.mxu0 %vm262_vm2, %v218_v42 }
 0x11e   :  { %4285 = vst.msk [vmem:[#allocation3 + $0x48] sm:$0x3] %vm1573_vm1, %v11299_v0  ;;  %4287 = vst.msk [vmem:[#allocation3 + $0x58] sm:$0x3] %vm1573_vm1, %v11299_v0 }
 0x11f   :  { %4288 = vst.msk [vmem:[#allocation3 + $0x60] sm:$0xff] %vm840_vm0, %v11299_v0  ;;  %4290 = vst.msk [vmem:[#allocation3 + $0x70] sm:$0xff] %vm840_vm0, %v11299_v0 }
 0x120   :  { %4289 = vst.msk [vmem:[#allocation3 + $0x68] sm:$0x3] %vm1573_vm1, %v11299_v0  ;;  %4291 = vst.msk [vmem:[#allocation3 + $0x78] sm:$0x3] %vm1573_vm1, %v11299_v0  ;;  %5916 = vmatmul.mubr.msk.f32.gmra.mrb[40].mxu0 %vm262_vm2, %v219_v43 }
 0x121   :  { %4292 = vst.msk [vmem:[#allocation3 + $0x80] sm:$0xff] %vm840_vm0, %v11299_v0  ;;  %4294 = vst.msk [vmem:[#allocation3 + $0x90] sm:$0xff] %vm840_vm0, %v11299_v0  ;;  %5918 = vmatprep.mubr.msk.f32.mxu0 %vm262_vm2, %v220_v44 }
 0x122   :  { %4293 = vst.msk [vmem:[#allocation3 + $0x88] sm:$0x3] %vm1573_vm1, %v11299_v0  ;;  %4295 = vst.msk [vmem:[#allocation3 + $0x98] sm:$0x3] %vm1573_vm1, %v11299_v0 }
 0x123   :  { %4296 = vst.msk [vmem:[#allocation3 + $0xa0] sm:$0xff] %vm840_vm0, %v11299_v0  ;;  %4298 = vst.msk [vmem:[#allocation3 + $0xb0] sm:$0xff] %vm840_vm0, %v11299_v0 }
 0x124   :  { %4297 = vst.msk [vmem:[#allocation3 + $0xa8] sm:$0x3] %vm1573_vm1, %v11299_v0  ;;  %4299 = vst.msk [vmem:[#allocation3 + $0xb8] sm:$0x3] %vm1573_vm1, %v11299_v0  ;;  %5919 = vmatmul.mubr.msk.f32.gmra.mrb[42].mxu0 %vm262_vm2, %v221_v45 }
 0x125   :  { %4300 = vst.msk [vmem:[#allocation3 + $0xc0] sm:$0xff] %vm840_vm0, %v11299_v0  ;;  %4302 = vst.msk [vmem:[#allocation3 + $0xd0] sm:$0xff] %vm840_vm0, %v11299_v0  ;;  %5921 = vmatprep.mubr.msk.f32.mxu0 %vm262_vm2, %v222_v46 }
 0x126   :  { %4301 = vst.msk [vmem:[#allocation3 + $0xc8] sm:$0x3] %vm1573_vm1, %v11299_v0  ;;  %4303 = vst.msk [vmem:[#allocation3 + $0xd8] sm:$0x3] %vm1573_vm1, %v11299_v0 }
 0x127   :  { %4304 = vst.msk [vmem:[#allocation3 + $0xe0] sm:$0xff] %vm840_vm0, %v11299_v0  ;;  %4306 = vst.msk [vmem:[#allocation3 + $0xf0] sm:$0xff] %vm840_vm0, %v11299_v0 }
 0x128   :  { %4305 = vst.msk [vmem:[#allocation3 + $0xe8] sm:$0x3] %vm1573_vm1, %v11299_v0  ;;  %4307 = vst.msk [vmem:[#allocation3 + $0xf8] sm:$0x3] %vm1573_vm1, %v11299_v0  ;;  %5922 = vmatmul.mubr.msk.f32.gmra.mrb[44].mxu0 %vm262_vm2, %v223_v47 }
 0x129   :  { %4308 = vst.msk [vmem:[#allocation3 + $0x100] sm:$0xff] %vm840_vm0, %v11299_v0  ;;  %4310 = vst.msk [vmem:[#allocation3 + $0x110] sm:$0xff] %vm840_vm0, %v11299_v0  ;;  %5924 = vmatprep.mubr.msk.f32.mxu0 %vm262_vm2, %v224_v48 }
 0x12a   :  { %4309 = vst.msk [vmem:[#allocation3 + $0x108] sm:$0x3] %vm1573_vm1, %v11299_v0  ;;  %4311 = vst.msk [vmem:[#allocation3 + $0x118] sm:$0x3] %vm1573_vm1, %v11299_v0 }
 0x12b   :  { %4312 = vst.msk [vmem:[#allocation3 + $0x120] sm:$0xff] %vm840_vm0, %v11299_v0  ;;  %4314 = vst.msk [vmem:[#allocation3 + $0x130] sm:$0xff] %vm840_vm0, %v11299_v0 }
 0x12c   :  { %4313 = vst.msk [vmem:[#allocation3 + $0x128] sm:$0x3] %vm1573_vm1, %v11299_v0  ;;  %4315 = vst.msk [vmem:[#allocation3 + $0x138] sm:$0x3] %vm1573_vm1, %v11299_v0  ;;  %5925 = vmatmul.mubr.msk.f32.gmra.mrb[46].mxu0 %vm262_vm2, %v225_v49 }
 0x12d   :  { %5927 = vmatprep.mubr.msk.f32.mxu0 %vm262_vm2, %v226_v50 }
 0x130   :  { %5928 = vmatmul.mubr.msk.f32.gmra.mrb[48].mxu0 %vm262_vm2, %v227_v51 }
 0x131   :  { %5930 = vmatprep.mubr.msk.f32.mxu0 %vm262_vm2, %v228_v52 }
 0x134   :  { %5931 = vmatmul.mubr.msk.f32.gmra.mrb[50].mxu0 %vm262_vm2, %v229_v53 }
 0x135   :  { %5933 = vmatprep.mubr.msk.f32.mxu0 %vm262_vm2, %v230_v54 }
 0x138   :  { %5934 = vmatmul.mubr.msk.f32.gmra.mrb[52].mxu0 %vm262_vm2, %v231_v55 }
 0x139   :  { %5936 = vmatprep.mubr.msk.f32.mxu0 %vm262_vm2, %v232_v56 }
 0x13c   :  { %5937 = vmatmul.mubr.msk.f32.gmra.mrb[54].mxu0 %vm262_vm2, %v233_v57 }
 0x13d   :  { %5939 = vmatprep.mubr.msk.f32.mxu0 %vm262_vm2, %v234_v58 }
 0x140   :  { %5940 = vmatmul.mubr.msk.f32.gmra.mrb[56].mxu0 %vm262_vm2, %v235_v59 }
 0x141   :  { %5942 = vmatprep.mubr.msk.f32.mxu0 %vm262_vm2, %v236_v60 }
 0x144   :  { %5943 = vmatmul.mubr.msk.f32.gmra.mrb[58].mxu0 %vm262_vm2, %v237_v61 }
 0x145   :  { %5945 = vmatprep.mubr.msk.f32.mxu0 %vm262_vm2, %v238_v62 }
 0x148   :  { %5946 = vmatmul.mubr.msk.f32.gmra.mrb[60].mxu0 %vm262_vm2, %v239_v63 }
 0x149   :  { %5948 = vmatprep.mubr.msk.f32.mxu0 %vm262_vm2, %v240_v1 }
 0x14c   :  { %5949 = vmatmul.mubr.msk.f32.gmra.mrb[62].mxu0 %vm262_vm2, %v241_v2 }
 0x1a3   :  { %v7071_v3 = vpop.f32.mrb[0].mxu0 }
 0x1a4   :  { %v842_v4 = vsel %vm840_vm0, %v7071_v3, 0.0  ;;  %v7075_v5 = vpop.f32.mrb[1].mxu0 }
 0x1a5   :  { %v841_v6 = vsel %vm840_vm0, %v7075_v5, 0.0 }
 0x1a6   :  { %v843_v7 = vadd.f32 %v842_v4, %v841_v6 }
 0x1a7   :  { %v7079_v8 = vpop.f32.mrb[2].mxu0 }
 0x1a8   :  { %v7081_v9 = vpop.f32.mrb[3].mxu0  ;;  %v846_v12 = vsel %vm840_vm0, %v7079_v8, 0.0 }
 0x1a9   :  { %v844_v10 = vsel %vm840_vm0, %v7081_v9, 0.0 }
 0x1aa   :  { %v845_v11 = vadd.f32 %v844_v10, %v843_v7 }
 0x1ab   :  { %v7087_v13 = vpop.f32.mrb[4].mxu0 }
 0x1ac   :  { %v847_v14 = vadd.f32 %v846_v12, %v845_v11  ;;  %v7089_v15 = vpop.f32.mrb[5].mxu0  ;;  %v850_v18 = vsel %vm840_vm0, %v7087_v13, 0.0 }
 0x1ad   :  { %v848_v16 = vsel %vm840_vm0, %v7089_v15, 0.0 }
 0x1ae   :  { %v849_v17 = vadd.f32 %v848_v16, %v847_v14 }
 0x1af   :  { %v7095_v19 = vpop.f32.mrb[6].mxu0 }
 0x1b0   :  { %v7097_v20 = vpop.f32.mrb[7].mxu0  ;;  %v851_v21 = vadd.f32 %v850_v18, %v849_v17  ;;  %v854_v24 = vsel %vm840_vm0, %v7095_v19, 0.0 }
 0x1b1   :  { %v852_v22 = vsel %vm840_vm0, %v7097_v20, 0.0 }
 0x1b2   :  { %v853_v23 = vadd.f32 %v852_v22, %v851_v21 }
 0x1b3   :  { %v7103_v25 = vpop.f32.mrb[8].mxu0 }
 0x1b4   :  { %v7105_v26 = vpop.f32.mrb[9].mxu0  ;;  %v855_v27 = vadd.f32 %v854_v24, %v853_v23  ;;  %v858_v30 = vsel %vm840_vm0, %v7103_v25, 0.0 }
 0x1b5   :  { %v856_v28 = vsel %vm840_vm0, %v7105_v26, 0.0 }
 0x1b6   :  { %v857_v29 = vadd.f32 %v856_v28, %v855_v27 }
 0x1b7   :  { %v7111_v31 = vpop.f32.mrb[10].mxu0 }
 0x1b8   :  { %v7113_v32 = vpop.f32.mrb[11].mxu0  ;;  %v859_v33 = vadd.f32 %v858_v30, %v857_v29  ;;  %v862_v36 = vsel %vm840_vm0, %v7111_v31, 0.0 }
 0x1b9   :  { %v860_v34 = vsel %vm840_vm0, %v7113_v32, 0.0 }
 0x1ba   :  { %v861_v35 = vadd.f32 %v860_v34, %v859_v33 }
 0x1bb   :  { %v7119_v37 = vpop.f32.mrb[12].mxu0 }
 0x1bc   :  { %v7121_v38 = vpop.f32.mrb[13].mxu0  ;;  %v863_v39 = vadd.f32 %v862_v36, %v861_v35  ;;  %v866_v42 = vsel %vm840_vm0, %v7119_v37, 0.0 }
 0x1bd   :  { %v864_v40 = vsel %vm840_vm0, %v7121_v38, 0.0 }
 0x1be   :  { %v865_v41 = vadd.f32 %v864_v40, %v863_v39 }
 0x1bf   :  { %v7127_v43 = vpop.f32.mrb[14].mxu0 }
 0x1c0   :  { %v7129_v44 = vpop.f32.mrb[15].mxu0  ;;  %v867_v45 = vadd.f32 %v866_v42, %v865_v41  ;;  %v870_v48 = vsel %vm840_vm0, %v7127_v43, 0.0 }
 0x1c1   :  { %v868_v46 = vsel %vm840_vm0, %v7129_v44, 0.0 }
 0x1c2   :  { %v869_v47 = vadd.f32 %v868_v46, %v867_v45 }
 0x1c3   :  { %v7135_v49 = vpop.f32.mrb[16].mxu0 }
 0x1c4   :  { %v7137_v50 = vpop.f32.mrb[17].mxu0  ;;  %v871_v51 = vadd.f32 %v870_v48, %v869_v47  ;;  %v874_v54 = vsel %vm840_vm0, %v7135_v49, 0.0 }
 0x1c5   :  { %v872_v52 = vsel %vm840_vm0, %v7137_v50, 0.0 }
 0x1c6   :  { %v873_v53 = vadd.f32 %v872_v52, %v871_v51 }
 0x1c7   :  { %v7143_v55 = vpop.f32.mrb[18].mxu0 }
 0x1c8   :  { %v7145_v56 = vpop.f32.mrb[19].mxu0  ;;  %v875_v57 = vadd.f32 %v874_v54, %v873_v53  ;;  %v878_v60 = vsel %vm840_vm0, %v7143_v55, 0.0 }
 0x1c9   :  { %v876_v58 = vsel %vm840_vm0, %v7145_v56, 0.0 }
 0x1ca   :  { %v877_v59 = vadd.f32 %v876_v58, %v875_v57 }
 0x1cb   :  { %v7151_v61 = vpop.f32.mrb[20].mxu0 }
 0x1cc   :  { %v7153_v62 = vpop.f32.mrb[21].mxu0  ;;  %v879_v63 = vadd.f32 %v878_v60, %v877_v59  ;;  %v882_v4 = vsel %vm840_vm0, %v7151_v61, 0.0 }
 0x1cd   :  { %v880_v1 = vsel %vm840_vm0, %v7153_v62, 0.0 }
 0x1ce   :  { %v881_v2 = vadd.f32 %v880_v1, %v879_v63 }
 0x1cf   :  { %v7159_v6 = vpop.f32.mrb[22].mxu0 }
 0x1d0   :  { %v7161_v7 = vpop.f32.mrb[23].mxu0  ;;  %v883_v10 = vadd.f32 %v882_v4, %v881_v2  ;;  %v886_v14 = vsel %vm840_vm0, %v7159_v6, 0.0 }
 0x1d1   :  { %v884_v11 = vsel %vm840_vm0, %v7161_v7, 0.0 }
 0x1d2   :  { %v885_v12 = vadd.f32 %v884_v11, %v883_v10 }
 0x1d3   :  { %v7167_v16 = vpop.f32.mrb[24].mxu0 }
 0x1d4   :  { %v7169_v17 = vpop.f32.mrb[25].mxu0  ;;  %v887_v18 = vadd.f32 %v886_v14, %v885_v12  ;;  %v890_v23 = vsel %vm840_vm0, %v7167_v16, 0.0 }
 0x1d5   :  { %v888_v21 = vsel %vm840_vm0, %v7169_v17, 0.0 }
 0x1d6   :  { %v889_v22 = vadd.f32 %v888_v21, %v887_v18 }
 0x1d7   :  { %v7175_v24 = vpop.f32.mrb[26].mxu0 }
 0x1d8   :  { %v7177_v27 = vpop.f32.mrb[27].mxu0  ;;  %v891_v28 = vadd.f32 %v890_v23, %v889_v22  ;;  %v894_v33 = vsel %vm840_vm0, %v7175_v24, 0.0 }
 0x1d9   :  { %v892_v29 = vsel %vm840_vm0, %v7177_v27, 0.0 }
 0x1da   :  { %v893_v30 = vadd.f32 %v892_v29, %v891_v28 }
 0x1db   :  { %v7183_v34 = vpop.f32.mrb[28].mxu0 }
 0x1dc   :  { %v7185_v35 = vpop.f32.mrb[29].mxu0  ;;  %v895_v36 = vadd.f32 %v894_v33, %v893_v30  ;;  %v898_v41 = vsel %vm840_vm0, %v7183_v34, 0.0 }
 0x1dd   :  { %v896_v39 = vsel %vm840_vm0, %v7185_v35, 0.0 }
 0x1de   :  { %v897_v40 = vadd.f32 %v896_v39, %v895_v36 }
 0x1df   :  { %v7191_v42 = vpop.f32.mrb[30].mxu0 }
 0x1e0   :  { %v7193_v45 = vpop.f32.mrb[31].mxu0  ;;  %v899_v46 = vadd.f32 %v898_v41, %v897_v40  ;;  %v902_v51 = vsel %vm840_vm0, %v7191_v42, 0.0 }
 0x1e1   :  { %v900_v47 = vsel %vm840_vm0, %v7193_v45, 0.0 }
 0x1e2   :  { %v901_v48 = vadd.f32 %v900_v47, %v899_v46 }
 0x1e3   :  { %v7199_v52 = vpop.f32.mrb[32].mxu0 }
 0x1e4   :  { %v7201_v53 = vpop.f32.mrb[33].mxu0  ;;  %v903_v54 = vadd.f32 %v902_v51, %v901_v48  ;;  %v906_v59 = vsel %vm840_vm0, %v7199_v52, 0.0 }
 0x1e5   :  { %v904_v57 = vsel %vm840_vm0, %v7201_v53, 0.0 }
 0x1e6   :  { %v905_v58 = vadd.f32 %v904_v57, %v903_v54 }
 0x1e7   :  { %v7207_v60 = vpop.f32.mrb[34].mxu0 }
 0x1e8   :  { %v7209_v63 = vpop.f32.mrb[35].mxu0  ;;  %v907_v1 = vadd.f32 %v906_v59, %v905_v58  ;;  %v910_v10 = vsel %vm840_vm0, %v7207_v60, 0.0 }
 0x1e9   :  { %v908_v2 = vsel %vm840_vm0, %v7209_v63, 0.0 }
 0x1ea   :  { %v909_v4 = vadd.f32 %v908_v2, %v907_v1 }
 0x1eb   :  { %v7215_v11 = vpop.f32.mrb[36].mxu0 }
 0x1ec   :  { %v7217_v12 = vpop.f32.mrb[37].mxu0  ;;  %v911_v14 = vadd.f32 %v910_v10, %v909_v4  ;;  %v914_v22 = vsel %vm840_vm0, %v7215_v11, 0.0 }
 0x1ed   :  { %v912_v18 = vsel %vm840_vm0, %v7217_v12, 0.0 }
 0x1ee   :  { %v913_v21 = vadd.f32 %v912_v18, %v911_v14 }
 0x1ef   :  { %v7223_v23 = vpop.f32.mrb[38].mxu0 }
 0x1f0   :  { %v7225_v28 = vpop.f32.mrb[39].mxu0  ;;  %v915_v29 = vadd.f32 %v914_v22, %v913_v21  ;;  %v918_v36 = vsel %vm840_vm0, %v7223_v23, 0.0 }
 0x1f1   :  { %v916_v30 = vsel %vm840_vm0, %v7225_v28, 0.0 }
 0x1f2   :  { %v917_v33 = vadd.f32 %v916_v30, %v915_v29 }
 0x1f3   :  { %v7231_v39 = vpop.f32.mrb[40].mxu0 }
 0x1f4   :  { %v7233_v40 = vpop.f32.mrb[41].mxu0  ;;  %v919_v41 = vadd.f32 %v918_v36, %v917_v33  ;;  %v922_v48 = vsel %vm840_vm0, %v7231_v39, 0.0 }
 0x1f5   :  { %v920_v46 = vsel %vm840_vm0, %v7233_v40, 0.0 }
 0x1f6   :  { %v921_v47 = vadd.f32 %v920_v46, %v919_v41 }
 0x1f7   :  { %v7239_v51 = vpop.f32.mrb[42].mxu0 }
 0x1f8   :  { %v7241_v54 = vpop.f32.mrb[43].mxu0  ;;  %v923_v57 = vadd.f32 %v922_v48, %v921_v47  ;;  %v926_v1 = vsel %vm840_vm0, %v7239_v51, 0.0 }
 0x1f9   :  { %v924_v58 = vsel %vm840_vm0, %v7241_v54, 0.0 }
 0x1fa   :  { %v925_v59 = vadd.f32 %v924_v58, %v923_v57 }
 0x1fb   :  { %v7247_v2 = vpop.f32.mrb[44].mxu0 }
 0x1fc   :  { %v7249_v4 = vpop.f32.mrb[45].mxu0  ;;  %v927_v10 = vadd.f32 %v926_v1, %v925_v59  ;;  %v930_v21 = vsel %vm840_vm0, %v7247_v2, 0.0 }
 0x1fd   :  { %v928_v14 = vsel %vm840_vm0, %v7249_v4, 0.0 }
 0x1fe   :  { %v929_v18 = vadd.f32 %v928_v14, %v927_v10 }
 0x1ff   :  { %v7255_v22 = vpop.f32.mrb[46].mxu0 }
 0x200   :  { %11612 = vst [vmem:[#allocation26_spill] sm:$0xff] %v7255_v22  ;;  %v7257_v29 = vpop.f32.mrb[47].mxu0  ;;  %v931_v30 = vadd.f32 %v930_v21, %v929_v18  ;;  %v934_v41 = vsel %vm840_vm0, %v7255_v22, 0.0 }
 0x201   :  { %v932_v33 = vsel %vm840_vm0, %v7257_v29, 0.0 }
 0x202   :  { %v933_v36 = vadd.f32 %v932_v33, %v931_v30 }
 0x203   :  { %v7263_v46 = vpop.f32.mrb[48].mxu0 }
 0x204   :  { %11613 = vst [vmem:[#allocation27_spill] sm:$0xff] %v7263_v46  ;;  %v7265_v47 = vpop.f32.mrb[49].mxu0  ;;  %v935_v48 = vadd.f32 %v934_v41, %v933_v36  ;;  %v938_v59 = vsel %vm840_vm0, %v7263_v46, 0.0 }
 0x205   :  { %11614 = vst [vmem:[#allocation28_spill] sm:$0xff] %v7265_v47  ;;  %v936_v57 = vsel %vm840_vm0, %v7265_v47, 0.0 }
 0x206   :  { %v937_v58 = vadd.f32 %v936_v57, %v935_v48 }
 0x207   :  { %v7271_v1 = vpop.f32.mrb[50].mxu0 }
 0x208   :  { %11615 = vst [vmem:[#allocation29_spill] sm:$0xff] %v7271_v1  ;;  %v7273_v10 = vpop.f32.mrb[51].mxu0  ;;  %v939_v14 = vadd.f32 %v938_v59, %v937_v58  ;;  %v942_v30 = vsel %vm840_vm0, %v7271_v1, 0.0 }
 0x209   :  { %11616 = vst [vmem:[#allocation30_spill] sm:$0xff] %v7273_v10  ;;  %v940_v18 = vsel %vm840_vm0, %v7273_v10, 0.0 }
 0x20a   :  { %v941_v21 = vadd.f32 %v940_v18, %v939_v14 }
 0x20b   :  { %v7279_v33 = vpop.f32.mrb[52].mxu0 }
 0x20c   :  { %11617 = vst [vmem:[#allocation31_spill] sm:$0xff] %v7279_v33  ;;  %v7281_v36 = vpop.f32.mrb[53].mxu0  ;;  %v943_v41 = vadd.f32 %v942_v30, %v941_v21  ;;  %v946_v0 = vsel %vm840_vm0, %v7279_v33, 0.0 }
 0x20d   :  { %11618 = vst [vmem:[#allocation32_spill] sm:$0xff] %v7281_v36  ;;  %v944_v48 = vsel %vm840_vm0, %v7281_v36, 0.0 }
 0x20e   :  { %v945_v57 = vadd.f32 %v944_v48, %v943_v41 }
 0x20f   :  { %v7287_v58 = vpop.f32.mrb[54].mxu0 }
 0x210   :  { %11619 = vst [vmem:[#allocation33_spill] sm:$0xff] %v7287_v58  ;;  %v7289_v59 = vpop.f32.mrb[55].mxu0  ;;  %v947_v14 = vadd.f32 %v946_v0, %v945_v57  ;;  %v950_v10 = vsel %vm840_vm0, %v7287_v58, 0.0 }
 0x211   :  { %11620 = vst [vmem:[#allocation34_spill] sm:$0xff] %v7289_v59  ;;  %v948_v18 = vsel %vm840_vm0, %v7289_v59, 0.0 }
 0x212   :  { %v949_v1 = vadd.f32 %v948_v18, %v947_v14 }
 0x213   :  { %v7295_v21 = vpop.f32.mrb[56].mxu0 }
 0x214   :  { %11621 = vst [vmem:[#allocation35_spill] sm:$0xff] %v7295_v21  ;;  %v7297_v30 = vpop.f32.mrb[57].mxu0  ;;  %v951_v41 = vadd.f32 %v950_v10, %v949_v1  ;;  %v954_v36 = vsel %vm840_vm0, %v7295_v21, 0.0 }
 0x215   :  { %11622 = vst [vmem:[#allocation36_spill] sm:$0xff] %v7297_v30  ;;  %v952_v48 = vsel %vm840_vm0, %v7297_v30, 0.0 }
 0x216   :  { %v953_v33 = vadd.f32 %v952_v48, %v951_v41 }
 0x217   :  { %v7303_v0 = vpop.f32.mrb[58].mxu0 }
 0x218   :  { %11623 = vst [vmem:[#allocation37_spill] sm:$0xff] %v7303_v0  ;;  %v7305_v57 = vpop.f32.mrb[59].mxu0  ;;  %v955_v14 = vadd.f32 %v954_v36, %v953_v33  ;;  %v958_v59 = vsel %vm840_vm0, %v7303_v0, 0.0 }
 0x219   :  { %11624 = vst [vmem:[#allocation38_spill] sm:$0xff] %v7305_v57  ;;  %v956_v18 = vsel %vm840_vm0, %v7305_v57, 0.0 }
 0x21a   :  { %v957_v58 = vadd.f32 %v956_v18, %v955_v14 }
 0x21b   :  { %v7311_v1 = vpop.f32.mrb[60].mxu0 }
 0x21c   :  { %11625 = vst [vmem:[#allocation39_spill] sm:$0xff] %v7311_v1  ;;  %v7313_v10 = vpop.f32.mrb[61].mxu0  ;;  %v959_v41 = vadd.f32 %v958_v59, %v957_v58  ;;  %v962_v30 = vsel %vm840_vm0, %v7311_v1, 0.0 }
 0x21d   :  { %11626 = vst [vmem:[#allocation40_spill] sm:$0xff] %v7313_v10  ;;  %v960_v48 = vsel %vm840_vm0, %v7313_v10, 0.0 }
 0x21e   :  { %v961_v21 = vadd.f32 %v960_v48, %v959_v41 }
 0x21f   :  { %v7319_v33 = vpop.f32.mrb[62].mxu0 }
 0x220   :  { %v7321_v36 = vpop.f32.mrb[63].mxu0  ;;  %v963_v14 = vadd.f32 %v962_v30, %v961_v21  ;;  %v966_v57 = vsel %vm840_vm0, %v7319_v33, 0.0 }
 0x221   :  { %v964_v18 = vsel %vm840_vm0, %v7321_v36, 0.0 }
 0x222   :  { %v965_v0 = vadd.f32 %v964_v18, %v963_v14  ;;  %v11653_v14 = vld [vmem:[#allocation30_spill] sm:$0xff]  ;;  %v11655_v18 = vld [vmem:[#allocation29_spill] sm:$0xff] }
 0x224   :  { %v967_v58 = vadd.f32 %v966_v57, %v965_v0  ;;  %v11649_v57 = vld [vmem:[#allocation28_spill] sm:$0xff] }
 0x226   :  { %v968_v59 = vrot.slane %v967_v58, 4 }
 0x228   :  { %v969_v46 = vadd.f32 %v968_v59, %v967_v58  ;;  %v11657_v58 = vld [vmem:[#allocation32_spill] sm:$0xff] }
 0x22a   :  { %v970_v10 = vrot.slane %v969_v46, 2 }
 0x22c   :  { %v971_v41 = vadd.f32 %v970_v10, %v969_v46  ;;  %v11651_v10 = vld [vmem:[#allocation27_spill] sm:$0xff] }
 0x22e   :  { %v972_v48 = vrot.slane %v971_v41, 1 }
 0x230   :  { %v973_v47 = vadd.f32 %v972_v48, %v971_v41  ;;  %v11659_v41 = vld [vmem:[#allocation31_spill] sm:$0xff] }
 0x232   :  { %v7327_v1 = vmul.f32 0.001953125, %v973_v47  ;;  %v11647_v47 = vld [vmem:[#allocation26_spill] sm:$0xff] }
 0x234   :  { %v7331_v22 = vsub.f32 %v7075_v5, %v7327_v1  ;;  %v7335_v21 = vsub.f32 %v7071_v3, %v7327_v1  ;;  %v7339_v30 = vsub.f32 %v7081_v9, %v7327_v1  ;;  %v7343_v0 = vsub.f32 %v7079_v8, %v7327_v1 }
 0x235   :  { %v7347_v46 = vsub.f32 %v7089_v15, %v7327_v1  ;;  %v7351_v5 = vsub.f32 %v7087_v13, %v7327_v1  ;;  %v7355_v3 = vsub.f32 %v7097_v20, %v7327_v1  ;;  %v7359_v9 = vsub.f32 %v7095_v19, %v7327_v1 }
 0x236   :  { %11627 = vst [vmem:[#allocation41_spill] sm:$0xff] %v7331_v22  ;;  %11628 = vst [vmem:[#allocation42_spill] sm:$0xff] %v7335_v21  ;;  %v7363_v8 = vsub.f32 %v7105_v26, %v7327_v1  ;;  %v7367_v15 = vsub.f32 %v7103_v25, %v7327_v1  ;;  %v7371_v13 = vsub.f32 %v7113_v32, %v7327_v1 }
 0x237   :  { %11629 = vst [vmem:[#allocation43_spill] sm:$0xff] %v7339_v30  ;;  %11630 = vst [vmem:[#allocation44_spill] sm:$0xff] %v7343_v0  ;;  %v7375_v20 = vsub.f32 %v7111_v31, %v7327_v1  ;;  %v7379_v19 = vsub.f32 %v7121_v38, %v7327_v1  ;;  %v7383_v26 = vsub.f32 %v7119_v37, %v7327_v1 }
 0x238   :  { %v7387_v25 = vsub.f32 %v7129_v44, %v7327_v1  ;;  %v7391_v32 = vsub.f32 %v7127_v43, %v7327_v1  ;;  %v7395_v31 = vsub.f32 %v7137_v50, %v7327_v1  ;;  %v7399_v38 = vsub.f32 %v7135_v49, %v7327_v1 }
 0x239   :  { %v7403_v37 = vsub.f32 %v7145_v56, %v7327_v1  ;;  %v7407_v44 = vsub.f32 %v7143_v55, %v7327_v1  ;;  %v7411_v43 = vsub.f32 %v7153_v62, %v7327_v1  ;;  %v7415_v50 = vsub.f32 %v7151_v61, %v7327_v1 }
 0x23a   :  { %v7419_v49 = vsub.f32 %v7161_v7, %v7327_v1  ;;  %v7423_v56 = vsub.f32 %v7159_v6, %v7327_v1  ;;  %v7427_v55 = vsub.f32 %v7169_v17, %v7327_v1  ;;  %v7431_v62 = vsub.f32 %v7167_v16, %v7327_v1 }
 0x23b   :  { %v7435_v61 = vsub.f32 %v7177_v27, %v7327_v1  ;;  %v7439_v7 = vsub.f32 %v7175_v24, %v7327_v1  ;;  %v7443_v6 = vsub.f32 %v7185_v35, %v7327_v1  ;;  %v7447_v17 = vsub.f32 %v7183_v34, %v7327_v1 }
 0x23c   :  { %v7451_v16 = vsub.f32 %v7193_v45, %v7327_v1  ;;  %v7455_v27 = vsub.f32 %v7191_v42, %v7327_v1  ;;  %v7459_v24 = vsub.f32 %v7201_v53, %v7327_v1  ;;  %v7463_v35 = vsub.f32 %v7199_v52, %v7327_v1 }
 0x23d   :  { %11631 = vst [vmem:[#allocation45_spill] sm:$0xff] %v7435_v61  ;;  %11632 = vst [vmem:[#allocation46_spill] sm:$0xff] %v7439_v7  ;;  %v7467_v34 = vsub.f32 %v7209_v63, %v7327_v1  ;;  %v7471_v45 = vsub.f32 %v7207_v60, %v7327_v1  ;;  %v7475_v42 = vsub.f32 %v7217_v12, %v7327_v1 }
 0x23e   :  { %11633 = vst [vmem:[#allocation47_spill] sm:$0xff] %v7443_v6  ;;  %11634 = vst [vmem:[#allocation48_spill] sm:$0xff] %v7459_v24  ;;  %v7479_v53 = vsub.f32 %v7215_v11, %v7327_v1  ;;  %v7483_v52 = vsub.f32 %v7225_v28, %v7327_v1  ;;  %v7487_v63 = vsub.f32 %v7223_v23, %v7327_v1 }
 0x23f   :  { %11635 = vst [vmem:[#allocation49_spill] sm:$0xff] %v7463_v35  ;;  %11636 = vst [vmem:[#allocation50_spill] sm:$0xff] %v7467_v34  ;;  %v7491_v60 = vsub.f32 %v7233_v40, %v7327_v1  ;;  %v7495_v12 = vsub.f32 %v7231_v39, %v7327_v1  ;;  %v7499_v11 = vsub.f32 %v7241_v54, %v7327_v1 }
 0x240   :  { %11637 = vst [vmem:[#allocation51_spill] sm:$0xff] %v7471_v45  ;;  %11638 = vst [vmem:[#allocation52_spill] sm:$0xff] %v7475_v42  ;;  %v7503_v28 = vsub.f32 %v7239_v51, %v7327_v1  ;;  %v7507_v23 = vsub.f32 %v7249_v4, %v7327_v1  ;;  %v7511_v40 = vsub.f32 %v7247_v2, %v7327_v1 }
 0x241   :  { %11639 = vst [vmem:[#allocation53_spill] sm:$0xff] %v7479_v53  ;;  %11640 = vst [vmem:[#allocation54_spill] sm:$0xff] %v7483_v52  ;;  %v7515_v39 = vsub.f32 %v7257_v29, %v7327_v1  ;;  %v7519_v54 = vsub.f32 %v11647_v47, %v7327_v1  ;;  %v7523_v51 = vsub.f32 %v11649_v57, %v7327_v1  ;;  %v11661_v47 = vld [vmem:[#allocation34_spill] sm:$0xff] }
 0x242   :  { %11641 = vst [vmem:[#allocation55_spill] sm:$0xff] %v7487_v63  ;;  %11642 = vst [vmem:[#allocation56_spill] sm:$0xff] %v7491_v60  ;;  %v7527_v4 = vsub.f32 %v11651_v10, %v7327_v1  ;;  %v7531_v2 = vsub.f32 %v11653_v14, %v7327_v1  ;;  %v7535_v29 = vsub.f32 %v11655_v18, %v7327_v1  ;;  %v11663_v10 = vld [vmem:[#allocation33_spill] sm:$0xff] }
 0x243   :  { %11643 = vst [vmem:[#allocation57_spill] sm:$0xff] %v7495_v12  ;;  %11644 = vst [vmem:[#allocation58_spill] sm:$0xff] %v7499_v11  ;;  %v7539_v59 = vsub.f32 %v11657_v58, %v7327_v1  ;;  %v7543_v48 = vsub.f32 %v11659_v41, %v7327_v1  ;;  %v7547_v57 = vsub.f32 %v11661_v47, %v7327_v1 }
 0x244   :  { %11645 = vst [vmem:[#allocation59_spill] sm:$0xff] %v7503_v28  ;;  %11646 = vst [vmem:[#allocation60_spill] sm:$0xff] %v7507_v23  ;;  %v7551_v14 = vsub.f32 %v11663_v10, %v7327_v1 }
 0x245   :  { %11648 = vst [vmem:[#allocation26_spill] sm:$0xff] %v7519_v54  ;;  %11650 = vst [vmem:[#allocation28_spill] sm:$0xff] %v7523_v51 }
 0x246   :  { %11652 = vst [vmem:[#allocation27_spill] sm:$0xff] %v7527_v4  ;;  %11654 = vst [vmem:[#allocation30_spill] sm:$0xff] %v7531_v2  ;;  %v11665_v2 = vld [vmem:[#allocation36_spill] sm:$0xff] }
 0x247   :  { %11656 = vst [vmem:[#allocation29_spill] sm:$0xff] %v7535_v29  ;;  %11658 = vst [vmem:[#allocation32_spill] sm:$0xff] %v7539_v59  ;;  %v7555_v18 = vsub.f32 %v11665_v2, %v7327_v1  ;;  %v11667_v29 = vld [vmem:[#allocation35_spill] sm:$0xff]  ;;  %v11669_v59 = vld [vmem:[#allocation38_spill] sm:$0xff] }
 0x248   :  { %11660 = vst [vmem:[#allocation31_spill] sm:$0xff] %v7543_v48  ;;  %11662 = vst [vmem:[#allocation34_spill] sm:$0xff] %v7547_v57  ;;  %v7559_v58 = vsub.f32 %v11667_v29, %v7327_v1  ;;  %v7563_v41 = vsub.f32 %v11669_v59, %v7327_v1  ;;  %v11671_v48 = vld [vmem:[#allocation37_spill] sm:$0xff]  ;;  %v11673_v57 = vld [vmem:[#allocation40_spill] sm:$0xff]  ;;  %v7579_v29 = vsub.f32 %v7321_v36, %v7327_v1 }
 0x249   :  { %11664 = vst [vmem:[#allocation33_spill] sm:$0xff] %v7551_v14  ;;  %11666 = vst [vmem:[#allocation36_spill] sm:$0xff] %v7555_v18  ;;  %v7567_v47 = vsub.f32 %v11671_v48, %v7327_v1  ;;  %v7571_v10 = vsub.f32 %v11673_v57, %v7327_v1  ;;  %v11675_v14 = vld [vmem:[#allocation39_spill] sm:$0xff]  ;;  %v7583_v59 = vsub.f32 %v7319_v33, %v7327_v1 }
 0x24a   :  { %11668 = vst [vmem:[#allocation35_spill] sm:$0xff] %v7559_v58  ;;  %11670 = vst [vmem:[#allocation38_spill] sm:$0xff] %v7563_v41  ;;  %v7575_v2 = vsub.f32 %v11675_v14, %v7327_v1  ;;  %v1040_v48 = vmul.f32 %v7331_v22, %v7331_v22  ;;  %v1042_v57 = vmul.f32 %v7339_v30, %v7339_v30 }
 0x24b   :  { %11672 = vst [vmem:[#allocation37_spill] sm:$0xff] %v7567_v47  ;;  %11674 = vst [vmem:[#allocation40_spill] sm:$0xff] %v7571_v10  ;;  %v1041_v47 = vmul.f32 %v7335_v21, %v7335_v21  ;;  %v1043_v14 = vmul.f32 %v7343_v0, %v7343_v0  ;;  %v1044_v1 = vmul.f32 %v7347_v46, %v7347_v46 }
 0x24c   :  { %11676 = vst [vmem:[#allocation39_spill] sm:$0xff] %v7575_v2  ;;  %11677 = vst [vmem:[#allocation61_spill] sm:$0xff] %v7579_v29  ;;  %v1104_v2 = vsel %vm840_vm0, %v1040_v48, 0.0  ;;  %v1107_v33 = vsel %vm840_vm0, %v1042_v57, 0.0  ;;  %v1045_v21 = vmul.f32 %v7351_v5, %v7351_v5  ;;  %v1046_v0 = vmul.f32 %v7355_v3, %v7355_v3 }
 0x24d   :  { %11678 = vst [vmem:[#allocation62_spill] sm:$0xff] %v7583_v59  ;;  %v1105_v36 = vsel %vm840_vm0, %v1041_v47, 0.0  ;;  %v1109_v59 = vsel %vm840_vm0, %v1043_v14, 0.0  ;;  %v1111_v48 = vsel %vm840_vm0, %v1044_v1, 0.0  ;;  %v1047_v47 = vmul.f32 %v7359_v9, %v7359_v9 }
 0x24e   :  { %v1106_v29 = vadd.f32 %v1105_v36, %v1104_v2  ;;  %v1113_v2 = vsel %vm840_vm0, %v1045_v21, 0.0  ;;  %v1115_v57 = vsel %vm840_vm0, %v1046_v0, 0.0  ;;  %v1051_v21 = vmul.f32 %v7375_v20, %v7375_v20 }
 0x24f   :  { %v1052_v0 = vmul.f32 %v7379_v19, %v7379_v19 }
 0x250   :  { %v1108_v22 = vadd.f32 %v1107_v33, %v1106_v29  ;;  %v1048_v29 = vmul.f32 %v7363_v8, %v7363_v8 }
 0x252   :  { %v1110_v30 = vadd.f32 %v1109_v59, %v1108_v22  ;;  %v1049_v22 = vmul.f32 %v7367_v15, %v7367_v15  ;;  %v1117_v59 = vsel %vm840_vm0, %v1047_v47, 0.0  ;;  %v1119_v1 = vsel %vm840_vm0, %v1048_v29, 0.0 }
 0x253   :  { %v1053_v47 = vmul.f32 %v7383_v26, %v7383_v26  ;;  %v1054_v29 = vmul.f32 %v7387_v25, %v7387_v25 }
 0x254   :  { %v1112_v10 = vadd.f32 %v1111_v48, %v1110_v30  ;;  %v1050_v30 = vmul.f32 %v7371_v13, %v7371_v13 }
 0x256   :  { %v1114_v36 = vadd.f32 %v1113_v2, %v1112_v10  ;;  %v1121_v10 = vsel %vm840_vm0, %v1049_v22, 0.0  ;;  %v1055_v22 = vmul.f32 %v7391_v32, %v7391_v32 }
 0x258   :  { %v1116_v33 = vadd.f32 %v1115_v57, %v1114_v36  ;;  %v1123_v36 = vsel %vm840_vm0, %v1050_v30, 0.0  ;;  %v1056_v30 = vmul.f32 %v7395_v31, %v7395_v31 }
 0x25a   :  { %v1118_v14 = vadd.f32 %v1117_v59, %v1116_v33  ;;  %v1125_v33 = vsel %vm840_vm0, %v1051_v21, 0.0  ;;  %v1057_v21 = vmul.f32 %v7399_v38, %v7399_v38 }
 0x25c   :  { %v1120_v48 = vadd.f32 %v1119_v1, %v1118_v14  ;;  %v1127_v14 = vsel %vm840_vm0, %v1052_v0, 0.0  ;;  %v1058_v0 = vmul.f32 %v7403_v37, %v7403_v37 }
 0x25e   :  { %v1122_v2 = vadd.f32 %v1121_v10, %v1120_v48  ;;  %v1129_v48 = vsel %vm840_vm0, %v1053_v47, 0.0  ;;  %v1059_v47 = vmul.f32 %v7407_v44, %v7407_v44 }
 0x260   :  { %v1124_v57 = vadd.f32 %v1123_v36, %v1122_v2  ;;  %v1131_v2 = vsel %vm840_vm0, %v1054_v29, 0.0  ;;  %v1060_v29 = vmul.f32 %v7411_v43, %v7411_v43 }
 0x262   :  { %v1126_v59 = vadd.f32 %v1125_v33, %v1124_v57  ;;  %v1133_v57 = vsel %vm840_vm0, %v1055_v22, 0.0  ;;  %v1061_v22 = vmul.f32 %v7415_v50, %v7415_v50 }
 0x264   :  { %v1128_v1 = vadd.f32 %v1127_v14, %v1126_v59  ;;  %v1135_v59 = vsel %vm840_vm0, %v1056_v30, 0.0  ;;  %v1062_v30 = vmul.f32 %v7419_v49, %v7419_v49 }
 0x266   :  { %v1130_v10 = vadd.f32 %v1129_v48, %v1128_v1  ;;  %v1137_v1 = vsel %vm840_vm0, %v1057_v21, 0.0  ;;  %v1063_v21 = vmul.f32 %v7423_v56, %v7423_v56 }
 0x268   :  { %v1132_v36 = vadd.f32 %v1131_v2, %v1130_v10  ;;  %v1139_v10 = vsel %vm840_vm0, %v1058_v0, 0.0  ;;  %v1064_v0 = vmul.f32 %v7427_v55, %v7427_v55 }
 0x26a   :  { %v1134_v33 = vadd.f32 %v1133_v57, %v1132_v36  ;;  %v1141_v36 = vsel %vm840_vm0, %v1059_v47, 0.0  ;;  %v1065_v47 = vmul.f32 %v7431_v62, %v7431_v62 }
 0x26c   :  { %v1136_v14 = vadd.f32 %v1135_v59, %v1134_v33  ;;  %v1143_v33 = vsel %vm840_vm0, %v1060_v29, 0.0  ;;  %v1066_v29 = vmul.f32 %v7435_v61, %v7435_v61 }
 0x26e   :  { %v1138_v48 = vadd.f32 %v1137_v1, %v1136_v14  ;;  %v1145_v14 = vsel %vm840_vm0, %v1061_v22, 0.0  ;;  %v1067_v22 = vmul.f32 %v7439_v7, %v7439_v7 }
 0x270   :  { %v1140_v2 = vadd.f32 %v1139_v10, %v1138_v48  ;;  %v1147_v48 = vsel %vm840_vm0, %v1062_v30, 0.0  ;;  %v1068_v30 = vmul.f32 %v7443_v6, %v7443_v6 }
 0x272   :  { %v1142_v57 = vadd.f32 %v1141_v36, %v1140_v2  ;;  %v1149_v2 = vsel %vm840_vm0, %v1063_v21, 0.0  ;;  %v1069_v21 = vmul.f32 %v7447_v17, %v7447_v17 }
 0x274   :  { %v1144_v59 = vadd.f32 %v1143_v33, %v1142_v57  ;;  %v1151_v57 = vsel %vm840_vm0, %v1064_v0, 0.0  ;;  %v1070_v0 = vmul.f32 %v7451_v16, %v7451_v16 }
 0x276   :  { %v1146_v1 = vadd.f32 %v1145_v14, %v1144_v59  ;;  %v1153_v59 = vsel %vm840_vm0, %v1065_v47, 0.0  ;;  %v1071_v47 = vmul.f32 %v7455_v27, %v7455_v27 }
 0x278   :  { %v1148_v10 = vadd.f32 %v1147_v48, %v1146_v1  ;;  %v1155_v1 = vsel %vm840_vm0, %v1066_v29, 0.0  ;;  %v1072_v29 = vmul.f32 %v7459_v24, %v7459_v24 }
 0x27a   :  { %v1150_v36 = vadd.f32 %v1149_v2, %v1148_v10  ;;  %v1157_v10 = vsel %vm840_vm0, %v1067_v22, 0.0  ;;  %v1073_v22 = vmul.f32 %v7463_v35, %v7463_v35 }
 0x27c   :  { %v1152_v33 = vadd.f32 %v1151_v57, %v1150_v36  ;;  %v1159_v36 = vsel %vm840_vm0, %v1068_v30, 0.0  ;;  %v1074_v30 = vmul.f32 %v7467_v34, %v7467_v34 }
 0x27e   :  { %v1154_v14 = vadd.f32 %v1153_v59, %v1152_v33  ;;  %v1161_v33 = vsel %vm840_vm0, %v1069_v21, 0.0  ;;  %v1075_v21 = vmul.f32 %v7471_v45, %v7471_v45 }
 0x280   :  { %v1156_v48 = vadd.f32 %v1155_v1, %v1154_v14  ;;  %v1163_v14 = vsel %vm840_vm0, %v1070_v0, 0.0  ;;  %v1076_v0 = vmul.f32 %v7475_v42, %v7475_v42 }
 0x282   :  { %v1158_v2 = vadd.f32 %v1157_v10, %v1156_v48  ;;  %v1165_v48 = vsel %vm840_vm0, %v1071_v47, 0.0  ;;  %v1077_v47 = vmul.f32 %v7479_v53, %v7479_v53 }
 0x284   :  { %v1160_v57 = vadd.f32 %v1159_v36, %v1158_v2  ;;  %v1167_v2 = vsel %vm840_vm0, %v1072_v29, 0.0  ;;  %v1078_v29 = vmul.f32 %v7483_v52, %v7483_v52 }
 0x286   :  { %v1162_v59 = vadd.f32 %v1161_v33, %v1160_v57  ;;  %v1169_v57 = vsel %vm840_vm0, %v1073_v22, 0.0  ;;  %v1079_v22 = vmul.f32 %v7487_v63, %v7487_v63 }
 0x288   :  { %v1164_v1 = vadd.f32 %v1163_v14, %v1162_v59  ;;  %v1171_v59 = vsel %vm840_vm0, %v1074_v30, 0.0  ;;  %v1080_v30 = vmul.f32 %v7491_v60, %v7491_v60 }
 0x28a   :  { %v1166_v10 = vadd.f32 %v1165_v48, %v1164_v1  ;;  %v1173_v1 = vsel %vm840_vm0, %v1075_v21, 0.0  ;;  %v1081_v21 = vmul.f32 %v7495_v12, %v7495_v12 }
 0x28c   :  { %v1168_v36 = vadd.f32 %v1167_v2, %v1166_v10  ;;  %v1175_v10 = vsel %vm840_vm0, %v1076_v0, 0.0  ;;  %v1082_v0 = vmul.f32 %v7499_v11, %v7499_v11 }
 0x28e   :  { %v1170_v33 = vadd.f32 %v1169_v57, %v1168_v36  ;;  %v1177_v36 = vsel %vm840_vm0, %v1077_v47, 0.0  ;;  %v1083_v47 = vmul.f32 %v7503_v28, %v7503_v28 }
 0x290   :  { %v1172_v14 = vadd.f32 %v1171_v59, %v1170_v33  ;;  %v1179_v33 = vsel %vm840_vm0, %v1078_v29, 0.0  ;;  %v1084_v29 = vmul.f32 %v7507_v23, %v7507_v23 }
 0x292   :  { %v1174_v48 = vadd.f32 %v1173_v1, %v1172_v14  ;;  %v1181_v14 = vsel %vm840_vm0, %v1079_v22, 0.0  ;;  %v1085_v22 = vmul.f32 %v7511_v40, %v7511_v40 }
 0x294   :  { %v1176_v2 = vadd.f32 %v1175_v10, %v1174_v48  ;;  %v1183_v48 = vsel %vm840_vm0, %v1080_v30, 0.0  ;;  %v1086_v30 = vmul.f32 %v7515_v39, %v7515_v39 }
 0x296   :  { %v1178_v57 = vadd.f32 %v1177_v36, %v1176_v2  ;;  %v1185_v2 = vsel %vm840_vm0, %v1081_v21, 0.0  ;;  %v1087_v21 = vmul.f32 %v7519_v54, %v7519_v54 }
 0x298   :  { %v1180_v59 = vadd.f32 %v1179_v33, %v1178_v57  ;;  %v1187_v57 = vsel %vm840_vm0, %v1082_v0, 0.0  ;;  %v1088_v0 = vmul.f32 %v7523_v51, %v7523_v51 }
 0x29a   :  { %v1182_v1 = vadd.f32 %v1181_v14, %v1180_v59  ;;  %v1189_v59 = vsel %vm840_vm0, %v1083_v47, 0.0  ;;  %v1089_v47 = vmul.f32 %v7527_v4, %v7527_v4 }
 0x29c   :  { %v1184_v10 = vadd.f32 %v1183_v48, %v1182_v1  ;;  %v1191_v1 = vsel %vm840_vm0, %v1084_v29, 0.0  ;;  %v11679_v29 = vld [vmem:[#allocation30_spill] sm:$0xff] }
 0x29e   :  { %v1186_v36 = vadd.f32 %v1185_v2, %v1184_v10  ;;  %v1193_v10 = vsel %vm840_vm0, %v1085_v22, 0.0  ;;  %v11680_v22 = vld [vmem:[#allocation29_spill] sm:$0xff] }
 0x2a0   :  { %v1188_v33 = vadd.f32 %v1187_v57, %v1186_v36  ;;  %v1195_v36 = vsel %vm840_vm0, %v1086_v30, 0.0  ;;  %v11681_v30 = vld [vmem:[#allocation32_spill] sm:$0xff] }
 0x2a2   :  { %v1190_v14 = vadd.f32 %v1189_v59, %v1188_v33  ;;  %v1197_v33 = vsel %vm840_vm0, %v1087_v21, 0.0  ;;  %v11682_v21 = vld [vmem:[#allocation31_spill] sm:$0xff] }
 0x2a4   :  { %v1192_v48 = vadd.f32 %v1191_v1, %v1190_v14  ;;  %v1090_v14 = vmul.f32 %v11679_v29, %v11679_v29  ;;  %v1199_v1 = vsel %vm840_vm0, %v1088_v0, 0.0  ;;  %v11683_v0 = vld [vmem:[#allocation34_spill] sm:$0xff] }
 0x2a6   :  { %v1194_v2 = vadd.f32 %v1193_v10, %v1192_v48  ;;  %v1091_v48 = vmul.f32 %v11680_v22, %v11680_v22  ;;  %v1201_v10 = vsel %vm840_vm0, %v1089_v47, 0.0  ;;  %v11684_v47 = vld [vmem:[#allocation33_spill] sm:$0xff] }
 0x2a8   :  { %v1196_v57 = vadd.f32 %v1195_v36, %v1194_v2  ;;  %v1092_v2 = vmul.f32 %v11681_v30, %v11681_v30  ;;  %v1203_v36 = vsel %vm840_vm0, %v1090_v14, 0.0 }
 0x2aa   :  { %v1198_v59 = vadd.f32 %v1197_v33, %v1196_v57  ;;  %v1093_v57 = vmul.f32 %v11682_v21, %v11682_v21  ;;  %v1205_v33 = vsel %vm840_vm0, %v1091_v48, 0.0 }
 0x2ac   :  { %v1200_v54 = vadd.f32 %v1199_v1, %v1198_v59  ;;  %v1094_v59 = vmul.f32 %v11683_v0, %v11683_v0  ;;  %v1207_v1 = vsel %vm840_vm0, %v1092_v2, 0.0 }
 0x2ae   :  { %v1202_v51 = vadd.f32 %v1201_v10, %v1200_v54  ;;  %v1095_v54 = vmul.f32 %v11684_v47, %v11684_v47  ;;  %v1209_v10 = vsel %vm840_vm0, %v1093_v57, 0.0  ;;  %v1211_v14 = vsel %vm840_vm0, %v1094_v59, 0.0  ;;  %v11685_v57 = vld [vmem:[#allocation37_spill] sm:$0xff]  ;;  %v11686_v59 = vld [vmem:[#allocation40_spill] sm:$0xff] }
 0x2af   :  { %v1817_v47 = vlaneseq }
 0x2b0   :  { %v1204_v4 = vadd.f32 %v1203_v36, %v1202_v51  ;;  %v1096_v51 = vmul.f32 %v7555_v18, %v7555_v18  ;;  %v1213_v48 = vsel %vm840_vm0, %v1095_v54, 0.0  ;;  %v11687_v54 = vld [vmem:[#allocation39_spill] sm:$0xff] }
 0x2b2   :  { %v1206_v29 = vadd.f32 %v1205_v33, %v1204_v4  ;;  %v1097_v4 = vmul.f32 %v7559_v58, %v7559_v58  ;;  %v1215_v2 = vsel %vm840_vm0, %v1096_v51, 0.0  ;;  %v11688_v51 = vld [vmem:[#allocation61_spill] sm:$0xff] }
 0x2b4   :  { %v1208_v22 = vadd.f32 %v1207_v1, %v1206_v29  ;;  %v1098_v29 = vmul.f32 %v7563_v41, %v7563_v41 }
 0x2b6   :  { %v1210_v30 = vadd.f32 %v1209_v10, %v1208_v22  ;;  %v1099_v22 = vmul.f32 %v11685_v57, %v11685_v57  ;;  %v1217_v10 = vsel %vm840_vm0, %v1097_v4, 0.0  ;;  %v11689_v4 = vld [vmem:[#allocation62_spill] sm:$0xff] }
 0x2b8   :  { %v1212_v36 = vadd.f32 %v1211_v14, %v1210_v30  ;;  %v1100_v30 = vmul.f32 %v11686_v59, %v11686_v59  ;;  %v1219_v14 = vsel %vm840_vm0, %v1098_v29, 0.0 }
 0x2ba   :  { %v1214_v33 = vadd.f32 %v1213_v48, %v1212_v36  ;;  %v1101_v36 = vmul.f32 %v11687_v54, %v11687_v54  ;;  %v1221_v48 = vsel %vm840_vm0, %v1099_v22, 0.0 }
 0x2bc   :  { %v1216_v1 = vadd.f32 %v1215_v2, %v1214_v33  ;;  %v1102_v33 = vmul.f32 %v11688_v51, %v11688_v51  ;;  %v1223_v2 = vsel %vm840_vm0, %v1100_v30, 0.0 }
 0x2be   :  { %v1218_v18 = vadd.f32 %v1217_v10, %v1216_v1  ;;  %v1103_v1 = vmul.f32 %v11689_v4, %v11689_v4  ;;  %v1225_v10 = vsel %vm840_vm0, %v1101_v36, 0.0 }
 0x2c0   :  { %v1220_v58 = vadd.f32 %v1219_v14, %v1218_v18  ;;  %v1227_v18 = vsel %vm840_vm0, %v1102_v33, 0.0  ;;  %v1229_v14 = vsel %vm840_vm0, %v1103_v1, 0.0  ;;  %v1809_v1 = vld [vmem:[#allocation2 + $0xa0] sm:$0xff] }
 0x2c2   :  { %v1222_v41 = vadd.f32 %v1221_v48, %v1220_v58  ;;  %v1818_v48 = vshrl.u32 %v1817_v47, 7 }
 0x2c4   :  { %v1224_v57 = vadd.f32 %v1223_v2, %v1222_v41  ;;  %v7777_v23 = vsub.s32 0, %v1818_v48  ;;  %v7779_v41 = vsub.s32 1, %v1818_v48  ;;  %v7784_v33 = vsub.s32 2, %v1818_v48 }
 0x2c6   :  { %v1226_v59 = vadd.f32 %v1225_v10, %v1224_v57  ;;  %11690 = vst [vmem:[#allocation39_spill] sm:$0xff] %v7777_v23  ;;  %11691 = vst [vmem:[#allocation61_spill] sm:$0xff] %v7779_v41  ;;  %v245_v57 = vld [vmem:[%s11692_s30] sm:$0x1f] }
 0x2c7   :  { %11693 = vst [vmem:[#allocation63_spill] sm:$0xff] %v7784_v33  ;;  %v7790_v2 = vrot.slane %v245_v57, %v7779_v41  ;;  %v1862_v10 = vld [vmem:[#allocation2 + $0x1e0] sm:$0xff] }
 0x2c8   :  { %v1228_v29 = vadd.f32 %v1227_v18, %v1226_v59  ;;  %v7787_v59 = vrot.slane %v245_v57, %v7777_v23 }
 0x2c9   :  { %11695 = vst [vmem:[#allocation65_spill] sm:$0xff] %v7790_v2 }
 0x2ca   :  { %v1230_v22 = vadd.f32 %v1229_v14, %v1228_v29  ;;  %11694 = vst [vmem:[#allocation64_spill] sm:$0xff] %v7787_v59  ;;  %v7793_v29 = vrot.slane %v245_v57, %v7784_v33  ;;  %v7797_v14 = vsub.s32 3, %v1818_v48 }
 0x2cc   :  { %v1231_v58 = vrot.slane %v1230_v22, 4  ;;  %11696 = vst [vmem:[#allocation66_spill] sm:$0xff] %v7793_v29  ;;  %11697 = vst [vmem:[#allocation67_spill] sm:$0xff] %v7797_v14 }
 0x2ce   :  { %v1232_v0 = vadd.f32 %v1231_v58, %v1230_v22  ;;  %v1914_v58 = vld [vmem:[#allocation2 + $0xa1] sm:$0xff] }
 0x2cf   :  { %v1934_v28 = vmul.f32 %v7793_v29, %v1914_v58  ;;  %v7823_v58 = vld [vmem:[%s11702_s5] ss:$0 sm:$0xff] }
 0x2d0   :  { %v1233_v21 = vrot.slane %v1232_v0, 2  ;;  %11703 = vst [vmem:[#allocation72_spill] sm:$0xff] %v7823_v58 }
 0x2d2   :  { %v1234_v30 = vadd.f32 %v1233_v21, %v1232_v0  ;;  %v1829_v21 = vmul.f32 %v7787_v59, %v1809_v1  ;;  %v1882_v0 = vmul.f32 %v7790_v2, %v1862_v10  ;;  %v1966_v1 = vld [vmem:[#allocation2 + $0x1e1] sm:$0xff] }
 0x2d4   :  { %v1235_v36 = vrot.slane %v1234_v30, 1  ;;  %v1898_v4 = vadd.f32 %v1882_v0, %v1829_v21  ;;  %v2018_v0 = vld [vmem:[#allocation2 + $0xa2] sm:$0xff] }
 0x2d6   :  { %v1236_v47 = vadd.f32 %v1235_v36, %v1234_v30  ;;  %v7801_v30 = vrot.slane %v245_v57, %v7797_v14  ;;  %v7803_v36 = vsub.s32 4, %v1818_v48  ;;  %v1950_v10 = vadd.f32 %v1934_v28, %v1898_v4 }
 0x2d8   :  { %v1237_v18 = vmul.f32 0.001953125, %v1236_v47  ;;  %11698 = vst [vmem:[#allocation68_spill] sm:$0xff] %v7801_v30  ;;  %11699 = vst [vmem:[#allocation69_spill] sm:$0xff] %v7803_v36  ;;  %v7808_v47 = vld [vmem:[%s11692_s30 + $0x8] sm:$0x1f]  ;;  %v1986_v11 = vmul.f32 %v7801_v30, %v1966_v1 }
 0x2d9   :  { %v7816_v21 = vrot.slane %v7808_v47, %v7777_v23 }
 0x2da   :  { %v1238_v22 = vadd.f32 1e-05, %v1237_v18  ;;  %v7812_v18 = vrot.slane %v245_v57, %v7803_v36  ;;  %v2002_v12 = vadd.f32 %v1986_v11, %v1950_v10 }
 0x2db   :  { %11701 = vst [vmem:[#allocation71_spill] sm:$0xff] %v7816_v21 }
 0x2dc   :  { %6128 = vrsqrt.f32 %v1238_v22  ;;  %11700 = vst [vmem:[#allocation70_spill] sm:$0xff] %v7812_v18  ;;  %v2071_v22 = vld [vmem:[#allocation2 + $0x320] sm:$0xff]  ;;  %v2038_v28 = vmul.f32 %v7812_v18, %v2018_v0 }
 0x2dd   :  { %v7827_v4 = vmul.f32 %v7816_v21, %v2071_v22  ;;  %v7845_v22 = vld [vmem:[#allocation9] ss:$0 sm:$0xff] }
 0x2de   :  { %11704 = vst [vmem:[#allocation73_spill] sm:$0xff] %v7845_v22 }
 0x2e6   :  { %v7818_v48 = vpop.eup %6128 }
 0x2e7   :  { %v1253_v57 = vmul.f32 %v7818_v48, %v7383_v26  ;;  %v1254_v1 = vmul.f32 %v7818_v48, %v7387_v25  ;;  %v1255_v60 = vmul.f32 %v7818_v48, %v7391_v32  ;;  %v1269_v63 = vmul.f32 %v7818_v48, %v7447_v17 }
 0x2e8   :  { %v1270_v11 = vmul.f32 %v7818_v48, %v7451_v16  ;;  %v1271_v10 = vmul.f32 %v7818_v48, %v7455_v27  ;;  %v1285_v0 = vmul.f32 %v7818_v48, %v7511_v40  ;;  %v1286_v26 = vmul.f32 %v7818_v48, %v7515_v39 }
 0x2e9   :  { %v1301_v25 = vmul.f32 %v7818_v48, %v11687_v54  ;;  %v1302_v32 = vmul.f32 %v7818_v48, %v11688_v51  ;;  %v1323_v17 = vmul.f32 %v7823_v58, %v1253_v57  ;;  %v1324_v16 = vmul.f32 %v7823_v58, %v1254_v1 }
 0x2ea   :  { %v1325_v27 = vmul.f32 %v7823_v58, %v1255_v60  ;;  %v1339_v52 = vmul.f32 %v7823_v58, %v1269_v63  ;;  %v1340_v40 = vmul.f32 %v7823_v58, %v1270_v11  ;;  %v1341_v39 = vmul.f32 %v7823_v58, %v1271_v10 }
 0x2eb   :  { %v1355_v53 = vmul.f32 %v7823_v58, %v1285_v0  ;;  %v1356_v42 = vmul.f32 %v7823_v58, %v1286_v26  ;;  %v1371_v54 = vmul.f32 %v7823_v58, %v1301_v25  ;;  %v1372_v51 = vmul.f32 %v7823_v58, %v1302_v32 }
 0x2ec   :  { %v1393_v57 = vadd.f32 %v7845_v22, %v1323_v17  ;;  %v1394_v1 = vadd.f32 %v7845_v22, %v1324_v16  ;;  %v1395_v60 = vadd.f32 %v7845_v22, %v1325_v27  ;;  %v1409_v63 = vadd.f32 %v7845_v22, %v1339_v52 }
 0x2ed   :  { %v1410_v11 = vadd.f32 %v7845_v22, %v1340_v40  ;;  %v1411_v10 = vadd.f32 %v7845_v22, %v1341_v39  ;;  %v1425_v0 = vadd.f32 %v7845_v22, %v1355_v53  ;;  %v1426_v26 = vadd.f32 %v7845_v22, %v1356_v42 }
 0x2ee   :  { %v1441_v25 = vadd.f32 %v7845_v22, %v1371_v54  ;;  %v1442_v32 = vadd.f32 %v7845_v22, %v1372_v51  ;;  %v1457_v58 = vmax.f32 %v1393_v57, 0.0  ;;  %v1458_v17 = vmax.f32 %v1394_v1, 0.0  ;;  %v7874_v51 = vld [vmem:[%s11692_s30 + $0x10] sm:$0x1f]  ;;  %v11751_v22 = vld [vmem:[#allocation31_spill] sm:$0xff] }
 0x2ef   :  { %v1459_v45 = vmax.f32 %v1395_v60, 0.0  ;;  %v1473_v16 = vmax.f32 %v1409_v63, 0.0  ;;  %v1474_v34 = vmax.f32 %v1410_v11, 0.0  ;;  %v1475_v27 = vmax.f32 %v1411_v10, 0.0  ;;  %11705 = vst [vmem:[#allocation74_spill] sm:$0xff] %v7874_v51  ;;  %v11718_v10 = vld [vmem:[#allocation43_spill] sm:$0xff] }
 0x2f0   :  { %v1489_v35 = vmax.f32 %v1425_v0, 0.0  ;;  %v1490_v52 = vmax.f32 %v1426_v26, 0.0  ;;  %v1505_v21 = vmax.f32 %v1441_v25, 0.0  ;;  %v1506_v40 = vmax.f32 %v1442_v32, 0.0  ;;  %v11719_v26 = vld [vmem:[#allocation44_spill] sm:$0xff] }
 0x2f1   :  { %v1521_v24 = vmin.f32 %v1457_v58, 6.0  ;;  %v1522_v39 = vmin.f32 %v1458_v17, 6.0  ;;  %v1523_v6 = vmin.f32 %v1459_v45, 6.0  ;;  %v1537_v53 = vmin.f32 %v1473_v16, 6.0 }
 0x2f2   :  { %v1538_v7 = vmin.f32 %v1474_v34, 6.0  ;;  %v1539_v42 = vmin.f32 %v1475_v27, 6.0  ;;  %v1553_v61 = vmin.f32 %v1489_v35, 6.0  ;;  %v1554_v54 = vmin.f32 %v1490_v52, 6.0  ;;  %v2124_v35 = vld [vmem:[#allocation2 + $0x460] sm:$0xff] }
 0x2f3   :  { %v2054_v57 = vadd.f32 %v2038_v28, %v2002_v12  ;;  %v7878_v1 = vrot.slane %v7808_v47, %v7779_v41  ;;  %v1569_v60 = vmin.f32 %v1505_v21, 6.0  ;;  %v1570_v63 = vmin.f32 %v1506_v40, 6.0  ;;  %1747 = vst.msk [vmem:[#allocation2 + $0x101] sm:$0xff] %vm840_vm0, %v1521_v24  ;;  %1748 = vst.msk [vmem:[#allocation2 + $0x111] sm:$0xff] %vm840_vm0, %v1522_v39 }
 0x2f4   :  { %1749 = vst.msk [vmem:[#allocation2 + $0x121] sm:$0xff] %vm840_vm0, %v1523_v6  ;;  %1764 = vst.msk [vmem:[#allocation2 + $0x241] sm:$0xff] %vm840_vm0, %v1537_v53  ;;  %v7892_v24 = vrot.slane %v7874_v51, %v7784_v33  ;;  %v7896_v6 = vrot.slane %v7808_v47, %v7784_v33  ;;  %v7914_v12 = vrot.slane %v7874_v51, %v7779_v41  ;;  %v11728_v33 = vld [vmem:[#allocation71_spill] sm:$0xff] }
 0x2f5   :  { %11706 = vst [vmem:[#allocation75_spill] sm:$0xff] %v7878_v1  ;;  %1765 = vst.msk [vmem:[#allocation2 + $0x251] sm:$0xff] %vm840_vm0, %v1538_v7  ;;  %v7900_v7 = vrot.slane %v7808_v47, %v7797_v14  ;;  %v7907_v34 = vadd.f32 %v7827_v4, %v2054_v57  ;;  %v7910_v45 = vmul.f32 %v7878_v1, %v2124_v35  ;;  %v11717_v4 = vld [vmem:[#allocation42_spill] sm:$0xff] }
 0x2f6   :  { %1766 = vst.msk [vmem:[#allocation2 + $0x261] sm:$0xff] %vm840_vm0, %v1539_v42  ;;  %1781 = vst.msk [vmem:[#allocation2 + $0x381] sm:$0xff] %vm840_vm0, %v1553_v61  ;;  %v7904_v61 = vrot.slane %v7808_v47, %v7803_v36  ;;  %v7918_v21 = vrot.slane %v7874_v51, %v7777_v23  ;;  %v7922_v58 = vrot.slane %v7874_v51, %v7797_v14  ;;  %v11716_v47 = vld [vmem:[#allocation41_spill] sm:$0xff] }
 0x2f7   :  { %1782 = vst.msk [vmem:[#allocation2 + $0x391] sm:$0xff] %vm840_vm0, %v1554_v54  ;;  %1798 = vst.msk [vmem:[#allocation2 + $0x4c1] sm:$0xff] %vm840_vm0, %v1569_v60  ;;  %v7926_v28 = vmul.f32 %v7818_v48, %v11716_v47  ;;  %v7930_v11 = vmul.f32 %v7818_v48, %v11717_v4  ;;  %v7934_v0 = vmul.f32 %v7818_v48, %v11718_v10 }
 0x2f8   :  { %1799 = vst.msk [vmem:[#allocation2 + $0x4d1] sm:$0xff] %vm840_vm0, %v1570_v63  ;;  %11707 = vst [vmem:[#allocation76_spill] sm:$0xff] %v7892_v24  ;;  %v7938_v25 = vmul.f32 %v7818_v48, %v11719_v26  ;;  %v7942_v32 = vmul.f32 %v7818_v48, %v7347_v46  ;;  %v7946_v17 = vmul.f32 %v7818_v48, %v7351_v5 }
 0x2f9   :  { %11708 = vst [vmem:[#allocation77_spill] sm:$0xff] %v7896_v6  ;;  %11709 = vst [vmem:[#allocation78_spill] sm:$0xff] %v7900_v7  ;;  %v7950_v16 = vmul.f32 %v7818_v48, %v7355_v3  ;;  %v7954_v39 = vmul.f32 %v7818_v48, %v7359_v9  ;;  %v7958_v53 = vmul.f32 %v7818_v48, %v7363_v8 }
 0x2fa   :  { %11710 = vst [vmem:[#allocation79_spill] sm:$0xff] %v7904_v61  ;;  %11711 = vst [vmem:[#allocation80_spill] sm:$0xff] %v7907_v34  ;;  %v1815_v27 = vld [vmem:[#allocation2 + $0x100] sm:$0xff]  ;;  %v1816_v52 = vld [vmem:[#allocation2 + $0x110] sm:$0xff]  ;;  %v7962_v46 = vmul.f32 %v7818_v48, %v7367_v15  ;;  %v7966_v5 = vmul.f32 %v7818_v48, %v7371_v13  ;;  %v7975_v8 = vmul.f32 %v7818_v48, %v7375_v20 }
 0x2fb   :  { %11712 = vst [vmem:[#allocation81_spill] sm:$0xff] %v7910_v45  ;;  %11713 = vst [vmem:[#allocation82_spill] sm:$0xff] %v7914_v12  ;;  %v1868_v40 = vld [vmem:[#allocation2 + $0x240] sm:$0xff]  ;;  %v1835_v3 = vmul.f32 %v7787_v59, %v1815_v27  ;;  %v1836_v42 = vmul.f32 %v7787_v59, %v1816_v52  ;;  %v7971_v60 = vld [vmem:[#allocation2 + $0x111] sm:$0xff]  ;;  %v7980_v13 = vmul.f32 %v7818_v48, %v7379_v19 }
 0x2fc   :  { %11714 = vst [vmem:[#allocation83_spill] sm:$0xff] %v7918_v21  ;;  %11715 = vst [vmem:[#allocation84_spill] sm:$0xff] %v7922_v58  ;;  %v1869_v54 = vld [vmem:[#allocation2 + $0x250] sm:$0xff]  ;;  %v1888_v9 = vmul.f32 %v7790_v2, %v1868_v40  ;;  %v1920_v57 = vld [vmem:[#allocation2 + $0x101] sm:$0xff]  ;;  %v7984_v35 = vmul.f32 %v7818_v48, %v7395_v31  ;;  %v7988_v47 = vmul.f32 %v7818_v48, %v7399_v38 }
 0x2fd   :  { %v1889_v15 = vmul.f32 %v7790_v2, %v1869_v54  ;;  %v1972_v63 = vld [vmem:[#allocation2 + $0x241] sm:$0xff]  ;;  %v1940_v10 = vmul.f32 %v7793_v29, %v1920_v57  ;;  %v7991_v20 = vld [vmem:[#allocation2 + $0x251] sm:$0xff]  ;;  %v7995_v26 = vmul.f32 %v7818_v48, %v7403_v37  ;;  %v7999_v19 = vmul.f32 %v7818_v48, %v7407_v44 }
 0x2fe   :  { %v1904_v4 = vadd.f32 %v1888_v9, %v1835_v3  ;;  %11720 = vst [vmem:[#allocation41_spill] sm:$0xff] %v7991_v20  ;;  %v1941_v31 = vmul.f32 %v7793_v29, %v7971_v60  ;;  %v2024_v40 = vld [vmem:[#allocation2 + $0x102] sm:$0xff]  ;;  %v8005_v38 = vmul.f32 %v7818_v48, %v7411_v43  ;;  %v8009_v3 = vmul.f32 %v7818_v48, %v7415_v50  ;;  %v8012_v57 = vld [vmem:[#allocation2 + $0x112] sm:$0xff] }
 0x2ff   :  { %v1905_v27 = vadd.f32 %v1889_v15, %v1836_v42  ;;  %v1992_v37 = vmul.f32 %v7801_v30, %v1972_v63  ;;  %11721 = vst [vmem:[#allocation42_spill] sm:$0xff] %v8012_v57  ;;  %v8016_v44 = vmul.f32 %v7818_v48, %v7419_v49  ;;  %v8020_v42 = vmul.f32 %v7818_v48, %v7423_v56  ;;  %v2077_v29 = vld [vmem:[#allocation2 + $0x380] sm:$0xff]  ;;  %v11723_v56 = vld [vmem:[#allocation45_spill] sm:$0xff]  ;;  %v11750_v34 = vld [vmem:[#allocation32_spill] sm:$0xff] }
 0x300   :  { %v1956_v9 = vadd.f32 %v1940_v10, %v1904_v4  ;;  %v1993_v43 = vmul.f32 %v7801_v30, %v7991_v20  ;;  %v8026_v50 = vmul.f32 %v7818_v48, %v7427_v55  ;;  %v8030_v63 = vmul.f32 %v7818_v48, %v7431_v62  ;;  %v8033_v10 = vld [vmem:[#allocation2 + $0x390] sm:$0xff]  ;;  %v2130_v59 = vld [vmem:[#allocation2 + $0x4c0] sm:$0xff] }
 0x301   :  { %v1957_v15 = vadd.f32 %v1941_v31, %v1905_v27  ;;  %v2044_v49 = vmul.f32 %v7812_v18, %v2024_v40  ;;  %11722 = vst [vmem:[#allocation43_spill] sm:$0xff] %v8033_v10  ;;  %v8037_v27 = vmul.f32 %v7818_v48, %v11723_v56  ;;  %v11724_v31 = vld [vmem:[#allocation46_spill] sm:$0xff]  ;;  %v2045_v55 = vmul.f32 %v7812_v18, %v8012_v57  ;;  %v8045_v62 = vld [vmem:[#allocation2 + $0x4d0] sm:$0xff]  ;;  %v11732_v58 = vld [vmem:[#allocation51_spill] sm:$0xff] }
 0x302   :  { %v2008_v4 = vadd.f32 %v1992_v37, %v1956_v9  ;;  %v8041_v30 = vmul.f32 %v7818_v48, %v11724_v31  ;;  %11725 = vst [vmem:[#allocation44_spill] sm:$0xff] %v8045_v62  ;;  %v11726_v9 = vld [vmem:[#allocation47_spill] sm:$0xff]  ;;  %v11727_v37 = vld [vmem:[#allocation48_spill] sm:$0xff]  ;;  %v2097_v41 = vmul.f32 %v11728_v33, %v2077_v29  ;;  %v2183_v23 = vld [vmem:[#allocation2 + $0x391] sm:$0xff]  ;;  %v2098_v36 = vmul.f32 %v11728_v33, %v8033_v10 }
 0x303   :  { %v2009_v2 = vadd.f32 %v1993_v43, %v1957_v15  ;;  %v8049_v40 = vmul.f32 %v7818_v48, %v11726_v9  ;;  %v8053_v14 = vmul.f32 %v7818_v48, %v11727_v37  ;;  %v2182_v31 = vld [vmem:[#allocation2 + $0x381] sm:$0xff]  ;;  %v11729_v43 = vld [vmem:[#allocation49_spill] sm:$0xff]  ;;  %v11730_v57 = vld [vmem:[#allocation50_spill] sm:$0xff]  ;;  %v8069_v29 = vmul.f32 %v7918_v21, %v1816_v52 }
 0x304   :  { %v2060_v56 = vadd.f32 %v2044_v49, %v2008_v4  ;;  %v2234_v15 = vld [vmem:[#allocation2 + $0x4c1] sm:$0xff]  ;;  %v8058_v18 = vmul.f32 %v7818_v48, %v11729_v43  ;;  %v8062_v51 = vmul.f32 %v7818_v48, %v11730_v57  ;;  %v8066_v37 = vld [vmem:[#allocation2 + $0x4d1] sm:$0xff]  ;;  %v8073_v20 = vmul.f32 %v7818_v48, %v11732_v58 }
 0x305   :  { %v2061_v9 = vadd.f32 %v2045_v55, %v2009_v2  ;;  %11731 = vst [vmem:[#allocation45_spill] sm:$0xff] %v8066_v37  ;;  %v2286_v4 = vld [vmem:[#allocation2 + $0x382] sm:$0xff]  ;;  %v2287_v49 = vld [vmem:[#allocation2 + $0x392] sm:$0xff]  ;;  %v2150_v45 = vmul.f32 %v7878_v1, %v2130_v59  ;;  %v2151_v2 = vmul.f32 %v7878_v1, %v8045_v62  ;;  %v8079_v57 = vmul.f32 %v7914_v12, %v1869_v54 }
 0x306   :  { %v2113_v43 = vadd.f32 %v2097_v41, %v2060_v56  ;;  %v2202_v33 = vmul.f32 %v7896_v6, %v2182_v31  ;;  %v2203_v10 = vmul.f32 %v7896_v6, %v2183_v23  ;;  %v2254_v52 = vmul.f32 %v7900_v7, %v2234_v15  ;;  %v11737_v23 = vld [vmem:[#allocation53_spill] sm:$0xff]  ;;  %v11740_v1 = vld [vmem:[#allocation56_spill] sm:$0xff]  ;;  %v11743_v62 = vld [vmem:[#allocation59_spill] sm:$0xff] }
 0x307   :  { %11733 = vst [vmem:[#allocation46_spill] sm:$0xff] %v8079_v57  ;;  %v2114_v55 = vadd.f32 %v2098_v36, %v2061_v9  ;;  %v2255_v58 = vmul.f32 %v7900_v7, %v8066_v37  ;;  %v2306_v41 = vmul.f32 %v7904_v61, %v2286_v4  ;;  %v8088_v59 = vmul.f32 %v7904_v61, %v2287_v49  ;;  %v11736_v36 = vld [vmem:[#allocation52_spill] sm:$0xff]  ;;  %v11745_v61 = vld [vmem:[#allocation26_spill] sm:$0xff]  ;;  %v11749_v6 = vld [vmem:[#allocation29_spill] sm:$0xff] }
 0x308   :  { %v2166_v21 = vadd.f32 %v2150_v45, %v2113_v43  ;;  %v8092_v54 = vmul.f32 %v7892_v24, %v7971_v60  ;;  %v1276_v31 = vmul.f32 %v7818_v48, %v11736_v36  ;;  %v1277_v15 = vmul.f32 %v7818_v48, %v11737_v23  ;;  %v11738_v45 = vld [vmem:[#allocation54_spill] sm:$0xff]  ;;  %v11739_v43 = vld [vmem:[#allocation55_spill] sm:$0xff]  ;;  %v11744_v24 = vld [vmem:[#allocation60_spill] sm:$0xff] }
 0x309   :  { %11734 = vst [vmem:[#allocation47_spill] sm:$0xff] %v8088_v59  ;;  %v2167_v56 = vadd.f32 %v2151_v2, %v2114_v55  ;;  %v1278_v9 = vmul.f32 %v7818_v48, %v11738_v45  ;;  %v1279_v4 = vmul.f32 %v7818_v48, %v11739_v43  ;;  %v1280_v49 = vmul.f32 %v7818_v48, %v11740_v1  ;;  %v11741_v2 = vld [vmem:[#allocation57_spill] sm:$0xff]  ;;  %v11742_v60 = vld [vmem:[#allocation58_spill] sm:$0xff]  ;;  %v11746_v43 = vld [vmem:[#allocation28_spill] sm:$0xff] }
 0x30a   :  { %11735 = vst [vmem:[#allocation48_spill] sm:$0xff] %v8092_v54  ;;  %v1281_v55 = vmul.f32 %v7818_v48, %v11741_v2  ;;  %v1282_v37 = vmul.f32 %v7818_v48, %v11742_v60  ;;  %v1283_v36 = vmul.f32 %v7818_v48, %v11743_v62  ;;  %v1284_v23 = vmul.f32 %v7818_v48, %v11744_v24  ;;  %v11747_v1 = vld [vmem:[#allocation27_spill] sm:$0xff]  ;;  %v11748_v2 = vld [vmem:[#allocation30_spill] sm:$0xff] }
 0x30b   :  { %v1287_v45 = vmul.f32 %v7818_v48, %v11745_v61  ;;  %v2218_v12 = vadd.f32 %v2202_v33, %v2166_v21  ;;  %v1288_v7 = vmul.f32 %v7818_v48, %v11746_v43  ;;  %v1289_v54 = vmul.f32 %v7818_v48, %v11747_v1  ;;  %v11752_v33 = vld [vmem:[#allocation34_spill] sm:$0xff]  ;;  %v11753_v43 = vld [vmem:[#allocation72_spill] sm:$0xff] }
 0x30c   :  { %v1290_v59 = vmul.f32 %v7818_v48, %v11748_v2  ;;  %v2219_v60 = vadd.f32 %v2203_v10, %v2167_v56  ;;  %v1291_v62 = vmul.f32 %v7818_v48, %v11749_v6  ;;  %v1292_v24 = vmul.f32 %v7818_v48, %v11750_v34  ;;  %v11754_v10 = vld [vmem:[#allocation33_spill] sm:$0xff] }
 0x30d   :  { %v1293_v61 = vmul.f32 %v7818_v48, %v11751_v22  ;;  %v1294_v21 = vmul.f32 %v7818_v48, %v11752_v33  ;;  %v8130_v57 = vmul.f32 %v11753_v43, %v7926_v28  ;;  %v8134_v1 = vmul.f32 %v11753_v43, %v7930_v11  ;;  %v11756_v33 = vld [vmem:[#allocation36_spill] sm:$0xff] }
 0x30e   :  { %v8138_v6 = vmul.f32 %v11753_v43, %v7934_v0  ;;  %v1295_v34 = vmul.f32 %v7818_v48, %v11754_v10  ;;  %v8144_v22 = vmul.f32 %v11753_v43, %v7938_v25  ;;  %v8148_v56 = vmul.f32 %v11753_v43, %v7942_v32 }
 0x30f   :  { %v8152_v28 = vmul.f32 %v11753_v43, %v7946_v17  ;;  %v2270_v11 = vadd.f32 %v2254_v52, %v2218_v12  ;;  %v8156_v0 = vmul.f32 %v11753_v43, %v7950_v16  ;;  %v8160_v2 = vmul.f32 %v11753_v43, %v7954_v39  ;;  %v11760_v39 = vld [vmem:[#allocation35_spill] sm:$0xff] }
 0x310   :  { %v8164_v25 = vmul.f32 %v11753_v43, %v7958_v53  ;;  %v1296_v32 = vmul.f32 %v7818_v48, %v11756_v33  ;;  %v8170_v17 = vmul.f32 %v11753_v43, %v7962_v46  ;;  %v8174_v12 = vmul.f32 %v11753_v43, %v7966_v5  ;;  %v11761_v33 = vld [vmem:[#allocation38_spill] sm:$0xff] }
 0x311   :  { %v8178_v16 = vmul.f32 %v11753_v43, %v7975_v8  ;;  %v1297_v52 = vmul.f32 %v7818_v48, %v11760_v39  ;;  %v1322_v53 = vmul.f32 %v11753_v43, %v7980_v13  ;;  %v1326_v10 = vmul.f32 %v11753_v43, %v7984_v35 }
 0x312   :  { %11755 = vst [vmem:[#allocation49_spill] sm:$0xff] %v8164_v25  ;;  %11757 = vst [vmem:[#allocation50_spill] sm:$0xff] %v8170_v17  ;;  %v1327_v46 = vmul.f32 %v11753_v43, %v7988_v47  ;;  %v1298_v5 = vmul.f32 %v7818_v48, %v11761_v33  ;;  %v1329_v8 = vmul.f32 %v11753_v43, %v7999_v19 }
 0x313   :  { %11758 = vst [vmem:[#allocation51_spill] sm:$0xff] %v8174_v12  ;;  %11759 = vst [vmem:[#allocation52_spill] sm:$0xff] %v8178_v16  ;;  %v1328_v12 = vmul.f32 %v11753_v43, %v7995_v26  ;;  %v1330_v39 = vmul.f32 %v11753_v43, %v8005_v38  ;;  %v2322_v16 = vadd.f32 %v2306_v41, %v2270_v11  ;;  %v11763_v41 = vld [vmem:[#allocation37_spill] sm:$0xff] }
 0x314   :  { %v1331_v13 = vmul.f32 %v11753_v43, %v8009_v3  ;;  %v1332_v35 = vmul.f32 %v11753_v43, %v8016_v44  ;;  %v1333_v47 = vmul.f32 %v11753_v43, %v8020_v42  ;;  %v8202_v33 = vadd.f32 %v2255_v58, %v2219_v60  ;;  %v11764_v60 = vld [vmem:[#allocation40_spill] sm:$0xff] }
 0x315   :  { %v1334_v26 = vmul.f32 %v11753_v43, %v8026_v50  ;;  %v1335_v19 = vmul.f32 %v11753_v43, %v8030_v63  ;;  %v1336_v38 = vmul.f32 %v11753_v43, %v8037_v27  ;;  %v1299_v3 = vmul.f32 %v7818_v48, %v11763_v41 }
 0x316   :  { %11762 = vst [vmem:[#allocation53_spill] sm:$0xff] %v8202_v33  ;;  %v1337_v44 = vmul.f32 %v11753_v43, %v8041_v30  ;;  %v1338_v42 = vmul.f32 %v11753_v43, %v8049_v40  ;;  %v1342_v58 = vmul.f32 %v11753_v43, %v8053_v14  ;;  %v1300_v50 = vmul.f32 %v7818_v48, %v11764_v60 }
 0x317   :  { %v1343_v63 = vmul.f32 %v11753_v43, %v8058_v18  ;;  %v1344_v27 = vmul.f32 %v11753_v43, %v8062_v51  ;;  %v1345_v11 = vmul.f32 %v11753_v43, %v8073_v20  ;;  %v2374_v30 = vadd.f32 %v8069_v29, %v2322_v16  ;;  %v11765_v51 = vld [vmem:[#allocation62_spill] sm:$0xff] }
 0x318   :  { %v1346_v41 = vmul.f32 %v11753_v43, %v1276_v31  ;;  %v1347_v40 = vmul.f32 %v11753_v43, %v1277_v15  ;;  %v1348_v14 = vmul.f32 %v11753_v43, %v1278_v9  ;;  %v1349_v33 = vmul.f32 %v11753_v43, %v1279_v4 }
 0x319   :  { %v1350_v60 = vmul.f32 %v11753_v43, %v1280_v49  ;;  %v1351_v18 = vmul.f32 %v11753_v43, %v1281_v55  ;;  %v1352_v17 = vmul.f32 %v11753_v43, %v1282_v37  ;;  %v1303_v25 = vmul.f32 %v7818_v48, %v11765_v51  ;;  %v11766_v55 = vld [vmem:[#allocation46_spill] sm:$0xff] }
 0x31a   :  { %v1353_v20 = vmul.f32 %v11753_v43, %v1283_v36  ;;  %v1354_v29 = vmul.f32 %v11753_v43, %v1284_v23  ;;  %v1357_v31 = vmul.f32 %v11753_v43, %v1287_v45  ;;  %v1358_v15 = vmul.f32 %v11753_v43, %v1288_v7 }
 0x31b   :  { %v1359_v9 = vmul.f32 %v11753_v43, %v1289_v54  ;;  %v1360_v4 = vmul.f32 %v11753_v43, %v1290_v59  ;;  %v1361_v49 = vmul.f32 %v11753_v43, %v1291_v62  ;;  %v8244_v16 = vadd.f32 %v11766_v55, %v2374_v30 }
 0x31c   :  { %v1362_v37 = vmul.f32 %v11753_v43, %v1292_v24  ;;  %v1363_v48 = vmul.f32 %v11753_v43, %v1293_v61  ;;  %v1364_v36 = vmul.f32 %v11753_v43, %v1294_v21  ;;  %v1365_v23 = vmul.f32 %v11753_v43, %v1295_v34  ;;  %v11768_v24 = vld [vmem:[#allocation73_spill] sm:$0xff] }
 0x31d   :  { %11767 = vst [vmem:[#allocation54_spill] sm:$0xff] %v8244_v16  ;;  %v1366_v45 = vmul.f32 %v11753_v43, %v1296_v32  ;;  %v1367_v7 = vmul.f32 %v11753_v43, %v1297_v52  ;;  %v1368_v54 = vmul.f32 %v11753_v43, %v1298_v5  ;;  %v1369_v59 = vmul.f32 %v11753_v43, %v1299_v3  ;;  %v11771_v52 = vld [vmem:[#allocation51_spill] sm:$0xff]  ;;  %v11772_v5 = vld [vmem:[#allocation52_spill] sm:$0xff] }
 0x31e   :  { %v1370_v62 = vmul.f32 %v11753_v43, %v1300_v50  ;;  %v1373_v30 = vmul.f32 %v11753_v43, %v1303_v25  ;;  %v8258_v51 = vadd.f32 %v11768_v24, %v8130_v57  ;;  %v8262_v61 = vadd.f32 %v11768_v24, %v8134_v1  ;;  %v11770_v25 = vld [vmem:[#allocation50_spill] sm:$0xff] }
 0x31f   :  { %v8266_v21 = vadd.f32 %v11768_v24, %v8138_v6  ;;  %v8270_v34 = vadd.f32 %v11768_v24, %v8144_v22  ;;  %v8274_v32 = vadd.f32 %v11768_v24, %v8148_v56  ;;  %v8278_v57 = vadd.f32 %v11768_v24, %v8152_v28  ;;  %v11769_v6 = vld [vmem:[#allocation49_spill] sm:$0xff] }
 0x320   :  { %v8282_v43 = vadd.f32 %v11768_v24, %v8156_v0  ;;  %v8286_v1 = vadd.f32 %v11768_v24, %v8160_v2  ;;  %v8290_v22 = vadd.f32 %v11768_v24, %v11769_v6  ;;  %v8294_v56 = vadd.f32 %v11768_v24, %v11770_v25 }
 0x321   :  { %v8298_v28 = vadd.f32 %v11768_v24, %v11771_v52  ;;  %v8302_v0 = vadd.f32 %v11768_v24, %v11772_v5  ;;  %v8305_v3 = vadd.f32 %v11768_v24, %v1322_v53  ;;  %v8308_v2 = vadd.f32 %v11768_v24, %v1326_v10 }
 0x322   :  { %v8311_v50 = vadd.f32 %v11768_v24, %v1327_v46  ;;  %v8314_v55 = vadd.f32 %v11768_v24, %v1328_v12  ;;  %v8317_v6 = vadd.f32 %v11768_v24, %v1329_v8  ;;  %v8320_v25 = vadd.f32 %v11768_v24, %v1330_v39 }
 0x323   :  { %v8323_v52 = vadd.f32 %v11768_v24, %v1331_v13  ;;  %v8326_v53 = vadd.f32 %v11768_v24, %v1332_v35  ;;  %v8329_v10 = vadd.f32 %v11768_v24, %v1333_v47  ;;  %v8332_v46 = vadd.f32 %v11768_v24, %v1334_v26 }
 0x324   :  { %v8335_v12 = vadd.f32 %v11768_v24, %v1335_v19  ;;  %v8338_v8 = vadd.f32 %v11768_v24, %v1336_v38  ;;  %v8341_v39 = vadd.f32 %v11768_v24, %v1337_v44  ;;  %v8344_v13 = vadd.f32 %v11768_v24, %v1338_v42 }
 0x325   :  { %v8347_v35 = vadd.f32 %v11768_v24, %v1342_v58  ;;  %v8350_v47 = vadd.f32 %v11768_v24, %v1343_v63  ;;  %v8353_v26 = vadd.f32 %v11768_v24, %v1344_v27  ;;  %v8356_v19 = vadd.f32 %v11768_v24, %v1345_v11 }
 0x326   :  { %v8359_v38 = vadd.f32 %v11768_v24, %v1346_v41  ;;  %v8362_v44 = vadd.f32 %v11768_v24, %v1347_v40  ;;  %v8365_v42 = vadd.f32 %v11768_v24, %v1348_v14  ;;  %v8368_v58 = vadd.f32 %v11768_v24, %v1349_v33 }
 0x327   :  { %v8371_v63 = vadd.f32 %v11768_v24, %v1350_v60  ;;  %v8374_v27 = vadd.f32 %v11768_v24, %v1351_v18  ;;  %v8377_v11 = vadd.f32 %v11768_v24, %v1352_v17  ;;  %v8380_v41 = vadd.f32 %v11768_v24, %v1353_v20 }
 0x328   :  { %v8383_v40 = vadd.f32 %v11768_v24, %v1354_v29  ;;  %v8386_v14 = vadd.f32 %v11768_v24, %v1357_v31  ;;  %v8389_v33 = vadd.f32 %v11768_v24, %v1358_v15  ;;  %v8392_v60 = vadd.f32 %v11768_v24, %v1359_v9 }
 0x329   :  { %v8395_v18 = vadd.f32 %v11768_v24, %v1360_v4  ;;  %v8398_v17 = vadd.f32 %v11768_v24, %v1361_v49  ;;  %v8401_v20 = vadd.f32 %v11768_v24, %v1362_v37  ;;  %v8404_v29 = vadd.f32 %v11768_v24, %v1363_v48 }
 0x32a   :  { %v8407_v31 = vadd.f32 %v11768_v24, %v1364_v36  ;;  %v8410_v15 = vadd.f32 %v11768_v24, %v1365_v23  ;;  %v8413_v9 = vadd.f32 %v11768_v24, %v1366_v45  ;;  %v8416_v4 = vadd.f32 %v11768_v24, %v1367_v7 }
 0x32b   :  { %11773 = vst [vmem:[#allocation55_spill] sm:$0xff] %v8398_v17  ;;  %11774 = vst [vmem:[#allocation56_spill] sm:$0xff] %v8401_v20  ;;  %v8419_v49 = vadd.f32 %v11768_v24, %v1368_v54  ;;  %v8422_v37 = vadd.f32 %v11768_v24, %v1369_v59  ;;  %v8425_v48 = vadd.f32 %v11768_v24, %v1370_v62  ;;  %v1444_v23 = vmax.f32 %v8258_v51, 0.0 }
 0x32c   :  { %11775 = vst [vmem:[#allocation57_spill] sm:$0xff] %v8404_v29  ;;  %11776 = vst [vmem:[#allocation58_spill] sm:$0xff] %v8407_v31  ;;  %v8428_v36 = vadd.f32 %v11768_v24, %v1373_v30  ;;  %v1445_v45 = vmax.f32 %v8262_v61, 0.0  ;;  %v1446_v5 = vmax.f32 %v8266_v21, 0.0  ;;  %v1447_v7 = vmax.f32 %v8270_v34, 0.0 }
 0x32d   :  { %11777 = vst [vmem:[#allocation59_spill] sm:$0xff] %v8410_v15  ;;  %11778 = vst [vmem:[#allocation60_spill] sm:$0xff] %v8419_v49  ;;  %v1448_v54 = vmax.f32 %v8274_v32, 0.0  ;;  %v1449_v16 = vmax.f32 %v8278_v57, 0.0  ;;  %v1450_v59 = vmax.f32 %v8282_v43, 0.0  ;;  %v1451_v62 = vmax.f32 %v8286_v1, 0.0 }
 0x32e   :  { %11779 = vst [vmem:[#allocation26_spill] sm:$0xff] %v8425_v48  ;;  %v1452_v48 = vmax.f32 %v8290_v22, 0.0  ;;  %v1453_v30 = vmax.f32 %v8294_v56, 0.0  ;;  %v1454_v24 = vmax.f32 %v8298_v28, 0.0  ;;  %v1455_v51 = vmax.f32 %v8302_v0, 0.0 }
 0x32f   :  { %v1456_v61 = vmax.f32 %v8305_v3, 0.0  ;;  %v1460_v21 = vmax.f32 %v8308_v2, 0.0  ;;  %v1461_v34 = vmax.f32 %v8311_v50, 0.0  ;;  %v1462_v32 = vmax.f32 %v8314_v55, 0.0 }
 0x330   :  { %v1463_v57 = vmax.f32 %v8317_v6, 0.0  ;;  %v1465_v1 = vmax.f32 %v8323_v52, 0.0  ;;  %v1466_v22 = vmax.f32 %v8326_v53, 0.0  ;;  %v1467_v56 = vmax.f32 %v8329_v10, 0.0 }
 0x331   :  { %v1503_v28 = vmax.f32 %v8422_v37, 0.0  ;;  %v1507_v3 = vmax.f32 %v8428_v36, 0.0  ;;  %v1508_v17 = vmin.f32 %v1444_v23, 6.0  ;;  %v1509_v2 = vmin.f32 %v1445_v45, 6.0  ;;  %v11825_v36 = vld [vmem:[#allocation83_spill] sm:$0xff] }
 0x332   :  { %v1510_v20 = vmin.f32 %v1446_v5, 6.0  ;;  %v1511_v50 = vmin.f32 %v1447_v7, 6.0  ;;  %v1512_v29 = vmin.f32 %v1448_v54, 6.0  ;;  %v1513_v55 = vmin.f32 %v1449_v16, 6.0 }
 0x333   :  { %v1514_v31 = vmin.f32 %v1450_v59, 6.0  ;;  %v1515_v6 = vmin.f32 %v1451_v62, 6.0  ;;  %v1516_v15 = vmin.f32 %v1452_v48, 6.0  ;;  %1734 = vst.msk [vmem:[#allocation2 + $0x11] sm:$0xff] %vm840_vm0, %v1508_v17  ;;  %v1517_v53 = vmin.f32 %v1453_v30, 6.0  ;;  %1735 = vst.msk [vmem:[#allocation2 + $0x21] sm:$0xff] %vm840_vm0, %v1509_v2 }
 0x334   :  { %v1518_v52 = vmin.f32 %v1454_v24, 6.0  ;;  %v1519_v10 = vmin.f32 %v1455_v51, 6.0  ;;  %v1520_v49 = vmin.f32 %v1456_v61, 6.0  ;;  %1736 = vst.msk [vmem:[#allocation2 + $0x31] sm:$0xff] %vm840_vm0, %v1510_v20  ;;  %1737 = vst.msk [vmem:[#allocation2 + $0x41] sm:$0xff] %vm840_vm0, %v1511_v50  ;;  %v1524_v23 = vmin.f32 %v1460_v21, 6.0 }
 0x335   :  { %v11780_v43 = vld [vmem:[#allocation26_spill] sm:$0xff]  ;;  %1738 = vst.msk [vmem:[#allocation2 + $0x51] sm:$0xff] %vm840_vm0, %v1512_v29  ;;  %v1525_v45 = vmin.f32 %v1461_v34, 6.0  ;;  %v1526_v16 = vmin.f32 %v1462_v32, 6.0  ;;  %v1527_v5 = vmin.f32 %v1463_v57, 6.0  ;;  %1739 = vst.msk [vmem:[#allocation2 + $0x61] sm:$0xff] %vm840_vm0, %v1513_v55 }
 0x336   :  { %v1504_v0 = vmax.f32 %v11780_v43, 0.0  ;;  %1740 = vst.msk [vmem:[#allocation2 + $0x71] sm:$0xff] %vm840_vm0, %v1514_v31  ;;  %1741 = vst.msk [vmem:[#allocation2 + $0x81] sm:$0xff] %vm840_vm0, %v1515_v6  ;;  %v11781_v17 = vmax.f32 %v8320_v25, 0.0  ;;  %v1529_v20 = vmin.f32 %v1465_v1, 6.0  ;;  %v1530_v7 = vmin.f32 %v1466_v22, 6.0 }
 0x337   :  { %1742 = vst.msk [vmem:[#allocation2 + $0xb1] sm:$0xff] %vm840_vm0, %v1516_v15  ;;  %v1531_v54 = vmin.f32 %v1467_v56, 6.0  ;;  %1743 = vst.msk [vmem:[#allocation2 + $0xc1] sm:$0xff] %vm840_vm0, %v1517_v53  ;;  %v11782_v29 = vmax.f32 %v8332_v46, 0.0  ;;  %v11783_v59 = vmax.f32 %v8335_v12, 0.0  ;;  %v11784_v25 = vmax.f32 %v8338_v8, 0.0 }
 0x338   :  { %v1528_v48 = vmin.f32 %v11781_v17, 6.0  ;;  %1744 = vst.msk [vmem:[#allocation2 + $0xd1] sm:$0xff] %vm840_vm0, %v1518_v52  ;;  %1745 = vst.msk [vmem:[#allocation2 + $0xe1] sm:$0xff] %vm840_vm0, %v1519_v10  ;;  %v11785_v30 = vmax.f32 %v8341_v39, 0.0  ;;  %v11786_v46 = vmax.f32 %v8344_v13, 0.0  ;;  %v11787_v12 = vmax.f32 %v8347_v35, 0.0 }
 0x339   :  { %1746 = vst.msk [vmem:[#allocation2 + $0xf1] sm:$0xff] %vm840_vm0, %v1520_v49  ;;  %v1532_v31 = vmin.f32 %v11782_v29, 6.0  ;;  %v1533_v15 = vmin.f32 %v11783_v59, 6.0  ;;  %v1534_v62 = vmin.f32 %v11784_v25, 6.0  ;;  %1751 = vst.msk [vmem:[#allocation2 + $0x151] sm:$0xff] %vm840_vm0, %v1524_v23  ;;  %v11788_v8 = vmax.f32 %v8350_v47, 0.0 }
 0x33a   :  { %v1535_v24 = vmin.f32 %v11785_v30, 6.0  ;;  %1752 = vst.msk [vmem:[#allocation2 + $0x161] sm:$0xff] %vm840_vm0, %v1525_v45  ;;  %1753 = vst.msk [vmem:[#allocation2 + $0x171] sm:$0xff] %vm840_vm0, %v1526_v16  ;;  %v1536_v49 = vmin.f32 %v11786_v46, 6.0  ;;  %v1540_v51 = vmin.f32 %v11787_v12, 6.0  ;;  %v11789_v39 = vmax.f32 %v8353_v26, 0.0 }
 0x33b   :  { %1754 = vst.msk [vmem:[#allocation2 + $0x181] sm:$0xff] %vm840_vm0, %v1527_v5  ;;  %v1541_v61 = vmin.f32 %v11788_v8, 6.0  ;;  %1755 = vst.msk [vmem:[#allocation2 + $0x191] sm:$0xff] %vm840_vm0, %v1528_v48  ;;  %v11790_v13 = vmax.f32 %v8356_v19, 0.0  ;;  %v11791_v35 = vmax.f32 %v8359_v38, 0.0  ;;  %v11792_v47 = vmax.f32 %v8362_v44, 0.0 }
 0x33c   :  { %v1542_v21 = vmin.f32 %v11789_v39, 6.0  ;;  %1756 = vst.msk [vmem:[#allocation2 + $0x1a1] sm:$0xff] %vm840_vm0, %v1529_v20  ;;  %1757 = vst.msk [vmem:[#allocation2 + $0x1b1] sm:$0xff] %vm840_vm0, %v1530_v7  ;;  %v11793_v26 = vmax.f32 %v8365_v42, 0.0  ;;  %v11794_v19 = vmax.f32 %v8368_v58, 0.0  ;;  %v11795_v38 = vmax.f32 %v8371_v63, 0.0 }
 0x33d   :  { %1758 = vst.msk [vmem:[#allocation2 + $0x1c1] sm:$0xff] %vm840_vm0, %v1531_v54  ;;  %v1543_v34 = vmin.f32 %v11790_v13, 6.0  ;;  %v1544_v32 = vmin.f32 %v11791_v35, 6.0  ;;  %v1545_v57 = vmin.f32 %v11792_v47, 6.0  ;;  %1759 = vst.msk [vmem:[#allocation2 + $0x1f1] sm:$0xff] %vm840_vm0, %v1532_v31  ;;  %v11796_v44 = vmax.f32 %v8374_v27, 0.0 }
 0x33e   :  { %v1546_v1 = vmin.f32 %v11793_v26, 6.0  ;;  %1760 = vst.msk [vmem:[#allocation2 + $0x201] sm:$0xff] %vm840_vm0, %v1533_v15  ;;  %1761 = vst.msk [vmem:[#allocation2 + $0x211] sm:$0xff] %vm840_vm0, %v1534_v62  ;;  %v1547_v22 = vmin.f32 %v11794_v19, 6.0  ;;  %v1548_v56 = vmin.f32 %v11795_v38, 6.0  ;;  %v11797_v42 = vmax.f32 %v8377_v11, 0.0 }
 0x33f   :  { %1762 = vst.msk [vmem:[#allocation2 + $0x221] sm:$0xff] %vm840_vm0, %v1535_v24  ;;  %v1549_v2 = vmin.f32 %v11796_v44, 6.0  ;;  %1763 = vst.msk [vmem:[#allocation2 + $0x231] sm:$0xff] %vm840_vm0, %v1536_v49  ;;  %v11798_v58 = vmax.f32 %v8380_v41, 0.0  ;;  %v11799_v63 = vmax.f32 %v8383_v40, 0.0  ;;  %v11800_v27 = vmax.f32 %v8386_v14, 0.0 }
 0x340   :  { %v1550_v50 = vmin.f32 %v11797_v42, 6.0  ;;  %1768 = vst.msk [vmem:[#allocation2 + $0x291] sm:$0xff] %vm840_vm0, %v1540_v51  ;;  %1769 = vst.msk [vmem:[#allocation2 + $0x2a1] sm:$0xff] %vm840_vm0, %v1541_v61  ;;  %v11801_v11 = vmax.f32 %v8389_v33, 0.0  ;;  %v2176_v10 = vld [vmem:[#allocation2 + $0x321] sm:$0xff]  ;;  %v11802_v41 = vmax.f32 %v8392_v60, 0.0 }
 0x341   :  { %1770 = vst.msk [vmem:[#allocation2 + $0x2b1] sm:$0xff] %vm840_vm0, %v1542_v21  ;;  %v1551_v55 = vmin.f32 %v11798_v58, 6.0  ;;  %v1552_v6 = vmin.f32 %v11799_v63, 6.0  ;;  %v1555_v52 = vmin.f32 %v11800_v27, 6.0  ;;  %1771 = vst.msk [vmem:[#allocation2 + $0x2c1] sm:$0xff] %vm840_vm0, %v1543_v34  ;;  %v11803_v40 = vmax.f32 %v8395_v18, 0.0 }
 0x342   :  { %v1556_v53 = vmin.f32 %v11801_v11, 6.0  ;;  %1772 = vst.msk [vmem:[#allocation2 + $0x2d1] sm:$0xff] %vm840_vm0, %v1544_v32  ;;  %1773 = vst.msk [vmem:[#allocation2 + $0x2e1] sm:$0xff] %vm840_vm0, %v1545_v57  ;;  %v1557_v23 = vmin.f32 %v11802_v41, 6.0  ;;  %v11804_v14 = vld [vmem:[#allocation55_spill] sm:$0xff]  ;;  %v11806_v33 = vld [vmem:[#allocation56_spill] sm:$0xff] }
 0x343   :  { %1774 = vst.msk [vmem:[#allocation2 + $0x2f1] sm:$0xff] %vm840_vm0, %v1546_v1  ;;  %v1558_v45 = vmin.f32 %v11803_v40, 6.0  ;;  %v11805_v16 = vmax.f32 %v11804_v14, 0.0  ;;  %v11807_v17 = vmax.f32 %v11806_v33, 0.0  ;;  %1775 = vst.msk [vmem:[#allocation2 + $0x301] sm:$0xff] %vm840_vm0, %v1547_v22  ;;  %v11808_v20 = vld [vmem:[#allocation57_spill] sm:$0xff] }
 0x344   :  { %1776 = vst.msk [vmem:[#allocation2 + $0x331] sm:$0xff] %vm840_vm0, %v1548_v56  ;;  %1777 = vst.msk [vmem:[#allocation2 + $0x341] sm:$0xff] %vm840_vm0, %v1549_v2  ;;  %v11809_v60 = vmax.f32 %v11808_v20, 0.0  ;;  %v11810_v54 = vld [vmem:[#allocation58_spill] sm:$0xff]  ;;  %v11812_v31 = vld [vmem:[#allocation59_spill] sm:$0xff]  ;;  %v11814_v25 = vmax.f32 %v8413_v9, 0.0 }
 0x345   :  { %v1559_v5 = vmin.f32 %v11805_v16, 6.0  ;;  %v1560_v48 = vmin.f32 %v11807_v17, 6.0  ;;  %1778 = vst.msk [vmem:[#allocation2 + $0x351] sm:$0xff] %vm840_vm0, %v1550_v50  ;;  %v11811_v18 = vmax.f32 %v11810_v54, 0.0  ;;  %v11813_v59 = vmax.f32 %v11812_v31, 0.0  ;;  %1779 = vst.msk [vmem:[#allocation2 + $0x361] sm:$0xff] %vm840_vm0, %v1551_v55 }
 0x346   :  { %v1561_v7 = vmin.f32 %v11809_v60, 6.0  ;;  %v1564_v62 = vmin.f32 %v11814_v25, 6.0  ;;  %1780 = vst.msk [vmem:[#allocation2 + $0x371] sm:$0xff] %vm840_vm0, %v1552_v6  ;;  %1783 = vst.msk [vmem:[#allocation2 + $0x3a1] sm:$0xff] %vm840_vm0, %v1555_v52  ;;  %v11815_v30 = vmax.f32 %v8416_v4, 0.0  ;;  %v11816_v46 = vld [vmem:[#allocation60_spill] sm:$0xff] }
 0x347   :  { %v1562_v29 = vmin.f32 %v11811_v18, 6.0  ;;  %v1563_v15 = vmin.f32 %v11813_v59, 6.0  ;;  %1785 = vst.msk [vmem:[#allocation2 + $0x3d1] sm:$0xff] %vm840_vm0, %v1556_v53  ;;  %v11817_v49 = vmax.f32 %v11816_v46, 0.0  ;;  %v1567_v51 = vmin.f32 %v1503_v28, 6.0  ;;  %1786 = vst.msk [vmem:[#allocation2 + $0x3e1] sm:$0xff] %vm840_vm0, %v1557_v23 }
 0x348   :  { %v1565_v24 = vmin.f32 %v11815_v30, 6.0  ;;  %v1568_v9 = vmin.f32 %v1504_v0, 6.0  ;;  %1787 = vst.msk [vmem:[#allocation2 + $0x3f1] sm:$0xff] %vm840_vm0, %v1558_v45  ;;  %1788 = vst.msk [vmem:[#allocation2 + $0x401] sm:$0xff] %vm840_vm0, %v1559_v5  ;;  %v11818_v8 = vld [vmem:[#allocation80_spill] sm:$0xff]  ;;  %v11819_v4 = vld [vmem:[#allocation81_spill] sm:$0xff] }
 0x349   :  { %v1566_v12 = vmin.f32 %v11817_v49, 6.0  ;;  %1789 = vst.msk [vmem:[#allocation2 + $0x411] sm:$0xff] %vm840_vm0, %v1560_v48  ;;  %v2160_v61 = vadd.f32 %v11819_v4, %v11818_v8  ;;  %v11820_v39 = vld [vmem:[#allocation77_spill] sm:$0xff]  ;;  %v2339_v13 = vld [vmem:[#allocation2 + $0x120] sm:$0xff]  ;;  %v1571_v37 = vmin.f32 %v1507_v3, 6.0  ;;  %1790 = vst.msk [vmem:[#allocation2 + $0x421] sm:$0xff] %vm840_vm0, %v1561_v7 }
 0x34a   :  { %v2196_v21 = vmul.f32 %v11820_v39, %v2176_v10  ;;  %1791 = vst.msk [vmem:[#allocation2 + $0x431] sm:$0xff] %vm840_vm0, %v1562_v29  ;;  %1792 = vst.msk [vmem:[#allocation2 + $0x441] sm:$0xff] %vm840_vm0, %v1563_v15  ;;  %v2228_v43 = vld [vmem:[#allocation2 + $0x461] sm:$0xff]  ;;  %v11821_v28 = vld [vmem:[#allocation53_spill] sm:$0xff]  ;;  %v2359_v3 = vmul.f32 %v11825_v36, %v2339_v13 }
 0x34b   :  { %1793 = vst.msk [vmem:[#allocation2 + $0x471] sm:$0xff] %vm840_vm0, %v1564_v62  ;;  %v11822_v0 = vld [vmem:[#allocation47_spill] sm:$0xff]  ;;  %v11823_v35 = vld [vmem:[#allocation54_spill] sm:$0xff]  ;;  %v11824_v32 = vld [vmem:[#allocation48_spill] sm:$0xff] }
 0x34c   :  { %v2323_v34 = vadd.f32 %v11822_v0, %v11821_v28  ;;  %v2478_v47 = vadd.f32 %v11824_v32, %v11823_v35  ;;  %1794 = vst.msk [vmem:[#allocation2 + $0x481] sm:$0xff] %vm840_vm0, %v1565_v24  ;;  %1795 = vst.msk [vmem:[#allocation2 + $0x491] sm:$0xff] %vm840_vm0, %v1566_v12  ;;  %v11826_v57 = vld [vmem:[#allocation41_spill] sm:$0xff]  ;;  %v11827_v26 = vld [vmem:[#allocation84_spill] sm:$0xff]  ;;  %v2212_v56 = vadd.f32 %v2196_v21, %v2160_v61 }
 0x34d   :  { %1796 = vst.msk [vmem:[#allocation2 + $0x4a1] sm:$0xff] %vm840_vm0, %v1567_v51  ;;  %1797 = vst.msk [vmem:[#allocation2 + $0x4b1] sm:$0xff] %vm840_vm0, %v1568_v9  ;;  %v2514_v1 = vmul.f32 %v11827_v26, %v11826_v57  ;;  %v11828_v19 = vld [vmem:[#allocation69_spill] sm:$0xff]  ;;  %v11829_v22 = vld [vmem:[#allocation74_spill] sm:$0xff] }
 0x34e   :  { %1800 = vst.msk [vmem:[#allocation2 + $0x4e1] sm:$0xff] %vm840_vm0, %v1571_v37  ;;  %v8618_v38 = vrot.slane %v11829_v22, %v11828_v19  ;;  %v11831_v44 = vld [vmem:[#allocation78_spill] sm:$0xff]  ;;  %v2391_v50 = vld [vmem:[#allocation2 + $0x260] sm:$0xff]  ;;  %v2375_v55 = vadd.f32 %v2359_v3, %v2323_v34  ;;  %v11837_v14 = vld [vmem:[#allocation61_spill] sm:$0xff] }
 0x34f   :  { %v2248_v2 = vmul.f32 %v11831_v44, %v2228_v43  ;;  %v248_v42 = vld [vmem:[%s11692_s30 + $0x18] sm:$0x1f]  ;;  %v2280_v58 = vld [vmem:[#allocation2 + $0x322] sm:$0xff]  ;;  %v2530_v63 = vadd.f32 %v2514_v1, %v2478_v47  ;;  %v8634_v48 = vld [vmem:[#allocation2 + $0x10] sm:$0xff] }
 0x350   :  { %11830 = vst [vmem:[#allocation28_spill] sm:$0xff] %v8618_v38  ;;  %v11832_v6 = vld [vmem:[#allocation82_spill] sm:$0xff]  ;;  %v11834_v53 = vld [vmem:[#allocation39_spill] sm:$0xff]  ;;  %v8632_v16 = vrot.slane %v248_v42, %v11837_v14  ;;  %11839 = vst [vmem:[#allocation29_spill] sm:$0xff] %v8634_v48  ;;  %v8659_v49 = vrot.slane %v248_v42, %v11828_v19 }
 0x351   :  { %v2411_v27 = vmul.f32 %v11832_v6, %v2391_v50  ;;  %v11833_v52 = vld [vmem:[#allocation42_spill] sm:$0xff]  ;;  %v8628_v10 = vrot.slane %v248_v42, %v11834_v53  ;;  %v2264_v41 = vadd.f32 %v2248_v2, %v2212_v56  ;;  %v11836_v23 = vld [vmem:[#allocation79_spill] sm:$0xff]  ;;  %v8638_v60 = vld [vmem:[#allocation2 + $0x30] sm:$0xff] }
 0x352   :  { %v2566_v11 = vmul.f32 %v8618_v38, %v11833_v52  ;;  %v2300_v40 = vmul.f32 %v11836_v23, %v2280_v58  ;;  %v2443_v45 = vld [vmem:[#allocation2 + $0x121] sm:$0xff]  ;;  %11838 = vst [vmem:[#allocation30_spill] sm:$0xff] %v8632_v16  ;;  %11841 = vst [vmem:[#allocation31_spill] sm:$0xff] %v8638_v60  ;;  %v8642_v54 = vld [vmem:[#allocation2 + $0x50] sm:$0xff] }
 0x353   :  { %11835 = vst [vmem:[#allocation27_spill] sm:$0xff] %v8628_v10  ;;  %v2427_v5 = vadd.f32 %v2411_v27, %v2375_v55  ;;  %v2495_v33 = vld [vmem:[#allocation2 + $0x261] sm:$0xff]  ;;  %11843 = vst [vmem:[#allocation72_spill] sm:$0xff] %v8642_v54  ;;  %v8649_v25 = vld [vmem:[#allocation2 + $0x70] sm:$0xff] }
 0x354   :  { %v2582_v17 = vadd.f32 %v2566_v11, %v2530_v63  ;;  %v8636_v20 = vld [vmem:[#allocation2 + $0x20] sm:$0xff]  ;;  %v11844_v18 = vld [vmem:[#allocation76_spill] sm:$0xff]  ;;  %v8651_v62 = vld [vmem:[#allocation2 + $0xb0] sm:$0xff]  ;;  %v8653_v30 = vadd.f32 %v2300_v40, %v2264_v41  ;;  %11848 = vst [vmem:[#allocation36_spill] sm:$0xff] %v8659_v49  ;;  %v2515_v21 = vmul.f32 %v11827_v26, %v2495_v33 }
 0x355   :  { %11840 = vst [vmem:[#allocation32_spill] sm:$0xff] %v8636_v20  ;;  %v8640_v7 = vld [vmem:[#allocation2 + $0x40] sm:$0xff]  ;;  %v2463_v29 = vmul.f32 %v11844_v18, %v2443_v45  ;;  %v8666_v8 = vld [vmem:[#allocation2 + $0xd0] sm:$0xff]  ;;  %v11851_v37 = vld [vmem:[#allocation44_spill] sm:$0xff] }
 0x356   :  { %11842 = vst [vmem:[#allocation34_spill] sm:$0xff] %v8640_v7  ;;  %v11845_v31 = vld [vmem:[#allocation43_spill] sm:$0xff]  ;;  %v2670_v43 = vmul.f32 %v8632_v16, %v11851_v37  ;;  %v8673_v28 = vld [vmem:[#allocation2 + $0x150] sm:$0xff]  ;;  %v11855_v32 = vld [vmem:[#allocation64_spill] sm:$0xff] }
 0x357   :  { %v2618_v59 = vmul.f32 %v8628_v10, %v11845_v31  ;;  %v8647_v15 = vld [vmem:[#allocation2 + $0x60] sm:$0xff]  ;;  %v2479_v61 = vadd.f32 %v2463_v29, %v2427_v5  ;;  %11852 = vst [vmem:[#allocation38_spill] sm:$0xff] %v8673_v28  ;;  %v8677_v34 = vld [vmem:[#allocation2 + $0x170] sm:$0xff]  ;;  %v1822_v47 = vmul.f32 %v11855_v32, %v8634_v48  ;;  %v1823_v3 = vmul.f32 %v11855_v32, %v8636_v20 }
 0x358   :  { %v11846_v24 = vld [vmem:[#allocation63_spill] sm:$0xff]  ;;  %11854 = vst [vmem:[#allocation40_spill] sm:$0xff] %v8677_v34  ;;  %v8679_v35 = vld [vmem:[#allocation2 + $0xf0] sm:$0xff]  ;;  %v1824_v57 = vmul.f32 %v11855_v32, %v8638_v60  ;;  %v1825_v1 = vmul.f32 %v11855_v32, %v8640_v7  ;;  %v1827_v50 = vmul.f32 %v11855_v32, %v8647_v15  ;;  %v1828_v58 = vmul.f32 %v11855_v32, %v8649_v25 }
 0x359   :  { %v8656_v46 = vrot.slane %v248_v42, %v11846_v24  ;;  %v11849_v12 = vld [vmem:[#allocation67_spill] sm:$0xff]  ;;  %v2634_v13 = vadd.f32 %v2618_v59, %v2582_v17  ;;  %v8691_v56 = vld [vmem:[#allocation2 + $0x190] sm:$0xff]  ;;  %v1830_v55 = vmul.f32 %v11855_v32, %v8651_v62  ;;  %v1832_v41 = vmul.f32 %v11855_v32, %v8666_v8 }
 0x35a   :  { %v8662_v51 = vrot.slane %v248_v42, %v11849_v12  ;;  %v8664_v9 = vld [vmem:[#allocation2 + $0xc0] sm:$0xff]  ;;  %11857 = vst [vmem:[#allocation46_spill] sm:$0xff] %v8691_v56  ;;  %v1826_v42 = vmul.f32 %v11855_v32, %v8642_v54  ;;  %v8703_v63 = vld [vmem:[#allocation2 + $0x1b0] sm:$0xff] }
 0x35b   :  { %11847 = vst [vmem:[#allocation33_spill] sm:$0xff] %v8656_v46  ;;  %v8668_v4 = vld [vmem:[#allocation2 + $0xe0] sm:$0xff]  ;;  %v8705_v27 = vld [vmem:[#allocation2 + $0x1f0] sm:$0xff]  ;;  %v1831_v11 = vmul.f32 %v11855_v32, %v8664_v9 }
 0x35c   :  { %11850 = vst [vmem:[#allocation35_spill] sm:$0xff] %v8662_v51  ;;  %v8675_v0 = vld [vmem:[#allocation2 + $0x160] sm:$0xff]  ;;  %v1833_v40 = vmul.f32 %v11855_v32, %v8668_v4  ;;  %v8715_v45 = vld [vmem:[#allocation2 + $0x210] sm:$0xff] }
 0x35d   :  { %11853 = vst [vmem:[#allocation37_spill] sm:$0xff] %v8675_v0  ;;  %v8689_v22 = vld [vmem:[#allocation2 + $0x180] sm:$0xff]  ;;  %v8719_v33 = vld [vmem:[#allocation2 + $0x230] sm:$0xff] }
 0x35e   :  { %11856 = vst [vmem:[#allocation62_spill] sm:$0xff] %v8689_v22  ;;  %v8693_v2 = vld [vmem:[#allocation2 + $0x1a0] sm:$0xff]  ;;  %11859 = vst [vmem:[#allocation49_spill] sm:$0xff] %v8719_v33  ;;  %v11860_v17 = vld [vmem:[#allocation65_spill] sm:$0xff] }
 0x35f   :  { %11858 = vst [vmem:[#allocation73_spill] sm:$0xff] %v8693_v2  ;;  %v8707_v52 = vld [vmem:[#allocation2 + $0x200] sm:$0xff]  ;;  %v1875_v29 = vmul.f32 %v11860_v17, %v8673_v28  ;;  %v1876_v31 = vmul.f32 %v11860_v17, %v8675_v0  ;;  %v1877_v59 = vmul.f32 %v11860_v17, %v8677_v34  ;;  %v1878_v37 = vmul.f32 %v11860_v17, %v8689_v22  ;;  %v11863_v49 = vld [vmem:[#allocation45_spill] sm:$0xff] }
 0x360   :  { %v8717_v5 = vld [vmem:[#allocation2 + $0x220] sm:$0xff]  ;;  %v1879_v19 = vmul.f32 %v11860_v17, %v8691_v56  ;;  %v1880_v12 = vmul.f32 %v11860_v17, %v8693_v2  ;;  %v1881_v24 = vmul.f32 %v11860_v17, %v8703_v63  ;;  %v1883_v14 = vmul.f32 %v11860_v17, %v8705_v27  ;;  %v8755_v60 = vld [vmem:[#allocation2 + $0x11] sm:$0xff] }
 0x361   :  { %v1884_v53 = vmul.f32 %v11860_v17, %v8707_v52  ;;  %v1834_v28 = vmul.f32 %v11855_v32, %v8679_v35  ;;  %v1885_v22 = vmul.f32 %v11860_v17, %v8715_v45  ;;  %v1886_v56 = vmul.f32 %v11860_v17, %v8717_v5  ;;  %11865 = vst [vmem:[#allocation26_spill] sm:$0xff] %v8755_v60  ;;  %v8757_v20 = vld [vmem:[#allocation2 + $0x21] sm:$0xff]  ;;  %v8759_v48 = vld [vmem:[#allocation2 + $0x31] sm:$0xff] }
 0x362   :  { %v1887_v2 = vmul.f32 %v11860_v17, %v8719_v33  ;;  %v8747_v34 = vadd.f32 %v2515_v21, %v2479_v61  ;;  %v8749_v0 = vadd.f32 %v2670_v43, %v2634_v13  ;;  %v8753_v54 = vmul.f32 %v8662_v51, %v11863_v49  ;;  %11866 = vst [vmem:[#allocation55_spill] sm:$0xff] %v8757_v20  ;;  %v8761_v26 = vld [vmem:[#allocation2 + $0x41] sm:$0xff]  ;;  %v8763_v61 = vld [vmem:[#allocation2 + $0x51] sm:$0xff] }
 0x363   :  { %v1891_v7 = vadd.f32 %v1875_v29, %v1822_v47  ;;  %11867 = vst [vmem:[#allocation56_spill] sm:$0xff] %v8759_v48  ;;  %v1892_v46 = vadd.f32 %v1876_v31, %v1823_v3  ;;  %v1893_v16 = vadd.f32 %v1877_v59, %v1824_v57  ;;  %v1894_v10 = vadd.f32 %v1878_v37, %v1825_v1  ;;  %v8765_v21 = vld [vmem:[#allocation2 + $0x61] sm:$0xff]  ;;  %v8767_v29 = vld [vmem:[#allocation2 + $0x71] sm:$0xff] }
 0x364   :  { %11861 = vst [vmem:[#allocation50_spill] sm:$0xff] %v8747_v34  ;;  %11862 = vst [vmem:[#allocation51_spill] sm:$0xff] %v8749_v0  ;;  %v1895_v38 = vadd.f32 %v1879_v19, %v1826_v42  ;;  %v1896_v13 = vadd.f32 %v1880_v12, %v1827_v50  ;;  %v1897_v49 = vadd.f32 %v1881_v24, %v1828_v58  ;;  %v8771_v0 = vld [vmem:[#allocation2 + $0xc1] sm:$0xff]  ;;  %v8773_v19 = vld [vmem:[#allocation2 + $0xd1] sm:$0xff] }
 0x365   :  { %11864 = vst [vmem:[#allocation52_spill] sm:$0xff] %v8753_v54  ;;  %11868 = vst [vmem:[#allocation57_spill] sm:$0xff] %v8761_v26  ;;  %v1899_v43 = vadd.f32 %v1883_v14, %v1830_v55  ;;  %v1900_v47 = vadd.f32 %v1884_v53, %v1831_v11  ;;  %v8769_v54 = vld [vmem:[#allocation2 + $0xb1] sm:$0xff]  ;;  %v1901_v3 = vadd.f32 %v1885_v22, %v1832_v41  ;;  %v8775_v42 = vld [vmem:[#allocation2 + $0xe1] sm:$0xff] }
 0x366   :  { %11869 = vst [vmem:[#allocation58_spill] sm:$0xff] %v8763_v61  ;;  %11870 = vst [vmem:[#allocation59_spill] sm:$0xff] %v8765_v21  ;;  %v1902_v57 = vadd.f32 %v1886_v56, %v1833_v40  ;;  %v1903_v1 = vadd.f32 %v1887_v2, %v1834_v28  ;;  %v8777_v31 = vld [vmem:[#allocation2 + $0xf1] sm:$0xff]  ;;  %v8805_v37 = vld [vmem:[#allocation2 + $0x161] sm:$0xff] }
 0x367   :  { %11871 = vst [vmem:[#allocation60_spill] sm:$0xff] %v8767_v29  ;;  %11872 = vst [vmem:[#allocation80_spill] sm:$0xff] %v8769_v54  ;;  %v11877_v12 = vld [vmem:[#allocation66_spill] sm:$0xff]  ;;  %v8919_v18 = vld [vmem:[#allocation2 + $0x340] sm:$0xff] }
 0x368   :  { %11873 = vst [vmem:[#allocation81_spill] sm:$0xff] %v8771_v0  ;;  %11874 = vst [vmem:[#allocation77_spill] sm:$0xff] %v8773_v19  ;;  %v1927_v24 = vmul.f32 %v11877_v12, %v8755_v60  ;;  %v1928_v53 = vmul.f32 %v11877_v12, %v8757_v20  ;;  %v1929_v14 = vmul.f32 %v11877_v12, %v8759_v48  ;;  %v8803_v59 = vld [vmem:[#allocation2 + $0x151] sm:$0xff]  ;;  %v8813_v20 = vld [vmem:[#allocation2 + $0x1a1] sm:$0xff] }
 0x369   :  { %11875 = vst [vmem:[#allocation53_spill] sm:$0xff] %v8775_v42  ;;  %11876 = vst [vmem:[#allocation47_spill] sm:$0xff] %v8777_v31  ;;  %v1930_v22 = vmul.f32 %v11877_v12, %v8761_v26  ;;  %v1931_v28 = vmul.f32 %v11877_v12, %v8763_v61  ;;  %v1932_v56 = vmul.f32 %v11877_v12, %v8765_v21  ;;  %v8807_v34 = vld [vmem:[#allocation2 + $0x171] sm:$0xff]  ;;  %v8809_v26 = vld [vmem:[#allocation2 + $0x181] sm:$0xff] }
 0x36a   :  { %v1933_v2 = vmul.f32 %v11877_v12, %v8767_v29  ;;  %v1935_v50 = vmul.f32 %v11877_v12, %v8769_v54  ;;  %v1936_v58 = vmul.f32 %v11877_v12, %v8771_v0  ;;  %v1937_v55 = vmul.f32 %v11877_v12, %v8773_v19  ;;  %11878 = vst [vmem:[#allocation54_spill] sm:$0xff] %v8803_v59  ;;  %v8811_v48 = vld [vmem:[#allocation2 + $0x191] sm:$0xff]  ;;  %v8819_v0 = vld [vmem:[#allocation2 + $0x201] sm:$0xff] }
 0x36b   :  { %v1938_v11 = vmul.f32 %v11877_v12, %v8775_v42  ;;  %v1939_v41 = vmul.f32 %v11877_v12, %v8777_v31  ;;  %v1943_v40 = vadd.f32 %v1927_v24, %v1891_v7  ;;  %11879 = vst [vmem:[#allocation48_spill] sm:$0xff] %v8805_v37  ;;  %11880 = vst [vmem:[#allocation83_spill] sm:$0xff] %v8807_v34  ;;  %v8815_v24 = vld [vmem:[#allocation2 + $0x1b1] sm:$0xff]  ;;  %v8869_v54 = vld [vmem:[#allocation2 + $0xc2] sm:$0xff] }
 0x36c   :  { %v1944_v29 = vadd.f32 %v1928_v53, %v1892_v46  ;;  %v1945_v21 = vadd.f32 %v1929_v14, %v1893_v16  ;;  %v1946_v61 = vadd.f32 %v1930_v22, %v1894_v10  ;;  %v1947_v60 = vadd.f32 %v1931_v28, %v1895_v38  ;;  %11881 = vst [vmem:[#allocation41_spill] sm:$0xff] %v8809_v26  ;;  %v8817_v19 = vld [vmem:[#allocation2 + $0x1f1] sm:$0xff]  ;;  %v8823_v53 = vld [vmem:[#allocation2 + $0x221] sm:$0xff] }
 0x36d   :  { %11882 = vst [vmem:[#allocation74_spill] sm:$0xff] %v8811_v48  ;;  %11883 = vst [vmem:[#allocation78_spill] sm:$0xff] %v8813_v20  ;;  %v1948_v51 = vadd.f32 %v1932_v56, %v1896_v13  ;;  %v1949_v42 = vadd.f32 %v1933_v2, %v1897_v49  ;;  %v1951_v31 = vadd.f32 %v1935_v50, %v1899_v43  ;;  %v8821_v38 = vld [vmem:[#allocation2 + $0x211] sm:$0xff]  ;;  %v11890_v13 = vld [vmem:[#allocation68_spill] sm:$0xff] }
 0x36e   :  { %v1952_v7 = vadd.f32 %v1936_v58, %v1900_v47  ;;  %11884 = vst [vmem:[#allocation82_spill] sm:$0xff] %v8815_v24  ;;  %11885 = vst [vmem:[#allocation42_spill] sm:$0xff] %v8817_v19  ;;  %v1953_v46 = vadd.f32 %v1937_v55, %v1901_v3  ;;  %v1954_v16 = vadd.f32 %v1938_v11, %v1902_v57  ;;  %v8825_v14 = vld [vmem:[#allocation2 + $0x231] sm:$0xff] }
 0x36f   :  { %11886 = vst [vmem:[#allocation79_spill] sm:$0xff] %v8819_v0  ;;  %v1955_v10 = vadd.f32 %v1939_v41, %v1903_v1  ;;  %11887 = vst [vmem:[#allocation43_spill] sm:$0xff] %v8821_v38  ;;  %v1979_v49 = vmul.f32 %v11890_v13, %v8803_v59  ;;  %v1980_v43 = vmul.f32 %v11890_v13, %v8805_v37  ;;  %v8853_v11 = vld [vmem:[#allocation2 + $0x12] sm:$0xff]  ;;  %v8855_v41 = vld [vmem:[#allocation2 + $0x22] sm:$0xff] }
 0x370   :  { %11888 = vst [vmem:[#allocation44_spill] sm:$0xff] %v8823_v53  ;;  %11889 = vst [vmem:[#allocation64_spill] sm:$0xff] %v8825_v14  ;;  %v1981_v47 = vmul.f32 %v11890_v13, %v8807_v34  ;;  %v1982_v3 = vmul.f32 %v11890_v13, %v8809_v26  ;;  %v1983_v57 = vmul.f32 %v11890_v13, %v8811_v48  ;;  %v8859_v34 = vld [vmem:[#allocation2 + $0x42] sm:$0xff]  ;;  %v8861_v37 = vld [vmem:[#allocation2 + $0x52] sm:$0xff] }
 0x371   :  { %v1984_v1 = vmul.f32 %v11890_v13, %v8813_v20  ;;  %v1985_v22 = vmul.f32 %v11890_v13, %v8815_v24  ;;  %v1987_v28 = vmul.f32 %v11890_v13, %v8817_v19  ;;  %v1988_v56 = vmul.f32 %v11890_v13, %v8819_v0  ;;  %11891 = vst [vmem:[#allocation65_spill] sm:$0xff] %v8853_v11  ;;  %v8857_v24 = vld [vmem:[#allocation2 + $0x32] sm:$0xff] }
 0x372   :  { %v1989_v2 = vmul.f32 %v11890_v13, %v8821_v38  ;;  %v1990_v50 = vmul.f32 %v11890_v13, %v8823_v53  ;;  %v1991_v58 = vmul.f32 %v11890_v13, %v8825_v14  ;;  %v8851_v55 = vadd.f32 %v1979_v49, %v1943_v40  ;;  %11892 = vst [vmem:[#allocation45_spill] sm:$0xff] %v8855_v41  ;;  %v8863_v53 = vld [vmem:[#allocation2 + $0x62] sm:$0xff]  ;;  %v8865_v0 = vld [vmem:[#allocation2 + $0x72] sm:$0xff] }
 0x373   :  { %11893 = vst [vmem:[#allocation66_spill] sm:$0xff] %v8857_v24  ;;  %v1996_v20 = vadd.f32 %v1980_v43, %v1944_v29  ;;  %v1997_v48 = vadd.f32 %v1981_v47, %v1945_v21  ;;  %v1998_v59 = vadd.f32 %v1982_v3, %v1946_v61  ;;  %v1999_v26 = vadd.f32 %v1983_v57, %v1947_v60  ;;  %v8867_v19 = vld [vmem:[#allocation2 + $0xb2] sm:$0xff]  ;;  %v8873_v43 = vld [vmem:[#allocation2 + $0xe2] sm:$0xff] }
 0x374   :  { %11894 = vst [vmem:[#allocation68_spill] sm:$0xff] %v8859_v34  ;;  %11895 = vst [vmem:[#allocation85_spill] sm:$0xff] %v8861_v37  ;;  %v2000_v38 = vadd.f32 %v1984_v1, %v1948_v51  ;;  %v2001_v14 = vadd.f32 %v1985_v22, %v1949_v42  ;;  %v2003_v40 = vadd.f32 %v1987_v28, %v1951_v31  ;;  %v8871_v60 = vld [vmem:[#allocation2 + $0xd2] sm:$0xff] }
 0x375   :  { %11896 = vst [vmem:[#allocation86_spill] sm:$0xff] %v8863_v53  ;;  %v2004_v49 = vadd.f32 %v1988_v56, %v1952_v7  ;;  %11897 = vst [vmem:[#allocation87_spill] sm:$0xff] %v8865_v0  ;;  %v2005_v29 = vadd.f32 %v1989_v2, %v1953_v46  ;;  %v2006_v21 = vadd.f32 %v1990_v50, %v1954_v16  ;;  %v8875_v47 = vld [vmem:[#allocation2 + $0xf2] sm:$0xff] }
 0x376   :  { %11898 = vst [vmem:[#allocation88_spill] sm:$0xff] %v8867_v19  ;;  %11899 = vst [vmem:[#allocation89_spill] sm:$0xff] %v8869_v54  ;;  %v2007_v61 = vadd.f32 %v1991_v58, %v1955_v10  ;;  %v11903_v51 = vld [vmem:[#allocation70_spill] sm:$0xff]  ;;  %v8897_v22 = vld [vmem:[#allocation2 + $0x290] sm:$0xff] }
 0x377   :  { %11900 = vst [vmem:[#allocation90_spill] sm:$0xff] %v8871_v60  ;;  %11901 = vst [vmem:[#allocation91_spill] sm:$0xff] %v8873_v43  ;;  %v8879_v42 = vmul.f32 %v11903_v51, %v8853_v11  ;;  %v2032_v31 = vmul.f32 %v11903_v51, %v8855_v41  ;;  %v2033_v7 = vmul.f32 %v11903_v51, %v8857_v24  ;;  %v8905_v58 = vld [vmem:[#allocation2 + $0x2a0] sm:$0xff]  ;;  %v8911_v41 = vld [vmem:[#allocation2 + $0x2d0] sm:$0xff] }
 0x378   :  { %11902 = vst [vmem:[#allocation92_spill] sm:$0xff] %v8875_v47  ;;  %v2034_v46 = vmul.f32 %v11903_v51, %v8859_v34  ;;  %v2035_v16 = vmul.f32 %v11903_v51, %v8861_v37  ;;  %v2036_v10 = vmul.f32 %v11903_v51, %v8863_v53  ;;  %v2037_v3 = vmul.f32 %v11903_v51, %v8865_v0  ;;  %v8907_v0 = vld [vmem:[#allocation2 + $0x2b0] sm:$0xff]  ;;  %v8913_v11 = vld [vmem:[#allocation2 + $0x2e0] sm:$0xff] }
 0x379   :  { %v2039_v57 = vmul.f32 %v11903_v51, %v8867_v19  ;;  %v2040_v1 = vmul.f32 %v11903_v51, %v8869_v54  ;;  %11904 = vst [vmem:[#allocation70_spill] sm:$0xff] %v8897_v22  ;;  %v2041_v28 = vmul.f32 %v11903_v51, %v8871_v60  ;;  %v2042_v56 = vmul.f32 %v11903_v51, %v8873_v43  ;;  %v8909_v19 = vld [vmem:[#allocation2 + $0x2c0] sm:$0xff]  ;;  %v8915_v60 = vld [vmem:[#allocation2 + $0x2f0] sm:$0xff] }
 0x37a   :  { %v2043_v2 = vmul.f32 %v11903_v51, %v8875_v47  ;;  %v2048_v50 = vadd.f32 %v2032_v31, %v1996_v20  ;;  %11905 = vst [vmem:[#allocation93_spill] sm:$0xff] %v8905_v58  ;;  %11906 = vst [vmem:[#allocation94_spill] sm:$0xff] %v8907_v0  ;;  %v2049_v53 = vadd.f32 %v2033_v7, %v1997_v48  ;;  %v8917_v31 = vld [vmem:[#allocation2 + $0x330] sm:$0xff]  ;;  %v11916_v7 = vld [vmem:[#allocation71_spill] sm:$0xff] }
 0x37b   :  { %11907 = vst [vmem:[#allocation95_spill] sm:$0xff] %v8909_v19  ;;  %v2050_v37 = vadd.f32 %v2034_v46, %v1998_v59  ;;  %v2051_v34 = vadd.f32 %v2035_v16, %v1999_v26  ;;  %v2052_v24 = vadd.f32 %v2036_v10, %v2000_v38  ;;  %11908 = vst [vmem:[#allocation96_spill] sm:$0xff] %v8911_v41  ;;  %v8921_v33 = vld [vmem:[#allocation2 + $0x350] sm:$0xff]  ;;  %v8923_v26 = vld [vmem:[#allocation2 + $0x360] sm:$0xff] }
 0x37c   :  { %11909 = vst [vmem:[#allocation97_spill] sm:$0xff] %v8913_v11  ;;  %11910 = vst [vmem:[#allocation98_spill] sm:$0xff] %v8915_v60  ;;  %v2053_v43 = vadd.f32 %v2037_v3, %v2001_v14  ;;  %v2055_v54 = vadd.f32 %v2039_v57, %v2003_v40  ;;  %v2056_v47 = vadd.f32 %v2040_v1, %v2004_v49  ;;  %v8925_v38 = vld [vmem:[#allocation2 + $0x370] sm:$0xff]  ;;  %v8951_v1 = vld [vmem:[#allocation2 + $0x3e0] sm:$0xff] }
 0x37d   :  { %v2057_v20 = vadd.f32 %v2041_v28, %v2005_v29  ;;  %11911 = vst [vmem:[#allocation99_spill] sm:$0xff] %v8917_v31  ;;  %11912 = vst [vmem:[#allocation100_spill] sm:$0xff] %v8919_v18  ;;  %v2058_v48 = vadd.f32 %v2042_v56, %v2006_v21  ;;  %v2059_v59 = vadd.f32 %v2043_v2, %v2007_v61  ;;  %v8949_v57 = vld [vmem:[#allocation2 + $0x3d0] sm:$0xff] }
 0x37e   :  { %11913 = vst [vmem:[#allocation101_spill] sm:$0xff] %v8921_v33  ;;  %11914 = vst [vmem:[#allocation102_spill] sm:$0xff] %v8923_v26  ;;  %v8929_v46 = vmul.f32 %v11916_v7, %v8897_v22  ;;  %v2085_v14 = vmul.f32 %v11916_v7, %v8905_v58  ;;  %v2086_v40 = vmul.f32 %v11916_v7, %v8907_v0  ;;  %v8965_v22 = vld [vmem:[#allocation2 + $0x420] sm:$0xff] }
 0x37f   :  { %11915 = vst [vmem:[#allocation103_spill] sm:$0xff] %v8925_v38  ;;  %v2087_v49 = vmul.f32 %v11916_v7, %v8909_v19  ;;  %v2088_v29 = vmul.f32 %v11916_v7, %v8911_v41  ;;  %v2089_v21 = vmul.f32 %v11916_v7, %v8913_v11  ;;  %v2090_v61 = vmul.f32 %v11916_v7, %v8915_v60  ;;  %v8961_v11 = vld [vmem:[#allocation2 + $0x400] sm:$0xff] }
 0x380   :  { %11917 = vst [vmem:[#allocation71_spill] sm:$0xff] %v8929_v46  ;;  %v2092_v16 = vmul.f32 %v11916_v7, %v8917_v31  ;;  %v2093_v10 = vmul.f32 %v11916_v7, %v8919_v18  ;;  %v2094_v3 = vmul.f32 %v11916_v7, %v8921_v33  ;;  %11918 = vst [vmem:[#allocation104_spill] sm:$0xff] %v8949_v57  ;;  %v8959_v31 = vld [vmem:[#allocation2 + $0x3f0] sm:$0xff]  ;;  %v8975_v46 = vld [vmem:[#allocation2 + $0x4a0] sm:$0xff] }
 0x381   :  { %11919 = vst [vmem:[#allocation105_spill] sm:$0xff] %v8951_v1  ;;  %v2095_v28 = vmul.f32 %v11916_v7, %v8923_v26  ;;  %v2096_v56 = vmul.f32 %v11916_v7, %v8925_v38  ;;  %v8957_v2 = vadd.f32 %v2085_v14, %v2048_v50  ;;  %v2102_v60 = vadd.f32 %v2086_v40, %v2049_v53  ;;  %v8963_v18 = vld [vmem:[#allocation2 + $0x410] sm:$0xff]  ;;  %v8971_v40 = vld [vmem:[#allocation2 + $0x480] sm:$0xff] }
 0x382   :  { %11921 = vst [vmem:[#allocation107_spill] sm:$0xff] %v8959_v31  ;;  %11922 = vst [vmem:[#allocation108_spill] sm:$0xff] %v8961_v11  ;;  %v2103_v41 = vadd.f32 %v2087_v49, %v2050_v37  ;;  %v2104_v19 = vadd.f32 %v2088_v29, %v2051_v34  ;;  %v2105_v0 = vadd.f32 %v2089_v21, %v2052_v24  ;;  %v8967_v33 = vld [vmem:[#allocation2 + $0x430] sm:$0xff]  ;;  %v11931_v24 = vld [vmem:[#allocation75_spill] sm:$0xff] }
 0x383   :  { %11920 = vst [vmem:[#allocation106_spill] sm:$0xff] %v8957_v2  ;;  %11923 = vst [vmem:[#allocation109_spill] sm:$0xff] %v8963_v18  ;;  %v2106_v58 = vadd.f32 %v2090_v61, %v2053_v43  ;;  %v8969_v26 = vld [vmem:[#allocation2 + $0x470] sm:$0xff]  ;;  %v2108_v38 = vadd.f32 %v2092_v16, %v2055_v54  ;;  %v2109_v50 = vadd.f32 %v2093_v10, %v2056_v47  ;;  %v9005_v10 = vld [vmem:[#allocation2 + $0x2a1] sm:$0xff] }
 0x384   :  { %11924 = vst [vmem:[#allocation110_spill] sm:$0xff] %v8965_v22  ;;  %11925 = vst [vmem:[#allocation111_spill] sm:$0xff] %v8967_v33  ;;  %v2110_v14 = vadd.f32 %v2094_v3, %v2057_v20  ;;  %v2111_v53 = vadd.f32 %v2095_v28, %v2058_v48  ;;  %v8973_v2 = vld [vmem:[#allocation2 + $0x490] sm:$0xff]  ;;  %v2112_v37 = vadd.f32 %v2096_v56, %v2059_v59  ;;  %v9009_v28 = vld [vmem:[#allocation2 + $0x2c1] sm:$0xff] }
 0x385   :  { %11926 = vst [vmem:[#allocation112_spill] sm:$0xff] %v8969_v26  ;;  %11927 = vst [vmem:[#allocation113_spill] sm:$0xff] %v8971_v40  ;;  %v8977_v34 = vld [vmem:[#allocation2 + $0x4b0] sm:$0xff]  ;;  %v8981_v43 = vmul.f32 %v11931_v24, %v8949_v57  ;;  %v8985_v49 = vmul.f32 %v11931_v24, %v8951_v1  ;;  %v2139_v54 = vmul.f32 %v11931_v24, %v8959_v31 }
 0x386   :  { %11928 = vst [vmem:[#allocation114_spill] sm:$0xff] %v8973_v2  ;;  %11929 = vst [vmem:[#allocation115_spill] sm:$0xff] %v8975_v46  ;;  %v2140_v47 = vmul.f32 %v11931_v24, %v8961_v11  ;;  %v2141_v20 = vmul.f32 %v11931_v24, %v8963_v18  ;;  %v2142_v48 = vmul.f32 %v11931_v24, %v8965_v22  ;;  %v9007_v3 = vld [vmem:[#allocation2 + $0x2b1] sm:$0xff] }
 0x387   :  { %11930 = vst [vmem:[#allocation116_spill] sm:$0xff] %v8977_v34  ;;  %11932 = vst [vmem:[#allocation75_spill] sm:$0xff] %v8985_v49  ;;  %v2143_v59 = vmul.f32 %v11931_v24, %v8967_v33  ;;  %v2145_v29 = vmul.f32 %v11931_v24, %v8969_v26  ;;  %v2146_v21 = vmul.f32 %v11931_v24, %v8971_v40  ;;  %v9017_v22 = vld [vmem:[#allocation2 + $0x2d1] sm:$0xff]  ;;  %v9025_v49 = vld [vmem:[#allocation2 + $0x341] sm:$0xff] }
 0x388   :  { %v2147_v61 = vmul.f32 %v11931_v24, %v8973_v2  ;;  %v2148_v16 = vmul.f32 %v11931_v24, %v8975_v46  ;;  %11933 = vst [vmem:[#allocation117_spill] sm:$0xff] %v9005_v10  ;;  %11934 = vst [vmem:[#allocation118_spill] sm:$0xff] %v9007_v3  ;;  %v2149_v56 = vmul.f32 %v11931_v24, %v8977_v34  ;;  %v9019_v2 = vld [vmem:[#allocation2 + $0x2e1] sm:$0xff]  ;;  %v9021_v18 = vld [vmem:[#allocation2 + $0x2f1] sm:$0xff] }
 0x389   :  { %11935 = vst [vmem:[#allocation119_spill] sm:$0xff] %v9009_v28  ;;  %v9013_v33 = vadd.f32 %v2139_v54, %v2102_v60  ;;  %v9015_v26 = vadd.f32 %v2140_v47, %v2103_v41  ;;  %v2157_v40 = vadd.f32 %v2141_v20, %v2104_v19  ;;  %11937 = vst [vmem:[#allocation121_spill] sm:$0xff] %v9017_v22  ;;  %v9023_v46 = vld [vmem:[#allocation2 + $0x331] sm:$0xff]  ;;  %v9029_v19 = vld [vmem:[#allocation2 + $0x361] sm:$0xff] }
 0x38a   :  { %11938 = vst [vmem:[#allocation122_spill] sm:$0xff] %v9019_v2  ;;  %11939 = vst [vmem:[#allocation123_spill] sm:$0xff] %v9021_v18  ;;  %v2158_v11 = vadd.f32 %v2142_v48, %v2105_v0  ;;  %v2159_v31 = vadd.f32 %v2143_v59, %v2106_v58  ;;  %v2161_v1 = vadd.f32 %v2145_v29, %v2108_v38  ;;  %v9027_v34 = vld [vmem:[#allocation2 + $0x351] sm:$0xff]  ;;  %v9059_v29 = vld [vmem:[#allocation2 + $0x401] sm:$0xff] }
 0x38b   :  { %11936 = vst [vmem:[#allocation120_spill] sm:$0xff] %v9015_v26  ;;  %v2162_v57 = vadd.f32 %v2146_v21, %v2109_v50  ;;  %11940 = vst [vmem:[#allocation124_spill] sm:$0xff] %v9023_v46  ;;  %v2163_v60 = vadd.f32 %v2147_v61, %v2110_v14  ;;  %v2164_v41 = vadd.f32 %v2148_v16, %v2111_v53  ;;  %v9031_v47 = vld [vmem:[#allocation2 + $0x371] sm:$0xff]  ;;  %v9063_v61 = vld [vmem:[#allocation2 + $0x421] sm:$0xff] }
 0x38c   :  { %11941 = vst [vmem:[#allocation125_spill] sm:$0xff] %v9025_v49  ;;  %11942 = vst [vmem:[#allocation126_spill] sm:$0xff] %v9027_v34  ;;  %v2165_v54 = vadd.f32 %v2149_v56, %v2112_v37  ;;  %v9035_v20 = vmul.f32 %v11820_v39, %v9005_v10  ;;  %v9039_v0 = vmul.f32 %v11820_v39, %v9007_v3  ;;  %v9049_v14 = vld [vmem:[#allocation2 + $0x3f1] sm:$0xff]  ;;  %v9077_v26 = vld [vmem:[#allocation2 + $0x4a1] sm:$0xff] }
 0x38d   :  { %11943 = vst [vmem:[#allocation127_spill] sm:$0xff] %v9029_v19  ;;  %11944 = vst [vmem:[#allocation128_spill] sm:$0xff] %v9031_v47  ;;  %v9043_v58 = vmul.f32 %v11820_v39, %v9009_v28  ;;  %v2193_v38 = vmul.f32 %v11820_v39, %v9017_v22  ;;  %v2194_v50 = vmul.f32 %v11820_v39, %v9019_v2  ;;  %v9061_v21 = vld [vmem:[#allocation2 + $0x411] sm:$0xff]  ;;  %v9073_v22 = vld [vmem:[#allocation2 + $0x481] sm:$0xff] }
 0x38e   :  { %11945 = vst [vmem:[#allocation129_spill] sm:$0xff] %v9039_v0  ;;  %11947 = vst [vmem:[#allocation131_spill] sm:$0xff] %v9049_v14  ;;  %v2195_v53 = vmul.f32 %v11820_v39, %v9021_v18  ;;  %v2197_v37 = vmul.f32 %v11820_v39, %v9023_v46  ;;  %v2198_v48 = vmul.f32 %v11820_v39, %v9025_v49  ;;  %v9069_v2 = vld [vmem:[#allocation2 + $0x431] sm:$0xff] }
 0x38f   :  { %11946 = vst [vmem:[#allocation130_spill] sm:$0xff] %v9043_v58  ;;  %v2199_v59 = vmul.f32 %v11820_v39, %v9027_v34  ;;  %11948 = vst [vmem:[#allocation132_spill] sm:$0xff] %v9059_v29  ;;  %v2200_v16 = vmul.f32 %v11820_v39, %v9029_v19  ;;  %v2201_v56 = vmul.f32 %v11820_v39, %v9031_v47  ;;  %v9071_v49 = vld [vmem:[#allocation2 + $0x471] sm:$0xff] }
 0x390   :  { %11949 = vst [vmem:[#allocation133_spill] sm:$0xff] %v9061_v21  ;;  %11950 = vst [vmem:[#allocation134_spill] sm:$0xff] %v9063_v61  ;;  %v2209_v18 = vadd.f32 %v2193_v38, %v2157_v40  ;;  %v2210_v46 = vadd.f32 %v2194_v50, %v2158_v11  ;;  %v2211_v34 = vadd.f32 %v2195_v53, %v2159_v31  ;;  %v9075_v58 = vld [vmem:[#allocation2 + $0x491] sm:$0xff] }
 0x391   :  { %11951 = vst [vmem:[#allocation135_spill] sm:$0xff] %v9069_v2  ;;  %11952 = vst [vmem:[#allocation136_spill] sm:$0xff] %v9071_v49  ;;  %v2213_v28 = vadd.f32 %v2197_v37, %v2161_v1  ;;  %v2214_v3 = vadd.f32 %v2198_v48, %v2162_v57  ;;  %v2215_v10 = vadd.f32 %v2199_v59, %v2163_v60  ;;  %v9079_v19 = vld [vmem:[#allocation2 + $0x4b1] sm:$0xff]  ;;  %v9109_v48 = vld [vmem:[#allocation2 + $0x2e2] sm:$0xff] }
 0x392   :  { %11953 = vst [vmem:[#allocation137_spill] sm:$0xff] %v9073_v22  ;;  %11954 = vst [vmem:[#allocation138_spill] sm:$0xff] %v9075_v58  ;;  %v2216_v0 = vadd.f32 %v2200_v16, %v2164_v41  ;;  %v2217_v47 = vadd.f32 %v2201_v56, %v2165_v54  ;;  %v9083_v11 = vmul.f32 %v11831_v44, %v9049_v14  ;;  %v9097_v41 = vld [vmem:[#allocation2 + $0x2c2] sm:$0xff]  ;;  %v9099_v54 = vld [vmem:[#allocation2 + $0x2d2] sm:$0xff] }
 0x393   :  { %11955 = vst [vmem:[#allocation139_spill] sm:$0xff] %v9077_v26  ;;  %11956 = vst [vmem:[#allocation140_spill] sm:$0xff] %v9079_v19  ;;  %v9087_v40 = vmul.f32 %v11831_v44, %v9059_v29  ;;  %v2245_v31 = vmul.f32 %v11831_v44, %v9061_v21  ;;  %v2246_v57 = vmul.f32 %v11831_v44, %v9063_v61  ;;  %v9111_v59 = vld [vmem:[#allocation2 + $0x2f2] sm:$0xff]  ;;  %v9119_v61 = vld [vmem:[#allocation2 + $0x342] sm:$0xff] }
 0x394   :  { %v2247_v1 = vmul.f32 %v11831_v44, %v9069_v2  ;;  %v2249_v60 = vmul.f32 %v11831_v44, %v9071_v49  ;;  %11958 = vst [vmem:[#allocation142_spill] sm:$0xff] %v9097_v41  ;;  %11959 = vst [vmem:[#allocation143_spill] sm:$0xff] %v9099_v54  ;;  %v2250_v38 = vmul.f32 %v11831_v44, %v9073_v22  ;;  %v9113_v16 = vld [vmem:[#allocation2 + $0x332] sm:$0xff] }
 0x395   :  { %11957 = vst [vmem:[#allocation141_spill] sm:$0xff] %v9087_v40  ;;  %v2251_v50 = vmul.f32 %v11831_v44, %v9075_v58  ;;  %v2252_v53 = vmul.f32 %v11831_v44, %v9077_v26  ;;  %v2253_v37 = vmul.f32 %v11831_v44, %v9079_v19  ;;  %11960 = vst [vmem:[#allocation144_spill] sm:$0xff] %v9109_v48  ;;  %v9121_v58 = vld [vmem:[#allocation2 + $0x352] sm:$0xff]  ;;  %v9123_v26 = vld [vmem:[#allocation2 + $0x362] sm:$0xff] }
 0x396   :  { %11961 = vst [vmem:[#allocation145_spill] sm:$0xff] %v9111_v59  ;;  %11962 = vst [vmem:[#allocation146_spill] sm:$0xff] %v9113_v16  ;;  %v9115_v56 = vadd.f32 %v2245_v31, %v2209_v18  ;;  %v9117_v49 = vadd.f32 %v2246_v57, %v2210_v46  ;;  %v2263_v22 = vadd.f32 %v2247_v1, %v2211_v34  ;;  %v9125_v40 = vld [vmem:[#allocation2 + $0x372] sm:$0xff]  ;;  %v9155_v1 = vld [vmem:[#allocation2 + $0x80] sm:$0xff] }
 0x397   :  { %v2265_v2 = vadd.f32 %v2249_v60, %v2213_v28  ;;  %11963 = vst [vmem:[#allocation147_spill] sm:$0xff] %v9119_v61  ;;  %11964 = vst [vmem:[#allocation148_spill] sm:$0xff] %v9121_v58  ;;  %v2266_v21 = vadd.f32 %v2250_v38, %v2214_v3  ;;  %v2267_v19 = vadd.f32 %v2251_v50, %v2215_v10  ;;  %v252_v10 = vld [vmem:[%s11276_s7] sm:$0xff]  ;;  %v253_v3 = vld [vmem:[%s11276_s7 + $0x8] sm:$0xff] }
 0x398   :  { %11965 = vst [vmem:[#allocation149_spill] sm:$0xff] %v9123_v26  ;;  %v2268_v29 = vadd.f32 %v2252_v53, %v2216_v0  ;;  %v2269_v14 = vadd.f32 %v2253_v37, %v2217_v47  ;;  %11966 = vst [vmem:[#allocation150_spill] sm:$0xff] %v9125_v40  ;;  %v9129_v18 = vmul.f32 %v11836_v23, %v9097_v41  ;;  %v254_v37 = vld [vmem:[%s11276_s7 + $0x10] sm:$0xff] }
 0x399   :  { %v9133_v46 = vmul.f32 %v11836_v23, %v9099_v54  ;;  %v2299_v34 = vmul.f32 %v11836_v23, %v9111_v59  ;;  %v2301_v28 = vmul.f32 %v11836_v23, %v9113_v16  ;;  %v9147_v47 = vmul.f32 %v11836_v23, %v9109_v48  ;;  %11967 = vst [vmem:[#allocation151_spill] sm:$0xff] %v9155_v1 }
 0x39a   :  { %v2302_v0 = vmul.f32 %v11836_v23, %v9119_v61  ;;  %v2303_v31 = vmul.f32 %v11836_v23, %v9121_v58  ;;  %v2304_v57 = vmul.f32 %v11836_v23, %v9123_v26  ;;  %v2305_v60 = vmul.f32 %v11836_v23, %v9125_v40  ;;  %v255_v26 = vld [vmem:[%s11276_s7 + $0x18] sm:$0xff]  ;;  %v1801_v58 = vld [vmem:[#allocation2] sm:$0xff] }
 0x39b   :  { %v9159_v38 = vadd.f32 %v2299_v34, %v2263_v22  ;;  %v2317_v50 = vadd.f32 %v2301_v28, %v2265_v2  ;;  %v9163_v53 = vmul.f32 %v11825_v36, %v8647_v15  ;;  %v9173_v22 = vmul.f32 %v11825_v36, %v8649_v25  ;;  %v1854_v15 = vld [vmem:[#allocation2 + $0x140] sm:$0xff] }
 0x39c   :  { %v2318_v61 = vadd.f32 %v2302_v0, %v2266_v21  ;;  %v2319_v16 = vadd.f32 %v2303_v31, %v2267_v19  ;;  %v2352_v2 = vmul.f32 %v11825_v36, %v8651_v62  ;;  %v1906_v34 = vld [vmem:[#allocation2 + $0x1] sm:$0xff]  ;;  %v2320_v28 = vadd.f32 %v2304_v57, %v2268_v29 }
 0x39d   :  { %v2321_v40 = vadd.f32 %v2305_v60, %v2269_v14  ;;  %v9179_v59 = vmul.f32 %v11825_v36, %v9155_v1  ;;  %v2353_v48 = vmul.f32 %v11825_v36, %v8664_v9  ;;  %v2383_v21 = vld [vmem:[#allocation2 + $0x1c0] sm:$0xff]  ;;  %v2354_v19 = vmul.f32 %v11825_v36, %v8666_v8 }
 0x39e   :  { %v6082_v25 = vpack.c.bf16 %v253_v3, %v252_v10  ;;  %v6086_v0 = vpack.c.bf16 %v255_v26, %v254_v37  ;;  %v1821_v31 = vmul.f32 %v11855_v32, %v1801_v58  ;;  %v1958_v62 = vld [vmem:[#allocation2 + $0x141] sm:$0xff]  ;;  %v2355_v29 = vmul.f32 %v11825_v36, %v8668_v4 }
 0x39f   :  { %v2356_v14 = vmul.f32 %v11825_v36, %v8679_v35  ;;  %v1874_v57 = vmul.f32 %v11860_v17, %v1854_v15  ;;  %v1926_v60 = vmul.f32 %v11877_v12, %v1906_v34  ;;  %v6140_v9 = vld [vmem:[#allocation2 + $0x100] sm:$0xff]  ;;  %v2368_v8 = vadd.f32 %v2352_v2, %v8653_v30 }
 0x3a0   :  { %v2357_v1 = vmul.f32 %v6140_v9, %v11825_v36  ;;  %v9196_v26 = vmul.f32 %v11832_v6, %v8703_v63  ;;  %v9199_v32 = vmul.f32 %v11832_v6, %v2383_v21  ;;  %6083 = vmatprep.subr.bf16.mxu1 %v6082_v25  ;;  %v2010_v4 = vld [vmem:[#allocation2 + $0x2] sm:$0xff]  ;;  %v9201_v58 = vadd.f32 %v2353_v48, %v2317_v50  ;;  %v11974_v9 = vld [vmem:[#allocation77_spill] sm:$0xff] }
 0x3a1   :  { %6085 = vmatpush3.bf16.msra.mxu1 %v6082_v25  ;;  %v1890_v35 = vadd.f32 %v1874_v57, %v1821_v31  ;;  %v1978_v17 = vmul.f32 %v11890_v13, %v1958_v62  ;;  %v2047_v12 = vadd.f32 %v8879_v42, %v8851_v55  ;;  %v9206_v10 = vadd.f32 %v2354_v19, %v2318_v61  ;;  %v2063_v37 = vld [vmem:[#allocation2 + $0x280] sm:$0xff]  ;;  %v11968_v61 = vld [vmem:[#allocation49_spill] sm:$0xff]  ;;  %v11970_v19 = vld [vmem:[#allocation76_spill] sm:$0xff] }
 0x3a2   :  { %v2371_v30 = vadd.f32 %v2355_v29, %v2319_v16  ;;  %v2372_v3 = vadd.f32 %v2356_v14, %v2320_v28  ;;  %v2373_v63 = vadd.f32 %v2357_v1, %v2321_v40  ;;  %6087 = vmatprep.subr.bf16.mxu1 %v6086_v0  ;;  %v2404_v2 = vmul.f32 %v11832_v6, %v8705_v27  ;;  %v2435_v50 = vld [vmem:[#allocation2 + $0x81] sm:$0xff]  ;;  %v11972_v62 = vld [vmem:[#allocation81_spill] sm:$0xff] }
 0x3a3   :  { %v9212_v48 = vmul.f32 %v11832_v6, %v8707_v52  ;;  %v1942_v15 = vadd.f32 %v1926_v60, %v1890_v35  ;;  %v2030_v13 = vmul.f32 %v11903_v51, %v2010_v4  ;;  %v9217_v55 = vmul.f32 %v11832_v6, %v8715_v45  ;;  %v6141_v16 = vld [vmem:[#allocation2 + $0x240] sm:$0xff]  ;;  %v9244_v60 = vld [vmem:[#allocation2 + $0x291] sm:$0xff] }
 0x3a4   :  { %v2407_v42 = vmul.f32 %v11832_v6, %v8717_v5  ;;  %v2408_v40 = vmul.f32 %v11832_v6, %v11968_v61  ;;  %v2409_v27 = vmul.f32 %v6141_v16, %v11832_v6  ;;  %v2116_v1 = vld [vmem:[#allocation2 + $0x3c0] sm:$0xff]  ;;  %v9224_v52 = vadd.f32 %v2404_v2, %v2368_v8  ;;  %v11971_v5 = vld [vmem:[#allocation80_spill] sm:$0xff]  ;;  %11973 = vst [vmem:[#allocation49_spill] sm:$0xff] %v9244_v60  ;;  %v11975_v4 = vld [vmem:[#allocation53_spill] sm:$0xff] }
 0x3a5   :  { %6089 = vmatpush3.bf16.msra.mxu1 %v6086_v0  ;;  %v1994_v34 = vadd.f32 %v1978_v17, %v1942_v15  ;;  %v2083_v51 = vmul.f32 %v11916_v7, %v2063_v37  ;;  %v11969_v28 = vld [vmem:[#allocation71_spill] sm:$0xff]  ;;  %v9231_v25 = vmul.f32 %v11970_v19, %v2435_v50  ;;  %v9235_v31 = vmul.f32 %v11970_v19, %v11971_v5  ;;  %v11977_v37 = vld [vmem:[#allocation42_spill] sm:$0xff]  ;;  %v11984_v5 = vld [vmem:[#allocation64_spill] sm:$0xff] }
 0x3a6   :  { %v2100_v21 = vadd.f32 %v11969_v28, %v2047_v12  ;;  %v9228_v45 = vadd.f32 %v2407_v42, %v2371_v30  ;;  %v9239_v29 = vmul.f32 %v11970_v19, %v11972_v62  ;;  %v9241_v14 = vadd.f32 %v2408_v40, %v2372_v3  ;;  %v11976_v17 = vld [vmem:[#allocation47_spill] sm:$0xff] }
 0x3a7   :  { %v2425_v0 = vadd.f32 %v2409_v27, %v2373_v63  ;;  %v2046_v57 = vadd.f32 %v2030_v13, %v1994_v34  ;;  %v2136_v7 = vmul.f32 %v11931_v24, %v2116_v1  ;;  %v9248_v8 = vmul.f32 %v11970_v19, %v11974_v9  ;;  %v6142_v30 = vld [vmem:[#allocation2 + $0x101] sm:$0xff]  ;;  %v11979_v13 = vld [vmem:[#allocation106_spill] sm:$0xff] }
 0x3a8   :  { %v9252_v35 = vmul.f32 %v11970_v19, %v11975_v4  ;;  %v9256_v12 = vmul.f32 %v11970_v19, %v11976_v17  ;;  %v2461_v3 = vmul.f32 %v6142_v30, %v11970_v19  ;;  %v2168_v63 = vld [vmem:[#allocation2 + $0x281] sm:$0xff]  ;;  %v2153_v15 = vadd.f32 %v8981_v43, %v2100_v21 }
 0x3a9   :  { %v11978_v24 = vld [vmem:[#allocation84_spill] sm:$0xff]  ;;  %v2099_v50 = vadd.f32 %v2083_v51, %v2046_v57  ;;  %v11980_v42 = vld [vmem:[#allocation75_spill] sm:$0xff]  ;;  %v2188_v57 = vmul.f32 %v11820_v39, %v2168_v63  ;;  %v2189_v9 = vmul.f32 %v11820_v39, %v9244_v60  ;;  %v9304_v39 = vld [vmem:[#allocation2 + $0x3d1] sm:$0xff] }
 0x3aa   :  { %v9261_v2 = vmul.f32 %v11978_v24, %v11977_v37  ;;  %v2154_v61 = vadd.f32 %v11980_v42, %v11979_v13  ;;  %v11981_v40 = vld [vmem:[#allocation79_spill] sm:$0xff]  ;;  %v11983_v34 = vld [vmem:[#allocation44_spill] sm:$0xff]  ;;  %v9280_v51 = vmul.f32 %v11978_v24, %v11984_v5  ;;  %v9282_v21 = vadd.f32 %v2461_v3, %v2425_v0  ;;  %v11987_v37 = vld [vmem:[#allocation89_spill] sm:$0xff]  ;;  %11994 = vst [vmem:[#allocation53_spill] sm:$0xff] %v9304_v39 }
 0x3ab   :  { %v9268_v16 = vmul.f32 %v11978_v24, %v11981_v40  ;;  %v11982_v27 = vld [vmem:[#allocation43_spill] sm:$0xff]  ;;  %v9276_v28 = vmul.f32 %v11978_v24, %v11983_v34  ;;  %v2152_v62 = vadd.f32 %v2136_v7, %v2099_v50  ;;  %v11988_v13 = vld [vmem:[#allocation28_spill] sm:$0xff]  ;;  %v11990_v40 = vld [vmem:[#allocation90_spill] sm:$0xff]  ;;  %v2205_v5 = vadd.f32 %v2189_v9, %v2153_v15 }
 0x3ac   :  { %v9272_v1 = vmul.f32 %v11978_v24, %v11982_v27  ;;  %v2547_v43 = vld [vmem:[#allocation2 + $0x122] sm:$0xff]  ;;  %v9294_v42 = vmul.f32 %v11988_v13, %v11987_v37  ;;  %v9298_v0 = vmul.f32 %v11988_v13, %v11990_v40  ;;  %v11997_v37 = vld [vmem:[#allocation129_spill] sm:$0xff] }
 0x3ad   :  { %v9287_v4 = vld [vmem:[#allocation2 + $0x3e1] sm:$0xff]  ;;  %v2207_v54 = vadd.f32 %v11997_v37, %v9013_v33  ;;  %v12000_v60 = vld [vmem:[#allocation101_spill] sm:$0xff]  ;;  %v2204_v15 = vadd.f32 %v2188_v57, %v2152_v62  ;;  %v2241_v33 = vmul.f32 %v11831_v44, %v9304_v39  ;;  %v12015_v39 = vld [vmem:[#allocation30_spill] sm:$0xff] }
 0x3ae   :  { %11985 = vst [vmem:[#allocation71_spill] sm:$0xff] %v9287_v4  ;;  %v6143_v17 = vld [vmem:[#allocation2 + $0x241] sm:$0xff]  ;;  %11989 = vst [vmem:[#allocation80_spill] sm:$0xff] %v9294_v42  ;;  %v9330_v37 = vld [vmem:[#allocation2 + $0x2b2] sm:$0xff] }
 0x3af   :  { %v9290_v30 = vmul.f32 %v6143_v17, %v11978_v24  ;;  %11991 = vst [vmem:[#allocation81_spill] sm:$0xff] %v9298_v0  ;;  %v11992_v7 = vld [vmem:[#allocation91_spill] sm:$0xff]  ;;  %v11995_v50 = vld [vmem:[#allocation92_spill] sm:$0xff]  ;;  %v2206_v17 = vadd.f32 %v9035_v20, %v2154_v61  ;;  %v2242_v61 = vmul.f32 %v11831_v44, %v9287_v4  ;;  %12005 = vst [vmem:[#allocation75_spill] sm:$0xff] %v9330_v37 }
 0x3b0   :  { %v9302_v3 = vmul.f32 %v11988_v13, %v11992_v7  ;;  %v2220_v63 = vld [vmem:[#allocation2 + $0x3c1] sm:$0xff]  ;;  %v9308_v27 = vmul.f32 %v11988_v13, %v11995_v50  ;;  %v9317_v7 = vmul.f32 %v11988_v13, %v2547_v43  ;;  %v12006_v43 = vld [vmem:[#allocation102_spill] sm:$0xff] }
 0x3b1   :  { %11986 = vst [vmem:[#allocation76_spill] sm:$0xff] %v9290_v30  ;;  %v2599_v34 = vld [vmem:[#allocation2 + $0x3a0] sm:$0xff]  ;;  %v12003_v50 = vld [vmem:[#allocation120_spill] sm:$0xff]  ;;  %v2240_v20 = vmul.f32 %v11831_v44, %v2220_v63 }
 0x3b2   :  { %11993 = vst [vmem:[#allocation77_spill] sm:$0xff] %v9302_v3  ;;  %11996 = vst [vmem:[#allocation47_spill] sm:$0xff] %v9308_v27  ;;  %v6144_v40 = vld [vmem:[#allocation2 + $0x102] sm:$0xff]  ;;  %v12004_v27 = vld [vmem:[#allocation130_spill] sm:$0xff] }
 0x3b3   :  { %v9314_v41 = vmul.f32 %v6144_v40, %v11988_v13  ;;  %11999 = vst [vmem:[#allocation84_spill] sm:$0xff] %v9317_v7  ;;  %v12001_v3 = vld [vmem:[#allocation27_spill] sm:$0xff]  ;;  %v2208_v42 = vadd.f32 %v12004_v27, %v12003_v50  ;;  %v9346_v27 = vld [vmem:[#allocation2 + $0x292] sm:$0xff]  ;;  %v2258_v7 = vadd.f32 %v2242_v61, %v2206_v17  ;;  %v2256_v30 = vadd.f32 %v2240_v20, %v2204_v15 }
 0x3b4   :  { %v9321_v0 = vmul.f32 %v12001_v3, %v12000_v60  ;;  %v2272_v9 = vld [vmem:[#allocation2 + $0x282] sm:$0xff]  ;;  %v9334_v40 = vmul.f32 %v12001_v3, %v12006_v43  ;;  %v9344_v63 = vmul.f32 %v12001_v3, %v2599_v34  ;;  %12012 = vst [vmem:[#allocation89_spill] sm:$0xff] %v9346_v27  ;;  %v12019_v17 = vld [vmem:[#allocation33_spill] sm:$0xff]  ;;  %v2314_v15 = vadd.f32 %v9147_v47, %v9117_v49 }
 0x3b5   :  { %11998 = vst [vmem:[#allocation42_spill] sm:$0xff] %v9314_v41  ;;  %v12008_v60 = vld [vmem:[#allocation103_spill] sm:$0xff]  ;;  %v2292_v41 = vmul.f32 %v11836_v23, %v2272_v9  ;;  %v6148_v20 = vld [vmem:[#allocation2 + $0x391] sm:$0xff] }
 0x3b6   :  { %12002 = vst [vmem:[#allocation106_spill] sm:$0xff] %v9321_v0  ;;  %12007 = vst [vmem:[#allocation79_spill] sm:$0xff] %v9334_v40  ;;  %v9338_v0 = vmul.f32 %v12001_v3, %v12008_v60  ;;  %v6145_v62 = vld [vmem:[#allocation2 + $0x380] sm:$0xff]  ;;  %v2257_v40 = vadd.f32 %v2241_v33, %v2205_v5  ;;  %v2259_v60 = vadd.f32 %v9083_v11, %v2207_v54  ;;  %v12018_v5 = vld [vmem:[#allocation128_spill] sm:$0xff] }
 0x3b7   :  { %v9341_v57 = vmul.f32 %v6145_v62, %v12001_v3  ;;  %12011 = vst [vmem:[#allocation64_spill] sm:$0xff] %v9344_v63  ;;  %v9348_v44 = vld [vmem:[#allocation2 + $0x2a2] sm:$0xff]  ;;  %v12017_v63 = vld [vmem:[#allocation141_spill] sm:$0xff]  ;;  %v2295_v54 = vmul.f32 %v11836_v23, %v9330_v37  ;;  %v9375_v33 = vmul.f32 %v12019_v17, %v12018_v5  ;;  %v9383_v9 = vmul.f32 %v6148_v20, %v12019_v17 }
 0x3b8   :  { %12009 = vst [vmem:[#allocation43_spill] sm:$0xff] %v9338_v0  ;;  %12013 = vst [vmem:[#allocation90_spill] sm:$0xff] %v9348_v44  ;;  %v2651_v50 = vld [vmem:[#allocation2 + $0x4e0] sm:$0xff]  ;;  %v12016_v0 = vld [vmem:[#allocation116_spill] sm:$0xff]  ;;  %v2260_v3 = vadd.f32 %v12017_v63, %v2208_v42  ;;  %v2294_v11 = vmul.f32 %v11836_v23, %v9348_v44  ;;  %v2308_v47 = vadd.f32 %v2292_v41, %v2256_v30 }
 0x3b9   :  { %12010 = vst [vmem:[#allocation44_spill] sm:$0xff] %v9341_v57  ;;  %v12014_v4 = vld [vmem:[#allocation115_spill] sm:$0xff]  ;;  %v9357_v62 = vmul.f32 %v12015_v39, %v12016_v0  ;;  %v9371_v0 = vmul.f32 %v12015_v39, %v2651_v50  ;;  %12021 = vst [vmem:[#allocation92_spill] sm:$0xff] %v9383_v9  ;;  %v2311_v50 = vadd.f32 %v2295_v54, %v2259_v60  ;;  %v12022_v44 = vld [vmem:[#allocation29_spill] sm:$0xff] }
 0x3ba   :  { %v9352_v43 = vmul.f32 %v12015_v39, %v12014_v4  ;;  %v6146_v57 = vld [vmem:[#allocation2 + $0x4c0] sm:$0xff]  ;;  %v2293_v4 = vmul.f32 %v11836_v23, %v9346_v27  ;;  %v2310_v63 = vadd.f32 %v2294_v11, %v2258_v7  ;;  %v2312_v5 = vadd.f32 %v9129_v18, %v2260_v3 }
 0x3bb   :  { %v9360_v34 = vmul.f32 %v6146_v57, %v12015_v39  ;;  %v2703_v13 = vld [vmem:[#allocation2 + $0x3a1] sm:$0xff]  ;;  %v2344_v27 = vmul.f32 %v11825_v36, %v12022_v44  ;;  %v2366_v41 = vadd.f32 %v9173_v22, %v2314_v15  ;;  %v2367_v54 = vadd.f32 %v9179_v59, %v9159_v38  ;;  %v12034_v38 = vld [vmem:[#allocation38_spill] sm:$0xff] }
 0x3bc   :  { %v6147_v42 = vld [vmem:[#allocation2 + $0x381] sm:$0xff]  ;;  %v2309_v23 = vadd.f32 %v2293_v4, %v2257_v40  ;;  %v9386_v37 = vmul.f32 %v12019_v17, %v2703_v13  ;;  %v12025_v40 = vld [vmem:[#allocation34_spill] sm:$0xff] }
 0x3bd   :  { %v9378_v61 = vmul.f32 %v6147_v42, %v12019_v17  ;;  %v2755_v57 = vld [vmem:[#allocation2 + $0x4e1] sm:$0xff]  ;;  %v2313_v42 = vadd.f32 %v9133_v46, %v9115_v56  ;;  %v2347_v13 = vmul.f32 %v11825_v36, %v12025_v40 }
 0x3be   :  { %v2807_v49 = vld [vmem:[#allocation2 + $0x3a2] sm:$0xff] }
 0x3bf   :  { %12020 = vst [vmem:[#allocation91_spill] sm:$0xff] %v9378_v61  ;;  %v12023_v61 = vld [vmem:[#allocation32_spill] sm:$0xff]  ;;  %v12024_v9 = vld [vmem:[#allocation31_spill] sm:$0xff]  ;;  %v2363_v11 = vadd.f32 %v2347_v13, %v2311_v50  ;;  %v2396_v50 = vmul.f32 %v11832_v6, %v12034_v38  ;;  %v2419_v13 = vadd.f32 %v9199_v32, %v2367_v54 }
 0x3c0   :  { %v2345_v20 = vmul.f32 %v11825_v36, %v12023_v61  ;;  %v2346_v7 = vmul.f32 %v11825_v36, %v12024_v9  ;;  %v6149_v60 = vld [vmem:[#allocation2 + $0x4c1] sm:$0xff]  ;;  %v6150_v61 = vld [vmem:[#allocation2 + $0x392] sm:$0xff] }
 0x3c1   :  { %v12026_v4 = vld [vmem:[#allocation35_spill] sm:$0xff]  ;;  %v12029_v46 = vld [vmem:[#allocation72_spill] sm:$0xff] }
 0x3c2   :  { %v9400_v18 = vmul.f32 %v6149_v60, %v12026_v4  ;;  %v9403_v56 = vmul.f32 %v12026_v4, %v2755_v57  ;;  %v2348_v3 = vmul.f32 %v11825_v36, %v12029_v46  ;;  %v2361_v30 = vadd.f32 %v2345_v20, %v2309_v23  ;;  %v12030_v9 = vld [vmem:[#allocation36_spill] sm:$0xff]  ;;  %v12031_v36 = vld [vmem:[#allocation37_spill] sm:$0xff]  ;;  %v12035_v20 = vld [vmem:[#allocation46_spill] sm:$0xff] }
 0x3c3   :  { %v2362_v44 = vadd.f32 %v2346_v7, %v2310_v63  ;;  %v9411_v40 = vmul.f32 %v6150_v61, %v12030_v9  ;;  %v9414_v60 = vmul.f32 %v12030_v9, %v2807_v49  ;;  %v2397_v22 = vmul.f32 %v11832_v6, %v12031_v36  ;;  %v12032_v15 = vld [vmem:[#allocation40_spill] sm:$0xff]  ;;  %v12033_v63 = vld [vmem:[#allocation62_spill] sm:$0xff]  ;;  %v12036_v7 = vld [vmem:[#allocation73_spill] sm:$0xff] }
 0x3c4   :  { %12027 = vst [vmem:[#allocation129_spill] sm:$0xff] %v9400_v18  ;;  %12028 = vst [vmem:[#allocation101_spill] sm:$0xff] %v9403_v56  ;;  %v2364_v57 = vadd.f32 %v2348_v3, %v2312_v5  ;;  %v2365_v56 = vadd.f32 %v9163_v53, %v2313_v42  ;;  %v2360_v18 = vadd.f32 %v2344_v27, %v2308_v47 }
 0x3c5   :  { %v2398_v23 = vmul.f32 %v11832_v6, %v12032_v15  ;;  %v2399_v59 = vmul.f32 %v11832_v6, %v12033_v63  ;;  %v2400_v49 = vmul.f32 %v11832_v6, %v12035_v20  ;;  %v2401_v5 = vmul.f32 %v11832_v6, %v12036_v7  ;;  %v12037_v63 = vld [vmem:[#allocation55_spill] sm:$0xff]  ;;  %v12038_v6 = vld [vmem:[#allocation56_spill] sm:$0xff] }
 0x3c6   :  { %v2418_v53 = vadd.f32 %v9196_v26, %v2366_v41  ;;  %v2413_v27 = vadd.f32 %v2397_v22, %v2361_v30  ;;  %v2421_v61 = vadd.f32 %v9212_v48, %v9201_v58  ;;  %v2422_v36 = vadd.f32 %v9217_v55, %v9206_v10  ;;  %v12039_v41 = vld [vmem:[#allocation57_spill] sm:$0xff]  ;;  %v12042_v58 = vld [vmem:[#allocation59_spill] sm:$0xff]  ;;  %v12043_v10 = vld [vmem:[#allocation60_spill] sm:$0xff] }
 0x3c7   :  { %v2414_v42 = vadd.f32 %v2398_v23, %v2362_v44  ;;  %v2415_v47 = vadd.f32 %v2399_v59, %v2363_v11  ;;  %v2416_v46 = vadd.f32 %v2400_v49, %v2364_v57  ;;  %v2417_v3 = vadd.f32 %v2401_v5, %v2365_v56  ;;  %v12040_v44 = vld [vmem:[#allocation26_spill] sm:$0xff]  ;;  %v2487_v49 = vld [vmem:[#allocation2 + $0x1c1] sm:$0xff] }
 0x3c8   :  { %v2412_v15 = vadd.f32 %v2396_v50, %v2360_v18  ;;  %v2449_v38 = vmul.f32 %v11970_v19, %v12037_v63  ;;  %v2450_v26 = vmul.f32 %v11970_v19, %v12038_v6  ;;  %v2451_v30 = vmul.f32 %v11970_v19, %v12039_v41  ;;  %v12041_v56 = vld [vmem:[#allocation58_spill] sm:$0xff] }
 0x3c9   :  { %v2448_v32 = vmul.f32 %v11970_v19, %v12040_v44  ;;  %v2452_v11 = vmul.f32 %v11970_v19, %v12041_v56  ;;  %v2453_v48 = vmul.f32 %v11970_v19, %v12042_v58  ;;  %v2454_v55 = vmul.f32 %v11970_v19, %v12043_v10 }
 0x3ca   :  { %v2465_v18 = vadd.f32 %v2449_v38, %v2413_v27  ;;  %v2466_v54 = vadd.f32 %v2450_v26, %v2414_v42  ;;  %v2467_v57 = vadd.f32 %v2451_v30, %v2415_v47  ;;  %v2471_v22 = vadd.f32 %v9231_v25, %v2419_v13  ;;  %v12044_v42 = vld [vmem:[#allocation48_spill] sm:$0xff]  ;;  %v12045_v47 = vld [vmem:[#allocation83_spill] sm:$0xff]  ;;  %v12046_v13 = vld [vmem:[#allocation41_spill] sm:$0xff] }
 0x3cb   :  { %v2468_v23 = vadd.f32 %v2452_v11, %v2416_v46  ;;  %v2469_v59 = vadd.f32 %v2453_v48, %v2417_v3  ;;  %v2470_v50 = vadd.f32 %v2454_v55, %v2418_v53  ;;  %v2472_v20 = vadd.f32 %v9235_v31, %v9224_v52  ;;  %v12047_v31 = vld [vmem:[#allocation54_spill] sm:$0xff]  ;;  %v9476_v11 = vld [vmem:[#allocation2 + $0x82] sm:$0xff]  ;;  %v12052_v55 = vld [vmem:[#allocation65_spill] sm:$0xff] }
 0x3cc   :  { %v2464_v7 = vadd.f32 %v2448_v32, %v2412_v15  ;;  %v2473_v5 = vadd.f32 %v9239_v29, %v2421_v61  ;;  %v2474_v63 = vadd.f32 %v9248_v8, %v2422_v36  ;;  %v2475_v19 = vadd.f32 %v9252_v35, %v9228_v45  ;;  %v12048_v46 = vld [vmem:[#allocation74_spill] sm:$0xff]  ;;  %v12051_v48 = vld [vmem:[#allocation76_spill] sm:$0xff] }
 0x3cd   :  { %v2476_v27 = vadd.f32 %v9256_v12, %v9241_v14  ;;  %v2501_v25 = vmul.f32 %v11978_v24, %v12044_v42  ;;  %v2502_v53 = vmul.f32 %v11978_v24, %v12045_v47  ;;  %v2503_v52 = vmul.f32 %v11978_v24, %v12046_v13  ;;  %v12049_v3 = vld [vmem:[#allocation78_spill] sm:$0xff] }
 0x3ce   :  { %v2500_v29 = vmul.f32 %v11978_v24, %v12047_v31  ;;  %v2504_v8 = vmul.f32 %v11978_v24, %v12048_v46  ;;  %v2505_v45 = vmul.f32 %v11978_v24, %v12049_v3  ;;  %v12050_v35 = vld [vmem:[#allocation82_spill] sm:$0xff]  ;;  %v2507_v12 = vmul.f32 %v11978_v24, %v2487_v49  ;;  %v12061_v31 = vld [vmem:[#allocation80_spill] sm:$0xff]  ;;  %v12062_v46 = vld [vmem:[#allocation81_spill] sm:$0xff] }
 0x3cf   :  { %v2506_v14 = vmul.f32 %v11978_v24, %v12050_v35  ;;  %v2517_v61 = vadd.f32 %v2501_v25, %v2465_v18  ;;  %v2518_v36 = vadd.f32 %v2502_v53, %v2466_v54  ;;  %v2519_v15 = vadd.f32 %v2503_v52, %v2467_v57  ;;  %v12053_v18 = vld [vmem:[#allocation28_spill] sm:$0xff]  ;;  %v12054_v57 = vld [vmem:[#allocation45_spill] sm:$0xff]  ;;  %v2591_v35 = vld [vmem:[#allocation2 + $0x300] sm:$0xff] }
 0x3d0   :  { %v2516_v38 = vadd.f32 %v2500_v29, %v2464_v7  ;;  %v2520_v6 = vadd.f32 %v2504_v8, %v2468_v23  ;;  %v2521_v26 = vadd.f32 %v2505_v45, %v2469_v59  ;;  %v2523_v30 = vadd.f32 %v2507_v12, %v2471_v22  ;;  %v12056_v23 = vld [vmem:[#allocation68_spill] sm:$0xff]  ;;  %v12057_v59 = vld [vmem:[#allocation85_spill] sm:$0xff] }
 0x3d1   :  { %v2522_v41 = vadd.f32 %v2506_v14, %v2470_v50  ;;  %v2524_v44 = vadd.f32 %v9261_v2, %v2472_v20  ;;  %v2525_v32 = vadd.f32 %v9268_v16, %v2473_v5  ;;  %v2526_v56 = vadd.f32 %v9272_v1, %v2474_v63  ;;  %v12055_v2 = vld [vmem:[#allocation66_spill] sm:$0xff]  ;;  %v12059_v20 = vld [vmem:[#allocation87_spill] sm:$0xff]  ;;  %v12060_v7 = vld [vmem:[#allocation88_spill] sm:$0xff] }
 0x3d2   :  { %v2527_v58 = vadd.f32 %v9276_v28, %v2475_v19  ;;  %v2528_v24 = vadd.f32 %v9280_v51, %v2476_v27  ;;  %v2529_v10 = vadd.f32 %v12051_v48, %v9282_v21  ;;  %v2552_v54 = vmul.f32 %v12053_v18, %v12052_v55  ;;  %v12058_v50 = vld [vmem:[#allocation86_spill] sm:$0xff]  ;;  %v12063_v3 = vld [vmem:[#allocation77_spill] sm:$0xff]  ;;  %v12064_v14 = vld [vmem:[#allocation47_spill] sm:$0xff] }
 0x3d3   :  { %v2553_v22 = vmul.f32 %v12053_v18, %v12054_v57  ;;  %v2554_v16 = vmul.f32 %v12053_v18, %v12055_v2  ;;  %v2555_v1 = vmul.f32 %v12053_v18, %v12056_v23  ;;  %v2556_v28 = vmul.f32 %v12053_v18, %v12057_v59  ;;  %v12065_v48 = vld [vmem:[#allocation42_spill] sm:$0xff] }
 0x3d4   :  { %v2557_v51 = vmul.f32 %v12053_v18, %v12058_v50  ;;  %v2558_v21 = vmul.f32 %v12053_v18, %v12059_v20  ;;  %v2559_v49 = vmul.f32 %v12053_v18, %v9476_v11  ;;  %v2560_v5 = vmul.f32 %v12053_v18, %v12060_v7  ;;  %v12073_v18 = vld [vmem:[#allocation96_spill] sm:$0xff]  ;;  %v12075_v57 = vld [vmem:[#allocation98_spill] sm:$0xff] }
 0x3d5   :  { %v2568_v63 = vadd.f32 %v2552_v54, %v2516_v38  ;;  %v2569_v19 = vadd.f32 %v2553_v22, %v2517_v61  ;;  %v2570_v27 = vadd.f32 %v2554_v16, %v2518_v36  ;;  %v2571_v42 = vadd.f32 %v2555_v1, %v2519_v15  ;;  %v12066_v38 = vld [vmem:[#allocation50_spill] sm:$0xff]  ;;  %v12067_v61 = vld [vmem:[#allocation84_spill] sm:$0xff]  ;;  %v12074_v54 = vld [vmem:[#allocation97_spill] sm:$0xff] }
 0x3d6   :  { %v2572_v25 = vadd.f32 %v2556_v28, %v2520_v6  ;;  %v2573_v47 = vadd.f32 %v2557_v51, %v2521_v26  ;;  %v2574_v53 = vadd.f32 %v2558_v21, %v2522_v41  ;;  %v2575_v13 = vadd.f32 %v2559_v49, %v2523_v30  ;;  %v12068_v15 = vld [vmem:[#allocation70_spill] sm:$0xff]  ;;  %v12069_v6 = vld [vmem:[#allocation27_spill] sm:$0xff]  ;;  %v12070_v41 = vld [vmem:[#allocation93_spill] sm:$0xff] }
 0x3d7   :  { %v2576_v52 = vadd.f32 %v2560_v5, %v2524_v44  ;;  %v2577_v29 = vadd.f32 %v12061_v31, %v2525_v32  ;;  %v2578_v8 = vadd.f32 %v12062_v46, %v2526_v56  ;;  %v2579_v45 = vadd.f32 %v12063_v3, %v2527_v58  ;;  %v12071_v44 = vld [vmem:[#allocation94_spill] sm:$0xff]  ;;  %v12072_v56 = vld [vmem:[#allocation95_spill] sm:$0xff]  ;;  %v12077_v1 = vld [vmem:[#allocation100_spill] sm:$0xff] }
 0x3d8   :  { %v2580_v12 = vadd.f32 %v12064_v14, %v2528_v24  ;;  %v2581_v55 = vadd.f32 %v12065_v48, %v2529_v10  ;;  %v2583_v36 = vadd.f32 %v12067_v61, %v12066_v38  ;;  %v2604_v26 = vmul.f32 %v12069_v6, %v12068_v15  ;;  %v12076_v16 = vld [vmem:[#allocation99_spill] sm:$0xff]  ;;  %v12078_v3 = vld [vmem:[#allocation106_spill] sm:$0xff] }
 0x3d9   :  { %v2605_v30 = vmul.f32 %v12069_v6, %v12070_v41  ;;  %v2606_v32 = vmul.f32 %v12069_v6, %v12071_v44  ;;  %v2607_v58 = vmul.f32 %v12069_v6, %v12072_v56  ;;  %v2608_v24 = vmul.f32 %v12069_v6, %v12073_v18  ;;  %v2643_v48 = vld [vmem:[#allocation2 + $0x440] sm:$0xff]  ;;  %v12081_v41 = vld [vmem:[#allocation44_spill] sm:$0xff]  ;;  %v12091_v56 = vld [vmem:[#allocation113_spill] sm:$0xff] }
 0x3da   :  { %v2609_v10 = vmul.f32 %v12069_v6, %v12074_v54  ;;  %v2610_v22 = vmul.f32 %v12069_v6, %v12075_v57  ;;  %v2611_v2 = vmul.f32 %v12069_v6, %v2591_v35  ;;  %v2612_v23 = vmul.f32 %v12069_v6, %v12076_v16  ;;  %v12079_v35 = vld [vmem:[#allocation79_spill] sm:$0xff]  ;;  %v12092_v18 = vld [vmem:[#allocation114_spill] sm:$0xff] }
 0x3db   :  { %v2613_v59 = vmul.f32 %v12069_v6, %v12077_v1  ;;  %v2620_v28 = vadd.f32 %v2604_v26, %v2568_v63  ;;  %v2621_v50 = vadd.f32 %v2605_v30, %v2569_v19  ;;  %v2622_v51 = vadd.f32 %v2606_v32, %v2570_v27  ;;  %v12080_v61 = vld [vmem:[#allocation43_spill] sm:$0xff]  ;;  %v12082_v6 = vld [vmem:[#allocation64_spill] sm:$0xff] }
 0x3dc   :  { %v2623_v20 = vadd.f32 %v2607_v58, %v2571_v42  ;;  %v2624_v21 = vadd.f32 %v2608_v24, %v2572_v25  ;;  %v2625_v49 = vadd.f32 %v2609_v10, %v2573_v47  ;;  %v2626_v7 = vadd.f32 %v2610_v22, %v2574_v53  ;;  %v12083_v19 = vld [vmem:[#allocation104_spill] sm:$0xff]  ;;  %v12084_v42 = vld [vmem:[#allocation105_spill] sm:$0xff]  ;;  %v12085_v47 = vld [vmem:[#allocation107_spill] sm:$0xff] }
 0x3dd   :  { %v2627_v5 = vadd.f32 %v2611_v2, %v2575_v13  ;;  %v2628_v31 = vadd.f32 %v2612_v23, %v2576_v52  ;;  %v2629_v46 = vadd.f32 %v2613_v59, %v2577_v29  ;;  %v2630_v14 = vadd.f32 %v12078_v3, %v2578_v8  ;;  %v12086_v13 = vld [vmem:[#allocation108_spill] sm:$0xff]  ;;  %v12087_v29 = vld [vmem:[#allocation109_spill] sm:$0xff] }
 0x3de   :  { %v2631_v38 = vadd.f32 %v12079_v35, %v2579_v45  ;;  %v2632_v15 = vadd.f32 %v12080_v61, %v2580_v12  ;;  %v2633_v44 = vadd.f32 %v12081_v41, %v2581_v55  ;;  %v2635_v63 = vadd.f32 %v12082_v6, %v2583_v36  ;;  %v12088_v45 = vld [vmem:[#allocation110_spill] sm:$0xff]  ;;  %v12089_v55 = vld [vmem:[#allocation111_spill] sm:$0xff]  ;;  %v12090_v30 = vld [vmem:[#allocation112_spill] sm:$0xff] }
 0x3df   :  { %v2656_v27 = vmul.f32 %v12015_v39, %v12083_v19  ;;  %v2657_v25 = vmul.f32 %v12015_v39, %v12084_v42  ;;  %v2658_v53 = vmul.f32 %v12015_v39, %v12085_v47  ;;  %v2659_v52 = vmul.f32 %v12015_v39, %v12086_v13  ;;  %v2695_v41 = vld [vmem:[#allocation2 + $0x301] sm:$0xff]  ;;  %v12102_v19 = vld [vmem:[#allocation126_spill] sm:$0xff] }
 0x3e0   :  { %v2660_v8 = vmul.f32 %v12015_v39, %v12087_v29  ;;  %v2661_v12 = vmul.f32 %v12015_v39, %v12088_v45  ;;  %v2662_v36 = vmul.f32 %v12015_v39, %v12089_v55  ;;  %v2663_v26 = vmul.f32 %v12015_v39, %v2643_v48  ;;  %v12103_v42 = vld [vmem:[#allocation127_spill] sm:$0xff] }
 0x3e1   :  { %v2664_v32 = vmul.f32 %v12015_v39, %v12090_v30  ;;  %v2665_v58 = vmul.f32 %v12015_v39, %v12091_v56  ;;  %v2666_v24 = vmul.f32 %v12015_v39, %v12092_v18  ;;  %v2672_v54 = vadd.f32 %v2656_v27, %v2620_v28  ;;  %v12093_v28 = vld [vmem:[#allocation49_spill] sm:$0xff]  ;;  %v12104_v56 = vld [vmem:[#allocation91_spill] sm:$0xff] }
 0x3e2   :  { %v2673_v10 = vadd.f32 %v2657_v25, %v2621_v50  ;;  %v2674_v57 = vadd.f32 %v2658_v53, %v2622_v51  ;;  %v2675_v22 = vadd.f32 %v2659_v52, %v2623_v20  ;;  %v2676_v2 = vadd.f32 %v2660_v8, %v2624_v21  ;;  %v12094_v51 = vld [vmem:[#allocation117_spill] sm:$0xff]  ;;  %v12095_v21 = vld [vmem:[#allocation118_spill] sm:$0xff]  ;;  %v2747_v18 = vld [vmem:[#allocation2 + $0x441] sm:$0xff] }
 0x3e3   :  { %v2677_v16 = vadd.f32 %v2661_v12, %v2625_v49  ;;  %v2678_v23 = vadd.f32 %v2662_v36, %v2626_v7  ;;  %v2679_v1 = vadd.f32 %v2663_v26, %v2627_v5  ;;  %v2680_v59 = vadd.f32 %v2664_v32, %v2628_v31  ;;  %v12096_v7 = vld [vmem:[#allocation119_spill] sm:$0xff]  ;;  %v12098_v31 = vld [vmem:[#allocation122_spill] sm:$0xff] }
 0x3e4   :  { %v2681_v3 = vadd.f32 %v2665_v58, %v2629_v46  ;;  %v2682_v48 = vadd.f32 %v2666_v24, %v2630_v14  ;;  %v2683_v35 = vadd.f32 %v9352_v43, %v2631_v38  ;;  %v2684_v61 = vadd.f32 %v9357_v62, %v2632_v15  ;;  %v12097_v43 = vld [vmem:[#allocation121_spill] sm:$0xff]  ;;  %v12099_v46 = vld [vmem:[#allocation123_spill] sm:$0xff]  ;;  %v12100_v38 = vld [vmem:[#allocation124_spill] sm:$0xff] }
 0x3e5   :  { %v2685_v6 = vadd.f32 %v9360_v34, %v2633_v44  ;;  %v2687_v39 = vadd.f32 %v9371_v0, %v2635_v63  ;;  %v2708_v50 = vmul.f32 %v12019_v17, %v12093_v28  ;;  %v2709_v20 = vmul.f32 %v12019_v17, %v12094_v51  ;;  %v12101_v44 = vld [vmem:[#allocation125_spill] sm:$0xff]  ;;  %v12105_v24 = vld [vmem:[#allocation51_spill] sm:$0xff] }
 0x3e6   :  { %v2710_v49 = vmul.f32 %v12019_v17, %v12095_v21  ;;  %v2711_v5 = vmul.f32 %v12019_v17, %v12096_v7  ;;  %v2712_v62 = vmul.f32 %v12019_v17, %v12097_v43  ;;  %v2713_v34 = vmul.f32 %v12019_v17, %v12098_v31 }
 0x3e7   :  { %v2714_v0 = vmul.f32 %v12019_v17, %v12099_v46  ;;  %v2715_v14 = vmul.f32 %v12019_v17, %v2695_v41  ;;  %v2716_v15 = vmul.f32 %v12019_v17, %v12100_v38  ;;  %v2717_v63 = vmul.f32 %v12019_v17, %v12101_v44  ;;  %v12106_v41 = vld [vmem:[#allocation92_spill] sm:$0xff] }
 0x3e8   :  { %v2718_v27 = vmul.f32 %v12019_v17, %v12102_v19  ;;  %v2719_v25 = vmul.f32 %v12019_v17, %v12103_v42  ;;  %v2724_v47 = vadd.f32 %v2708_v50, %v2672_v54  ;;  %v2725_v53 = vadd.f32 %v2709_v20, %v2673_v10  ;;  %v12107_v10 = vld [vmem:[#allocation53_spill] sm:$0xff]  ;;  %v12116_v20 = vld [vmem:[#allocation138_spill] sm:$0xff] }
 0x3e9   :  { %v2726_v13 = vadd.f32 %v2710_v49, %v2674_v57  ;;  %v2727_v52 = vadd.f32 %v2711_v5, %v2675_v22  ;;  %v2728_v29 = vadd.f32 %v2712_v62, %v2676_v2  ;;  %v2729_v8 = vadd.f32 %v2713_v34, %v2677_v16  ;;  %v12108_v22 = vld [vmem:[#allocation71_spill] sm:$0xff]  ;;  %v12115_v50 = vld [vmem:[#allocation137_spill] sm:$0xff]  ;;  %v12118_v5 = vld [vmem:[#allocation140_spill] sm:$0xff] }
 0x3ea   :  { %v2730_v45 = vadd.f32 %v2714_v0, %v2678_v23  ;;  %v2731_v12 = vadd.f32 %v2715_v14, %v2679_v1  ;;  %v2732_v55 = vadd.f32 %v2716_v15, %v2680_v59  ;;  %v2733_v36 = vadd.f32 %v2717_v63, %v2681_v3  ;;  %v12109_v16 = vld [vmem:[#allocation131_spill] sm:$0xff]  ;;  %v12110_v1 = vld [vmem:[#allocation132_spill] sm:$0xff]  ;;  %v12111_v59 = vld [vmem:[#allocation133_spill] sm:$0xff] }
 0x3eb   :  { %v2734_v26 = vadd.f32 %v2718_v27, %v2682_v48  ;;  %v2735_v30 = vadd.f32 %v2719_v25, %v2683_v35  ;;  %v2736_v32 = vadd.f32 %v9375_v33, %v2684_v61  ;;  %v2737_v58 = vadd.f32 %v12104_v56, %v2685_v6  ;;  %v12112_v48 = vld [vmem:[#allocation134_spill] sm:$0xff]  ;;  %v12113_v61 = vld [vmem:[#allocation135_spill] sm:$0xff]  ;;  %v12119_v56 = vld [vmem:[#allocation129_spill] sm:$0xff] }
 0x3ec   :  { %v2738_v17 = vadd.f32 %v12106_v41, %v12105_v24  ;;  %v2739_v54 = vadd.f32 %v9386_v37, %v2687_v39  ;;  %v2760_v57 = vmul.f32 %v12026_v4, %v12107_v10  ;;  %v2761_v2 = vmul.f32 %v12026_v4, %v12108_v22  ;;  %v12114_v39 = vld [vmem:[#allocation136_spill] sm:$0xff]  ;;  %v12117_v49 = vld [vmem:[#allocation139_spill] sm:$0xff]  ;;  %v12121_v10 = vld [vmem:[#allocation101_spill] sm:$0xff] }
 0x3ed   :  { %v2762_v23 = vmul.f32 %v12026_v4, %v12109_v16  ;;  %v2763_v33 = vmul.f32 %v12026_v4, %v12110_v1  ;;  %v2764_v3 = vmul.f32 %v12026_v4, %v12111_v59  ;;  %v2765_v35 = vmul.f32 %v12026_v4, %v12112_v48  ;;  %v2799_v25 = vld [vmem:[#allocation2 + $0x302] sm:$0xff] }
 0x3ee   :  { %v2766_v37 = vmul.f32 %v12026_v4, %v12113_v61  ;;  %v2767_v6 = vmul.f32 %v12026_v4, %v2747_v18  ;;  %v2768_v28 = vmul.f32 %v12026_v4, %v12114_v39  ;;  %v2769_v51 = vmul.f32 %v12026_v4, %v12115_v50  ;;  %v12120_v24 = vld [vmem:[#allocation52_spill] sm:$0xff] }
 0x3ef   :  { %v2770_v21 = vmul.f32 %v12026_v4, %v12116_v20  ;;  %v2771_v7 = vmul.f32 %v12026_v4, %v12117_v49  ;;  %v2772_v43 = vmul.f32 %v12026_v4, %v12118_v5  ;;  %v2776_v62 = vadd.f32 %v2760_v57, %v2724_v47  ;;  %v12122_v47 = vld [vmem:[#allocation89_spill] sm:$0xff]  ;;  %v12129_v57 = vld [vmem:[#allocation146_spill] sm:$0xff]  ;;  %v2845_v20 = vld [vmem:[#allocation2 + $0x20] sm:$0xff] }
 0x3f0   :  { %v2777_v31 = vadd.f32 %v2761_v2, %v2725_v53  ;;  %v2778_v34 = vadd.f32 %v2762_v23, %v2726_v13  ;;  %v2779_v46 = vadd.f32 %v2763_v33, %v2727_v52  ;;  %v2780_v0 = vadd.f32 %v2764_v3, %v2728_v29  ;;  %v12123_v13 = vld [vmem:[#allocation90_spill] sm:$0xff]  ;;  %v12124_v29 = vld [vmem:[#allocation75_spill] sm:$0xff]  ;;  %v12131_v23 = vld [vmem:[#allocation148_spill] sm:$0xff] }
 0x3f1   :  { %v2781_v14 = vadd.f32 %v2765_v35, %v2729_v8  ;;  %v2782_v38 = vadd.f32 %v2766_v37, %v2730_v45  ;;  %v2783_v15 = vadd.f32 %v2767_v6, %v2731_v12  ;;  %v2784_v44 = vadd.f32 %v2768_v28, %v2732_v55  ;;  %v12125_v45 = vld [vmem:[#allocation142_spill] sm:$0xff]  ;;  %v12126_v55 = vld [vmem:[#allocation143_spill] sm:$0xff]  ;;  %v12132_v33 = vld [vmem:[#allocation149_spill] sm:$0xff] }
 0x3f2   :  { %v2785_v63 = vadd.f32 %v2769_v51, %v2733_v36  ;;  %v2786_v19 = vadd.f32 %v2770_v21, %v2734_v26  ;;  %v2787_v27 = vadd.f32 %v2771_v7, %v2735_v30  ;;  %v2788_v42 = vadd.f32 %v2772_v43, %v2736_v32  ;;  %v249_v26 = vld [vmem:[%s11692_s30 + $0x20] sm:$0x1f]  ;;  %v12127_v30 = vld [vmem:[#allocation144_spill] sm:$0xff]  ;;  %v12133_v3 = vld [vmem:[#allocation150_spill] sm:$0xff] }
 0x3f3   :  { %v2789_v18 = vadd.f32 %v12119_v56, %v2737_v58  ;;  %v2790_v41 = vadd.f32 %v12120_v24, %v2738_v17  ;;  %v2791_v4 = vadd.f32 %v12121_v10, %v2739_v54  ;;  %v2812_v53 = vmul.f32 %v12030_v9, %v12122_v47  ;;  %v12128_v58 = vld [vmem:[#allocation145_spill] sm:$0xff]  ;;  %v12130_v2 = vld [vmem:[#allocation147_spill] sm:$0xff] }
 0x3f4   :  { %v2813_v52 = vmul.f32 %v12030_v9, %v12123_v13  ;;  %v2814_v8 = vmul.f32 %v12030_v9, %v12124_v29  ;;  %v2815_v12 = vmul.f32 %v12030_v9, %v12125_v45  ;;  %v2816_v36 = vmul.f32 %v12030_v9, %v12126_v55  ;;  %v6151_v35 = vld [vmem:[#allocation2 + $0x382] sm:$0xff]  ;;  %v2846_v56 = vld [vmem:[#allocation2 + $0x30] sm:$0xff] }
 0x3f5   :  { %v2817_v32 = vmul.f32 %v12030_v9, %v12127_v30  ;;  %v2818_v17 = vmul.f32 %v12030_v9, %v12128_v58  ;;  %v2819_v54 = vmul.f32 %v12030_v9, %v2799_v25  ;;  %v2820_v22 = vmul.f32 %v12030_v9, %v12129_v57  ;;  %v12134_v21 = vld [vmem:[#allocation39_spill] sm:$0xff]  ;;  %v2848_v10 = vld [vmem:[#allocation2 + $0x50] sm:$0xff] }
 0x3f6   :  { %v2821_v16 = vmul.f32 %v12030_v9, %v12130_v2  ;;  %v2822_v1 = vmul.f32 %v12030_v9, %v12131_v23  ;;  %v2823_v59 = vmul.f32 %v12030_v9, %v12132_v33  ;;  %v2824_v48 = vmul.f32 %v12030_v9, %v12133_v3  ;;  %v2847_v24 = vld [vmem:[#allocation2 + $0x40] sm:$0xff] }
 0x3f7   :  { %v2825_v61 = vmul.f32 %v6151_v35, %v12030_v9  ;;  %v2828_v37 = vadd.f32 %v2812_v53, %v2776_v62  ;;  %v2829_v6 = vadd.f32 %v2813_v52, %v2777_v31  ;;  %v2830_v39 = vadd.f32 %v2814_v8, %v2778_v34  ;;  %v2849_v62 = vld [vmem:[#allocation2 + $0x60] sm:$0xff]  ;;  %v2850_v31 = vld [vmem:[#allocation2 + $0x70] sm:$0xff] }
 0x3f8   :  { %v2831_v28 = vadd.f32 %v2815_v12, %v2779_v46  ;;  %v2832_v50 = vadd.f32 %v2816_v36, %v2780_v0  ;;  %v2833_v51 = vadd.f32 %v2817_v32, %v2781_v14  ;;  %v2864_v49 = vrot.slane %v249_v26, %v12134_v21  ;;  %v2852_v34 = vld [vmem:[#allocation2 + $0x90] sm:$0xff]  ;;  %v2853_v14 = vld [vmem:[#allocation2 + $0xc0] sm:$0xff] }
 0x3f9   :  { %v2834_v7 = vadd.f32 %v2818_v17, %v2782_v38  ;;  %v2835_v5 = vadd.f32 %v2819_v54, %v2783_v15  ;;  %v2836_v43 = vadd.f32 %v2820_v22, %v2784_v44  ;;  %v2837_v25 = vadd.f32 %v2821_v16, %v2785_v63  ;;  %v2854_v53 = vld [vmem:[#allocation2 + $0xd0] sm:$0xff]  ;;  %v2855_v38 = vld [vmem:[#allocation2 + $0xe0] sm:$0xff] }
 0x3fa   :  { %v2838_v47 = vadd.f32 %v2822_v1, %v2786_v19  ;;  %v2839_v13 = vadd.f32 %v2823_v59, %v2787_v27  ;;  %v2840_v29 = vadd.f32 %v2824_v48, %v2788_v42  ;;  %v2841_v9 = vadd.f32 %v2825_v61, %v2789_v18  ;;  %v12135_v15 = vld [vmem:[#allocation61_spill] sm:$0xff]  ;;  %v12136_v63 = vld [vmem:[#allocation63_spill] sm:$0xff] }
 0x3fb   :  { %v2842_v46 = vadd.f32 %v9411_v40, %v2790_v41  ;;  %v2843_v0 = vadd.f32 %v9414_v60, %v2791_v4  ;;  %v9645_v44 = vrot.slane %v249_v26, %v12135_v15  ;;  %v9648_v52 = vrot.slane %v249_v26, %v12136_v63  ;;  %v2856_v19 = vld [vmem:[#allocation2 + $0xf0] sm:$0xff]  ;;  %v2857_v27 = vld [vmem:[#allocation2 + $0x100] sm:$0xff] }
 0x3fc   :  { %v2858_v42 = vld [vmem:[#allocation2 + $0x110] sm:$0xff]  ;;  %v2865_v18 = vmul.f32 %v2864_v49, %v2845_v20  ;;  %v2866_v8 = vmul.f32 %v2864_v49, %v2846_v56  ;;  %v12137_v45 = vld [vmem:[#allocation67_spill] sm:$0xff]  ;;  %v2867_v4 = vmul.f32 %v2864_v49, %v2847_v24  ;;  %v2868_v55 = vmul.f32 %v2864_v49, %v2848_v10 }
 0x3fd   :  { %v9651_v12 = vrot.slane %v249_v26, %v12137_v45  ;;  %v12138_v40 = vld [vmem:[#allocation69_spill] sm:$0xff]  ;;  %v2869_v36 = vmul.f32 %v2864_v49, %v2849_v62  ;;  %v2870_v30 = vmul.f32 %v2864_v49, %v2850_v31  ;;  %v12139_v32 = vld [vmem:[#allocation151_spill] sm:$0xff]  ;;  %v2872_v17 = vmul.f32 %v2864_v49, %v2852_v34 }
 0x3fe   :  { %v9654_v41 = vrot.slane %v249_v26, %v12138_v40  ;;  %v2860_v60 = vld [vmem:[#allocation2 + $0x130] sm:$0xff]  ;;  %v2871_v58 = vmul.f32 %v2864_v49, %v12139_v32  ;;  %v2873_v54 = vmul.f32 %v2864_v49, %v2853_v14  ;;  %v2874_v57 = vmul.f32 %v2864_v49, %v2854_v53  ;;  %v6152_v1 = vld [vmem:[#allocation2 + $0x120] sm:$0xff] }
 0x3ff   :  { %v2875_v22 = vmul.f32 %v2864_v49, %v2855_v38  ;;  %v2876_v2 = vmul.f32 %v2864_v49, %v2856_v19  ;;  %v2877_v16 = vmul.f32 %v2864_v49, %v2857_v27  ;;  %v2878_v23 = vmul.f32 %v2864_v49, %v2858_v42  ;;  %v2898_v56 = vld [vmem:[#allocation2 + $0x160] sm:$0xff]  ;;  %v2899_v24 = vld [vmem:[#allocation2 + $0x170] sm:$0xff] }
 0x400   :  { %v2879_v33 = vmul.f32 %v6152_v1, %v2864_v49  ;;  %v2880_v59 = vmul.f32 %v2864_v49, %v2860_v60  ;;  %v2881_v3 = vadd.f32 %v2865_v18, %v2828_v37  ;;  %v2882_v26 = vadd.f32 %v2866_v8, %v2829_v6  ;;  %v2900_v10 = vld [vmem:[#allocation2 + $0x180] sm:$0xff]  ;;  %v2901_v53 = vld [vmem:[#allocation2 + $0x190] sm:$0xff] }
 0x401   :  { %v2883_v48 = vadd.f32 %v2867_v4, %v2830_v39  ;;  %v2884_v35 = vadd.f32 %v2868_v55, %v2831_v28  ;;  %v2885_v61 = vadd.f32 %v2869_v36, %v2832_v50  ;;  %v2886_v20 = vadd.f32 %v2870_v30, %v2833_v51  ;;  %v2902_v38 = vld [vmem:[#allocation2 + $0x1a0] sm:$0xff]  ;;  %v2903_v19 = vld [vmem:[#allocation2 + $0x1b0] sm:$0xff] }
 0x402   :  { %v2887_v62 = vadd.f32 %v2871_v58, %v2834_v7  ;;  %v2888_v31 = vadd.f32 %v2872_v17, %v2835_v5  ;;  %v2889_v34 = vadd.f32 %v2873_v54, %v2836_v43  ;;  %v9657_v14 = vadd.f32 %v2874_v57, %v2837_v25  ;;  %v2904_v6 = vld [vmem:[#allocation2 + $0x1c0] sm:$0xff]  ;;  %v2905_v39 = vld [vmem:[#allocation2 + $0x1d0] sm:$0xff] }
 0x403   :  { %v2891_v27 = vadd.f32 %v2875_v22, %v2838_v47  ;;  %v2892_v42 = vadd.f32 %v2876_v2, %v2839_v13  ;;  %v9659_v49 = vadd.f32 %v2877_v16, %v2840_v29  ;;  %v9661_v37 = vadd.f32 %v2878_v23, %v2841_v9  ;;  %v2906_v28 = vld [vmem:[#allocation2 + $0x200] sm:$0xff]  ;;  %v2907_v7 = vld [vmem:[#allocation2 + $0x210] sm:$0xff] }
 0x404   :  { %v9663_v50 = vadd.f32 %v2879_v33, %v2842_v46  ;;  %v9665_v51 = vadd.f32 %v2880_v59, %v2843_v0  ;;  %v2908_v5 = vld [vmem:[#allocation2 + $0x220] sm:$0xff]  ;;  %v2909_v43 = vld [vmem:[#allocation2 + $0x230] sm:$0xff]  ;;  %v2918_v25 = vmul.f32 %v9645_v44, %v2898_v56  ;;  %v2919_v18 = vmul.f32 %v9645_v44, %v2899_v24 }
 0x405   :  { %v2910_v47 = vld [vmem:[#allocation2 + $0x240] sm:$0xff]  ;;  %v2920_v13 = vmul.f32 %v9645_v44, %v2900_v10  ;;  %v2921_v29 = vmul.f32 %v9645_v44, %v2901_v53  ;;  %v2922_v9 = vmul.f32 %v9645_v44, %v2902_v38  ;;  %v2923_v8 = vmul.f32 %v9645_v44, %v2903_v19  ;;  %v2951_v45 = vld [vmem:[#allocation2 + $0x31] sm:$0xff] }
 0x406   :  { %v2950_v46 = vld [vmem:[#allocation2 + $0x21] sm:$0xff]  ;;  %v2911_v0 = vld [vmem:[#allocation2 + $0x250] sm:$0xff]  ;;  %v2924_v4 = vmul.f32 %v9645_v44, %v2904_v6  ;;  %v2925_v55 = vmul.f32 %v9645_v44, %v2905_v39  ;;  %v2934_v36 = vadd.f32 %v2918_v25, %v2881_v3  ;;  %v2935_v30 = vadd.f32 %v2919_v18, %v2882_v26 }
 0x407   :  { %v2912_v40 = vld [vmem:[#allocation2 + $0x260] sm:$0xff]  ;;  %v2913_v60 = vld [vmem:[#allocation2 + $0x270] sm:$0xff]  ;;  %v2926_v32 = vmul.f32 %v9645_v44, %v2906_v28  ;;  %v2927_v58 = vmul.f32 %v9645_v44, %v2907_v7  ;;  %v2928_v17 = vmul.f32 %v9645_v44, %v2908_v5  ;;  %v2929_v54 = vmul.f32 %v9645_v44, %v2909_v43 }
 0x408   :  { %v2952_v57 = vld [vmem:[#allocation2 + $0x41] sm:$0xff]  ;;  %v2930_v22 = vmul.f32 %v9645_v44, %v2910_v47  ;;  %v2936_v2 = vadd.f32 %v2920_v13, %v2883_v48  ;;  %v2970_v16 = vmul.f32 %v9648_v52, %v2950_v46  ;;  %v2971_v23 = vmul.f32 %v9648_v52, %v2951_v45  ;;  %v2953_v26 = vld [vmem:[#allocation2 + $0x51] sm:$0xff] }
 0x409   :  { %v2931_v1 = vmul.f32 %v9645_v44, %v2911_v0  ;;  %v2932_v33 = vmul.f32 %v9645_v44, %v2912_v40  ;;  %v2933_v59 = vmul.f32 %v9645_v44, %v2913_v60  ;;  %v2937_v3 = vadd.f32 %v2921_v29, %v2884_v35  ;;  %v3002_v56 = vld [vmem:[#allocation2 + $0x161] sm:$0xff]  ;;  %v3003_v24 = vld [vmem:[#allocation2 + $0x171] sm:$0xff] }
 0x40a   :  { %v2938_v10 = vadd.f32 %v2922_v9, %v2885_v61  ;;  %v2954_v53 = vld [vmem:[#allocation2 + $0x61] sm:$0xff]  ;;  %v2972_v38 = vmul.f32 %v9648_v52, %v2952_v57  ;;  %v2986_v19 = vadd.f32 %v2970_v16, %v2934_v36  ;;  %v2987_v48 = vadd.f32 %v2971_v23, %v2935_v30  ;;  %v2955_v43 = vld [vmem:[#allocation2 + $0x71] sm:$0xff] }
 0x40b   :  { %v2939_v6 = vadd.f32 %v2923_v8, %v2886_v20  ;;  %v2940_v39 = vadd.f32 %v2924_v4, %v2887_v62  ;;  %v2941_v28 = vadd.f32 %v2925_v55, %v2888_v31  ;;  %v9686_v7 = vadd.f32 %v2926_v32, %v2889_v34  ;;  %v3004_v5 = vld [vmem:[#allocation2 + $0x181] sm:$0xff]  ;;  %v3005_v62 = vld [vmem:[#allocation2 + $0x191] sm:$0xff] }
 0x40c   :  { %v2973_v25 = vmul.f32 %v9648_v52, %v2953_v26  ;;  %v2988_v44 = vadd.f32 %v2972_v38, %v2936_v2  ;;  %v3022_v35 = vmul.f32 %v9651_v12, %v3002_v56  ;;  %v3023_v18 = vmul.f32 %v9651_v12, %v3003_v24  ;;  %v3054_v31 = vld [vmem:[#allocation2 + $0x22] sm:$0xff]  ;;  %v3055_v34 = vld [vmem:[#allocation2 + $0x32] sm:$0xff] }
 0x40d   :  { %v9692_v61 = vadd.f32 %v2927_v58, %v9657_v14  ;;  %v9694_v47 = vadd.f32 %v2928_v17, %v2891_v27  ;;  %v9696_v13 = vadd.f32 %v2929_v54, %v2892_v42  ;;  %v2974_v20 = vmul.f32 %v9648_v52, %v2954_v53  ;;  %v2956_v29 = vld [vmem:[#allocation2 + $0x81] sm:$0xff]  ;;  %v2957_v9 = vld [vmem:[#allocation2 + $0x91] sm:$0xff] }
 0x40e   :  { %v2989_v8 = vadd.f32 %v2973_v25, %v2937_v3  ;;  %v3006_v46 = vld [vmem:[#allocation2 + $0x1a1] sm:$0xff]  ;;  %v3024_v45 = vmul.f32 %v9651_v12, %v3004_v5  ;;  %v3038_v0 = vadd.f32 %v3022_v35, %v2986_v19  ;;  %v3039_v40 = vadd.f32 %v3023_v18, %v2987_v48  ;;  %v3007_v36 = vld [vmem:[#allocation2 + $0x1b1] sm:$0xff] }
 0x40f   :  { %v9701_v14 = vadd.f32 %v2930_v22, %v9659_v49  ;;  %v9704_v27 = vadd.f32 %v2931_v1, %v9661_v37  ;;  %v2975_v42 = vmul.f32 %v9648_v52, %v2955_v43  ;;  %v2990_v60 = vadd.f32 %v2974_v20, %v2938_v10  ;;  %v3056_v4 = vld [vmem:[#allocation2 + $0x42] sm:$0xff]  ;;  %v3057_v22 = vld [vmem:[#allocation2 + $0x52] sm:$0xff] }
 0x410   :  { %v2958_v55 = vld [vmem:[#allocation2 + $0xc1] sm:$0xff]  ;;  %v3025_v30 = vmul.f32 %v9651_v12, %v3005_v62  ;;  %v3040_v32 = vadd.f32 %v3024_v45, %v2988_v44  ;;  %v3074_v58 = vmul.f32 %v9654_v41, %v3054_v31  ;;  %v3075_v17 = vmul.f32 %v9654_v41, %v3055_v34  ;;  %v3009_v16 = vld [vmem:[#allocation2 + $0x1d1] sm:$0xff] }
 0x411   :  { %v2976_v54 = vmul.f32 %v9648_v52, %v2956_v29  ;;  %v2977_v49 = vmul.f32 %v9648_v52, %v2957_v9  ;;  %v2991_v57 = vadd.f32 %v2975_v42, %v2939_v6  ;;  %v3026_v37 = vmul.f32 %v9651_v12, %v3006_v46  ;;  %v3008_v2 = vld [vmem:[#allocation2 + $0x1c1] sm:$0xff]  ;;  %v2959_v19 = vld [vmem:[#allocation2 + $0xd1] sm:$0xff] }
 0x412   :  { %v3041_v23 = vadd.f32 %v3025_v30, %v2989_v8  ;;  %v3076_v1 = vmul.f32 %v9654_v41, %v3056_v4  ;;  %v9714_v3 = vadd.f32 %v3074_v58, %v3038_v0  ;;  %v9716_v26 = vadd.f32 %v3075_v17, %v3039_v40  ;;  %v3058_v38 = vld [vmem:[#allocation2 + $0x62] sm:$0xff]  ;;  %v3061_v29 = vld [vmem:[#allocation2 + $0x92] sm:$0xff] }
 0x413   :  { %v9719_v56 = vadd.f32 %v2932_v33, %v9663_v50  ;;  %v9722_v24 = vadd.f32 %v2933_v59, %v9665_v51  ;;  %v2978_v10 = vmul.f32 %v9648_v52, %v2958_v55  ;;  %v3027_v53 = vmul.f32 %v9651_v12, %v3007_v36  ;;  %v2960_v48 = vld [vmem:[#allocation2 + $0xe1] sm:$0xff]  ;;  %v3059_v59 = vld [vmem:[#allocation2 + $0x72] sm:$0xff] }
 0x414   :  { %v2992_v6 = vadd.f32 %v2976_v54, %v2940_v39  ;;  %v3042_v5 = vadd.f32 %v3026_v37, %v2990_v60  ;;  %v3077_v43 = vmul.f32 %v9654_v41, %v3057_v22  ;;  %v9727_v25 = vadd.f32 %v3076_v1, %v3040_v32  ;;  %v3010_v35 = vld [vmem:[#allocation2 + $0x201] sm:$0xff]  ;;  %v2961_v8 = vld [vmem:[#allocation2 + $0xf1] sm:$0xff] }
 0x415   :  { %v2993_v44 = vadd.f32 %v2977_v49, %v2941_v28  ;;  %v3028_v50 = vmul.f32 %v9651_v12, %v3008_v2  ;;  %v3029_v33 = vmul.f32 %v9651_v12, %v3009_v16  ;;  %v3043_v51 = vadd.f32 %v3027_v53, %v2991_v57  ;;  %v2962_v46 = vld [vmem:[#allocation2 + $0x101] sm:$0xff]  ;;  %v3011_v4 = vld [vmem:[#allocation2 + $0x211] sm:$0xff] }
 0x416   :  { %v3078_v18 = vmul.f32 %v9654_v41, %v3058_v38  ;;  %v9732_v20 = vadd.f32 %v3077_v43, %v3041_v23  ;;  %v3106_v39 = vsel %vm840_vm0, %v9714_v3, 0.0  ;;  %v3107_v62 = vsel %vm840_vm0, %v9716_v26, 0.0  ;;  %v3012_v32 = vld [vmem:[#allocation2 + $0x221] sm:$0xff]  ;;  %v3013_v23 = vld [vmem:[#allocation2 + $0x231] sm:$0xff] }
 0x417   :  { %v2979_v31 = vmul.f32 %v9648_v52, %v2959_v19  ;;  %v2980_v28 = vmul.f32 %v9648_v52, %v2960_v48  ;;  %v2994_v34 = vadd.f32 %v2978_v10, %v9686_v7  ;;  %v3108_v9 = vadd.f32 %v3107_v62, %v3106_v39  ;;  %v2963_v7 = vld [vmem:[#allocation2 + $0x111] sm:$0xff]  ;;  %v3062_v22 = vld [vmem:[#allocation2 + $0xc2] sm:$0xff] }
 0x418   :  { %v3044_v45 = vadd.f32 %v3028_v50, %v2992_v6  ;;  %v3079_v0 = vmul.f32 %v9654_v41, %v3059_v59  ;;  %v9742_v40 = vadd.f32 %v3078_v18, %v3042_v5  ;;  %v3109_v42 = vsel %vm840_vm0, %v9727_v25, 0.0  ;;  %v2964_v16 = vld [vmem:[#allocation2 + $0x121] sm:$0xff]  ;;  %v3063_v6 = vld [vmem:[#allocation2 + $0xd2] sm:$0xff] }
 0x419   :  { %v2995_v60 = vadd.f32 %v2979_v31, %v9692_v61  ;;  %v3030_v55 = vmul.f32 %v9651_v12, %v3010_v35  ;;  %v3045_v36 = vadd.f32 %v3029_v33, %v2993_v44  ;;  %v3110_v30 = vadd.f32 %v3109_v42, %v3108_v9  ;;  %v2965_v5 = vld [vmem:[#allocation2 + $0x131] sm:$0xff]  ;;  %v3014_v43 = vld [vmem:[#allocation2 + $0x241] sm:$0xff] }
 0x41a   :  { %v3080_v58 = vmul.f32 %v9654_v41, %v9476_v11  ;;  %v3081_v17 = vmul.f32 %v9654_v41, %v3061_v29  ;;  %v9751_v54 = vadd.f32 %v3079_v0, %v3043_v51  ;;  %v3111_v49 = vsel %vm840_vm0, %v9732_v20, 0.0  ;;  %v3064_v18 = vld [vmem:[#allocation2 + $0xe2] sm:$0xff]  ;;  %v3015_v62 = vld [vmem:[#allocation2 + $0x251] sm:$0xff] }
 0x41b   :  { %v2981_v57 = vmul.f32 %v9648_v52, %v2961_v8  ;;  %v2982_v61 = vmul.f32 %v9648_v52, %v2962_v46  ;;  %v2996_v37 = vadd.f32 %v2980_v28, %v9694_v47  ;;  %v3112_v2 = vadd.f32 %v3111_v49, %v3110_v30  ;;  %v3016_v0 = vld [vmem:[#allocation2 + $0x261] sm:$0xff]  ;;  %v3017_v42 = vld [vmem:[#allocation2 + $0x271] sm:$0xff] }
 0x41c   :  { %v3031_v1 = vmul.f32 %v9651_v12, %v3011_v4  ;;  %v3046_v11 = vadd.f32 %v3030_v55, %v2994_v34  ;;  %v9759_v10 = vadd.f32 %v3080_v58, %v3044_v45  ;;  %v3113_v53 = vsel %vm840_vm0, %v9742_v40, 0.0 }
 0x41d   :  { %v2983_v38 = vmul.f32 %v9648_v52, %v2963_v7  ;;  %v2997_v19 = vadd.f32 %v2981_v57, %v9696_v13  ;;  %v3032_v48 = vmul.f32 %v9651_v12, %v3012_v32  ;;  %v3114_v47 = vadd.f32 %v3113_v53, %v3112_v2  ;;  %v3066_v7 = vld [vmem:[#allocation2 + $0x102] sm:$0xff]  ;;  %v3069_v53 = vld [vmem:[#allocation2 + $0x132] sm:$0xff] }
 0x41e   :  { %v3047_v44 = vadd.f32 %v3031_v1, %v2995_v60  ;;  %v3082_v50 = vmul.f32 %v9654_v41, %v3062_v22  ;;  %v9767_v33 = vadd.f32 %v3081_v17, %v3045_v36  ;;  %v3115_v51 = vsel %vm840_vm0, %v9751_v54, 0.0  ;;  %v3067_v22 = vld [vmem:[#allocation2 + $0x112] sm:$0xff] }
 0x41f   :  { %v2984_v59 = vmul.f32 %v9648_v52, %v2964_v16  ;;  %v2998_v35 = vadd.f32 %v2982_v61, %v9701_v14  ;;  %v3033_v13 = vmul.f32 %v9651_v12, %v3013_v23  ;;  %v3116_v39 = vadd.f32 %v3115_v51, %v3114_v47  ;;  %v3065_v14 = vld [vmem:[#allocation2 + $0xf2] sm:$0xff] }
 0x420   :  { %v3048_v31 = vadd.f32 %v3032_v48, %v2996_v37  ;;  %v3083_v28 = vmul.f32 %v9654_v41, %v3063_v6  ;;  %v9775_v34 = vadd.f32 %v3082_v50, %v3046_v11  ;;  %v3117_v29 = vsel %vm840_vm0, %v9759_v10, 0.0  ;;  %v3068_v11 = vld [vmem:[#allocation2 + $0x122] sm:$0xff] }
 0x421   :  { %v2985_v9 = vmul.f32 %v9648_v52, %v2965_v5  ;;  %v2999_v8 = vadd.f32 %v2983_v38, %v9704_v27  ;;  %v3034_v46 = vmul.f32 %v9651_v12, %v3014_v43  ;;  %v3118_v45 = vadd.f32 %v3117_v29, %v3116_v39 }
 0x422   :  { %v3049_v60 = vadd.f32 %v3033_v13, %v2997_v19  ;;  %v3084_v4 = vmul.f32 %v9654_v41, %v3064_v18  ;;  %v9783_v55 = vadd.f32 %v3083_v28, %v3047_v44  ;;  %v3119_v36 = vsel %vm840_vm0, %v9767_v33, 0.0 }
 0x423   :  { %v3000_v30 = vadd.f32 %v2984_v59, %v9719_v56  ;;  %v3035_v52 = vmul.f32 %v9651_v12, %v3015_v62  ;;  %v3120_v27 = vadd.f32 %v3119_v36, %v3118_v45  ;;  %v3050_v32 = vadd.f32 %v3034_v46, %v2998_v35 }
 0x424   :  { %v3085_v58 = vmul.f32 %v9654_v41, %v3065_v14  ;;  %v9790_v17 = vadd.f32 %v3084_v4, %v3048_v31  ;;  %v3121_v49 = vsel %vm840_vm0, %v9775_v34, 0.0  ;;  %v3001_v57 = vadd.f32 %v2985_v9, %v9722_v24 }
 0x425   :  { %v3036_v61 = vmul.f32 %v9651_v12, %v3016_v0  ;;  %v3037_v37 = vmul.f32 %v9651_v12, %v3017_v42  ;;  %v3122_v56 = vadd.f32 %v3121_v49, %v3120_v27  ;;  %v3051_v2 = vadd.f32 %v3035_v52, %v2999_v8 }
 0x426   :  { %v3086_v16 = vmul.f32 %v9654_v41, %v3066_v7  ;;  %v9798_v23 = vadd.f32 %v3085_v58, %v3049_v60  ;;  %v3123_v1 = vsel %vm840_vm0, %v9783_v55, 0.0  ;;  %v3087_v24 = vmul.f32 %v9654_v41, %v3067_v22 }
 0x427   :  { %v3124_v38 = vadd.f32 %v3123_v1, %v3122_v56  ;;  %v3052_v19 = vadd.f32 %v3036_v61, %v3000_v30  ;;  %v3125_v12 = vsel %vm840_vm0, %v9790_v17, 0.0  ;;  %v3053_v6 = vadd.f32 %v3037_v37, %v3001_v57 }
 0x428   :  { %v9803_v48 = vadd.f32 %v3086_v16, %v3050_v32  ;;  %v3088_v5 = vmul.f32 %v9654_v41, %v3068_v11  ;;  %v3089_v43 = vmul.f32 %v9654_v41, %v3069_v53  ;;  %v3103_v44 = vadd.f32 %v3087_v24, %v3051_v2 }
 0x429   :  { %v3126_v47 = vadd.f32 %v3125_v12, %v3124_v38  ;;  %v3127_v50 = vsel %vm840_vm0, %v9798_v23, 0.0 }
 0x42a   :  { %v3104_v59 = vadd.f32 %v3088_v5, %v3052_v19  ;;  %v3129_v35 = vsel %vm840_vm0, %v9803_v48, 0.0  ;;  %v9813_v18 = vadd.f32 %v3089_v43, %v3053_v6  ;;  %v3131_v39 = vsel %vm840_vm0, %v3103_v44, 0.0 }
 0x42b   :  { %v3128_v51 = vadd.f32 %v3127_v50, %v3126_v47 }
 0x42c   :  { %v3133_v31 = vsel %vm840_vm0, %v3104_v59, 0.0  ;;  %v3135_v41 = vsel %vm840_vm0, %v9813_v18, 0.0 }
 0x42d   :  { %v3130_v13 = vadd.f32 %v3129_v35, %v3128_v51 }
 0x42f   :  { %v3132_v62 = vadd.f32 %v3131_v39, %v3130_v13 }
 0x431   :  { %v3134_v28 = vadd.f32 %v3133_v31, %v3132_v62 }
 0x433   :  { %v3136_v29 = vadd.f32 %v3135_v41, %v3134_v28 }
 0x435   :  { %v3137_v9 = vrot.slane %v3136_v29, 4 }
 0x437   :  { %v3138_v8 = vadd.f32 %v3137_v9, %v3136_v29 }
 0x439   :  { %v3139_v46 = vrot.slane %v3138_v8, 2 }
 0x43b   :  { %v3140_v14 = vadd.f32 %v3139_v46, %v3138_v8 }
 0x43d   :  { %v3141_v45 = vrot.slane %v3140_v14, 1 }
 0x43f   :  { %v3142_v0 = vadd.f32 %v3141_v45, %v3140_v14 }
 0x441   :  { %v3144_v42 = vmul.f32 0.0078125, %v3142_v0 }
 0x443   :  { %v9820_v60 = vsub.f32 %v9714_v3, %v3144_v42  ;;  %v9823_v4 = vsub.f32 %v9716_v26, %v3144_v42  ;;  %v9826_v36 = vsub.f32 %v9727_v25, %v3144_v42  ;;  %v9829_v30 = vsub.f32 %v9732_v20, %v3144_v42 }
 0x444   :  { %v9836_v27 = vsub.f32 %v9742_v40, %v3144_v42  ;;  %v9841_v26 = vsub.f32 %v9751_v54, %v3144_v42  ;;  %v9848_v49 = vsub.f32 %v9759_v10, %v3144_v42  ;;  %v9854_v54 = vsub.f32 %v9767_v33, %v3144_v42 }
 0x445   :  { %v3161_v52 = vmul.f32 %v9820_v60, %v9820_v60  ;;  %v3162_v7 = vmul.f32 %v9823_v4, %v9823_v4  ;;  %v3163_v3 = vmul.f32 %v9826_v36, %v9826_v36  ;;  %v3164_v25 = vmul.f32 %v9829_v30, %v9829_v30 }
 0x446   :  { %v3165_v40 = vmul.f32 %v9836_v27, %v9836_v27  ;;  %v3166_v37 = vmul.f32 %v9841_v26, %v9841_v26  ;;  %v9860_v2 = vsub.f32 %v9775_v34, %v3144_v42  ;;  %v3167_v10 = vmul.f32 %v9848_v49, %v9848_v49 }
 0x447   :  { %v3177_v20 = vsel %vm840_vm0, %v3161_v52, 0.0  ;;  %v3178_v32 = vsel %vm840_vm0, %v3162_v7, 0.0  ;;  %v3180_v57 = vsel %vm840_vm0, %v3163_v3, 0.0  ;;  %v3182_v22 = vsel %vm840_vm0, %v3164_v25, 0.0 }
 0x448   :  { %v3179_v58 = vadd.f32 %v3178_v32, %v3177_v20  ;;  %v3184_v16 = vsel %vm840_vm0, %v3165_v40, 0.0  ;;  %v9866_v11 = vsub.f32 %v9783_v55, %v3144_v42  ;;  %v3168_v33 = vmul.f32 %v9854_v54, %v9854_v54 }
 0x449   :  { %v3186_v53 = vsel %vm840_vm0, %v3166_v37, 0.0  ;;  %v9872_v19 = vsub.f32 %v9790_v17, %v3144_v42  ;;  %v3169_v34 = vmul.f32 %v9860_v2, %v9860_v2  ;;  %v3188_v24 = vsel %vm840_vm0, %v3167_v10, 0.0 }
 0x44a   :  { %v3181_v61 = vadd.f32 %v3180_v57, %v3179_v58  ;;  %v9878_v6 = vsub.f32 %v9798_v23, %v3144_v42  ;;  %v3170_v55 = vmul.f32 %v9866_v11, %v9866_v11  ;;  %v3190_v47 = vsel %vm840_vm0, %v3168_v33, 0.0  ;;  %v9925_v33 = vld [vmem:[#allocation12] ss:$0 sm:$0xff] }
 0x44b   :  { %v9884_v43 = vsub.f32 %v9803_v48, %v3144_v42  ;;  %v3171_v17 = vmul.f32 %v9872_v19, %v9872_v19  ;;  %v3192_v50 = vsel %vm840_vm0, %v3169_v34, 0.0  ;;  %v9889_v35 = vsub.f32 %v3103_v44, %v3144_v42 }
 0x44c   :  { %v3183_v56 = vadd.f32 %v3182_v22, %v3181_v61  ;;  %v3172_v23 = vmul.f32 %v9878_v6, %v9878_v6  ;;  %v3194_v13 = vsel %vm840_vm0, %v3170_v55, 0.0  ;;  %v9894_v62 = vsub.f32 %v3104_v59, %v3144_v42  ;;  %v9915_v22 = vld [vmem:[#allocation10] ss:$0 sm:$0xff] }
 0x44d   :  { %v3173_v48 = vmul.f32 %v9884_v43, %v9884_v43  ;;  %v3196_v31 = vsel %vm840_vm0, %v3171_v17, 0.0  ;;  %v9900_v41 = vsub.f32 %v9813_v18, %v3144_v42  ;;  %v3174_v44 = vmul.f32 %v9889_v35, %v9889_v35 }
 0x44e   :  { %v3185_v1 = vadd.f32 %v3184_v16, %v3183_v56  ;;  %v3198_v29 = vsel %vm840_vm0, %v3172_v23, 0.0  ;;  %v3175_v8 = vmul.f32 %v9894_v62, %v9894_v62 }
 0x44f   :  { %v3200_v59 = vsel %vm840_vm0, %v3173_v48, 0.0  ;;  %v3176_v14 = vmul.f32 %v9900_v41, %v9900_v41  ;;  %v3202_v45 = vsel %vm840_vm0, %v3174_v44, 0.0 }
 0x450   :  { %v3187_v38 = vadd.f32 %v3186_v53, %v3185_v1  ;;  %v3204_v18 = vsel %vm840_vm0, %v3175_v8, 0.0 }
 0x451   :  { %v3206_v52 = vsel %vm840_vm0, %v3176_v14, 0.0 }
 0x452   :  { %v3189_v12 = vadd.f32 %v3188_v24, %v3187_v38 }
 0x454   :  { %v3191_v5 = vadd.f32 %v3190_v47, %v3189_v12 }
 0x456   :  { %v3193_v51 = vadd.f32 %v3192_v50, %v3191_v5 }
 0x458   :  { %v3195_v39 = vadd.f32 %v3194_v13, %v3193_v51 }
 0x45a   :  { %v3197_v28 = vadd.f32 %v3196_v31, %v3195_v39 }
 0x45c   :  { %v3199_v9 = vadd.f32 %v3198_v29, %v3197_v28 }
 0x45e   :  { %v3201_v46 = vadd.f32 %v3200_v59, %v3199_v9 }
 0x460   :  { %v3203_v0 = vadd.f32 %v3202_v45, %v3201_v46 }
 0x462   :  { %v3205_v42 = vadd.f32 %v3204_v18, %v3203_v0 }
 0x464   :  { %v3207_v7 = vadd.f32 %v3206_v52, %v3205_v42 }
 0x466   :  { %v3208_v3 = vrot.slane %v3207_v7, 4 }
 0x468   :  { %v3209_v25 = vadd.f32 %v3208_v3, %v3207_v7 }
 0x46a   :  { %v3210_v20 = vrot.slane %v3209_v25, 2 }
 0x46c   :  { %v3211_v32 = vadd.f32 %v3210_v20, %v3209_v25 }
 0x46e   :  { %v3212_v58 = vrot.slane %v3211_v32, 1 }
 0x470   :  { %v3213_v40 = vadd.f32 %v3212_v58, %v3211_v32 }
 0x472   :  { %v3214_v57 = vmul.f32 0.0078125, %v3213_v40 }
 0x474   :  { %v3215_v61 = vadd.f32 1e-05, %v3214_v57 }
 0x476   :  { %6130 = vrsqrt.f32 %v3215_v61 }
 0x480   :  { %v9913_v37 = vpop.eup %6130 }
 0x481   :  { %v3217_v56 = vmul.f32 %v9913_v37, %v9820_v60  ;;  %v3218_v10 = vmul.f32 %v9913_v37, %v9823_v4  ;;  %v3219_v16 = vmul.f32 %v9913_v37, %v9826_v36  ;;  %v3220_v1 = vmul.f32 %v9913_v37, %v9829_v30 }
 0x482   :  { %v3221_v53 = vmul.f32 %v9913_v37, %v9836_v27  ;;  %v3222_v38 = vmul.f32 %v9913_v37, %v9841_v26  ;;  %v3223_v60 = vmul.f32 %v9913_v37, %v9848_v49  ;;  %v3224_v12 = vmul.f32 %v9913_v37, %v9854_v54 }
 0x483   :  { %v3239_v34 = vmul.f32 %v9915_v22, %v3217_v56  ;;  %v3240_v4 = vmul.f32 %v9915_v22, %v3218_v10  ;;  %v3241_v36 = vmul.f32 %v9915_v22, %v3219_v16  ;;  %v3242_v24 = vmul.f32 %v9915_v22, %v3220_v1 }
 0x484   :  { %v3243_v30 = vmul.f32 %v9915_v22, %v3221_v53  ;;  %v3244_v49 = vmul.f32 %v9915_v22, %v3222_v38  ;;  %v3245_v17 = vmul.f32 %v9915_v22, %v3223_v60  ;;  %v3246_v48 = vmul.f32 %v9915_v22, %v3224_v12 }
 0x485   :  { %v3261_v27 = vadd.f32 %v9925_v33, %v3239_v34  ;;  %v3262_v26 = vadd.f32 %v9925_v33, %v3240_v4  ;;  %v3263_v55 = vadd.f32 %v9925_v33, %v3241_v36  ;;  %v3264_v47 = vadd.f32 %v9925_v33, %v3242_v24 }
 0x486   :  { %v3265_v5 = vadd.f32 %v9925_v33, %v3243_v30  ;;  %v3266_v54 = vadd.f32 %v9925_v33, %v3244_v49  ;;  %v3267_v44 = vadd.f32 %v9925_v33, %v3245_v17  ;;  %v3225_v9 = vmul.f32 %v9913_v37, %v9860_v2 }
 0x487   :  { %v3277_v50 = vmax.f32 %v3261_v27, 0.0  ;;  %v3278_v51 = vmax.f32 %v3262_v26, 0.0  ;;  %v3279_v23 = vmax.f32 %v3263_v55, 0.0  ;;  %v3280_v31 = vmax.f32 %v3264_v47, 0.0 }
 0x488   :  { %v3281_v28 = vmax.f32 %v3265_v5, 0.0  ;;  %v3226_v8 = vmul.f32 %v9913_v37, %v9866_v11  ;;  %v3227_v59 = vmul.f32 %v9913_v37, %v9872_v19  ;;  %v3282_v46 = vmax.f32 %v3266_v54, 0.0 }
 0x489   :  { %v3293_v13 = vmin.f32 %v3277_v50, 6.0  ;;  %v3294_v39 = vmin.f32 %v3278_v51, 6.0  ;;  %v3295_v29 = vmin.f32 %v3279_v23, 6.0  ;;  %v3268_v14 = vadd.f32 %v9925_v33, %v3246_v48  ;;  %v259_v50 = vld [vmem:[%s11279_s10 + $0x8] sm:$0xff]  ;;  %v260_v51 = vld [vmem:[%s11279_s10 + $0x10] sm:$0xff] }
 0x48a   :  { %v3247_v45 = vmul.f32 %v9915_v22, %v3225_v9  ;;  %v3296_v0 = vmin.f32 %v3280_v31, 6.0  ;;  %v3283_v18 = vmax.f32 %v3267_v44, 0.0  ;;  %v3248_v42 = vmul.f32 %v9915_v22, %v3226_v8 }
 0x48b   :  { %5959 = vmatprep.mubr.msk.f32.mxu1 %vm840_vm0, %v3293_v13  ;;  %v3228_v2 = vmul.f32 %v9913_v37, %v9878_v6  ;;  %v3297_v11 = vmin.f32 %v3281_v28, 6.0  ;;  %v3249_v19 = vmul.f32 %v9915_v22, %v3227_v59  ;;  %v3229_v7 = vmul.f32 %v9913_v37, %v9884_v43  ;;  %v261_v13 = vld [vmem:[%s11279_s10 + $0x18] sm:$0xff] }
 0x48c   :  { %5960 = vmatmul.mubr.msk.f32.vlgmr.msra.gmra.mrb[0].mxu1 %vm840_vm0, %v3294_v39  ;;  %v3269_v52 = vadd.f32 %v9925_v33, %v3247_v45  ;;  %v3298_v3 = vmin.f32 %v3282_v46, 6.0  ;;  %v3284_v25 = vmax.f32 %v3268_v14, 0.0  ;;  %v3299_v20 = vmin.f32 %v3283_v18, 6.0 }
 0x48d   :  { %5962 = vmatprep.mubr.msk.f32.mxu1 %vm840_vm0, %v3295_v29  ;;  %v3270_v32 = vadd.f32 %v9925_v33, %v3248_v42  ;;  %v3250_v58 = vmul.f32 %v9915_v22, %v3228_v2  ;;  %v3230_v6 = vmul.f32 %v9913_v37, %v9889_v35  ;;  %v3271_v57 = vadd.f32 %v9925_v33, %v3249_v19 }
 0x48e   :  { %v3285_v40 = vmax.f32 %v3269_v52, 0.0  ;;  %v3251_v61 = vmul.f32 %v9915_v22, %v3229_v7  ;;  %v3231_v43 = vmul.f32 %v9913_v37, %v9894_v62  ;;  %v3300_v56 = vmin.f32 %v3284_v25, 6.0 }
 0x48f   :  { %v3286_v10 = vmax.f32 %v3270_v32, 0.0  ;;  %v3272_v16 = vadd.f32 %v9925_v33, %v3250_v58  ;;  %v3252_v1 = vmul.f32 %v9915_v22, %v3230_v6  ;;  %v3232_v35 = vmul.f32 %v9913_v37, %v9900_v41 }
 0x490   :  { %5963 = vmatmul.mubr.msk.f32.gmra.mrb[2].mxu1 %vm840_vm0, %v3296_v0  ;;  %v3301_v53 = vmin.f32 %v3285_v40, 6.0  ;;  %v3287_v38 = vmax.f32 %v3271_v57, 0.0  ;;  %v3273_v60 = vadd.f32 %v9925_v33, %v3251_v61  ;;  %v3253_v34 = vmul.f32 %v9915_v22, %v3231_v43 }
 0x491   :  { %5965 = vmatprep.mubr.msk.f32.mxu1 %vm840_vm0, %v3297_v11  ;;  %v3302_v62 = vmin.f32 %v3286_v10, 6.0  ;;  %v3288_v4 = vmax.f32 %v3272_v16, 0.0  ;;  %v3274_v36 = vadd.f32 %v9925_v33, %v3252_v1  ;;  %v3254_v24 = vmul.f32 %v9915_v22, %v3232_v35  ;;  %v3865_v16 = vld [vmem:[%s11280_s11] sm:$0xff]  ;;  %v3866_v1 = vld [vmem:[%s11280_s11 + $0x8] sm:$0xff]  ;;  %s6351_s11 = scalar_lea.vmem %s5553_s0, 32 }
 0x492   :  { %v3303_v30 = vmin.f32 %v3287_v38, 6.0  ;;  %v3289_v12 = vmax.f32 %v3273_v60, 0.0  ;;  %v3275_v41 = vadd.f32 %v9925_v33, %v3253_v34  ;;  %v6094_v39 = vpack.c.bf16 %v261_v13, %v260_v51  ;;  %p6352_p2 = scmp.ne.s32.totalorder %s5553_s0, %s6351_s11  ;;  %p6357_p4 = scmp.lt.s32.totalorder %s6351_s11, %s6351_s11 }
 0x493   :  { %v3304_v37 = vmin.f32 %v3288_v4, 6.0  ;;  %v3290_v27 = vmax.f32 %v3274_v36, 0.0  ;;  %v3276_v26 = vadd.f32 %v9925_v33, %v3254_v24  ;;  %v258_v33 = vld [vmem:[%s11279_s10] sm:$0xff] }
 0x494   :  { %5966 = vmatmul.mubr.msk.f32.gmra.mrb[4].mxu1 %vm840_vm0, %v3298_v3  ;;  %v3305_v55 = vmin.f32 %v3289_v12, 6.0  ;;  %v3291_v49 = vmax.f32 %v3275_v41, 0.0  ;;  %v6090_v23 = vpack.c.bf16 %v259_v50, %v258_v33  ;;  %p6358_p5 = por %p6357_p4, %p6356_p3 }
 0x495   :  { %5968 = vmatprep.mubr.msk.f32.mxu1 %vm840_vm0, %v3299_v20  ;;  %v3306_v47 = vmin.f32 %v3290_v27, 6.0  ;;  %v3292_v22 = vmax.f32 %v3276_v26, 0.0 }
 0x496   :  { %v3307_v5 = vmin.f32 %v3291_v49, 6.0  ;;  %6091 = vmatprep.subr.bf16.mxu1 %v6090_v23  ;;  %p6359_p6 = pnand %p6358_p5, %p6352_p2 }
 0x497   :  { %v3308_v17 = vmin.f32 %v3292_v22, 6.0  ;;  %6093 = vmatpush3.bf16.msra.mxu1 %v6090_v23 }
 0x498   :  { %5969 = vmatmul.mubr.msk.f32.gmra.mrb[6].mxu1 %vm840_vm0, %v3300_v56  ;;  %6095 = vmatprep.subr.bf16.mxu1 %v6094_v39 }
 0x499   :  { %5971 = vmatprep.mubr.msk.f32.mxu1 %vm840_vm0, %v3301_v53  ;;  %v10028_v53 = vpack.c.bf16 %v3866_v1, %v3865_v16 }
 0x49b   :  { %6097 = vmatpush3.bf16.msra.mxu1 %v6094_v39 }
 0x49c   :  { %5972 = vmatmul.mubr.msk.f32.gmra.mrb[8].mxu1 %vm840_vm0, %v3302_v62  ;;  %6099 = vmatprep.subr.bf16.mxu1 %v10028_v53 }
 0x49d   :  { %5974 = vmatprep.mubr.msk.f32.mxu1 %vm840_vm0, %v3303_v30 }
 0x4a0   :  { %5975 = vmatmul.mubr.msk.f32.gmra.mrb[10].mxu1 %vm840_vm0, %v3304_v37 }
 0x4a1   :  { %5977 = vmatprep.mubr.msk.f32.mxu1 %vm840_vm0, %v3305_v55 }
 0x4a4   :  { %5978 = vmatmul.mubr.msk.f32.gmra.mrb[12].mxu1 %vm840_vm0, %v3306_v47 }
 0x4a5   :  { %5980 = vmatprep.mubr.msk.f32.mxu1 %vm840_vm0, %v3307_v5 }
 0x4a8   :  { %5981 = vmatmul.mubr.msk.f32.gmra.mrb[14].mxu1 %vm840_vm0, %v3308_v17 }
 0x55f   :  { %v5961_v54 = vpop.f32.mrb[0].mxu1 }
 0x560   :  { %v3503_v48 = vsel %vm840_vm0, %v5961_v54, 0.0  ;;  %v3423_v31 = vpop.f32.mrb[1].mxu1 }
 0x561   :  { %v3502_v28 = vsel %vm840_vm0, %v3423_v31, 0.0 }
 0x562   :  { %v3504_v44 = vadd.f32 %v3503_v48, %v3502_v28 }
 0x563   :  { %v5964_v29 = vpop.f32.mrb[2].mxu1 }
 0x564   :  { %v3433_v9 = vpop.f32.mrb[3].mxu1  ;;  %v3507_v46 = vsel %vm840_vm0, %v5964_v29, 0.0 }
 0x565   :  { %v3505_v8 = vsel %vm840_vm0, %v3433_v9, 0.0 }
 0x566   :  { %v3506_v59 = vadd.f32 %v3505_v8, %v3504_v44 }
 0x567   :  { %v5967_v14 = vpop.f32.mrb[4].mxu1 }
 0x568   :  { %v3443_v45 = vpop.f32.mrb[5].mxu1  ;;  %v3508_v0 = vadd.f32 %v3507_v46, %v3506_v59  ;;  %v3511_v2 = vsel %vm840_vm0, %v5967_v14, 0.0 }
 0x569   :  { %v3509_v18 = vsel %vm840_vm0, %v3443_v45, 0.0 }
 0x56a   :  { %v3510_v42 = vadd.f32 %v3509_v18, %v3508_v0 }
 0x56b   :  { %v5970_v11 = vpop.f32.mrb[6].mxu1 }
 0x56c   :  { %v3453_v52 = vpop.f32.mrb[7].mxu1  ;;  %v3512_v19 = vadd.f32 %v3511_v2, %v3510_v42  ;;  %v3515_v25 = vsel %vm840_vm0, %v5970_v11, 0.0 }
 0x56d   :  { %v3513_v7 = vsel %vm840_vm0, %v3453_v52, 0.0 }
 0x56e   :  { %v3514_v3 = vadd.f32 %v3513_v7, %v3512_v19 }
 0x56f   :  { %v5973_v20 = vpop.f32.mrb[8].mxu1 }
 0x570   :  { %v3463_v32 = vpop.f32.mrb[9].mxu1  ;;  %v3516_v58 = vadd.f32 %v3515_v25, %v3514_v3  ;;  %v3519_v57 = vsel %vm840_vm0, %v5973_v20, 0.0 }
 0x571   :  { %v3517_v6 = vsel %vm840_vm0, %v3463_v32, 0.0 }
 0x572   :  { %v3518_v40 = vadd.f32 %v3517_v6, %v3516_v58 }
 0x573   :  { %v5976_v61 = vpop.f32.mrb[10].mxu1 }
 0x574   :  { %v3473_v43 = vpop.f32.mrb[11].mxu1  ;;  %v3520_v56 = vadd.f32 %v3519_v57, %v3518_v40  ;;  %v3523_v38 = vsel %vm840_vm0, %v5976_v61, 0.0 }
 0x575   :  { %v3521_v10 = vsel %vm840_vm0, %v3473_v43, 0.0 }
 0x576   :  { %v3522_v35 = vadd.f32 %v3521_v10, %v3520_v56 }
 0x577   :  { %v5979_v60 = vpop.f32.mrb[12].mxu1 }
 0x578   :  { %v3483_v34 = vpop.f32.mrb[13].mxu1  ;;  %v3524_v62 = vadd.f32 %v3523_v38, %v3522_v35  ;;  %v3527_v24 = vsel %vm840_vm0, %v5979_v60, 0.0 }
 0x579   :  { %v3525_v4 = vsel %vm840_vm0, %v3483_v34, 0.0 }
 0x57a   :  { %v3526_v36 = vadd.f32 %v3525_v4, %v3524_v62 }
 0x57b   :  { %v5982_v30 = vpop.f32.mrb[14].mxu1 }
 0x57c   :  { %v3493_v12 = vpop.f32.mrb[15].mxu1  ;;  %v3528_v41 = vadd.f32 %v3527_v24, %v3526_v36  ;;  %v3531_v26 = vsel %vm840_vm0, %v5982_v30, 0.0 }
 0x57d   :  { %v3529_v37 = vsel %vm840_vm0, %v3493_v12, 0.0 }
 0x57e   :  { %v3530_v27 = vadd.f32 %v3529_v37, %v3528_v41 }
 0x580   :  { %v3532_v55 = vadd.f32 %v3531_v26, %v3530_v27 }
 0x582   :  { %v3533_v49 = vrot.slane %v3532_v55, 4 }
 0x584   :  { %v3534_v47 = vadd.f32 %v3533_v49, %v3532_v55 }
 0x586   :  { %v3535_v22 = vrot.slane %v3534_v47, 2 }
 0x588   :  { %v3536_v5 = vadd.f32 %v3535_v22, %v3534_v47 }
 0x58a   :  { %v3537_v17 = vrot.slane %v3536_v5, 1 }
 0x58c   :  { %v3538_v33 = vadd.f32 %v3537_v17, %v3536_v5 }
 0x58e   :  { %v3539_v50 = vmul.f32 0.0078125, %v3538_v33 }
 0x590   :  { %v10036_v51 = vsub.f32 %v3423_v31, %v3539_v50  ;;  %v10038_v23 = vsub.f32 %v5961_v54, %v3539_v50  ;;  %v10040_v13 = vsub.f32 %v3433_v9, %v3539_v50  ;;  %v10042_v39 = vsub.f32 %v5964_v29, %v3539_v50 }
 0x591   :  { %v10044_v48 = vsub.f32 %v3443_v45, %v3539_v50  ;;  %v10046_v28 = vsub.f32 %v5967_v14, %v3539_v50  ;;  %v10048_v44 = vsub.f32 %v3453_v52, %v3539_v50  ;;  %v10050_v8 = vsub.f32 %v5970_v11, %v3539_v50 }
 0x592   :  { %v10052_v59 = vsub.f32 %v3463_v32, %v3539_v50  ;;  %v10054_v46 = vsub.f32 %v5973_v20, %v3539_v50  ;;  %v10056_v31 = vsub.f32 %v3473_v43, %v3539_v50  ;;  %v10058_v54 = vsub.f32 %v5976_v61, %v3539_v50 }
 0x593   :  { %v10060_v9 = vsub.f32 %v3483_v34, %v3539_v50  ;;  %v10062_v29 = vsub.f32 %v5979_v60, %v3539_v50  ;;  %v3554_v45 = vsub.f32 %v3493_v12, %v3539_v50  ;;  %v10064_v0 = vsub.f32 %v5982_v30, %v3539_v50 }
 0x594   :  { %v3556_v14 = vmul.f32 %v10036_v51, %v10036_v51  ;;  %v3557_v18 = vmul.f32 %v10038_v23, %v10038_v23  ;;  %v3558_v42 = vmul.f32 %v10040_v13, %v10040_v13  ;;  %v3559_v2 = vmul.f32 %v10042_v39, %v10042_v39 }
 0x595   :  { %v3560_v7 = vmul.f32 %v10044_v48, %v10044_v48  ;;  %v3561_v20 = vmul.f32 %v10046_v28, %v10046_v28  ;;  %v3562_v6 = vmul.f32 %v10048_v44, %v10048_v44  ;;  %v3563_v61 = vmul.f32 %v10050_v8, %v10050_v8 }
 0x596   :  { %v3572_v11 = vsel %vm840_vm0, %v3556_v14, 0.0  ;;  %v3573_v52 = vsel %vm840_vm0, %v3557_v18, 0.0  ;;  %v3575_v3 = vsel %vm840_vm0, %v3558_v42, 0.0  ;;  %v3577_v32 = vsel %vm840_vm0, %v3559_v2, 0.0 }
 0x597   :  { %v3574_v19 = vadd.f32 %v3573_v52, %v3572_v11  ;;  %v3579_v40 = vsel %vm840_vm0, %v3560_v7, 0.0  ;;  %v3581_v43 = vsel %vm840_vm0, %v3561_v20, 0.0  ;;  %v3564_v10 = vmul.f32 %v10052_v59, %v10052_v59 }
 0x598   :  { %v3583_v16 = vsel %vm840_vm0, %v3562_v6, 0.0  ;;  %v3565_v35 = vmul.f32 %v10054_v46, %v10054_v46  ;;  %v3585_v38 = vsel %vm840_vm0, %v3563_v61, 0.0  ;;  %v3566_v34 = vmul.f32 %v10056_v31, %v10056_v31 }
 0x599   :  { %v3576_v25 = vadd.f32 %v3575_v3, %v3574_v19  ;;  %v3587_v62 = vsel %vm840_vm0, %v3564_v10, 0.0  ;;  %v3567_v36 = vmul.f32 %v10058_v54, %v10058_v54  ;;  %v3568_v12 = vmul.f32 %v10060_v9, %v10060_v9 }
 0x59a   :  { %v3589_v24 = vsel %vm840_vm0, %v3565_v35, 0.0  ;;  %v3591_v41 = vsel %vm840_vm0, %v3566_v34, 0.0  ;;  %v3569_v27 = vmul.f32 %v10062_v29, %v10062_v29  ;;  %v3570_v49 = vmul.f32 %v3554_v45, %v3554_v45 }
 0x59b   :  { %v3578_v58 = vadd.f32 %v3577_v32, %v3576_v25  ;;  %v3593_v26 = vsel %vm840_vm0, %v3567_v36, 0.0  ;;  %v3595_v47 = vsel %vm840_vm0, %v3568_v12, 0.0  ;;  %v3571_v5 = vmul.f32 %v10064_v0, %v10064_v0 }
 0x59c   :  { %v3597_v17 = vsel %vm840_vm0, %v3569_v27, 0.0  ;;  %v3599_v50 = vsel %vm840_vm0, %v3570_v49, 0.0 }
 0x59d   :  { %v3580_v57 = vadd.f32 %v3579_v40, %v3578_v58  ;;  %v3601_v18 = vsel %vm840_vm0, %v3571_v5, 0.0  ;;  %v5649_v58 = vld [vmem:[#allocation13] ss:$0 sm:$0xff] }
 0x59f   :  { %v3582_v56 = vadd.f32 %v3581_v43, %v3580_v57  ;;  %v5650_v43 = vld [vmem:[#allocation15] ss:$0 sm:$0xff] }
 0x5a1   :  { %v3584_v1 = vadd.f32 %v3583_v16, %v3582_v56 }
 0x5a3   :  { %v3586_v60 = vadd.f32 %v3585_v38, %v3584_v1 }
 0x5a5   :  { %v3588_v4 = vadd.f32 %v3587_v62, %v3586_v60 }
 0x5a7   :  { %v3590_v30 = vadd.f32 %v3589_v24, %v3588_v4 }
 0x5a9   :  { %v3592_v37 = vadd.f32 %v3591_v41, %v3590_v30 }
 0x5ab   :  { %v3594_v55 = vadd.f32 %v3593_v26, %v3592_v37 }
 0x5ad   :  { %v3596_v22 = vadd.f32 %v3595_v47, %v3594_v55 }
 0x5af   :  { %v3598_v33 = vadd.f32 %v3597_v17, %v3596_v22 }
 0x5b1   :  { %v3600_v14 = vadd.f32 %v3599_v50, %v3598_v33 }
 0x5b3   :  { %v3602_v42 = vadd.f32 %v3601_v18, %v3600_v14 }
 0x5b5   :  { %v3603_v2 = vrot.slane %v3602_v42, 4 }
 0x5b7   :  { %v3604_v11 = vadd.f32 %v3603_v2, %v3602_v42 }
 0x5b9   :  { %v3605_v52 = vrot.slane %v3604_v11, 2 }
 0x5bb   :  { %v3606_v19 = vadd.f32 %v3605_v52, %v3604_v11 }
 0x5bd   :  { %v3607_v7 = vrot.slane %v3606_v19, 1 }
 0x5bf   :  { %v3608_v3 = vadd.f32 %v3607_v7, %v3606_v19 }
 0x5c1   :  { %v3609_v25 = vmul.f32 0.0078125, %v3608_v3 }
 0x5c3   :  { %v3610_v20 = vadd.f32 1e-05, %v3609_v25 }
 0x5c5   :  { %6132 = vrsqrt.f32 %v3610_v20 }
 0x5cf   :  { %v6133_v32 = vpop.eup %6132 }
 0x5d0   :  { %v3626_v6 = vmul.f32 %v6133_v32, %v3554_v45  ;;  %v3612_v40 = vmul.f32 %v6133_v32, %v10036_v51  ;;  %v3613_v57 = vmul.f32 %v6133_v32, %v10038_v23  ;;  %v3614_v61 = vmul.f32 %v6133_v32, %v10040_v13 }
 0x5d1   :  { %v3615_v56 = vmul.f32 %v6133_v32, %v10042_v39  ;;  %v3616_v10 = vmul.f32 %v6133_v32, %v10044_v48  ;;  %v3617_v16 = vmul.f32 %v6133_v32, %v10046_v28  ;;  %v3618_v1 = vmul.f32 %v6133_v32, %v10048_v44 }
 0x5d2   :  { %v3634_v35 = vmul.f32 %v5649_v58, %v3612_v40  ;;  %v3635_v38 = vmul.f32 %v5649_v58, %v3613_v57  ;;  %v3636_v60 = vmul.f32 %v5649_v58, %v3614_v61  ;;  %v3619_v51 = vmul.f32 %v6133_v32, %v10050_v8 }
 0x5d3   :  { %v3637_v62 = vmul.f32 %v5649_v58, %v3615_v56  ;;  %v3638_v23 = vmul.f32 %v5649_v58, %v3616_v10  ;;  %v3620_v39 = vmul.f32 %v6133_v32, %v10052_v59  ;;  %v3621_v48 = vmul.f32 %v6133_v32, %v10054_v46 }
 0x5d4   :  { %v3656_v34 = vadd.f32 %v5650_v43, %v3634_v35  ;;  %v3657_v45 = vadd.f32 %v5650_v43, %v3635_v38  ;;  %v3658_v13 = vadd.f32 %v5650_v43, %v3636_v60  ;;  %v3622_v28 = vmul.f32 %v6133_v32, %v10056_v31 }
 0x5d5   :  { %v3623_v44 = vmul.f32 %v6133_v32, %v10058_v54  ;;  %v3624_v4 = vmul.f32 %v6133_v32, %v10060_v9  ;;  %v3625_v36 = vmul.f32 %v6133_v32, %v10062_v29  ;;  %v3659_v8 = vadd.f32 %v5650_v43, %v3637_v62 }
 0x5d6   :  { %5991 = vmatprep.mubr.msk.f32.mxu1 %vm840_vm0, %v3656_v34  ;;  %v3639_v24 = vmul.f32 %v5649_v58, %v3617_v16  ;;  %v3627_v30 = vmul.f32 %v6133_v32, %v10064_v0  ;;  %v3660_v59 = vadd.f32 %v5650_v43, %v3638_v23  ;;  %v3640_v46 = vmul.f32 %v5649_v58, %v3618_v1 }
 0x5d7   :  { %5992 = vmatmul.mubr.msk.f32.vlgmr.msra.gmra.mrb[16].mxu1 %vm840_vm0, %v3657_v45  ;;  %v3641_v54 = vmul.f32 %v5649_v58, %v3619_v51  ;;  %v3642_v9 = vmul.f32 %v5649_v58, %v3620_v39  ;;  %v3643_v41 = vmul.f32 %v5649_v58, %v3621_v48  ;;  %v3644_v0 = vmul.f32 %v5649_v58, %v3622_v28 }
 0x5d8   :  { %5994 = vmatprep.mubr.msk.f32.mxu1 %vm840_vm0, %v3658_v13  ;;  %6101 = vmatpush3.bf16.msra.mxu1 %v10028_v53  ;;  %v3661_v31 = vadd.f32 %v5650_v43, %v3639_v24  ;;  %v3662_v12 = vadd.f32 %v5650_v43, %v3640_v46  ;;  %v3645_v27 = vmul.f32 %v5649_v58, %v3623_v44 }
 0x5d9   :  { %v3663_v29 = vadd.f32 %v5650_v43, %v3641_v54  ;;  %v3664_v37 = vadd.f32 %v5650_v43, %v3642_v9  ;;  %v3665_v53 = vadd.f32 %v5650_v43, %v3643_v41  ;;  %v3666_v26 = vadd.f32 %v5650_v43, %v3644_v0 }
 0x5da   :  { %v3646_v55 = vmul.f32 %v5649_v58, %v3624_v4  ;;  %v3667_v49 = vadd.f32 %v5650_v43, %v3645_v27  ;;  %v3647_v47 = vmul.f32 %v5649_v58, %v3625_v36  ;;  %v3648_v22 = vmul.f32 %v5649_v58, %v3626_v6 }
 0x5db   :  { %5995 = vmatmul.mubr.msk.f32.gmra.mrb[18].mxu1 %vm840_vm0, %v3659_v8  ;;  %v3649_v33 = vmul.f32 %v5649_v58, %v3627_v30 }
 0x5dc   :  { %5997 = vmatprep.mubr.msk.f32.mxu1 %vm840_vm0, %v3660_v59  ;;  %v3668_v5 = vadd.f32 %v5650_v43, %v3646_v55  ;;  %v3669_v17 = vadd.f32 %v5650_v43, %v3647_v47  ;;  %v3670_v50 = vadd.f32 %v5650_v43, %v3648_v22  ;;  %v3875_v55 = vld [vmem:[%s11286_s17 + $0x8] sm:$0xff] }
 0x5dd   :  { %v3671_v14 = vadd.f32 %v5650_v43, %v3649_v33 }
 0x5df   :  { %5998 = vmatmul.mubr.msk.f32.gmra.mrb[20].mxu1 %vm840_vm0, %v3661_v31 }
 0x5e0   :  { %6000 = vmatprep.mubr.msk.f32.mxu1 %vm840_vm0, %v3662_v12 }
 0x5e3   :  { %6001 = vmatmul.mubr.msk.f32.gmra.mrb[22].mxu1 %vm840_vm0, %v3663_v29 }
 0x5e4   :  { %6003 = vmatprep.mubr.msk.f32.mxu1 %vm840_vm0, %v3664_v37 }
 0x5e7   :  { %6004 = vmatmul.mubr.msk.f32.gmra.mrb[24].mxu1 %vm840_vm0, %v3665_v53 }
 0x5e8   :  { %6006 = vmatprep.mubr.msk.f32.mxu1 %vm840_vm0, %v3666_v26  ;;  %v3874_v26 = vld [vmem:[%s11286_s17] sm:$0xff] }
 0x5eb   :  { %6007 = vmatmul.mubr.msk.f32.gmra.mrb[26].mxu1 %vm840_vm0, %v3667_v49  ;;  %v3876_v49 = vld [vmem:[%s11286_s17 + $0x10] sm:$0xff] }
 0x5ec   :  { %6009 = vmatprep.mubr.msk.f32.mxu1 %vm840_vm0, %v3668_v5  ;;  %v6102_v5 = vpack.c.bf16 %v3875_v55, %v3874_v26 }
 0x5ee   :  { %6103 = vmatprep.subr.bf16.mxu1 %v6102_v5 }
 0x5ef   :  { %6010 = vmatmul.mubr.msk.f32.gmra.mrb[28].mxu1 %vm840_vm0, %v3669_v17  ;;  %v3877_v17 = vld [vmem:[%s11286_s17 + $0x18] sm:$0xff] }
 0x5f0   :  { %6012 = vmatprep.mubr.msk.f32.mxu1 %vm840_vm0, %v3670_v50  ;;  %v6106_v50 = vpack.c.bf16 %v3877_v17, %v3876_v49 }
 0x5f3   :  { %6013 = vmatmul.mubr.msk.f32.gmra.mrb[30].mxu1 %vm840_vm0, %v3671_v14 }
 0x6aa   :  { %v10144_v18 = vpop.f32.mrb[16].mxu1 }
 0x6ab   :  { %12140 = vst [vmem:[#allocation120_spill] sm:$0xff] %v10144_v18  ;;  %v10146_v42 = vpop.f32.mrb[17].mxu1 }
 0x6ac   :  { %12141 = vst [vmem:[#allocation130_spill] sm:$0xff] %v10146_v42  ;;  %6019 = vmatprep.mubr.msk.f32.mxu1 %vm3880_vm3, %v10146_v42 }
 0x6ad   :  { %6020 = vmatmul.mubr.msk.f32.vlgmr.msra.gmra.mrb[32].mxu1 %vm3880_vm3, %v10144_v18 }
 0x6ae   :  { %v10152_v2 = vpop.f32.mrb[18].mxu1  ;;  %6105 = vmatpush3.bf16.msra.mxu1 %v6102_v5 }
 0x6af   :  { %12142 = vst [vmem:[#allocation102_spill] sm:$0xff] %v10152_v2  ;;  %v10154_v11 = vpop.f32.mrb[19].mxu1  ;;  %6107 = vmatprep.subr.bf16.mxu1 %v6106_v50 }
 0x6b0   :  { %12143 = vst [vmem:[#allocation103_spill] sm:$0xff] %v10154_v11  ;;  %6022 = vmatprep.mubr.msk.f32.mxu1 %vm3880_vm3, %v10154_v11 }
 0x6b1   :  { %6023 = vmatmul.mubr.msk.f32.gmra.mrb[34].mxu1 %vm3880_vm3, %v10152_v2 }
 0x6b2   :  { %v10160_v52 = vpop.f32.mrb[20].mxu1  ;;  %6109 = vmatpush3.bf16.msra.mxu1 %v6106_v50 }
 0x6b3   :  { %12144 = vst [vmem:[#allocation115_spill] sm:$0xff] %v10160_v52  ;;  %v10162_v19 = vpop.f32.mrb[21].mxu1 }
 0x6b4   :  { %12145 = vst [vmem:[#allocation30_spill] sm:$0xff] %v10162_v19  ;;  %6025 = vmatprep.mubr.msk.f32.mxu1 %vm3880_vm3, %v10162_v19 }
 0x6b5   :  { %6026 = vmatmul.mubr.msk.f32.gmra.mrb[36].mxu1 %vm3880_vm3, %v10160_v52 }
 0x6b6   :  { %v10168_v7 = vpop.f32.mrb[22].mxu1 }
 0x6b7   :  { %12146 = vst [vmem:[#allocation116_spill] sm:$0xff] %v10168_v7  ;;  %v10170_v3 = vpop.f32.mrb[23].mxu1 }
 0x6b8   :  { %12147 = vst [vmem:[#allocation141_spill] sm:$0xff] %v10170_v3  ;;  %6028 = vmatprep.mubr.msk.f32.mxu1 %vm3880_vm3, %v10170_v3 }
 0x6b9   :  { %6029 = vmatmul.mubr.msk.f32.gmra.mrb[38].mxu1 %vm3880_vm3, %v10168_v7 }
 0x6ba   :  { %v10176_v25 = vpop.f32.mrb[24].mxu1 }
 0x6bb   :  { %12148 = vst [vmem:[#allocation128_spill] sm:$0xff] %v10176_v25  ;;  %v10178_v20 = vpop.f32.mrb[25].mxu1 }
 0x6bc   :  { %12149 = vst [vmem:[#allocation33_spill] sm:$0xff] %v10178_v20  ;;  %6031 = vmatprep.mubr.msk.f32.mxu1 %vm3880_vm3, %v10178_v20 }
 0x6bd   :  { %6032 = vmatmul.mubr.msk.f32.gmra.mrb[40].mxu1 %vm3880_vm3, %v10176_v25 }
 0x6be   :  { %v10184_v32 = vpop.f32.mrb[26].mxu1 }
 0x6bf   :  { %12150 = vst [vmem:[#allocation29_spill] sm:$0xff] %v10184_v32  ;;  %v10186_v58 = vpop.f32.mrb[27].mxu1 }
 0x6c0   :  { %12151 = vst [vmem:[#allocation32_spill] sm:$0xff] %v10186_v58  ;;  %6034 = vmatprep.mubr.msk.f32.mxu1 %vm3880_vm3, %v10186_v58 }
 0x6c1   :  { %6035 = vmatmul.mubr.msk.f32.gmra.mrb[42].mxu1 %vm3880_vm3, %v10184_v32 }
 0x6c2   :  { %v10192_v6 = vpop.f32.mrb[28].mxu1 }
 0x6c3   :  { %12152 = vst [vmem:[#allocation31_spill] sm:$0xff] %v10192_v6  ;;  %v10194_v40 = vpop.f32.mrb[29].mxu1 }
 0x6c4   :  { %12153 = vst [vmem:[#allocation34_spill] sm:$0xff] %v10194_v40  ;;  %6037 = vmatprep.mubr.msk.f32.mxu1 %vm3880_vm3, %v10194_v40 }
 0x6c5   :  { %6038 = vmatmul.mubr.msk.f32.gmra.mrb[44].mxu1 %vm3880_vm3, %v10192_v6 }
 0x6c6   :  { %v10200_v57 = vpop.f32.mrb[30].mxu1 }
 0x6c7   :  { %12154 = vst [vmem:[#allocation35_spill] sm:$0xff] %v10200_v57  ;;  %v10202_v61 = vpop.f32.mrb[31].mxu1 }
 0x6c8   :  { %12155 = vst [vmem:[#allocation72_spill] sm:$0xff] %v10202_v61  ;;  %6040 = vmatprep.mubr.msk.f32.mxu1 %vm3880_vm3, %v10202_v61 }
 0x6c9   :  { %6041 = vmatmul.mubr.msk.f32.gmra.mrb[46].mxu1 %vm3880_vm3, %v10200_v57 }
 0x780   :  { %v10208_v43 = vpop.f32.mrb[32].mxu1 }
 0x781   :  { %v4075_v56 = vsel %vm840_vm0, %v10208_v43, 0.0  ;;  %v3995_v10 = vpop.f32.mrb[33].mxu1 }
 0x782   :  { %v4074_v16 = vsel %vm840_vm0, %v3995_v10, 0.0 }
 0x783   :  { %v4076_v1 = vadd.f32 %v4075_v56, %v4074_v16 }
 0x784   :  { %v6024_v35 = vpop.f32.mrb[34].mxu1 }
 0x785   :  { %v4005_v38 = vpop.f32.mrb[35].mxu1  ;;  %v4079_v45 = vsel %vm840_vm0, %v6024_v35, 0.0 }
 0x786   :  { %v4077_v60 = vsel %vm840_vm0, %v4005_v38, 0.0 }
 0x787   :  { %v4078_v34 = vadd.f32 %v4077_v60, %v4076_v1 }
 0x788   :  { %v6027_v51 = vpop.f32.mrb[36].mxu1 }
 0x789   :  { %v4015_v62 = vpop.f32.mrb[37].mxu1  ;;  %v4080_v23 = vadd.f32 %v4079_v45, %v4078_v34  ;;  %v4083_v48 = vsel %vm840_vm0, %v6027_v51, 0.0 }
 0x78a   :  { %v4081_v13 = vsel %vm840_vm0, %v4015_v62, 0.0 }
 0x78b   :  { %v4082_v39 = vadd.f32 %v4081_v13, %v4080_v23 }
 0x78c   :  { %v6030_v28 = vpop.f32.mrb[38].mxu1 }
 0x78d   :  { %v4025_v44 = vpop.f32.mrb[39].mxu1  ;;  %v4084_v4 = vadd.f32 %v4083_v48, %v4082_v39  ;;  %v4087_v24 = vsel %vm840_vm0, %v6030_v28, 0.0 }
 0x78e   :  { %v4085_v36 = vsel %vm840_vm0, %v4025_v44, 0.0 }
 0x78f   :  { %v4086_v8 = vadd.f32 %v4085_v36, %v4084_v4 }
 0x790   :  { %v6033_v30 = vpop.f32.mrb[40].mxu1 }
 0x791   :  { %v4035_v59 = vpop.f32.mrb[41].mxu1  ;;  %v4088_v46 = vadd.f32 %v4087_v24, %v4086_v8  ;;  %v4091_v12 = vsel %vm840_vm0, %v6033_v30, 0.0 }
 0x792   :  { %v4089_v31 = vsel %vm840_vm0, %v4035_v59, 0.0 }
 0x793   :  { %v4090_v54 = vadd.f32 %v4089_v31, %v4088_v46 }
 0x794   :  { %v6036_v9 = vpop.f32.mrb[42].mxu1 }
 0x795   :  { %v4045_v29 = vpop.f32.mrb[43].mxu1  ;;  %v4092_v41 = vadd.f32 %v4091_v12, %v4090_v54  ;;  %v4095_v53 = vsel %vm840_vm0, %v6036_v9, 0.0 }
 0x796   :  { %v4093_v37 = vsel %vm840_vm0, %v4045_v29, 0.0 }
 0x797   :  { %v4094_v0 = vadd.f32 %v4093_v37, %v4092_v41 }
 0x798   :  { %v6039_v27 = vpop.f32.mrb[44].mxu1 }
 0x799   :  { %v4055_v47 = vpop.f32.mrb[45].mxu1  ;;  %v4096_v22 = vadd.f32 %v4095_v53, %v4094_v0  ;;  %v4099_v56 = vsel %vm840_vm0, %v6039_v27, 0.0 }
 0x79a   :  { %v4097_v33 = vsel %vm840_vm0, %v4055_v47, 0.0 }
 0x79b   :  { %v4098_v14 = vadd.f32 %v4097_v33, %v4096_v22 }
 0x79c   :  { %v6042_v16 = vpop.f32.mrb[46].mxu1 }
 0x79d   :  { %v4065_v1 = vpop.f32.mrb[47].mxu1  ;;  %v4100_v60 = vadd.f32 %v4099_v56, %v4098_v14  ;;  %v4103_v23 = vsel %vm840_vm0, %v6042_v16, 0.0 }
 0x79e   :  { %v4101_v34 = vsel %vm840_vm0, %v4065_v1, 0.0 }
 0x79f   :  { %v4102_v45 = vadd.f32 %v4101_v34, %v4100_v60 }
 0x7a1   :  { %v4104_v13 = vadd.f32 %v4103_v23, %v4102_v45 }
 0x7a3   :  { %v4105_v39 = vrot.slane %v4104_v13, 4 }
 0x7a5   :  { %v4106_v48 = vadd.f32 %v4105_v39, %v4104_v13 }
 0x7a7   :  { %v4107_v4 = vrot.slane %v4106_v48, 2 }
 0x7a9   :  { %v4108_v36 = vadd.f32 %v4107_v4, %v4106_v48 }
 0x7ab   :  { %v4109_v8 = vrot.slane %v4108_v36, 1 }
 0x7ad   :  { %v4110_v24 = vadd.f32 %v4109_v8, %v4108_v36 }
 0x7af   :  { %v4111_v46 = vmul.f32 0.0078125, %v4110_v24 }
 0x7b1   :  { %v10239_v31 = vsub.f32 %v3995_v10, %v4111_v46  ;;  %v10242_v54 = vsub.f32 %v10208_v43, %v4111_v46  ;;  %v10244_v12 = vsub.f32 %v4005_v38, %v4111_v46  ;;  %v10246_v41 = vsub.f32 %v6024_v35, %v4111_v46 }
 0x7b2   :  { %v10248_v37 = vsub.f32 %v4015_v62, %v4111_v46  ;;  %v10250_v0 = vsub.f32 %v6027_v51, %v4111_v46  ;;  %v10252_v53 = vsub.f32 %v4025_v44, %v4111_v46  ;;  %v10254_v26 = vsub.f32 %v6030_v28, %v4111_v46 }
 0x7b3   :  { %v10256_v55 = vsub.f32 %v4035_v59, %v4111_v46  ;;  %v10258_v49 = vsub.f32 %v6033_v30, %v4111_v46  ;;  %v10260_v10 = vsub.f32 %v4045_v29, %v4111_v46  ;;  %v10262_v43 = vsub.f32 %v6036_v9, %v4111_v46 }
 0x7b4   :  { %v10264_v38 = vsub.f32 %v4055_v47, %v4111_v46  ;;  %v10266_v35 = vsub.f32 %v6039_v27, %v4111_v46  ;;  %v10268_v62 = vsub.f32 %v4065_v1, %v4111_v46  ;;  %v10270_v51 = vsub.f32 %v6042_v16, %v4111_v46 }
 0x7b5   :  { %v4128_v28 = vmul.f32 %v10239_v31, %v10239_v31  ;;  %v4129_v44 = vmul.f32 %v10242_v54, %v10242_v54  ;;  %v4130_v30 = vmul.f32 %v10244_v12, %v10244_v12  ;;  %v4131_v59 = vmul.f32 %v10246_v41, %v10246_v41 }
 0x7b6   :  { %v4132_v47 = vmul.f32 %v10248_v37, %v10248_v37  ;;  %v4133_v17 = vmul.f32 %v10250_v0, %v10250_v0  ;;  %v4134_v14 = vmul.f32 %v10252_v53, %v10252_v53  ;;  %v4135_v1 = vmul.f32 %v10254_v26, %v10254_v26 }
 0x7b7   :  { %v4144_v9 = vsel %vm840_vm0, %v4128_v28, 0.0  ;;  %v4145_v29 = vsel %vm840_vm0, %v4129_v44, 0.0  ;;  %v4147_v22 = vsel %vm840_vm0, %v4130_v30, 0.0  ;;  %v4149_v33 = vsel %vm840_vm0, %v4131_v59, 0.0 }
 0x7b8   :  { %v4146_v27 = vadd.f32 %v4145_v29, %v4144_v9  ;;  %v4151_v56 = vsel %vm840_vm0, %v4132_v47, 0.0  ;;  %v4153_v60 = vsel %vm840_vm0, %v4133_v17, 0.0  ;;  %v4136_v45 = vmul.f32 %v10256_v55, %v10256_v55 }
 0x7b9   :  { %v4155_v23 = vsel %vm840_vm0, %v4134_v14, 0.0  ;;  %v4137_v39 = vmul.f32 %v10258_v49, %v10258_v49  ;;  %v4157_v48 = vsel %vm840_vm0, %v4135_v1, 0.0  ;;  %v4138_v36 = vmul.f32 %v10260_v10, %v10260_v10 }
 0x7ba   :  { %v4148_v5 = vadd.f32 %v4147_v22, %v4146_v27  ;;  %v4159_v8 = vsel %vm840_vm0, %v4136_v45, 0.0  ;;  %v4139_v46 = vmul.f32 %v10262_v43, %v10262_v43  ;;  %v4140_v30 = vmul.f32 %v10264_v38, %v10264_v38 }
 0x7bb   :  { %v4161_v28 = vsel %vm840_vm0, %v4137_v39, 0.0  ;;  %v4163_v59 = vsel %vm840_vm0, %v4138_v36, 0.0  ;;  %v4141_v29 = vmul.f32 %v10266_v35, %v10266_v35  ;;  %v4142_v22 = vmul.f32 %v10268_v62, %v10268_v62 }
 0x7bc   :  { %v4150_v50 = vadd.f32 %v4149_v33, %v4148_v5  ;;  %v4165_v27 = vsel %vm840_vm0, %v4139_v46, 0.0  ;;  %v4167_v5 = vsel %vm840_vm0, %v4140_v30, 0.0  ;;  %v4143_v33 = vmul.f32 %v10270_v51, %v10270_v51  ;;  %v5683_v30 = vld [vmem:[#allocation16] ss:$0 sm:$0xff] }
 0x7be   :  { %v4152_v16 = vadd.f32 %v4151_v56, %v4150_v50  ;;  %v4169_v50 = vsel %vm840_vm0, %v4141_v29, 0.0  ;;  %v4171_v56 = vsel %vm840_vm0, %v4142_v22, 0.0  ;;  %v4173_v1 = vsel %vm840_vm0, %v4143_v33, 0.0  ;;  %v5684_v33 = vld [vmem:[#allocation18] ss:$0 sm:$0xff] }
 0x7c0   :  { %v4154_v34 = vadd.f32 %v4153_v60, %v4152_v16 }
 0x7c2   :  { %v4156_v13 = vadd.f32 %v4155_v23, %v4154_v34 }
 0x7c4   :  { %v4158_v4 = vadd.f32 %v4157_v48, %v4156_v13 }
 0x7c6   :  { %v4160_v24 = vadd.f32 %v4159_v8, %v4158_v4 }
 0x7c8   :  { %v4162_v44 = vadd.f32 %v4161_v28, %v4160_v24 }
 0x7ca   :  { %v4164_v9 = vadd.f32 %v4163_v59, %v4162_v44 }
 0x7cc   :  { %v4166_v47 = vadd.f32 %v4165_v27, %v4164_v9 }
 0x7ce   :  { %v4168_v17 = vadd.f32 %v4167_v5, %v4166_v47 }
 0x7d0   :  { %v4170_v14 = vadd.f32 %v4169_v50, %v4168_v17 }
 0x7d2   :  { %v4172_v16 = vadd.f32 %v4171_v56, %v4170_v14 }
 0x7d4   :  { %v4174_v60 = vadd.f32 %v4173_v1, %v4172_v16 }
 0x7d6   :  { %v4175_v34 = vrot.slane %v4174_v60, 4 }
 0x7d8   :  { %v4176_v45 = vadd.f32 %v4175_v34, %v4174_v60 }
 0x7da   :  { %v4177_v23 = vrot.slane %v4176_v45, 2 }
 0x7dc   :  { %v4178_v13 = vadd.f32 %v4177_v23, %v4176_v45 }
 0x7de   :  { %v4179_v39 = vrot.slane %v4178_v13, 1 }
 0x7e0   :  { %v4180_v48 = vadd.f32 %v4179_v39, %v4178_v13 }
 0x7e2   :  { %v4181_v4 = vmul.f32 0.0078125, %v4180_v48 }
 0x7e4   :  { %v4182_v36 = vadd.f32 1e-05, %v4181_v4 }
 0x7e6   :  { %6134 = vrsqrt.f32 %v4182_v36 }
 0x7f0   :  { %v6135_v8 = vpop.eup %6134 }
 0x7f1   :  { %v4184_v24 = vmul.f32 %v6135_v8, %v10239_v31  ;;  %v4185_v46 = vmul.f32 %v6135_v8, %v10242_v54  ;;  %v4186_v28 = vmul.f32 %v6135_v8, %v10244_v12  ;;  %v4187_v44 = vmul.f32 %v6135_v8, %v10246_v41 }
 0x7f2   :  { %v4188_v59 = vmul.f32 %v6135_v8, %v10248_v37  ;;  %v4189_v9 = vmul.f32 %v6135_v8, %v10250_v0  ;;  %v4190_v29 = vmul.f32 %v6135_v8, %v10252_v53  ;;  %v4191_v27 = vmul.f32 %v6135_v8, %v10254_v26 }
 0x7f3   :  { %v4192_v47 = vmul.f32 %v6135_v8, %v10256_v55  ;;  %v4193_v22 = vmul.f32 %v6135_v8, %v10258_v49  ;;  %v4194_v31 = vmul.f32 %v6135_v8, %v10260_v10  ;;  %v4195_v54 = vmul.f32 %v6135_v8, %v10262_v43 }
 0x7f4   :  { %v4196_v12 = vmul.f32 %v6135_v8, %v10264_v38  ;;  %v4197_v41 = vmul.f32 %v6135_v8, %v10266_v35  ;;  %v4198_v37 = vmul.f32 %v6135_v8, %v10268_v62  ;;  %v4199_v0 = vmul.f32 %v6135_v8, %v10270_v51 }
 0x7f5   :  { %v4206_v5 = vmul.f32 %v5683_v30, %v4184_v24  ;;  %v4207_v53 = vmul.f32 %v5683_v30, %v4185_v46  ;;  %v4208_v17 = vmul.f32 %v5683_v30, %v4186_v28  ;;  %v4209_v26 = vmul.f32 %v5683_v30, %v4187_v44 }
 0x7f6   :  { %v4210_v55 = vmul.f32 %v5683_v30, %v4188_v59  ;;  %v4211_v50 = vmul.f32 %v5683_v30, %v4189_v9  ;;  %v4212_v49 = vmul.f32 %v5683_v30, %v4190_v29  ;;  %v4213_v14 = vmul.f32 %v5683_v30, %v4191_v27 }
 0x7f7   :  { %v4214_v10 = vmul.f32 %v5683_v30, %v4192_v47  ;;  %v4215_v56 = vmul.f32 %v5683_v30, %v4193_v22  ;;  %v4216_v43 = vmul.f32 %v5683_v30, %v4194_v31  ;;  %v4217_v16 = vmul.f32 %v5683_v30, %v4195_v54 }
 0x7f8   :  { %v4218_v38 = vmul.f32 %v5683_v30, %v4196_v12  ;;  %v4219_v1 = vmul.f32 %v5683_v30, %v4197_v41  ;;  %v4220_v35 = vmul.f32 %v5683_v30, %v4198_v37  ;;  %v4221_v60 = vmul.f32 %v5683_v30, %v4199_v0 }
 0x7f9   :  { %v4228_v62 = vadd.f32 %v5684_v33, %v4206_v5  ;;  %v4229_v34 = vadd.f32 %v5684_v33, %v4207_v53  ;;  %v4230_v51 = vadd.f32 %v5684_v33, %v4208_v17  ;;  %v4231_v45 = vadd.f32 %v5684_v33, %v4209_v26 }
 0x7fa   :  { %v4232_v23 = vadd.f32 %v5684_v33, %v4210_v55  ;;  %v4233_v13 = vadd.f32 %v5684_v33, %v4211_v50  ;;  %v4234_v39 = vadd.f32 %v5684_v33, %v4212_v49  ;;  %v4235_v48 = vadd.f32 %v5684_v33, %v4213_v14 }
 0x7fb   :  { %v4236_v4 = vadd.f32 %v5684_v33, %v4214_v10  ;;  %v4237_v36 = vadd.f32 %v5684_v33, %v4215_v56  ;;  %v4238_v8 = vadd.f32 %v5684_v33, %v4216_v43  ;;  %v4239_v24 = vadd.f32 %v5684_v33, %v4217_v16 }
 0x7fc   :  { %v4240_v46 = vadd.f32 %v5684_v33, %v4218_v38  ;;  %v4241_v28 = vadd.f32 %v5684_v33, %v4219_v1  ;;  %v4242_v44 = vadd.f32 %v5684_v33, %v4220_v35  ;;  %v4243_v59 = vadd.f32 %v5684_v33, %v4221_v60 }
 0x7fd   :  { %v4244_v9 = vmax.f32 %v4228_v62, 0.0  ;;  %v4245_v29 = vmax.f32 %v4229_v34, 0.0  ;;  %v4246_v27 = vmax.f32 %v4230_v51, 0.0  ;;  %v4247_v30 = vmax.f32 %v4231_v45, 0.0  ;;  %v3869_v45 = vld [vmem:[%s11283_s14] sm:$0x7] }
 0x7fe   :  { %v4248_v47 = vmax.f32 %v4232_v23, 0.0  ;;  %v4249_v22 = vmax.f32 %v4233_v13, 0.0  ;;  %v4250_v31 = vmax.f32 %v4234_v39, 0.0  ;;  %v4251_v54 = vmax.f32 %v4235_v48, 0.0  ;;  %v4333_v39 = vld [vmem:[#allocation3] sm:$0xff] }
 0x7ff   :  { %v4252_v12 = vmax.f32 %v4236_v4, 0.0  ;;  %v4253_v41 = vmax.f32 %v4237_v36, 0.0  ;;  %v4254_v37 = vmax.f32 %v4238_v8, 0.0  ;;  %v4255_v0 = vmax.f32 %v4239_v24, 0.0  ;;  %v4385_v48 = vld [vmem:[#allocation3 + $0x1] sm:$0xff] }
 0x800   :  { %v4256_v5 = vmax.f32 %v4240_v46, 0.0  ;;  %v4257_v53 = vmax.f32 %v4241_v28, 0.0  ;;  %v4258_v17 = vmax.f32 %v4242_v44, 0.0  ;;  %v4259_v26 = vmax.f32 %v4243_v59, 0.0  ;;  %v4341_v4 = vld [vmem:[#allocation3 + $0xa0] sm:$0xff] }
 0x801   :  { %v4260_v55 = vmin.f32 %v4244_v9, 6.0  ;;  %v4261_v50 = vmin.f32 %v4245_v29, 6.0  ;;  %v4262_v49 = vmin.f32 %v4246_v27, 6.0  ;;  %v4263_v33 = vmin.f32 %v4247_v30, 6.0  ;;  %v4393_v36 = vld [vmem:[#allocation3 + $0xa1] sm:$0xff] }
 0x802   :  { %v4264_v14 = vmin.f32 %v4248_v47, 6.0  ;;  %v4265_v10 = vmin.f32 %v4249_v22, 6.0  ;;  %v4266_v56 = vmin.f32 %v4250_v31, 6.0  ;;  %v4267_v43 = vmin.f32 %v4251_v54, 6.0  ;;  %v4437_v29 = vld [vmem:[#allocation3 + $0x2] sm:$0xff] }
 0x803   :  { %v4268_v16 = vmin.f32 %v4252_v12, 6.0  ;;  %v4269_v38 = vmin.f32 %v4253_v41, 6.0  ;;  %v4270_v1 = vmin.f32 %v4254_v37, 6.0  ;;  %v4271_v35 = vmin.f32 %v4255_v0, 6.0  ;;  %4317 = vst.msk [vmem:[#allocation3 + $0x11] sm:$0xff] %vm840_vm0, %v4260_v55  ;;  %4319 = vst.msk [vmem:[#allocation3 + $0x31] sm:$0xff] %vm840_vm0, %v4262_v49 }
 0x804   :  { %4320 = vst.msk [vmem:[#allocation3 + $0x41] sm:$0xff] %vm840_vm0, %v4263_v33  ;;  %4318 = vst.msk [vmem:[#allocation3 + $0x21] sm:$0xff] %vm840_vm0, %v4261_v50  ;;  %v4272_v60 = vmin.f32 %v4256_v5, 6.0  ;;  %v4273_v62 = vmin.f32 %v4257_v53, 6.0  ;;  %v4274_v34 = vmin.f32 %v4258_v17, 6.0  ;;  %v4275_v51 = vmin.f32 %v4259_v26, 6.0 }
 0x805   :  { %4321 = vst.msk [vmem:[#allocation3 + $0x51] sm:$0xff] %vm840_vm0, %v4264_v14  ;;  %4322 = vst.msk [vmem:[#allocation3 + $0x61] sm:$0xff] %vm840_vm0, %v4265_v10  ;;  %v10356_v23 = vrot.slane %v3869_v45, %v12134_v21  ;;  %v10359_v13 = vrot.slane %v3869_v45, %v12135_v15  ;;  %v10362_v8 = vrot.slane %v3869_v45, %v12136_v63  ;;  %v4445_v27 = vld [vmem:[#allocation3 + $0xa2] sm:$0xff]  ;;  %v4653_v53 = vld [vmem:[#allocation3 + $0x90] sm:$0xff] }
 0x806   :  { %4323 = vst.msk [vmem:[#allocation3 + $0x71] sm:$0xff] %vm840_vm0, %v4266_v56  ;;  %4324 = vst.msk [vmem:[#allocation3 + $0x81] sm:$0xff] %vm840_vm0, %v4267_v43  ;;  %v3870_v30 = vld [vmem:[%s11283_s14 + $0x4] sm:$0x7]  ;;  %v3871_v12 = vld [vmem:[%s11283_s14 + $0x8] sm:$0x7] }
 0x807   :  { %4325 = vst.msk [vmem:[#allocation3 + $0xb1] sm:$0xff] %vm840_vm0, %v4268_v16  ;;  %4326 = vst.msk [vmem:[#allocation3 + $0xc1] sm:$0xff] %vm840_vm0, %v4269_v38  ;;  %v4353_v24 = vmul.f32 %v10356_v23, %v4333_v39  ;;  %v4405_v46 = vmul.f32 %v10359_v13, %v4385_v48  ;;  %v4361_v59 = vmul.f32 %v10356_v23, %v4341_v4  ;;  %v4661_v55 = vld [vmem:[#allocation3 + $0x130] sm:$0xff] }
 0x808   :  { %4327 = vst.msk [vmem:[#allocation3 + $0xd1] sm:$0xff] %vm840_vm0, %v4270_v1  ;;  %4328 = vst.msk [vmem:[#allocation3 + $0xe1] sm:$0xff] %vm840_vm0, %v4271_v35  ;;  %v4413_v9 = vmul.f32 %v10359_v13, %v4393_v36  ;;  %v4457_v37 = vmul.f32 %v10362_v8, %v4437_v29  ;;  %v4465_v5 = vmul.f32 %v10362_v8, %v4445_v27  ;;  %v4705_v50 = vld [vmem:[#allocation3 + $0x91] sm:$0xff] }
 0x809   :  { %4329 = vst.msk [vmem:[#allocation3 + $0xf1] sm:$0xff] %vm840_vm0, %v4272_v60  ;;  %4330 = vst.msk [vmem:[#allocation3 + $0x101] sm:$0xff] %vm840_vm0, %v4273_v62  ;;  %v4421_v41 = vadd.f32 %v4405_v46, %v4353_v24  ;;  %v10389_v17 = vrot.slane %v3870_v30, %v12134_v21  ;;  %v10392_v26 = vrot.slane %v3870_v30, %v12135_v15  ;;  %v4757_v49 = vld [vmem:[#allocation3 + $0x92] sm:$0xff] }
 0x80a   :  { %4331 = vst.msk [vmem:[#allocation3 + $0x111] sm:$0xff] %vm840_vm0, %v4274_v34  ;;  %4332 = vst.msk [vmem:[#allocation3 + $0x121] sm:$0xff] %vm840_vm0, %v4275_v51  ;;  %v4429_v0 = vadd.f32 %v4413_v9, %v4361_v59  ;;  %v4334_v56 = vld [vmem:[#allocation3 + $0x10] sm:$0xff]  ;;  %v10403_v16 = vrot.slane %v3871_v12, %v12134_v21  ;;  %v10406_v38 = vrot.slane %v3871_v12, %v12135_v15 }
 0x80b   :  { %v10400_v43 = vld [vmem:[#allocation3 + $0x20] sm:$0xff]  ;;  %v10409_v35 = vrot.slane %v3870_v30, %v12136_v63  ;;  %v10411_v60 = vld [vmem:[#allocation3 + $0x30] sm:$0xff]  ;;  %v10417_v51 = vadd.f32 %v4457_v37, %v4421_v41  ;;  %v10420_v45 = vrot.slane %v3871_v12, %v12136_v63  ;;  %v4354_v29 = vmul.f32 %v10356_v23, %v4334_v56 }
 0x80c   :  { %12161 = vst [vmem:[#allocation46_spill] sm:$0xff] %v10400_v43  ;;  %12162 = vst [vmem:[#allocation73_spill] sm:$0xff] %v10403_v16  ;;  %v10413_v62 = vld [vmem:[#allocation3 + $0x40] sm:$0xff]  ;;  %v10415_v34 = vld [vmem:[#allocation3 + $0x50] sm:$0xff]  ;;  %v10428_v48 = vadd.f32 %v4465_v5, %v4429_v0  ;;  %v10431_v4 = vmul.f32 %v10403_v16, %v4653_v53  ;;  %v10434_v36 = vmul.f32 %v10403_v16, %v4661_v55 }
 0x80d   :  { %12163 = vst [vmem:[#allocation55_spill] sm:$0xff] %v10406_v38  ;;  %12164 = vst [vmem:[#allocation56_spill] sm:$0xff] %v10409_v35  ;;  %v10422_v21 = vld [vmem:[#allocation3 + $0x60] sm:$0xff]  ;;  %v10424_v39 = vld [vmem:[#allocation3 + $0x70] sm:$0xff]  ;;  %v10437_v24 = vmul.f32 %v10406_v38, %v4705_v50  ;;  %v4355_v27 = vmul.f32 %v10356_v23, %v10400_v43  ;;  %v10451_v30 = vmul.f32 %v10420_v45, %v4757_v49 }
 0x80e   :  { %12165 = vst [vmem:[#allocation57_spill] sm:$0xff] %v10411_v60  ;;  %12166 = vst [vmem:[#allocation26_spill] sm:$0xff] %v10420_v45  ;;  %v10426_v15 = vld [vmem:[#allocation3 + $0xb0] sm:$0xff]  ;;  %v10445_v9 = vld [vmem:[#allocation3 + $0xc0] sm:$0xff]  ;;  %v4356_v37 = vmul.f32 %v10356_v23, %v10411_v60  ;;  %v4357_v0 = vmul.f32 %v10356_v23, %v10413_v62  ;;  %v10464_v5 = vmul.f32 %v10389_v17, %v4334_v56 }
 0x80f   :  { %12167 = vst [vmem:[#allocation58_spill] sm:$0xff] %v10431_v4  ;;  %12168 = vst [vmem:[#allocation59_spill] sm:$0xff] %v10434_v36  ;;  %v10455_v12 = vld [vmem:[#allocation3 + $0xe0] sm:$0xff]  ;;  %v4358_v55 = vmul.f32 %v10356_v23, %v10415_v34  ;;  %v4359_v50 = vmul.f32 %v10356_v23, %v10422_v21  ;;  %v10470_v49 = vld [vmem:[#allocation3 + $0x11] sm:$0xff]  ;;  %v10478_v7 = vmul.f32 %v10389_v17, %v10400_v43 }
 0x810   :  { %v10366_v28 = vld [vmem:[#allocation3 + $0x100] sm:$0xff]  ;;  %12169 = vst [vmem:[#allocation60_spill] sm:$0xff] %v10437_v24  ;;  %12172 = vst [vmem:[#allocation41_spill] sm:$0xff] %v10451_v30  ;;  %v10457_v41 = vld [vmem:[#allocation3 + $0xf0] sm:$0xff]  ;;  %v4363_v3 = vmul.f32 %v10356_v23, %v10445_v9  ;;  %v4365_v58 = vmul.f32 %v10356_v23, %v10455_v12 }
 0x811   :  { %12156 = vst [vmem:[#allocation36_spill] sm:$0xff] %v10366_v28  ;;  %v10368_v44 = vld [vmem:[#allocation3 + $0x101] sm:$0xff]  ;;  %v10375_v47 = vld [vmem:[#allocation3 + $0x110] sm:$0xff]  ;;  %v4367_v22 = vmul.f32 %v10356_v23, %v10366_v28  ;;  %12174 = vst [vmem:[#allocation74_spill] sm:$0xff] %v10455_v12  ;;  %v4366_v25 = vmul.f32 %v10356_v23, %v10457_v41 }
 0x812   :  { %12157 = vst [vmem:[#allocation37_spill] sm:$0xff] %v10368_v44  ;;  %12158 = vst [vmem:[#allocation40_spill] sm:$0xff] %v10375_v47  ;;  %v10379_v31 = vld [vmem:[#allocation3 + $0x111] sm:$0xff]  ;;  %v4419_v54 = vmul.f32 %v10359_v13, %v10368_v44  ;;  %v4368_v33 = vmul.f32 %v10356_v23, %v10375_v47  ;;  %v10398_v10 = vld [vmem:[#allocation3 + $0x102] sm:$0xff]  ;;  %v4523_v11 = vmul.f32 %v10389_v17, %v10375_v47 }
 0x813   :  { %12159 = vst [vmem:[#allocation62_spill] sm:$0xff] %v10379_v31  ;;  %v4420_v14 = vmul.f32 %v10359_v13, %v10379_v31  ;;  %12160 = vst [vmem:[#allocation38_spill] sm:$0xff] %v10398_v10  ;;  %v10439_v46 = vld [vmem:[#allocation3 + $0x112] sm:$0xff]  ;;  %v4471_v63 = vmul.f32 %v10362_v8, %v10398_v10  ;;  %v10443_v59 = vld [vmem:[#allocation3 + $0x120] sm:$0xff]  ;;  %v4575_v42 = vmul.f32 %v10392_v26, %v10379_v31 }
 0x814   :  { %v4435_v1 = vadd.f32 %v4419_v54, %v4367_v22  ;;  %12170 = vst [vmem:[#allocation48_spill] sm:$0xff] %v10439_v46  ;;  %12171 = vst [vmem:[#allocation83_spill] sm:$0xff] %v10443_v59  ;;  %v10453_v54 = vld [vmem:[#allocation3 + $0xd0] sm:$0xff]  ;;  %v4472_v56 = vmul.f32 %v10362_v8, %v10439_v46  ;;  %v10488_v52 = vld [vmem:[#allocation3 + $0x41] sm:$0xff]  ;;  %v4524_v18 = vmul.f32 %v10389_v17, %v10443_v59 }
 0x815   :  { %v4436_v22 = vadd.f32 %v4420_v14, %v4368_v33  ;;  %12173 = vst [vmem:[#allocation54_spill] sm:$0xff] %v10453_v54  ;;  %12175 = vst [vmem:[#allocation78_spill] sm:$0xff] %v10457_v41  ;;  %v10472_v33 = vld [vmem:[#allocation3 + $0x21] sm:$0xff]  ;;  %v10474_v14 = vld [vmem:[#allocation3 + $0x31] sm:$0xff]  ;;  %v4364_v57 = vmul.f32 %v10356_v23, %v10453_v54  ;;  %v4406_v59 = vmul.f32 %v10359_v13, %v10470_v49 }
 0x816   :  { %v4487_v53 = vadd.f32 %v4471_v63, %v4435_v1  ;;  %v4360_v1 = vmul.f32 %v10356_v23, %v10424_v39  ;;  %v4362_v63 = vmul.f32 %v10356_v23, %v10426_v15  ;;  %v10490_v19 = vld [vmem:[#allocation3 + $0x51] sm:$0xff]  ;;  %v10492_v2 = vld [vmem:[#allocation3 + $0x61] sm:$0xff]  ;;  %v4407_v30 = vmul.f32 %v10359_v13, %v10472_v33 }
 0x817   :  { %12176 = vst [vmem:[#allocation82_spill] sm:$0xff] %v10490_v19  ;;  %12177 = vst [vmem:[#allocation76_spill] sm:$0xff] %v10492_v2  ;;  %v10502_v61 = vld [vmem:[#allocation3 + $0x71] sm:$0xff]  ;;  %v10506_v40 = vld [vmem:[#allocation3 + $0xc1] sm:$0xff]  ;;  %v4488_v32 = vadd.f32 %v4472_v56, %v4436_v22  ;;  %v4408_v22 = vmul.f32 %v10359_v13, %v10474_v14  ;;  %v4409_v56 = vmul.f32 %v10359_v13, %v10488_v52 }
 0x818   :  { %12178 = vst [vmem:[#allocation65_spill] sm:$0xff] %v10502_v61  ;;  %v10504_v6 = vld [vmem:[#allocation3 + $0xb1] sm:$0xff]  ;;  %12180 = vst [vmem:[#allocation45_spill] sm:$0xff] %v10506_v40  ;;  %v10514_v36 = vld [vmem:[#allocation3 + $0xe1] sm:$0xff]  ;;  %v4539_v47 = vadd.f32 %v4523_v11, %v4487_v53  ;;  %v4410_v23 = vmul.f32 %v10359_v13, %v10490_v19  ;;  %v4411_v24 = vmul.f32 %v10359_v13, %v10492_v2 }
 0x819   :  { %12179 = vst [vmem:[#allocation28_spill] sm:$0xff] %v10504_v6  ;;  %v10512_v20 = vld [vmem:[#allocation3 + $0xd1] sm:$0xff]  ;;  %12182 = vst [vmem:[#allocation68_spill] sm:$0xff] %v10514_v36  ;;  %v4412_v4 = vmul.f32 %v10359_v13, %v10502_v61  ;;  %v4414_v11 = vmul.f32 %v10359_v13, %v10504_v6  ;;  %v4415_v53 = vmul.f32 %v10359_v13, %v10506_v40  ;;  %v10550_v61 = vld [vmem:[#allocation3 + $0x22] sm:$0xff] }
 0x81a   :  { %12181 = vst [vmem:[#allocation66_spill] sm:$0xff] %v10512_v20  ;;  %v10516_v31 = vld [vmem:[#allocation3 + $0xf1] sm:$0xff]  ;;  %v4416_v45 = vmul.f32 %v10359_v13, %v10512_v20  ;;  %v4417_v38 = vmul.f32 %v10359_v13, %v10514_v36  ;;  %v10542_v16 = vadd.f32 %v4524_v18, %v4488_v32  ;;  %v10546_v43 = vmul.f32 %v10409_v35, %v10439_v46  ;;  %v10558_v32 = vld [vmem:[#allocation3 + $0x42] sm:$0xff] }
 0x81b   :  { %12183 = vst [vmem:[#allocation85_spill] sm:$0xff] %v10516_v31  ;;  %v4418_v10 = vmul.f32 %v10359_v13, %v10516_v31  ;;  %v4422_v44 = vadd.f32 %v4406_v59, %v4354_v29  ;;  %v10548_v6 = vld [vmem:[#allocation3 + $0x12] sm:$0xff]  ;;  %v4511_v20 = vmul.f32 %v10389_v17, %v10411_v60  ;;  %v10556_v36 = vadd.f32 %v4575_v42, %v4539_v47  ;;  %v10562_v46 = vld [vmem:[#allocation3 + $0x62] sm:$0xff] }
 0x81c   :  { %12184 = vst [vmem:[#allocation86_spill] sm:$0xff] %v10542_v16  ;;  %12185 = vst [vmem:[#allocation87_spill] sm:$0xff] %v10546_v43  ;;  %v10552_v40 = vld [vmem:[#allocation3 + $0x32] sm:$0xff]  ;;  %v4423_v2 = vadd.f32 %v4407_v30, %v4355_v27  ;;  %v4424_v13 = vadd.f32 %v4408_v22, %v4356_v37  ;;  %v4425_v18 = vadd.f32 %v4409_v56, %v4357_v0  ;;  %v10568_v60 = vld [vmem:[#allocation3 + $0xc2] sm:$0xff] }
 0x81d   :  { %12186 = vst [vmem:[#allocation88_spill] sm:$0xff] %v10556_v36  ;;  %12187 = vst [vmem:[#allocation80_spill] sm:$0xff] %v10558_v32  ;;  %v10560_v16 = vld [vmem:[#allocation3 + $0x52] sm:$0xff]  ;;  %v4426_v59 = vadd.f32 %v4410_v23, %v4358_v55  ;;  %v4427_v29 = vadd.f32 %v4411_v24, %v4359_v50  ;;  %v4428_v43 = vadd.f32 %v4412_v4, %v4360_v1  ;;  %v10572_v0 = vld [vmem:[#allocation3 + $0xe2] sm:$0xff] }
 0x81e   :  { %12188 = vst [vmem:[#allocation81_spill] sm:$0xff] %v10560_v16  ;;  %12189 = vst [vmem:[#allocation77_spill] sm:$0xff] %v10562_v46  ;;  %v4430_v35 = vadd.f32 %v4414_v11, %v4362_v63  ;;  %v10564_v31 = vld [vmem:[#allocation3 + $0x72] sm:$0xff]  ;;  %v4431_v42 = vadd.f32 %v4415_v53, %v4363_v3  ;;  %v4432_v47 = vadd.f32 %v4416_v45, %v4364_v57 }
 0x81f   :  { %12190 = vst [vmem:[#allocation47_spill] sm:$0xff] %v10564_v31  ;;  %v10566_v19 = vld [vmem:[#allocation3 + $0xb2] sm:$0xff]  ;;  %12192 = vst [vmem:[#allocation50_spill] sm:$0xff] %v10568_v60  ;;  %v4433_v27 = vadd.f32 %v4417_v38, %v4365_v58  ;;  %v4434_v30 = vadd.f32 %v4418_v10, %v4366_v25  ;;  %v4458_v4 = vmul.f32 %v10362_v8, %v10548_v6 }
 0x820   :  { %12191 = vst [vmem:[#allocation42_spill] sm:$0xff] %v10566_v19  ;;  %v10570_v37 = vld [vmem:[#allocation3 + $0xd2] sm:$0xff]  ;;  %12194 = vst [vmem:[#allocation70_spill] sm:$0xff] %v10572_v0  ;;  %v4459_v24 = vmul.f32 %v10362_v8, %v10550_v61  ;;  %v4460_v55 = vmul.f32 %v10362_v8, %v10552_v40  ;;  %v4461_v3 = vmul.f32 %v10362_v8, %v10558_v32 }
 0x821   :  { %12193 = vst [vmem:[#allocation84_spill] sm:$0xff] %v10570_v37  ;;  %v10574_v22 = vld [vmem:[#allocation3 + $0xf2] sm:$0xff]  ;;  %v4462_v25 = vmul.f32 %v10362_v8, %v10560_v16  ;;  %v4463_v58 = vmul.f32 %v10362_v8, %v10562_v46  ;;  %v4464_v57 = vmul.f32 %v10362_v8, %v10564_v31  ;;  %v4466_v10 = vmul.f32 %v10362_v8, %v10566_v19  ;;  %v10600_v46 = vld [vmem:[#allocation3 + $0x80] sm:$0xff] }
 0x822   :  { %v4467_v38 = vmul.f32 %v10362_v8, %v10568_v60  ;;  %v4468_v45 = vmul.f32 %v10362_v8, %v10570_v37  ;;  %v4469_v50 = vmul.f32 %v10362_v8, %v10572_v0  ;;  %v4470_v1 = vmul.f32 %v10362_v8, %v10574_v22 }
 0x823   :  { %v4474_v63 = vadd.f32 %v4458_v4, %v4422_v44  ;;  %v4475_v56 = vadd.f32 %v4459_v24, %v4423_v2  ;;  %v4476_v23 = vadd.f32 %v4460_v55, %v4424_v13  ;;  %v4477_v11 = vadd.f32 %v4461_v3, %v4425_v18 }
 0x824   :  { %v4478_v53 = vadd.f32 %v4462_v25, %v4426_v59  ;;  %v4479_v36 = vadd.f32 %v4463_v58, %v4427_v29  ;;  %v4480_v31 = vadd.f32 %v4464_v57, %v4428_v43  ;;  %v4482_v19 = vadd.f32 %v4466_v10, %v4430_v35 }
 0x825   :  { %v4483_v60 = vadd.f32 %v4467_v38, %v4431_v42  ;;  %v4484_v16 = vadd.f32 %v4468_v45, %v4432_v47  ;;  %v4485_v32 = vadd.f32 %v4469_v50, %v4433_v27  ;;  %v4486_v37 = vadd.f32 %v4470_v1, %v4434_v30  ;;  %v10628_v45 = vld [vmem:[#allocation3 + $0x81] sm:$0xff] }
 0x826   :  { %v4512_v0 = vmul.f32 %v10389_v17, %v10413_v62  ;;  %v4513_v8 = vmul.f32 %v10389_v17, %v10415_v34  ;;  %v4514_v2 = vmul.f32 %v10389_v17, %v10422_v21  ;;  %v4517_v44 = vmul.f32 %v10389_v17, %v10426_v15  ;;  %v10630_v50 = vld [vmem:[#allocation3 + $0x121] sm:$0xff] }
 0x827   :  { %v4515_v43 = vmul.f32 %v10389_v17, %v10424_v39  ;;  %v4516_v35 = vmul.f32 %v10389_v17, %v10600_v46  ;;  %v4518_v13 = vmul.f32 %v10389_v17, %v10445_v9  ;;  %v4519_v18 = vmul.f32 %v10389_v17, %v10453_v54  ;;  %12195 = vst [vmem:[#allocation27_spill] sm:$0xff] %v10630_v50 }
 0x828   :  { %v4520_v59 = vmul.f32 %v10389_v17, %v10455_v12  ;;  %v4521_v29 = vmul.f32 %v10389_v17, %v10457_v41  ;;  %v4522_v15 = vmul.f32 %v10389_v17, %v10366_v28  ;;  %v4525_v42 = vadd.f32 %v10464_v5, %v10417_v51  ;;  %v12197_v51 = vld [vmem:[#allocation76_spill] sm:$0xff] }
 0x829   :  { %v4526_v47 = vadd.f32 %v10478_v7, %v4474_v63  ;;  %v4527_v27 = vadd.f32 %v4511_v20, %v4475_v56  ;;  %v4528_v30 = vadd.f32 %v4512_v0, %v4476_v23  ;;  %v4529_v4 = vadd.f32 %v4513_v8, %v4477_v11  ;;  %v12200_v0 = vld [vmem:[#allocation45_spill] sm:$0xff]  ;;  %v12201_v63 = vld [vmem:[#allocation66_spill] sm:$0xff]  ;;  %v12202_v23 = vld [vmem:[#allocation68_spill] sm:$0xff] }
 0x82a   :  { %v4530_v24 = vadd.f32 %v4514_v2, %v4478_v53  ;;  %v4531_v55 = vadd.f32 %v4515_v43, %v4479_v36  ;;  %v4532_v3 = vadd.f32 %v4516_v35, %v4480_v31  ;;  %v4533_v25 = vadd.f32 %v4517_v44, %v10428_v48  ;;  %v12198_v36 = vld [vmem:[#allocation65_spill] sm:$0xff] }
 0x82b   :  { %v4534_v58 = vadd.f32 %v4518_v13, %v4482_v19  ;;  %v4535_v57 = vadd.f32 %v4519_v18, %v4483_v60  ;;  %v4536_v10 = vadd.f32 %v4520_v59, %v4484_v16  ;;  %v4537_v38 = vadd.f32 %v4521_v29, %v4485_v32  ;;  %v12196_v60 = vld [vmem:[#allocation82_spill] sm:$0xff]  ;;  %v12199_v32 = vld [vmem:[#allocation28_spill] sm:$0xff]  ;;  %v12203_v53 = vld [vmem:[#allocation85_spill] sm:$0xff] }
 0x82c   :  { %v4538_v17 = vadd.f32 %v4522_v15, %v4486_v37  ;;  %v4561_v7 = vmul.f32 %v10392_v26, %v10470_v49  ;;  %v4562_v20 = vmul.f32 %v10392_v26, %v10472_v33  ;;  %v4563_v31 = vmul.f32 %v10392_v26, %v10474_v14  ;;  %v12204_v2 = vld [vmem:[#allocation37_spill] sm:$0xff] }
 0x82d   :  { %v4564_v19 = vmul.f32 %v10392_v26, %v10488_v52  ;;  %v4565_v16 = vmul.f32 %v10392_v26, %v12196_v60  ;;  %v4566_v48 = vmul.f32 %v10392_v26, %v12197_v51  ;;  %v4567_v5 = vmul.f32 %v10392_v26, %v12198_v36 }
 0x82e   :  { %v4568_v49 = vmul.f32 %v10392_v26, %v10628_v45  ;;  %v4569_v37 = vmul.f32 %v10392_v26, %v12199_v32  ;;  %v4570_v1 = vmul.f32 %v10392_v26, %v12200_v0  ;;  %v4571_v56 = vmul.f32 %v10392_v26, %v12201_v63 }
 0x82f   :  { %v4572_v11 = vmul.f32 %v10392_v26, %v12202_v23  ;;  %v4573_v8 = vmul.f32 %v10392_v26, %v12203_v53  ;;  %v4574_v44 = vmul.f32 %v10392_v26, %v12204_v2  ;;  %v4576_v43 = vmul.f32 %v10392_v26, %v10630_v50  ;;  %v12205_v23 = vld [vmem:[#allocation56_spill] sm:$0xff] }
 0x830   :  { %v4577_v35 = vadd.f32 %v4561_v7, %v4525_v42  ;;  %v4578_v13 = vadd.f32 %v4562_v20, %v4526_v47  ;;  %v4579_v18 = vadd.f32 %v4563_v31, %v4527_v27  ;;  %v4580_v59 = vadd.f32 %v4564_v19, %v4528_v30  ;;  %v10666_v42 = vld [vmem:[#allocation3 + $0x82] sm:$0xff]  ;;  %v12206_v47 = vld [vmem:[#allocation86_spill] sm:$0xff]  ;;  %v12212_v19 = vld [vmem:[#allocation73_spill] sm:$0xff] }
 0x831   :  { %v4581_v29 = vadd.f32 %v4565_v16, %v4529_v4  ;;  %v4582_v15 = vadd.f32 %v4566_v48, %v4530_v24  ;;  %v4583_v32 = vadd.f32 %v4567_v5, %v4531_v55  ;;  %v4584_v28 = vadd.f32 %v4568_v49, %v4532_v3  ;;  %v12207_v55 = vld [vmem:[#allocation80_spill] sm:$0xff]  ;;  %v12208_v3 = vld [vmem:[#allocation81_spill] sm:$0xff]  ;;  %v12211_v31 = vld [vmem:[#allocation46_spill] sm:$0xff] }
 0x832   :  { %v4585_v63 = vadd.f32 %v4569_v37, %v4533_v25  ;;  %v4586_v41 = vadd.f32 %v4570_v1, %v4534_v58  ;;  %v4613_v0 = vmul.f32 %v12205_v23, %v10548_v6  ;;  %v4614_v53 = vmul.f32 %v12205_v23, %v10550_v61  ;;  %v12209_v58 = vld [vmem:[#allocation77_spill] sm:$0xff]  ;;  %v12214_v49 = vld [vmem:[#allocation42_spill] sm:$0xff] }
 0x833   :  { %v4587_v2 = vadd.f32 %v4571_v56, %v4535_v57  ;;  %v4588_v12 = vadd.f32 %v4572_v11, %v4536_v10  ;;  %v4589_v54 = vadd.f32 %v4573_v8, %v4537_v38  ;;  %v4590_v26 = vadd.f32 %v4574_v44, %v4538_v17  ;;  %v12210_v10 = vld [vmem:[#allocation47_spill] sm:$0xff]  ;;  %v12213_v48 = vld [vmem:[#allocation57_spill] sm:$0xff]  ;;  %v12216_v56 = vld [vmem:[#allocation84_spill] sm:$0xff] }
 0x834   :  { %v10669_v27 = vadd.f32 %v4576_v43, %v12206_v47  ;;  %v4615_v30 = vmul.f32 %v12205_v23, %v10552_v40  ;;  %v4629_v4 = vadd.f32 %v4613_v0, %v4577_v35  ;;  %v4630_v24 = vadd.f32 %v4614_v53, %v4578_v13  ;;  %v10681_v17 = vld [vmem:[#allocation3 + $0x122] sm:$0xff]  ;;  %v12215_v0 = vld [vmem:[#allocation50_spill] sm:$0xff] }
 0x835   :  { %v4616_v6 = vmul.f32 %v12205_v23, %v12207_v55  ;;  %v4617_v25 = vmul.f32 %v12205_v23, %v12208_v3  ;;  %v4618_v57 = vmul.f32 %v12205_v23, %v12209_v58  ;;  %v4619_v38 = vmul.f32 %v12205_v23, %v12210_v10  ;;  %v12217_v53 = vld [vmem:[#allocation70_spill] sm:$0xff] }
 0x836   :  { %v4620_v7 = vmul.f32 %v12205_v23, %v10666_v42  ;;  %v4631_v20 = vadd.f32 %v4615_v30, %v4579_v18  ;;  %v4666_v16 = vmul.f32 %v12212_v19, %v12211_v31  ;;  %v4667_v5 = vmul.f32 %v12212_v19, %v12213_v48  ;;  %v12218_v47 = vld [vmem:[#allocation38_spill] sm:$0xff] }
 0x837   :  { %v4621_v37 = vmul.f32 %v12205_v23, %v12214_v49  ;;  %v4622_v1 = vmul.f32 %v12205_v23, %v12215_v0  ;;  %v4623_v11 = vmul.f32 %v12205_v23, %v12216_v56  ;;  %v4624_v8 = vmul.f32 %v12205_v23, %v12217_v53 }
 0x838   :  { %v4632_v44 = vadd.f32 %v4616_v6, %v4580_v59  ;;  %v4668_v43 = vmul.f32 %v12212_v19, %v10413_v62  ;;  %v4682_v35 = vadd.f32 %v4666_v16, %v4629_v4  ;;  %v4683_v13 = vadd.f32 %v4667_v5, %v4630_v24  ;;  %v12219_v59 = vld [vmem:[#allocation55_spill] sm:$0xff] }
 0x839   :  { %v4625_v18 = vmul.f32 %v12205_v23, %v10574_v22  ;;  %v4626_v30 = vmul.f32 %v12205_v23, %v12218_v47  ;;  %v4628_v31 = vmul.f32 %v12205_v23, %v10681_v17  ;;  %v4633_v48 = vadd.f32 %v4617_v25, %v4581_v29 }
 0x83a   :  { %v4669_v49 = vmul.f32 %v12212_v19, %v10415_v34  ;;  %v4684_v50 = vadd.f32 %v4668_v43, %v4631_v20  ;;  %v4718_v6 = vmul.f32 %v12219_v59, %v10472_v33  ;;  %v4719_v62 = vmul.f32 %v12219_v59, %v10474_v14 }
 0x83b   :  { %v4634_v4 = vadd.f32 %v4618_v57, %v4582_v15  ;;  %v4635_v24 = vadd.f32 %v4619_v38, %v4583_v32  ;;  %v4636_v16 = vadd.f32 %v4620_v7, %v4584_v28  ;;  %v4670_v5 = vmul.f32 %v12212_v19, %v10422_v21  ;;  %v12220_v28 = vld [vmem:[#allocation26_spill] sm:$0xff] }
 0x83c   :  { %v4685_v47 = vadd.f32 %v4669_v49, %v4632_v44  ;;  %v4720_v23 = vmul.f32 %v12219_v59, %v10488_v52  ;;  %v4734_v29 = vadd.f32 %v4718_v6, %v4682_v35  ;;  %v4735_v25 = vadd.f32 %v4719_v62, %v4683_v13  ;;  %v12222_v35 = vld [vmem:[#allocation88_spill] sm:$0xff]  ;;  %v12223_v13 = vld [vmem:[#allocation87_spill] sm:$0xff]  ;;  %v12225_v62 = vld [vmem:[#allocation74_spill] sm:$0xff] }
 0x83d   :  { %v4637_v34 = vadd.f32 %v4621_v37, %v4585_v63  ;;  %v4638_v20 = vadd.f32 %v4622_v1, %v4586_v41  ;;  %v4671_v33 = vmul.f32 %v12212_v19, %v10424_v39  ;;  %v4686_v43 = vadd.f32 %v4670_v5, %v4633_v48 }
 0x83e   :  { %v4721_v14 = vmul.f32 %v12219_v59, %v12196_v60  ;;  %v4736_v15 = vadd.f32 %v4720_v23, %v4684_v50  ;;  %v4770_v32 = vmul.f32 %v12220_v28, %v10550_v61  ;;  %v4771_v21 = vmul.f32 %v12220_v28, %v10552_v40 }
 0x83f   :  { %v4639_v57 = vadd.f32 %v4623_v11, %v4587_v2  ;;  %v4672_v52 = vmul.f32 %v12212_v19, %v10600_v46  ;;  %v4687_v63 = vadd.f32 %v4671_v33, %v4634_v4  ;;  %v4722_v41 = vmul.f32 %v12219_v59, %v12197_v51  ;;  %v12221_v11 = vld [vmem:[#allocation58_spill] sm:$0xff] }
 0x840   :  { %v4737_v39 = vadd.f32 %v4721_v14, %v4685_v47  ;;  %v4772_v38 = vmul.f32 %v12220_v28, %v12207_v55  ;;  %v10729_v60 = vadd.f32 %v4770_v32, %v4734_v29  ;;  %v10731_v50 = vadd.f32 %v4771_v21, %v4735_v25  ;;  %v12227_v29 = vld [vmem:[#allocation60_spill] sm:$0xff]  ;;  %v12228_v14 = vld [vmem:[#allocation78_spill] sm:$0xff] }
 0x841   :  { %v4640_v61 = vadd.f32 %v4624_v8, %v4588_v12  ;;  %v4641_v7 = vadd.f32 %v4625_v18, %v4589_v54  ;;  %v4642_v37 = vadd.f32 %v4626_v30, %v4590_v26  ;;  %v4723_v40 = vmul.f32 %v12219_v59, %v12198_v36  ;;  %v12224_v18 = vld [vmem:[#allocation54_spill] sm:$0xff] }
 0x842   :  { %v4688_v2 = vadd.f32 %v4672_v52, %v4635_v24  ;;  %v4738_v46 = vadd.f32 %v4722_v41, %v4686_v43  ;;  %v4773_v1 = vmul.f32 %v12220_v28, %v12208_v3  ;;  %v10737_v51 = vadd.f32 %v4772_v38, %v4736_v15  ;;  %v12229_v21 = vld [vmem:[#allocation66_spill] sm:$0xff] }
 0x843   :  { %v4674_v55 = vmul.f32 %v12212_v19, %v10445_v9  ;;  %v4689_v44 = vadd.f32 %v12221_v11, %v4636_v16  ;;  %v4724_v12 = vmul.f32 %v12219_v59, %v10628_v45  ;;  %v4739_v54 = vadd.f32 %v4723_v40, %v4687_v63  ;;  %v12226_v16 = vld [vmem:[#allocation45_spill] sm:$0xff] }
 0x844   :  { %v4774_v26 = vmul.f32 %v12220_v28, %v12209_v58  ;;  %v10746_v36 = vadd.f32 %v4773_v1, %v4737_v39  ;;  %v4802_v8 = vsel %vm840_vm0, %v10729_v60, 0.0  ;;  %v4803_v3 = vsel %vm840_vm0, %v10731_v50, 0.0  ;;  %v12230_v39 = vld [vmem:[#allocation36_spill] sm:$0xff]  ;;  %v12232_v1 = vld [vmem:[#allocation41_spill] sm:$0xff] }
 0x845   :  { %v4643_v9 = vadd.f32 %v12223_v13, %v12222_v35  ;;  %v4675_v47 = vmul.f32 %v12212_v19, %v12224_v18  ;;  %v4690_v30 = vadd.f32 %v4674_v55, %v4637_v34  ;;  %v4804_v45 = vadd.f32 %v4803_v3, %v4802_v8  ;;  %v12235_v18 = vld [vmem:[#allocation83_spill] sm:$0xff] }
 0x846   :  { %v4740_v48 = vadd.f32 %v4724_v12, %v4688_v2  ;;  %v4775_v58 = vmul.f32 %v12220_v28, %v12210_v10  ;;  %v10758_v49 = vadd.f32 %v4774_v26, %v4738_v46  ;;  %v4805_v6 = vsel %vm840_vm0, %v10737_v51, 0.0  ;;  %v12231_v2 = vld [vmem:[#allocation68_spill] sm:$0xff]  ;;  %v12234_v26 = vld [vmem:[#allocation85_spill] sm:$0xff] }
 0x847   :  { %v4676_v4 = vmul.f32 %v12212_v19, %v12225_v62  ;;  %v4691_v24 = vadd.f32 %v4675_v47, %v4638_v20  ;;  %v4726_v5 = vmul.f32 %v12219_v59, %v12226_v16  ;;  %v4806_v23 = vadd.f32 %v4805_v6, %v4804_v45  ;;  %v12236_v45 = vld [vmem:[#allocation37_spill] sm:$0xff]  ;;  %v12237_v16 = vld [vmem:[#allocation62_spill] sm:$0xff] }
 0x848   :  { %v4741_v25 = vadd.f32 %v12227_v29, %v4689_v44  ;;  %v4776_v34 = vmul.f32 %v12220_v28, %v10666_v42  ;;  %v10769_v33 = vadd.f32 %v4775_v58, %v4739_v54  ;;  %v4807_v10 = vsel %vm840_vm0, %v10746_v36, 0.0  ;;  %v12233_v44 = vld [vmem:[#allocation40_spill] sm:$0xff]  ;;  %v4713_v58 = vld [vmem:[#allocation3 + $0x131] sm:$0xff] }
 0x849   :  { %v4644_v43 = vadd.f32 %v4628_v31, %v10669_v27  ;;  %v4677_v15 = vmul.f32 %v12212_v19, %v12228_v14  ;;  %v4692_v20 = vadd.f32 %v4676_v4, %v4639_v57  ;;  %v4808_v32 = vadd.f32 %v4807_v10, %v4806_v23  ;;  %v12239_v10 = vld [vmem:[#allocation27_spill] sm:$0xff] }
 0x84a   :  { %v4727_v52 = vmul.f32 %v12219_v59, %v12229_v21  ;;  %v4742_v63 = vadd.f32 %v4726_v5, %v4690_v30  ;;  %v10778_v41 = vadd.f32 %v4776_v34, %v4740_v48  ;;  %v4809_v42 = vsel %vm840_vm0, %v10758_v49, 0.0  ;;  %v12240_v21 = vld [vmem:[#allocation38_spill] sm:$0xff] }
 0x84b   :  { %v4678_v38 = vmul.f32 %v12212_v19, %v12230_v39  ;;  %v4693_v40 = vadd.f32 %v4677_v15, %v4640_v61  ;;  %v4728_v27 = vmul.f32 %v12219_v59, %v12231_v2  ;;  %v4810_v31 = vadd.f32 %v4809_v42, %v4808_v32  ;;  %v4765_v32 = vld [vmem:[#allocation3 + $0x132] sm:$0xff] }
 0x84c   :  { %v4743_v46 = vadd.f32 %v4727_v52, %v4691_v24  ;;  %v4778_v57 = vmul.f32 %v12220_v28, %v12215_v0  ;;  %v10789_v55 = vadd.f32 %v12232_v1, %v4741_v25  ;;  %v4811_v11 = vsel %vm840_vm0, %v10769_v33, 0.0 }
 0x84d   :  { %v4679_v12 = vmul.f32 %v12212_v19, %v12233_v44  ;;  %v4694_v54 = vadd.f32 %v4678_v38, %v4641_v7  ;;  %v4729_v61 = vmul.f32 %v12219_v59, %v12234_v26  ;;  %v4812_v8 = vadd.f32 %v4811_v11, %v4810_v31  ;;  %v12241_v38 = vld [vmem:[#allocation48_spill] sm:$0xff] }
 0x84e   :  { %v4744_v3 = vadd.f32 %v4728_v27, %v4692_v20  ;;  %v4779_v35 = vmul.f32 %v12220_v28, %v12216_v56  ;;  %v10799_v13 = vadd.f32 %v4778_v57, %v4742_v63  ;;  %v4813_v0 = vsel %vm840_vm0, %v10778_v41, 0.0 }
 0x84f   :  { %v4680_v47 = vmul.f32 %v12212_v19, %v12235_v18  ;;  %v4695_v30 = vadd.f32 %v4679_v12, %v4642_v37  ;;  %v4730_v7 = vmul.f32 %v12219_v59, %v12236_v45  ;;  %v4814_v48 = vadd.f32 %v4813_v0, %v4812_v8 }
 0x850   :  { %v4745_v6 = vadd.f32 %v4729_v61, %v4693_v40  ;;  %v4780_v62 = vmul.f32 %v12220_v28, %v12217_v53  ;;  %v10809_v4 = vadd.f32 %v4779_v35, %v4743_v46  ;;  %v4815_v56 = vsel %vm840_vm0, %v10789_v55, 0.0  ;;  %v12238_v53 = vld [vmem:[#allocation59_spill] sm:$0xff] }
 0x851   :  { %v4696_v24 = vadd.f32 %v4680_v47, %v4643_v9  ;;  %v4731_v5 = vmul.f32 %v12219_v59, %v12237_v16  ;;  %v4816_v19 = vadd.f32 %v4815_v56, %v4814_v48  ;;  %v4746_v37 = vadd.f32 %v4730_v7, %v4694_v54 }
 0x852   :  { %v4781_v23 = vmul.f32 %v12220_v28, %v10574_v22  ;;  %v10817_v29 = vadd.f32 %v4780_v62, %v4744_v3  ;;  %v4817_v25 = vsel %vm840_vm0, %v10799_v13, 0.0  ;;  %v4697_v34 = vadd.f32 %v12238_v53, %v4644_v43 }
 0x853   :  { %v4732_v14 = vmul.f32 %v12219_v59, %v12239_v10  ;;  %v4733_v9 = vmul.f32 %v12219_v59, %v4713_v58  ;;  %v4818_v15 = vadd.f32 %v4817_v25, %v4816_v19  ;;  %v4747_v20 = vadd.f32 %v4731_v5, %v4695_v30 }
 0x854   :  { %v4782_v52 = vmul.f32 %v12220_v28, %v12240_v21  ;;  %v10827_v63 = vadd.f32 %v4781_v23, %v4745_v6  ;;  %v4819_v22 = vsel %vm840_vm0, %v10809_v4, 0.0  ;;  %v4783_v43 = vmul.f32 %v12220_v28, %v12241_v38 }
 0x855   :  { %v4820_v42 = vadd.f32 %v4819_v22, %v4818_v15  ;;  %v4748_v39 = vadd.f32 %v4732_v14, %v4696_v24  ;;  %v4821_v59 = vsel %vm840_vm0, %v10817_v29, 0.0  ;;  %v4785_v2 = vmul.f32 %v12220_v28, %v4765_v32 }
 0x856   :  { %v10833_v40 = vadd.f32 %v4782_v52, %v4746_v37  ;;  %v4749_v31 = vadd.f32 %v4733_v9, %v4697_v34  ;;  %v4784_v46 = vmul.f32 %v12220_v28, %v10681_v17  ;;  %v4799_v57 = vadd.f32 %v4783_v43, %v4747_v20 }
 0x857   :  { %v4822_v27 = vadd.f32 %v4821_v59, %v4820_v42  ;;  %v4823_v1 = vsel %vm840_vm0, %v10827_v63, 0.0 }
 0x858   :  { %v4800_v44 = vadd.f32 %v4784_v46, %v4748_v39  ;;  %v4825_v12 = vsel %vm840_vm0, %v10833_v40, 0.0  ;;  %v10844_v26 = vadd.f32 %v4785_v2, %v4749_v31  ;;  %v4827_v61 = vsel %vm840_vm0, %v4799_v57, 0.0 }
 0x859   :  { %v4824_v11 = vadd.f32 %v4823_v1, %v4822_v27 }
 0x85a   :  { %v4829_v3 = vsel %vm840_vm0, %v4800_v44, 0.0  ;;  %v4831_v17 = vsel %vm840_vm0, %v10844_v26, 0.0 }
 0x85b   :  { %v4826_v54 = vadd.f32 %v4825_v12, %v4824_v11 }
 0x85d   :  { %v4828_v8 = vadd.f32 %v4827_v61, %v4826_v54 }
 0x85f   :  { %v4830_v35 = vadd.f32 %v4829_v3, %v4828_v8 }
 0x861   :  { %v4832_v28 = vadd.f32 %v4831_v17, %v4830_v35 }
 0x863   :  { %v4833_v0 = vrot.slane %v4832_v28, 4 }
 0x865   :  { %v4834_v18 = vadd.f32 %v4833_v0, %v4832_v28 }
 0x867   :  { %v4835_v47 = vrot.slane %v4834_v18, 2 }
 0x869   :  { %v4836_v30 = vadd.f32 %v4835_v47, %v4834_v18 }
 0x86b   :  { %v4837_v45 = vrot.slane %v4836_v30, 1 }
 0x86d   :  { %v4838_v7 = vadd.f32 %v4837_v45, %v4836_v30 }
 0x86f   :  { %v4839_v48 = vmul.f32 0.0078125, %v4838_v7 }
 0x871   :  { %v10851_v58 = vsub.f32 %v10729_v60, %v4839_v48  ;;  %v10854_v6 = vsub.f32 %v10731_v50, %v4839_v48  ;;  %v10857_v62 = vsub.f32 %v10737_v51, %v4839_v48  ;;  %v10860_v56 = vsub.f32 %v10746_v36, %v4839_v48 }
 0x872   :  { %v10867_v5 = vsub.f32 %v10758_v49, %v4839_v48  ;;  %v10872_v50 = vsub.f32 %v10769_v33, %v4839_v48  ;;  %v10879_v23 = vsub.f32 %v10778_v41, %v4839_v48  ;;  %v10885_v33 = vsub.f32 %v10789_v55, %v4839_v48 }
 0x873   :  { %v4856_v24 = vmul.f32 %v10851_v58, %v10851_v58  ;;  %v4857_v16 = vmul.f32 %v10854_v6, %v10854_v6  ;;  %v4858_v60 = vmul.f32 %v10857_v62, %v10857_v62  ;;  %v4859_v51 = vmul.f32 %v10860_v56, %v10860_v56 }
 0x874   :  { %v4860_v49 = vmul.f32 %v10867_v5, %v10867_v5  ;;  %v4861_v34 = vmul.f32 %v10872_v50, %v10872_v50  ;;  %v10891_v9 = vsub.f32 %v10799_v13, %v4839_v48  ;;  %v4862_v41 = vmul.f32 %v10879_v23, %v10879_v23 }
 0x875   :  { %v4872_v36 = vsel %vm840_vm0, %v4856_v24, 0.0  ;;  %v4873_v19 = vsel %vm840_vm0, %v4857_v16, 0.0  ;;  %v4875_v25 = vsel %vm840_vm0, %v4858_v60, 0.0  ;;  %v4877_v10 = vsel %vm840_vm0, %v4859_v51, 0.0 }
 0x876   :  { %v4874_v37 = vadd.f32 %v4873_v19, %v4872_v36  ;;  %v4879_v15 = vsel %vm840_vm0, %v4860_v49, 0.0  ;;  %v10897_v32 = vsub.f32 %v10809_v4, %v4839_v48  ;;  %v4863_v55 = vmul.f32 %v10885_v33, %v10885_v33 }
 0x877   :  { %v4881_v21 = vsel %vm840_vm0, %v4861_v34, 0.0  ;;  %v10903_v22 = vsub.f32 %v10817_v29, %v4839_v48  ;;  %v4864_v13 = vmul.f32 %v10891_v9, %v10891_v9  ;;  %v4883_v42 = vsel %vm840_vm0, %v4862_v41, 0.0  ;;  %v10962_v41 = vld [vmem:[%s11285_s16] ss:$0 sm:$0xff] }
 0x878   :  { %v4876_v53 = vadd.f32 %v4875_v25, %v4874_v37  ;;  %v10909_v38 = vsub.f32 %v10827_v63, %v4839_v48  ;;  %v4865_v4 = vmul.f32 %v10897_v32, %v10897_v32  ;;  %v4885_v43 = vsel %vm840_vm0, %v4863_v55, 0.0  ;;  %v10949_v25 = vld [vmem:[%s11284_s15] ss:$0 sm:$0xff] }
 0x879   :  { %v10915_v2 = vsub.f32 %v10833_v40, %v4839_v48  ;;  %v4866_v29 = vmul.f32 %v10903_v22, %v10903_v22  ;;  %v4887_v27 = vsel %vm840_vm0, %v4864_v13, 0.0  ;;  %v10920_v46 = vsub.f32 %v4799_v57, %v4839_v48 }
 0x87a   :  { %v4878_v14 = vadd.f32 %v4877_v10, %v4876_v53  ;;  %v4867_v63 = vmul.f32 %v10909_v38, %v10909_v38  ;;  %v4889_v1 = vsel %vm840_vm0, %v4865_v4, 0.0  ;;  %v10925_v12 = vsub.f32 %v4800_v44, %v4839_v48 }
 0x87b   :  { %v4868_v40 = vmul.f32 %v10915_v2, %v10915_v2  ;;  %v4891_v54 = vsel %vm840_vm0, %v4866_v29, 0.0  ;;  %v10931_v8 = vsub.f32 %v10844_v26, %v4839_v48  ;;  %v4869_v57 = vmul.f32 %v10920_v46, %v10920_v46 }
 0x87c   :  { %v4880_v20 = vadd.f32 %v4879_v15, %v4878_v14  ;;  %v4893_v3 = vsel %vm840_vm0, %v4867_v63, 0.0  ;;  %v4870_v17 = vmul.f32 %v10925_v12, %v10925_v12 }
 0x87d   :  { %v4895_v44 = vsel %vm840_vm0, %v4868_v40, 0.0  ;;  %v4871_v0 = vmul.f32 %v10931_v8, %v10931_v8  ;;  %v4897_v18 = vsel %vm840_vm0, %v4869_v57, 0.0 }
 0x87e   :  { %v4882_v52 = vadd.f32 %v4881_v21, %v4880_v20  ;;  %v4899_v26 = vsel %vm840_vm0, %v4870_v17, 0.0 }
 0x87f   :  { %v4901_v45 = vsel %vm840_vm0, %v4871_v0, 0.0 }
 0x880   :  { %v4884_v39 = vadd.f32 %v4883_v42, %v4882_v52 }
 0x882   :  { %v4886_v59 = vadd.f32 %v4885_v43, %v4884_v39 }
 0x884   :  { %v4888_v31 = vadd.f32 %v4887_v27, %v4886_v59 }
 0x886   :  { %v4890_v11 = vadd.f32 %v4889_v1, %v4888_v31 }
 0x888   :  { %v4892_v61 = vadd.f32 %v4891_v54, %v4890_v11 }
 0x88a   :  { %v4894_v35 = vadd.f32 %v4893_v3, %v4892_v61 }
 0x88c   :  { %v4896_v28 = vadd.f32 %v4895_v44, %v4894_v35 }
 0x88e   :  { %v4898_v47 = vadd.f32 %v4897_v18, %v4896_v28 }
 0x890   :  { %v4900_v30 = vadd.f32 %v4899_v26, %v4898_v47 }
 0x892   :  { %v4902_v7 = vadd.f32 %v4901_v45, %v4900_v30 }
 0x894   :  { %v4903_v48 = vrot.slane %v4902_v7, 4 }
 0x896   :  { %v4904_v24 = vadd.f32 %v4903_v48, %v4902_v7 }
 0x898   :  { %v4905_v16 = vrot.slane %v4904_v24, 2 }
 0x89a   :  { %v4906_v60 = vadd.f32 %v4905_v16, %v4904_v24 }
 0x89c   :  { %v4907_v51 = vrot.slane %v4906_v60, 1 }
 0x89e   :  { %v4908_v36 = vadd.f32 %v4907_v51, %v4906_v60 }
 0x8a0   :  { %v4909_v19 = vmul.f32 0.0078125, %v4908_v36 }
 0x8a2   :  { %v4910_v37 = vadd.f32 1e-05, %v4909_v19 }
 0x8a4   :  { %6136 = vrsqrt.f32 %v4910_v37 }
 0x8ae   :  { %v10944_v49 = vpop.eup %6136 }
 0x8af   :  { %v4912_v53 = vmul.f32 %v10944_v49, %v10851_v58  ;;  %v4913_v34 = vmul.f32 %v10944_v49, %v10854_v6  ;;  %v4914_v10 = vmul.f32 %v10944_v49, %v10857_v62  ;;  %v4915_v14 = vmul.f32 %v10944_v49, %v10860_v56 }
 0x8b0   :  { %v4916_v15 = vmul.f32 %v10944_v49, %v10867_v5  ;;  %v4917_v58 = vmul.f32 %v10944_v49, %v10872_v50  ;;  %v4918_v6 = vmul.f32 %v10944_v49, %v10879_v23  ;;  %v4919_v52 = vmul.f32 %v10944_v49, %v10885_v33 }
 0x8b1   :  { %v4934_v20 = vmul.f32 %v10949_v25, %v4912_v53  ;;  %v4935_v62 = vmul.f32 %v10949_v25, %v4913_v34  ;;  %v4936_v56 = vmul.f32 %v10949_v25, %v4914_v10  ;;  %v4937_v55 = vmul.f32 %v10949_v25, %v4915_v14 }
 0x8b2   :  { %v4938_v21 = vmul.f32 %v10949_v25, %v4916_v15  ;;  %v4939_v23 = vmul.f32 %v10949_v25, %v4917_v58  ;;  %v4940_v4 = vmul.f32 %v10949_v25, %v4918_v6  ;;  %v4941_v63 = vmul.f32 %v10949_v25, %v4919_v52 }
 0x8b3   :  { %v4956_v5 = vadd.f32 %v10962_v41, %v4934_v20  ;;  %v4957_v50 = vadd.f32 %v10962_v41, %v4935_v62  ;;  %v4958_v13 = vadd.f32 %v10962_v41, %v4936_v56  ;;  %v4959_v42 = vadd.f32 %v10962_v41, %v4937_v55 }
 0x8b4   :  { %v4960_v39 = vadd.f32 %v10962_v41, %v4938_v21  ;;  %v4961_v33 = vadd.f32 %v10962_v41, %v4939_v23  ;;  %v4962_v40 = vadd.f32 %v10962_v41, %v4940_v4  ;;  %v4920_v61 = vmul.f32 %v10944_v49, %v10891_v9 }
 0x8b5   :  { %v4972_v43 = vmax.f32 %v4956_v5, 0.0  ;;  %v4973_v59 = vmax.f32 %v4957_v50, 0.0  ;;  %v4974_v29 = vmax.f32 %v4958_v13, 0.0  ;;  %v4975_v1 = vmax.f32 %v4959_v42, 0.0 }
 0x8b6   :  { %v4976_v11 = vmax.f32 %v4960_v39, 0.0  ;;  %v4921_v57 = vmul.f32 %v10944_v49, %v10897_v32  ;;  %v4922_v3 = vmul.f32 %v10944_v49, %v10903_v22  ;;  %v4977_v35 = vmax.f32 %v4961_v33, 0.0  ;;  %v5384_v39 = vld [vmem:[%s11289_s20 + $0x8] sm:$0xff] }
 0x8b7   :  { %v4988_v27 = vmin.f32 %v4972_v43, 6.0  ;;  %v4989_v31 = vmin.f32 %v4973_v59, 6.0  ;;  %v4990_v54 = vmin.f32 %v4974_v29, 6.0  ;;  %v4963_v17 = vadd.f32 %v10962_v41, %v4941_v63 }
 0x8b8   :  { %v4942_v44 = vmul.f32 %v10949_v25, %v4920_v61  ;;  %v4991_v28 = vmin.f32 %v4975_v1, 6.0  ;;  %v4978_v0 = vmax.f32 %v4962_v40, 0.0  ;;  %v4943_v18 = vmul.f32 %v10949_v25, %v4921_v57 }
 0x8b9   :  { %6051 = vmatprep.mubr.msk.f32.mxu1 %vm840_vm0, %v4988_v27  ;;  %v4923_v9 = vmul.f32 %v10944_v49, %v10909_v38  ;;  %v4992_v32 = vmin.f32 %v4976_v11, 6.0  ;;  %v4944_v22 = vmul.f32 %v10949_v25, %v4922_v3  ;;  %v4924_v26 = vmul.f32 %v10944_v49, %v10915_v2 }
 0x8ba   :  { %6052 = vmatmul.mubr.msk.f32.vlgmr.msra.gmra.mrb[48].mxu1 %vm840_vm0, %v4989_v31  ;;  %v4964_v47 = vadd.f32 %v10962_v41, %v4942_v44  ;;  %v4993_v30 = vmin.f32 %v4977_v35, 6.0  ;;  %v4979_v45 = vmax.f32 %v4963_v17, 0.0  ;;  %v4994_v7 = vmin.f32 %v4978_v0, 6.0 }
 0x8bb   :  { %6054 = vmatprep.mubr.msk.f32.mxu1 %vm840_vm0, %v4990_v54  ;;  %v4965_v48 = vadd.f32 %v10962_v41, %v4943_v18  ;;  %v4945_v24 = vmul.f32 %v10949_v25, %v4923_v9  ;;  %v4925_v38 = vmul.f32 %v10944_v49, %v10920_v46  ;;  %v4966_v60 = vadd.f32 %v10962_v41, %v4944_v22 }
 0x8bc   :  { %v4980_v16 = vmax.f32 %v4964_v47, 0.0  ;;  %v4946_v51 = vmul.f32 %v10949_v25, %v4924_v26  ;;  %v4926_v2 = vmul.f32 %v10944_v49, %v10925_v12  ;;  %v4995_v36 = vmin.f32 %v4979_v45, 6.0 }
 0x8bd   :  { %v4981_v19 = vmax.f32 %v4965_v48, 0.0  ;;  %v4967_v37 = vadd.f32 %v10962_v41, %v4945_v24  ;;  %v4947_v53 = vmul.f32 %v10949_v25, %v4925_v38  ;;  %v4927_v46 = vmul.f32 %v10944_v49, %v10931_v8 }
 0x8be   :  { %6055 = vmatmul.mubr.msk.f32.gmra.mrb[50].mxu1 %vm840_vm0, %v4991_v28  ;;  %v4996_v34 = vmin.f32 %v4980_v16, 6.0  ;;  %v4982_v10 = vmax.f32 %v4966_v60, 0.0  ;;  %v4968_v14 = vadd.f32 %v10962_v41, %v4946_v51  ;;  %v4948_v15 = vmul.f32 %v10949_v25, %v4926_v2 }
 0x8bf   :  { %6057 = vmatprep.mubr.msk.f32.mxu1 %vm840_vm0, %v4992_v32  ;;  %v4997_v12 = vmin.f32 %v4981_v19, 6.0  ;;  %v4983_v58 = vmax.f32 %v4967_v37, 0.0  ;;  %v4969_v6 = vadd.f32 %v10962_v41, %v4947_v53  ;;  %v4949_v20 = vmul.f32 %v10949_v25, %v4927_v46 }
 0x8c0   :  { %v4998_v62 = vmin.f32 %v4982_v10, 6.0  ;;  %v4984_v56 = vmax.f32 %v4968_v14, 0.0  ;;  %v4970_v8 = vadd.f32 %v10962_v41, %v4948_v15  ;;  %v6397_v42 = vmov 0.0|0.0  }
 0x8c1   :  { %v4999_v49 = vmin.f32 %v4983_v58, 6.0  ;;  %v4985_v55 = vmax.f32 %v4969_v6, 0.0  ;;  %v4971_v21 = vadd.f32 %v10962_v41, %v4949_v20  ;;  %6110 = vmatprep.subr.bf16.mxu0 %v6397_v42  ;;  %v5383_v41 = vld [vmem:[%s11289_s20] sm:$0xff] }
 0x8c2   :  { %6058 = vmatmul.mubr.msk.f32.gmra.mrb[52].mxu1 %vm840_vm0, %v4993_v30  ;;  %v5000_v52 = vmin.f32 %v4984_v56, 6.0  ;;  %v4986_v5 = vmax.f32 %v4970_v8, 0.0  ;;  %v6111_v4 = vpack.c.bf16 %v5384_v39, %v5383_v41 }
 0x8c3   :  { %6060 = vmatprep.mubr.msk.f32.mxu1 %vm840_vm0, %v4994_v7  ;;  %v5001_v50 = vmin.f32 %v4985_v55, 6.0  ;;  %v4987_v25 = vmax.f32 %v4971_v21, 0.0  ;;  %v12242_v7 = vmov 0.0  }
 0x8c4   :  { %v5002_v13 = vmin.f32 %v4986_v5, 6.0  ;;  %6112 = vmatpush3.bf16.msra.mxu0 %v6111_v4  ;;  %6079 = vmatprep.mubr.msk.f32.mxu0 %vm6398_vm4, %v12242_v7 }
 0x8c5   :  { %v5003_v23 = vmin.f32 %v4987_v25, 6.0 }
 0x8c6   :  { %6061 = vmatmul.mubr.msk.f32.gmra.mrb[54].mxu1 %vm840_vm0, %v4995_v36 }
 0x8c7   :  { %6063 = vmatprep.mubr.msk.f32.mxu1 %vm840_vm0, %v4996_v34 }
 0x8ca   :  { %6064 = vmatmul.mubr.msk.f32.gmra.mrb[56].mxu1 %vm840_vm0, %v4997_v12 }
 0x8cb   :  { %6066 = vmatprep.mubr.msk.f32.mxu1 %vm840_vm0, %v4998_v62 }
 0x8ce   :  { %6067 = vmatmul.mubr.msk.f32.gmra.mrb[58].mxu1 %vm840_vm0, %v4999_v49 }
 0x8cf   :  { %6069 = vmatprep.mubr.msk.f32.mxu1 %vm840_vm0, %v5000_v52 }
 0x8d2   :  { %6070 = vmatmul.mubr.msk.f32.gmra.mrb[60].mxu1 %vm840_vm0, %v5001_v50 }
 0x8d3   :  { %6072 = vmatprep.mubr.msk.f32.mxu1 %vm840_vm0, %v5002_v13 }
 0x8d6   :  { %6073 = vmatmul.mubr.msk.f32.gmra.mrb[62].mxu1 %vm840_vm0, %v5003_v23 }
 0x98d   :  { %v6053_v43 = vpop.f32.mrb[48].mxu1 }
 0x98e   :  { %v5198_v59 = vsel %vm3880_vm3, %v6053_v43, 0.0  ;;  %v5118_v29 = vpop.f32.mrb[49].mxu1 }
 0x98f   :  { %v5197_v27 = vsel %vm3880_vm3, %v5118_v29, 0.0 }
 0x990   :  { %v5199_v31 = vadd.f32 %v5198_v59, %v5197_v27 }
 0x991   :  { %v6056_v33 = vpop.f32.mrb[50].mxu1 }
 0x992   :  { %v5128_v63 = vpop.f32.mrb[51].mxu1  ;;  %v5202_v40 = vsel %vm3880_vm3, %v6056_v33, 0.0 }
 0x993   :  { %v5200_v1 = vsel %vm3880_vm3, %v5128_v63, 0.0 }
 0x994   :  { %v5201_v11 = vadd.f32 %v5200_v1, %v5199_v31 }
 0x995   :  { %v6059_v54 = vpop.f32.mrb[52].mxu1 }
 0x996   :  { %v5138_v61 = vpop.f32.mrb[53].mxu1  ;;  %v5203_v57 = vadd.f32 %v5202_v40, %v5201_v11  ;;  %v5206_v17 = vsel %vm3880_vm3, %v6059_v54, 0.0 }
 0x997   :  { %v5204_v3 = vsel %vm3880_vm3, %v5138_v61, 0.0 }
 0x998   :  { %v5205_v35 = vadd.f32 %v5204_v3, %v5203_v57 }
 0x999   :  { %v6062_v44 = vpop.f32.mrb[54].mxu1 }
 0x99a   :  { %v5148_v28 = vpop.f32.mrb[55].mxu1  ;;  %v5207_v0 = vadd.f32 %v5206_v17, %v5205_v35  ;;  %v5210_v32 = vsel %vm3880_vm3, %v6062_v44, 0.0 }
 0x99b   :  { %v5208_v18 = vsel %vm3880_vm3, %v5148_v28, 0.0 }
 0x99c   :  { %v5209_v9 = vadd.f32 %v5208_v18, %v5207_v0 }
 0x99d   :  { %v6065_v47 = vpop.f32.mrb[56].mxu1 }
 0x99e   :  { %v5158_v22 = vpop.f32.mrb[57].mxu1  ;;  %v5211_v26 = vadd.f32 %v5210_v32, %v5209_v9  ;;  %v5214_v48 = vsel %vm3880_vm3, %v6065_v47, 0.0 }
 0x99f   :  { %v5212_v30 = vsel %vm3880_vm3, %v5158_v22, 0.0 }
 0x9a0   :  { %v5213_v45 = vadd.f32 %v5212_v30, %v5211_v26 }
 0x9a1   :  { %v6068_v24 = vpop.f32.mrb[58].mxu1 }
 0x9a2   :  { %v5168_v38 = vpop.f32.mrb[59].mxu1  ;;  %v5215_v16 = vadd.f32 %v5214_v48, %v5213_v45  ;;  %v5218_v2 = vsel %vm3880_vm3, %v6068_v24, 0.0 }
 0x9a3   :  { %v5216_v60 = vsel %vm3880_vm3, %v5168_v38, 0.0 }
 0x9a4   :  { %v5217_v51 = vadd.f32 %v5216_v60, %v5215_v16 }
 0x9a5   :  { %v6071_v36 = vpop.f32.mrb[60].mxu1 }
 0x9a6   :  { %v5178_v19 = vpop.f32.mrb[61].mxu1  ;;  %v5219_v37 = vadd.f32 %v5218_v2, %v5217_v51  ;;  %v5222_v34 = vsel %vm3880_vm3, %v6071_v36, 0.0 }
 0x9a7   :  { %v5220_v53 = vsel %vm3880_vm3, %v5178_v19, 0.0 }
 0x9a8   :  { %v5221_v46 = vadd.f32 %v5220_v53, %v5219_v37 }
 0x9a9   :  { %v6074_v10 = vpop.f32.mrb[62].mxu1 }
 0x9aa   :  { %v5188_v14 = vpop.f32.mrb[63].mxu1  ;;  %v5223_v15 = vadd.f32 %v5222_v34, %v5221_v46  ;;  %v5226_v6 = vsel %vm3880_vm3, %v6074_v10, 0.0 }
 0x9ab   :  { %v5224_v12 = vsel %vm3880_vm3, %v5188_v14, 0.0 }
 0x9ac   :  { %v5225_v58 = vadd.f32 %v5224_v12, %v5223_v15 }
 0x9ae   :  { %v5227_v20 = vadd.f32 %v5226_v6, %v5225_v58 }
 0x9b0   :  { %v5228_v62 = vrot.slane %v5227_v20, 4 }
 0x9b2   :  { %v5229_v56 = vadd.f32 %v5228_v62, %v5227_v20 }
 0x9b4   :  { %v5230_v8 = vrot.slane %v5229_v56, 2 }
 0x9b6   :  { %v5231_v49 = vadd.f32 %v5230_v8, %v5229_v56 }
 0x9b8   :  { %v5232_v55 = vrot.slane %v5231_v49, 1 }
 0x9ba   :  { %v5233_v21 = vadd.f32 %v5232_v55, %v5231_v49 }
 0x9bc   :  { %v5234_v52 = vmul.f32 0.0078125, %v5233_v21 }
 0x9be   :  { %v11059_v5 = vsub.f32 %v5118_v29, %v5234_v52  ;;  %v11061_v50 = vsub.f32 %v6053_v43, %v5234_v52  ;;  %v11063_v25 = vsub.f32 %v5128_v63, %v5234_v52  ;;  %v11065_v13 = vsub.f32 %v6056_v33, %v5234_v52 }
 0x9bf   :  { %v11067_v23 = vsub.f32 %v5138_v61, %v5234_v52  ;;  %v11069_v42 = vsub.f32 %v6059_v54, %v5234_v52  ;;  %v11071_v41 = vsub.f32 %v5148_v28, %v5234_v52  ;;  %v11073_v39 = vsub.f32 %v6062_v44, %v5234_v52 }
 0x9c0   :  { %v11075_v4 = vsub.f32 %v5158_v22, %v5234_v52  ;;  %v11077_v59 = vsub.f32 %v6065_v47, %v5234_v52  ;;  %v11079_v29 = vsub.f32 %v5168_v38, %v5234_v52  ;;  %v11081_v43 = vsub.f32 %v6068_v24, %v5234_v52 }
 0x9c1   :  { %v11083_v27 = vsub.f32 %v5178_v19, %v5234_v52  ;;  %v11085_v31 = vsub.f32 %v6071_v36, %v5234_v52  ;;  %v11087_v33 = vsub.f32 %v5188_v14, %v5234_v52  ;;  %v11089_v63 = vsub.f32 %v6074_v10, %v5234_v52 }
 0x9c2   :  { %v5251_v1 = vmul.f32 %v11059_v5, %v11059_v5  ;;  %v5252_v11 = vmul.f32 %v11061_v50, %v11061_v50  ;;  %v5253_v40 = vmul.f32 %v11063_v25, %v11063_v25  ;;  %v5254_v54 = vmul.f32 %v11065_v13, %v11065_v13 }
 0x9c3   :  { %v5255_v35 = vmul.f32 %v11067_v23, %v11067_v23  ;;  %v5256_v28 = vmul.f32 %v11069_v42, %v11069_v42  ;;  %v5257_v9 = vmul.f32 %v11071_v41, %v11071_v41  ;;  %v5258_v22 = vmul.f32 %v11073_v39, %v11073_v39 }
 0x9c4   :  { %v5267_v61 = vsel %vm3880_vm3, %v5251_v1, 0.0  ;;  %v5268_v57 = vsel %vm3880_vm3, %v5252_v11, 0.0  ;;  %v5270_v17 = vsel %vm3880_vm3, %v5253_v40, 0.0  ;;  %v5272_v0 = vsel %vm3880_vm3, %v5254_v54, 0.0 }
 0x9c5   :  { %v5269_v3 = vadd.f32 %v5268_v57, %v5267_v61  ;;  %v5274_v32 = vsel %vm3880_vm3, %v5255_v35, 0.0  ;;  %v5276_v26 = vsel %vm3880_vm3, %v5256_v28, 0.0  ;;  %v5259_v45 = vmul.f32 %v11075_v4, %v11075_v4 }
 0x9c6   :  { %v5278_v7 = vsel %vm3880_vm3, %v5257_v9, 0.0  ;;  %v5260_v24 = vmul.f32 %v11077_v59, %v11077_v59  ;;  %v5280_v38 = vsel %vm3880_vm3, %v5258_v22, 0.0  ;;  %v5261_v60 = vmul.f32 %v11079_v29, %v11079_v29 }
 0x9c7   :  { %v5271_v44 = vadd.f32 %v5270_v17, %v5269_v3  ;;  %v5282_v51 = vsel %vm3880_vm3, %v5259_v45, 0.0  ;;  %v5262_v36 = vmul.f32 %v11081_v43, %v11081_v43  ;;  %v5263_v53 = vmul.f32 %v11083_v27, %v11083_v27 }
 0x9c8   :  { %v5284_v19 = vsel %vm3880_vm3, %v5260_v24, 0.0  ;;  %v5286_v46 = vsel %vm3880_vm3, %v5261_v60, 0.0  ;;  %v5264_v10 = vmul.f32 %v11085_v31, %v11085_v31  ;;  %v5265_v12 = vmul.f32 %v11087_v33, %v11087_v33 }
 0x9c9   :  { %v5273_v18 = vadd.f32 %v5272_v0, %v5271_v44  ;;  %v5288_v14 = vsel %vm3880_vm3, %v5262_v36, 0.0  ;;  %v5290_v58 = vsel %vm3880_vm3, %v5263_v53, 0.0  ;;  %v5266_v20 = vmul.f32 %v11089_v63, %v11089_v63  ;;  %v12244_v36 = vld [vmem:[#allocation128_spill] sm:$0xff] }
 0x9ca   :  { %v5292_v62 = vsel %vm3880_vm3, %v5264_v10, 0.0  ;;  %v5294_v8 = vsel %vm3880_vm3, %v5265_v12, 0.0  ;;  %v12247_v10 = vld [vmem:[#allocation34_spill] sm:$0xff] }
 0x9cb   :  { %v5275_v47 = vadd.f32 %v5274_v32, %v5273_v18  ;;  %v5296_v55 = vsel %vm3880_vm3, %v5266_v20, 0.0  ;;  %v11154_v18 = vld [vmem:[%s11287_s18] ss:$0 sm:$0xff] }
 0x9cc   :  { %v12250_v20 = vld [vmem:[#allocation35_spill] sm:$0xff] }
 0x9cd   :  { %v5277_v30 = vadd.f32 %v5276_v26, %v5275_v47 }
 0x9cf   :  { %v5279_v48 = vadd.f32 %v5278_v7, %v5277_v30 }
 0x9d1   :  { %v5281_v16 = vadd.f32 %v5280_v38, %v5279_v48 }
 0x9d3   :  { %v5283_v2 = vadd.f32 %v5282_v51, %v5281_v16  ;;  %v12243_v51 = vld [vmem:[#allocation33_spill] sm:$0xff] }
 0x9d5   :  { %v5285_v37 = vadd.f32 %v5284_v19, %v5283_v2 }
 0x9d7   :  { %v5287_v34 = vadd.f32 %v5286_v46, %v5285_v37  ;;  %v12245_v37 = vld [vmem:[#allocation32_spill] sm:$0xff]  ;;  %v12246_v46 = vld [vmem:[#allocation29_spill] sm:$0xff] }
 0x9d9   :  { %v5289_v15 = vadd.f32 %v5288_v14, %v5287_v34 }
 0x9db   :  { %v5291_v6 = vadd.f32 %v5290_v58, %v5289_v15  ;;  %v12248_v15 = vld [vmem:[#allocation31_spill] sm:$0xff]  ;;  %v12249_v58 = vld [vmem:[#allocation72_spill] sm:$0xff] }
 0x9dd   :  { %v5293_v56 = vadd.f32 %v5292_v62, %v5291_v6 }
 0x9df   :  { %v5295_v49 = vadd.f32 %v5294_v8, %v5293_v56 }
 0x9e1   :  { %v5297_v21 = vadd.f32 %v5296_v55, %v5295_v49 }
 0x9e3   :  { %v5298_v52 = vrot.slane %v5297_v21, 4 }
 0x9e5   :  { %v5299_v1 = vadd.f32 %v5298_v52, %v5297_v21 }
 0x9e7   :  { %v5300_v11 = vrot.slane %v5299_v1, 2 }
 0x9e9   :  { %v5301_v40 = vadd.f32 %v5300_v11, %v5299_v1 }
 0x9eb   :  { %v5302_v54 = vrot.slane %v5301_v40, 1 }
 0x9ed   :  { %v5303_v61 = vadd.f32 %v5302_v54, %v5301_v40 }
 0x9ef   :  { %v5304_v57 = vmul.f32 0.0078125, %v5303_v61 }
 0x9f1   :  { %v5305_v3 = vadd.f32 1e-05, %v5304_v57 }
 0x9f3   :  { %6138 = vrsqrt.f32 %v5305_v3 }
 0x9fd   :  { %v6139_v35 = vpop.eup %6138 }
 0x9fe   :  { %v11140_v17 = vmul.f32 %v6139_v35, %v11059_v5  ;;  %v11143_v44 = vmul.f32 %v6139_v35, %v11061_v50  ;;  %v11146_v28 = vmul.f32 %v6139_v35, %v11063_v25  ;;  %v11149_v0 = vmul.f32 %v6139_v35, %v11065_v13 }
 0x9ff   :  { %v11157_v9 = vmul.f32 %v6139_v35, %v11067_v23  ;;  %v11160_v5 = vmul.f32 %v6139_v35, %v11069_v42  ;;  %v11163_v50 = vmul.f32 %v6139_v35, %v11071_v41  ;;  %v11166_v25 = vmul.f32 %v6139_v35, %v11073_v39  ;;  %v11175_v23 = vld [vmem:[%s11288_s19] ss:$0 sm:$0xff] }
 0xa00   :  { %v5315_v13 = vmul.f32 %v6139_v35, %v11075_v4  ;;  %v5316_v32 = vmul.f32 %v6139_v35, %v11077_v59  ;;  %v5317_v47 = vmul.f32 %v6139_v35, %v11079_v29  ;;  %v5318_v22 = vmul.f32 %v6139_v35, %v11081_v43 }
 0xa01   :  { %v5319_v42 = vmul.f32 %v6139_v35, %v11083_v27  ;;  %v5320_v41 = vmul.f32 %v6139_v35, %v11085_v31  ;;  %v5321_v39 = vmul.f32 %v6139_v35, %v11087_v33  ;;  %v5322_v26 = vmul.f32 %v6139_v35, %v11089_v63 }
 0xa02   :  { %v5337_v4 = vmul.f32 %v11154_v18, %v5315_v13  ;;  %v5338_v59 = vmul.f32 %v11154_v18, %v5316_v32  ;;  %v5339_v29 = vmul.f32 %v11154_v18, %v5317_v47  ;;  %v5340_v43 = vmul.f32 %v11154_v18, %v5318_v22 }
 0xa03   :  { %v5341_v30 = vmul.f32 %v11154_v18, %v5319_v42  ;;  %v5342_v45 = vmul.f32 %v11154_v18, %v5320_v41  ;;  %v5343_v27 = vmul.f32 %v11154_v18, %v5321_v39  ;;  %v5344_v31 = vmul.f32 %v11154_v18, %v5322_v26 }
 0xa04   :  { %v5359_v33 = vadd.f32 %v11175_v23, %v5337_v4  ;;  %v5360_v63 = vadd.f32 %v11175_v23, %v5338_v59  ;;  %v5361_v7 = vadd.f32 %v11175_v23, %v5339_v29  ;;  %v5362_v48 = vadd.f32 %v11175_v23, %v5340_v43 }
 0xa05   :  { %v5363_v24 = vadd.f32 %v11175_v23, %v5341_v30  ;;  %v5364_v38 = vadd.f32 %v11175_v23, %v5342_v45  ;;  %v5365_v16 = vadd.f32 %v11175_v23, %v5343_v27  ;;  %v5366_v60 = vadd.f32 %v11175_v23, %v5344_v31 }
 0xa06   :  { %v5375_v2 = vadd.f32 %v5359_v33, %v12243_v51  ;;  %v5376_v19 = vadd.f32 %v12244_v36, %v5360_v63  ;;  %v5377_v53 = vadd.f32 %v5361_v7, %v12245_v37  ;;  %v5378_v34 = vadd.f32 %v12246_v46, %v5362_v48 }
 0xa07   :  { %v5379_v14 = vadd.f32 %v5363_v24, %v12247_v10  ;;  %v5380_v12 = vadd.f32 %v12248_v15, %v5364_v38  ;;  %v5381_v6 = vadd.f32 %v5365_v16, %v12249_v58  ;;  %v5382_v62 = vadd.f32 %v12250_v20, %v5366_v60  ;;  %v12251_v24 = vld [vmem:[#allocation130_spill] sm:$0xff]  ;;  %v12253_v60 = vld [vmem:[#allocation103_spill] sm:$0xff] }
 0xa08   :  { %v5394_v56 = vmax.f32 %v5375_v2, 0.0  ;;  %v5395_v8 = vmax.f32 %v5376_v19, 0.0  ;;  %v5396_v49 = vmax.f32 %v5377_v53, 0.0  ;;  %v5397_v55 = vmax.f32 %v5378_v34, 0.0  ;;  %v12254_v2 = vld [vmem:[#allocation102_spill] sm:$0xff]  ;;  %v12256_v53 = vld [vmem:[#allocation115_spill] sm:$0xff] }
 0xa09   :  { %v5398_v21 = vmax.f32 %v5379_v14, 0.0  ;;  %v5399_v52 = vmax.f32 %v5380_v12, 0.0  ;;  %v5400_v1 = vmax.f32 %v5381_v6, 0.0  ;;  %v5401_v11 = vmax.f32 %v5382_v62, 0.0  ;;  %v12255_v19 = vld [vmem:[#allocation30_spill] sm:$0xff]  ;;  %v12257_v34 = vld [vmem:[#allocation141_spill] sm:$0xff] }
 0xa0a   :  { %v5410_v40 = vmin.f32 %v5394_v56, 6.0  ;;  %v5411_v54 = vmin.f32 %v5395_v8, 6.0  ;;  %v5412_v61 = vmin.f32 %v5396_v49, 6.0  ;;  %v5413_v57 = vmin.f32 %v5397_v55, 6.0  ;;  %v12258_v14 = vld [vmem:[#allocation116_spill] sm:$0xff] }
 0xa0b   :  { %v5414_v3 = vmin.f32 %v5398_v21, 6.0  ;;  %v5415_v35 = vmin.f32 %v5399_v52, 6.0  ;;  %v5416_v13 = vmin.f32 %v5400_v1, 6.0  ;;  %v5417_v32 = vmin.f32 %v5401_v11, 6.0 }
 0xa0c   :  { %v5439_v47 = vsel %vm3880_vm3, %v5410_v40, 0.0  ;;  %v5440_v22 = vsel %vm3880_vm3, %v5411_v54, 0.0  ;;  %v5442_v41 = vsel %vm3880_vm3, %v5412_v61, 0.0  ;;  %v5444_v39 = vsel %vm3880_vm3, %v5413_v57, 0.0 }
 0xa0d   :  { %v5441_v42 = vadd.f32 %v5440_v22, %v5439_v47  ;;  %v5446_v26 = vsel %vm3880_vm3, %v5414_v3, 0.0  ;;  %v5448_v4 = vsel %vm3880_vm3, %v5415_v35, 0.0  ;;  %v5329_v59 = vmul.f32 %v11154_v18, %v11140_v17 }
 0xa0e   :  { %v5330_v29 = vmul.f32 %v11154_v18, %v11143_v44  ;;  %v5331_v43 = vmul.f32 %v11154_v18, %v11146_v28  ;;  %v5332_v45 = vmul.f32 %v11154_v18, %v11149_v0  ;;  %v5333_v27 = vmul.f32 %v11154_v18, %v11157_v9 }
 0xa0f   :  { %v5443_v30 = vadd.f32 %v5442_v41, %v5441_v42  ;;  %v5334_v31 = vmul.f32 %v11154_v18, %v11160_v5  ;;  %v5335_v33 = vmul.f32 %v11154_v18, %v11163_v50  ;;  %v5336_v17 = vmul.f32 %v11154_v18, %v11166_v25  ;;  %v12252_v25 = vld [vmem:[#allocation120_spill] sm:$0xff] }
 0xa10   :  { %v5351_v44 = vadd.f32 %v11175_v23, %v5329_v59  ;;  %v5352_v28 = vadd.f32 %v11175_v23, %v5330_v29  ;;  %v5353_v7 = vadd.f32 %v11175_v23, %v5331_v43  ;;  %v5354_v0 = vadd.f32 %v11175_v23, %v5332_v45 }
 0xa11   :  { %v5445_v63 = vadd.f32 %v5444_v39, %v5443_v30  ;;  %v5355_v9 = vadd.f32 %v11175_v23, %v5333_v27  ;;  %v5356_v48 = vadd.f32 %v11175_v23, %v5334_v31  ;;  %v5357_v5 = vadd.f32 %v11175_v23, %v5335_v33 }
 0xa12   :  { %v5358_v50 = vadd.f32 %v11175_v23, %v5336_v17  ;;  %v5367_v38 = vadd.f32 %v5351_v44, %v12251_v24  ;;  %v5368_v16 = vadd.f32 %v12252_v25, %v5352_v28  ;;  %v5369_v51 = vadd.f32 %v5353_v7, %v12253_v60 }
 0xa13   :  { %v5447_v18 = vadd.f32 %v5446_v26, %v5445_v63  ;;  %v5370_v36 = vadd.f32 %v12254_v2, %v5354_v0  ;;  %v5371_v37 = vadd.f32 %v5355_v9, %v12255_v19  ;;  %v5372_v46 = vadd.f32 %v12256_v53, %v5356_v48 }
 0xa14   :  { %v5373_v10 = vadd.f32 %v5357_v5, %v12257_v34  ;;  %v5374_v15 = vadd.f32 %v12258_v14, %v5358_v50  ;;  %v5386_v58 = vmax.f32 %v5367_v38, 0.0  ;;  %v5387_v23 = vmax.f32 %v5368_v16, 0.0  ;;  %v5705_v16 = vld [vmem:[%s11290_s21] ss:$0 sm:$0xff] }
 0xa15   :  { %v5449_v12 = vadd.f32 %v5448_v4, %v5447_v18  ;;  %v5388_v6 = vmax.f32 %v5369_v51, 0.0  ;;  %v5450_v20 = vsel %vm3880_vm3, %v5416_v13, 0.0  ;;  %v5389_v62 = vmax.f32 %v5370_v36, 0.0 }
 0xa16   :  { %v5402_v8 = vmin.f32 %v5386_v58, 6.0  ;;  %v5403_v49 = vmin.f32 %v5387_v23, 6.0  ;;  %v5452_v55 = vsel %vm3880_vm3, %v5417_v32, 0.0  ;;  %v5390_v21 = vmax.f32 %v5371_v37, 0.0 }
 0xa17   :  { %v5451_v56 = vadd.f32 %v5450_v20, %v5449_v12  ;;  %v5404_v52 = vmin.f32 %v5388_v6, 6.0  ;;  %v5391_v40 = vmax.f32 %v5372_v46, 0.0  ;;  %v5405_v54 = vmin.f32 %v5389_v62, 6.0 }
 0xa18   :  { %v5418_v11 = vsel %vm3880_vm3, %v5402_v8, 0.0  ;;  %v5419_v61 = vsel %vm3880_vm3, %v5403_v49, 0.0  ;;  %v5392_v35 = vmax.f32 %v5373_v10, 0.0  ;;  %v5406_v47 = vmin.f32 %v5390_v21, 6.0 }
 0xa19   :  { %v5453_v1 = vadd.f32 %v5452_v55, %v5451_v56  ;;  %v5420_v3 = vadd.f32 %v5419_v61, %v5418_v11  ;;  %v5421_v13 = vsel %vm3880_vm3, %v5404_v52, 0.0  ;;  %v5393_v42 = vmax.f32 %v5374_v15, 0.0 }
 0xa1a   :  { %v5407_v41 = vmin.f32 %v5391_v40, 6.0  ;;  %v5423_v32 = vsel %vm3880_vm3, %v5405_v54, 0.0  ;;  %v5408_v4 = vmin.f32 %v5392_v35, 6.0  ;;  %v5425_v59 = vsel %vm3880_vm3, %v5406_v47, 0.0 }
 0xa1b   :  { %v5454_v57 = vrot.slane %v5453_v1, 4  ;;  %v5422_v22 = vadd.f32 %v5421_v13, %v5420_v3  ;;  %v5409_v43 = vmin.f32 %v5393_v42, 6.0 }
 0xa1c   :  { %v5427_v30 = vsel %vm3880_vm3, %v5407_v41, 0.0  ;;  %v5429_v31 = vsel %vm3880_vm3, %v5408_v4, 0.0 }
 0xa1d   :  { %v5455_v39 = vadd.f32 %v5454_v57, %v5453_v1  ;;  %v5424_v26 = vadd.f32 %v5423_v32, %v5422_v22  ;;  %v5431_v17 = vsel %vm3880_vm3, %v5409_v43, 0.0 }
 0xa1f   :  { %v5426_v29 = vadd.f32 %v5425_v59, %v5424_v26  ;;  %v5456_v27 = vrot.slane %v5455_v39, 2 }
 0xa21   :  { %v5428_v45 = vadd.f32 %v5427_v30, %v5426_v29  ;;  %v5457_v28 = vadd.f32 %v5456_v27, %v5455_v39 }
 0xa23   :  { %v5430_v33 = vadd.f32 %v5429_v31, %v5428_v45  ;;  %v5458_v0 = vrot.slane %v5457_v28, 1 }
 0xa25   :  { %v5432_v44 = vadd.f32 %v5431_v17, %v5430_v33  ;;  %v5459_v5 = vadd.f32 %v5458_v0, %v5457_v28 }
 0xa27   :  { %v5433_v63 = vrot.slane %v5432_v44, 4  ;;  %v5462_v38 = vmul.f32 0.015625, %v5459_v5 }
 0xa29   :  { %v5434_v7 = vadd.f32 %v5433_v63, %v5432_v44 }
 0xa2b   :  { %v5435_v9 = vrot.slane %v5434_v7, 2 }
 0xa2d   :  { %v5436_v48 = vadd.f32 %v5435_v9, %v5434_v7 }
 0xa2f   :  { %v5437_v50 = vrot.slane %v5436_v48, 1 }
 0xa31   :  { %v5438_v24 = vadd.f32 %v5437_v50, %v5436_v48 }
 0xa33   :  { %v5461_v18 = vmul.f32 0.015625, %v5438_v24 }
 0xa35   :  { %v5472_v25 = vsel %vm5471_vm5, %v5462_v38, %v5461_v18 }
 0xa36   :  { %6080 = vmatmul.mubr.msk.f32.vlgmr.msra.gmra.mrb[64].mxu0 %vm3880_vm3, %v5472_v25 }
 0xb09   :  { %v5541_v60 = vpop.f32.mrb[64].mxu0 }
 0xb0a   :  { %v5542_v51 = vadd.f32 %v5705_v16, %v5541_v60  ;;  %v6081_v2 = vpop.f32.mrb[65].mxu0 }
 0xb0c   :  { %5545 = vst [vmem:[#allocation19] sm:$0x3] %v5542_v51 }
 0xb0d   :  { %6362 = shalt.err (!%p6359_p6)
}
 0xb0e   :  { %s12259_s29 = sld [smem:[#allocation159_spill]] }
 0xb14   :  { %s6363_s25 = scalar_lea.hbm %s12259_s29, 32 }
 0xb15   :  { %p6364_p7 = scmp.ne.s32.totalorder %s12259_s29, %s6363_s25  ;;  %p6367_p8 = scmp.lt.u32.totalorder %s6363_s25, %s12259_s29 }
 0xb17   :  { %p6369_p9 = pnand %p6367_p8, %p6364_p7 }
 0xb19   :  { %6372 = shalt.err (!%p6369_p9)
}
 0xb1a   :  { %5555 = dma.vmem_to_hbm [thread:$0]  %s5553_s0, 32, %s12259_s29, [#allocation6]  }
 0xb1b   :  { %6383 = dma.done.wait [#allocation6], 32  }
 0xb1c   :  { %6384 = vsyncadd [#allocation6], 4294967264 }
 0xb1d   :  { %5559 = vsyncpa [#allocation5], 1 }
 0xb1e   :  { %5560 = vsyncpa [#allocation8], 1 }
 0xb1f   :  { %5561 = vsyncpa [#allocation11], 1 }
 0xb20   :  { %5562 = vsyncpa [#allocation14], 1 }
 0xb21   :  { %5563 = vsyncpa [#allocation17], 1 }
 0xb22   :  { %5564 = vsyncpa [#allocation6], 1 }

</bundles_post_ra>
